<compile_context>
chip_gen: v7x
topology: tpu7x:2x2x1
jax: 0.10.0
libtpu: 0.0.40
codegen_flags: <defaults>
</compile_context>

<pallas_src>
import math

import jax
import jax.numpy as jnp
import numpy as np
from jax import lax
from jax.experimental import pallas as pl
from jax.experimental.pallas import tpu as pltpu

DIM = 16                         # channels ("dim")
FFN_FACTOR = 2.0
HIDDEN = int(DIM * FFN_FACTOR)   # 32
N, H, W = 2, 16, 16
_DILATIONS = (1, 2, 3)
_SQRT_2 = math.sqrt(2.0)
_INV_SQRT_2 = 1.0 / _SQRT_2


def _erf_approx(x):
    # Abramowitz & Stegun 7.1.26 erf (f32 precision), Mosaic-safe ops only.
    a1, a2, a3, a4, a5 = (0.254829592, -0.284496736, 1.421413741,
                          -1.453152027, 1.061405429)
    p = 0.3275911
    sgn = jnp.where(x >= 0.0, 1.0, -1.0)
    ax = jnp.abs(x)
    t = 1.0 / (1.0 + p * ax)
    poly = ((((a5 * t + a4) * t + a3) * t + a2) * t + a1) * t
    return sgn * (1.0 - poly * jnp.exp(-ax * ax))


def _gelu_exact(x):
    # torch.nn.functional.gelu default ('none') = 0.5*x*(1+erf(x/sqrt(2)))
    return 0.5 * x * (1.0 + _erf_approx(x * _INV_SQRT_2))


def build_tap_masks(n, hh, ww):
    """Static {0,1} f32 boundary masks, one row per (conv, tap).

    Row g*9 + ky*3 + kx holds, for every lane l (= img*H*W + r*W + c),
    whether the depthwise tap with offset ((ky-1)*dil_g, (kx-1)*dil_g) reads
    an in-bounds pixel of the SAME image.  Shape (32, n*H*W) (rows 27..31 pad).
    Pure numpy: independent of inputs and parameters.
    """
    hw = hh * ww
    lanes = np.arange(n * hw)
    sp = lanes % hw
    row = sp // ww
    col = sp % ww
    masks = np.zeros((32, n * hw), np.float32)
    for g, d in enumerate(_DILATIONS):
        for ky in range(3):
            for kx in range(3):
                oy, ox = (ky - 1) * d, (kx - 1) * d
                ok = ((row + oy >= 0) & (row + oy < hh) &
                      (col + ox >= 0) & (col + ox < ww))
                masks[g * 9 + ky * 3 + kx] = ok.astype(np.float32)
    return jnp.asarray(masks)


def pack_params(params):
    """One-time weight pre-packing (runs once, outside the per-call path).

    Returns:
      w_in  : (3*hid, dim)  fused project_in weight
      w_out : (dim, hid)    project_out weight
      tab   : (9*hid, 128)  lane-dense per-channel table:
              col 0..2 = dwconv1/2/3 weights (tap-major: row k*hid + c)
              col 3    = project_in bias   (first 3*hid rows)
              col 4..6 = dwconv1/2/3 bias  (first hid rows)
              col 7    = project_out bias  (first dim rows)
    """
    hid = params["dwconv1_b"].shape[0]
    dim = params["project_out_b"].shape[0]
    f32 = jnp.float32

    w_in = params["project_in_w"].reshape(3 * hid, dim).astype(f32)
    w_out = params["project_out_w"].reshape(dim, hid).astype(f32)

    def dw_flat(w_hkk):  # (hid, 3, 3) -> (9*hid,), tap-major then channel
        return jnp.transpose(w_hkk, (1, 2, 0)).reshape(9 * hid)

    def pad_col(v):
        v = jnp.asarray(v, f32).reshape(-1)
        return jnp.pad(v, (0, 9 * hid - v.shape[0]))

    cols = [
        dw_flat(params["dwconv1_w"][:, 0, 1]),   # Conv3d: only middle depth slice acts
        dw_flat(params["dwconv2_w"][:, 0]),
        dw_flat(params["dwconv3_w"][:, 0]),
        pad_col(params["project_in_b"]),
        pad_col(params["dwconv1_b"]),
        pad_col(params["dwconv2_b"]),
        pad_col(params["dwconv3_b"]),
        pad_col(params["project_out_b"]),
    ]
    tab = jnp.stack([c.astype(f32) for c in cols], axis=1)   # (9*hid, 8)
    tab = jnp.pad(tab, ((0, 0), (0, 128 - tab.shape[1])))    # lane-dense (9*hid, 128)
    return w_in, w_out, tab


def _make_kernel(n, hh, ww, hid, dim):
    hw = hh * ww
    lanes = n * hw

    def kernel(x_ref, w_in_ref, w_out_ref, tab_ref, masks_ref, o_ref):
        x = x_ref[...].astype(jnp.float32)                        # (dim, N*H*W)

        # ---- project_in: single fused (3*hid, dim) @ (dim, N*H*W) MXU matmul
        b_in = tab_ref[0:3 * hid, 3:4]                            # (3*hid, 1)
        y = jnp.dot(w_in_ref[...], x,
                    preferred_element_type=jnp.float32) + b_in    # (3*hid, L)

        def depthwise(y_g, g):
            # Depthwise 3x3 conv (dilation d, "same" padding d) as 9 static
            # lane rolls (XLU).  Boundary handling is folded into the per-tap
            # weight plane (wk * precomputed mask row), so each tap body is
            # just roll -> mul -> add (no per-tap select, no separate bcast).
            dil = _DILATIONS[g]
            w_col = tab_ref[:, g:g + 1]                           # (9*hid, 1)
            b_g = tab_ref[0:hid, 4 + g:5 + g]                     # (hid, 1)
            acc = None
            for ky in range(3):
                for kx in range(3):
                    k = ky * 3 + kx
                    s = ((ky - 1) * ww + (kx - 1)) * dil          # lane offset
                    wk = w_col[k * hid:(k + 1) * hid, :]          # (hid, 1)
                    if ky == 1 and kx == 1:
                        mw = wk                                   # center tap: unmasked
                    else:
                        mrow = masks_ref[g * 9 + k:g * 9 + k + 1, :]   # (1, L)
                        mw = wk * mrow                            # (hid, L) masked plane
                    tap = y_g if s == 0 else pltpu.roll(y_g, (-s) % lanes, axis=1)
                    term = tap * mw
                    acc = term if acc is None else acc + term
            return acc + b_g

        z1 = depthwise(y[0 * hid:1 * hid, :], 0)
        z2 = depthwise(y[1 * hid:2 * hid, :], 1)
        z3 = depthwise(y[2 * hid:3 * hid, :], 2)

        gated = _gelu_exact(z1) * z2 * z3                         # (hid, L)

        # ---- project_out: (dim, hid) @ (hid, N*H*W); lane-dense store
        b_out = tab_ref[0:dim, 7:8]                               # (dim, 1)
        out = jnp.dot(w_out_ref[...], gated,
                      preferred_element_type=jnp.float32) + b_out
        o_ref[...] = out.astype(o_ref.dtype)

    return kernel


def feed_forward(x_nchw, w_in, w_out, tab, masks):
    """x_nchw: (N, dim, H, W) float32 (PyTorch layout). Returns (N, dim, H, W)."""
    n, c, hh, ww = x_nchw.shape
    lanes = n * hh * ww
    hid = w_out.shape[1]

    # Layout plumbing (tiny XLA ops): channels -> sublanes, batch*H*W -> lanes.
    x2 = jnp.transpose(x_nchw, (1, 0, 2, 3)).reshape(c, lanes)

    def vmem():
        return pl.BlockSpec(memory_space=pltpu.MemorySpace.VMEM)

    out2 = pl.pallas_call(
        _make_kernel(n, hh, ww, hid, c),
        out_shape=jax.ShapeDtypeStruct((c, lanes), x_nchw.dtype),
        in_specs=[vmem(), vmem(), vmem(), vmem(), vmem()],
        out_specs=vmem(),
    )(x2, w_in, w_out, tab, masks)

    return jnp.transpose(out2.reshape(c, n, hh, ww), (1, 0, 2, 3))


# --------------------------- pure-JAX reference (NCHW) ------------------------
def reference(x_nchw, params):
    c = x_nchw.shape[1]
    hid = params["dwconv1_b"].shape[0]
    w_in = params["project_in_w"].reshape(3 * hid, c)
    y = jnp.einsum("nchw,oc->nohw", x_nchw, w_in) \
        + params["project_in_b"][None, :, None, None]
    x1, x2, x3 = y[:, :hid], y[:, hid:2 * hid], y[:, 2 * hid:]

    def dwconv(xx, w, b, dil):  # w: (hid, 3, 3)
        out = lax.conv_general_dilated(
            xx, w[:, None, :, :], window_strides=(1, 1),
            padding=[(dil, dil), (dil, dil)], rhs_dilation=(dil, dil),
            dimension_numbers=("NCHW", "OIHW", "NCHW"),
            feature_group_count=hid)
        return out + b[None, :, None, None]

    z1 = dwconv(x1, params["dwconv1_w"][:, 0, 1], params["dwconv1_b"], 1)
    z2 = dwconv(x2, params["dwconv2_w"][:, 0], params["dwconv2_b"], 2)
    z3 = dwconv(x3, params["dwconv3_w"][:, 0], params["dwconv3_b"], 3)
    gated = 0.5 * z1 * (1.0 + lax.erf(z1 / _SQRT_2)) * z2 * z3
    w_out = params["project_out_w"].reshape(c, hid)
    return jnp.einsum("nchw,oc->nohw", gated, w_out) \
        + params["project_out_b"][None, :, None, None]


if __name__ == "__main__":
    key = jax.random.PRNGKey(0)
    ks = jax.random.split(key, 11)
    params = {
        "project_in_w":  0.1 * jax.random.normal(ks[0], (3 * HIDDEN, DIM, 1, 1, 1), jnp.float32),
        "project_in_b":  0.1 * jax.random.normal(ks[1], (3 * HIDDEN,), jnp.float32),
        "dwconv1_w":     0.1 * jax.random.normal(ks[2], (HIDDEN, 1, 3, 3, 3), jnp.float32),
        "dwconv1_b":     0.1 * jax.random.normal(ks[3], (HIDDEN,), jnp.float32),
        "dwconv2_w":     0.1 * jax.random.normal(ks[4], (HIDDEN, 1, 3, 3), jnp.float32),
        "dwconv2_b":     0.1 * jax.random.normal(ks[5], (HIDDEN,), jnp.float32),
        "dwconv3_w":     0.1 * jax.random.normal(ks[6], (HIDDEN, 1, 3, 3), jnp.float32),
        "dwconv3_b":     0.1 * jax.random.normal(ks[7], (HIDDEN,), jnp.float32),
        "project_out_w": 0.1 * jax.random.normal(ks[8], (DIM, HIDDEN, 1, 1, 1), jnp.float32),
        "project_out_b": 0.1 * jax.random.normal(ks[9], (DIM,), jnp.float32),
    }
    x = jax.random.normal(ks[10], (N, DIM, H, W), jnp.float32)   # NCHW input, like PyTorch

    # One-time prep (weight packing + static tap masks), outside the hot path.
    w_in, w_out, tab = pack_params(params)
    masks = build_tap_masks(N, H, W)

    ff = jax.jit(feed_forward)
    out = jax.block_until_ready(ff(x, w_in, w_out, tab, masks))
    ref = jax.block_until_ready(reference(x, params))

    assert out.shape == (N, DIM, H, W) and out.dtype == jnp.float32
    np.testing.assert_allclose(np.asarray(out), np.asarray(ref), rtol=1e-3, atol=2e-4)
    print("KERNEL_OK")
</pallas_src>

<mosaic_0001>
module attributes {stable_mosaic.version = 11 : i64} {
  func.func @kernel(%arg0: memref<16x512xf32, #tpu.memory_space<vmem>>, %arg1: memref<96x16xf32, #tpu.memory_space<vmem>>, %arg2: memref<16x32xf32, #tpu.memory_space<vmem>>, %arg3: memref<288x128xf32, #tpu.memory_space<vmem>>, %arg4: memref<32x512xf32, #tpu.memory_space<vmem>>, %arg5: memref<16x512xf32, #tpu.memory_space<vmem>>) attributes {dimension_semantics = [], scalar_prefetch = 0 : i64, scratch_operands = 0 : i64, tpu.core_type = #tpu.core_type<tc>} {
    %c0 = arith.constant 0 : index
    %c0_0 = arith.constant 0 : index
    %0 = vector.load %arg0[%c0, %c0_0] : memref<16x512xf32, #tpu.memory_space<vmem>>, vector<16x512xf32>
    %c0_1 = arith.constant 0 : index
    %c3 = arith.constant 3 : index
    %1 = vector.load %arg3[%c0_1, %c3] : memref<288x128xf32, #tpu.memory_space<vmem>>, vector<96x1xf32>
    %c0_2 = arith.constant 0 : index
    %c0_3 = arith.constant 0 : index
    %2 = vector.load %arg1[%c0_2, %c0_3] : memref<96x16xf32, #tpu.memory_space<vmem>>, vector<96x16xf32>
    %cst = arith.constant dense<0.000000e+00> : vector<96x512xf32>
    %3 = tpu.matmul %2, %0, %cst {dimension_numbers = #tpu.dot_dimension_numbers<[1], [0], [0], [1], [0, 0, 1, 1], [], []>} : vector<96x16xf32>, vector<16x512xf32>, vector<96x512xf32> -> vector<96x512xf32>
    %4 = vector.broadcast %1 : vector<96x1xf32> to vector<96x512xf32>
    %5 = arith.addf %3, %4 : vector<96x512xf32>
    %6 = vector.extract_strided_slice %5 {offsets = [0, 0], sizes = [32, 512], strides = [1, 1]} : vector<96x512xf32> to vector<32x512xf32>
    %c0_4 = arith.constant 0 : index
    %c0_5 = arith.constant 0 : index
    %7 = vector.load %arg3[%c0_4, %c0_5] : memref<288x128xf32, #tpu.memory_space<vmem>>, vector<288x1xf32>
    %c0_6 = arith.constant 0 : index
    %c4 = arith.constant 4 : index
    %8 = vector.load %arg3[%c0_6, %c4] : memref<288x128xf32, #tpu.memory_space<vmem>>, vector<32x1xf32>
    %9 = vector.extract_strided_slice %7 {offsets = [0, 0], sizes = [32, 1], strides = [1, 1]} : vector<288x1xf32> to vector<32x1xf32>
    %c0_7 = arith.constant 0 : index
    %c0_8 = arith.constant 0 : index
    %10 = vector.load %arg4[%c0_7, %c0_8] : memref<32x512xf32, #tpu.memory_space<vmem>>, vector<1x512xf32>
    %11 = vector.broadcast %9 : vector<32x1xf32> to vector<32x512xf32>
    %12 = vector.broadcast %10 : vector<1x512xf32> to vector<32x512xf32>
    %13 = arith.mulf %11, %12 : vector<32x512xf32>
    %c17_i32 = arith.constant 17 : i32
    %14 = tpu.dynamic_rotate %6 by %c17_i32 dim 1 : vector<32x512xf32>, i32 -> vector<32x512xf32>
    %15 = arith.mulf %14, %13 : vector<32x512xf32>
    %16 = vector.extract_strided_slice %7 {offsets = [32, 0], sizes = [32, 1], strides = [1, 1]} : vector<288x1xf32> to vector<32x1xf32>
    %c1 = arith.constant 1 : index
    %c0_9 = arith.constant 0 : index
    %17 = vector.load %arg4[%c1, %c0_9] : memref<32x512xf32, #tpu.memory_space<vmem>>, vector<1x512xf32>
    %18 = vector.broadcast %16 : vector<32x1xf32> to vector<32x512xf32>
    %19 = vector.broadcast %17 : vector<1x512xf32> to vector<32x512xf32>
    %20 = arith.mulf %18, %19 : vector<32x512xf32>
    %c16_i32 = arith.constant 16 : i32
    %21 = tpu.dynamic_rotate %6 by %c16_i32 dim 1 : vector<32x512xf32>, i32 -> vector<32x512xf32>
    %22 = arith.mulf %21, %20 : vector<32x512xf32>
    %23 = arith.addf %15, %22 : vector<32x512xf32>
    %24 = vector.extract_strided_slice %7 {offsets = [64, 0], sizes = [32, 1], strides = [1, 1]} : vector<288x1xf32> to vector<32x1xf32>
    %c2 = arith.constant 2 : index
    %c0_10 = arith.constant 0 : index
    %25 = vector.load %arg4[%c2, %c0_10] : memref<32x512xf32, #tpu.memory_space<vmem>>, vector<1x512xf32>
    %26 = vector.broadcast %24 : vector<32x1xf32> to vector<32x512xf32>
    %27 = vector.broadcast %25 : vector<1x512xf32> to vector<32x512xf32>
    %28 = arith.mulf %26, %27 : vector<32x512xf32>
    %c15_i32 = arith.constant 15 : i32
    %29 = tpu.dynamic_rotate %6 by %c15_i32 dim 1 : vector<32x512xf32>, i32 -> vector<32x512xf32>
    %30 = arith.mulf %29, %28 : vector<32x512xf32>
    %31 = arith.addf %23, %30 : vector<32x512xf32>
    %32 = vector.extract_strided_slice %7 {offsets = [96, 0], sizes = [32, 1], strides = [1, 1]} : vector<288x1xf32> to vector<32x1xf32>
    %c3_11 = arith.constant 3 : index
    %c0_12 = arith.constant 0 : index
    %33 = vector.load %arg4[%c3_11, %c0_12] : memref<32x512xf32, #tpu.memory_space<vmem>>, vector<1x512xf32>
    %34 = vector.broadcast %32 : vector<32x1xf32> to vector<32x512xf32>
    %35 = vector.broadcast %33 : vector<1x512xf32> to vector<32x512xf32>
    %36 = arith.mulf %34, %35 : vector<32x512xf32>
    %c1_i32 = arith.constant 1 : i32
    %37 = tpu.dynamic_rotate %6 by %c1_i32 dim 1 : vector<32x512xf32>, i32 -> vector<32x512xf32>
    %38 = arith.mulf %37, %36 : vector<32x512xf32>
    %39 = arith.addf %31, %38 : vector<32x512xf32>
    %40 = vector.extract_strided_slice %7 {offsets = [128, 0], sizes = [32, 1], strides = [1, 1]} : vector<288x1xf32> to vector<32x1xf32>
    %41 = vector.broadcast %40 : vector<32x1xf32> to vector<32x512xf32>
    %42 = arith.mulf %6, %41 : vector<32x512xf32>
    %43 = arith.addf %39, %42 : vector<32x512xf32>
    %44 = vector.extract_strided_slice %7 {offsets = [160, 0], sizes = [32, 1], strides = [1, 1]} : vector<288x1xf32> to vector<32x1xf32>
    %c5 = arith.constant 5 : index
    %c0_13 = arith.constant 0 : index
    %45 = vector.load %arg4[%c5, %c0_13] : memref<32x512xf32, #tpu.memory_space<vmem>>, vector<1x512xf32>
    %46 = vector.broadcast %44 : vector<32x1xf32> to vector<32x512xf32>
    %47 = vector.broadcast %45 : vector<1x512xf32> to vector<32x512xf32>
    %48 = arith.mulf %46, %47 : vector<32x512xf32>
    %c511_i32 = arith.constant 511 : i32
    %49 = tpu.dynamic_rotate %6 by %c511_i32 dim 1 : vector<32x512xf32>, i32 -> vector<32x512xf32>
    %50 = arith.mulf %49, %48 : vector<32x512xf32>
    %51 = arith.addf %43, %50 : vector<32x512xf32>
    %52 = vector.extract_strided_slice %7 {offsets = [192, 0], sizes = [32, 1], strides = [1, 1]} : vector<288x1xf32> to vector<32x1xf32>
    %c6 = arith.constant 6 : index
    %c0_14 = arith.constant 0 : index
    %53 = vector.load %arg4[%c6, %c0_14] : memref<32x512xf32, #tpu.memory_space<vmem>>, vector<1x512xf32>
    %54 = vector.broadcast %52 : vector<32x1xf32> to vector<32x512xf32>
    %55 = vector.broadcast %53 : vector<1x512xf32> to vector<32x512xf32>
    %56 = arith.mulf %54, %55 : vector<32x512xf32>
    %c497_i32 = arith.constant 497 : i32
    %57 = tpu.dynamic_rotate %6 by %c497_i32 dim 1 : vector<32x512xf32>, i32 -> vector<32x512xf32>
    %58 = arith.mulf %57, %56 : vector<32x512xf32>
    %59 = arith.addf %51, %58 : vector<32x512xf32>
    %60 = vector.extract_strided_slice %7 {offsets = [224, 0], sizes = [32, 1], strides = [1, 1]} : vector<288x1xf32> to vector<32x1xf32>
    %c7 = arith.constant 7 : index
    %c0_15 = arith.constant 0 : index
    %61 = vector.load %arg4[%c7, %c0_15] : memref<32x512xf32, #tpu.memory_space<vmem>>, vector<1x512xf32>
    %62 = vector.broadcast %60 : vector<32x1xf32> to vector<32x512xf32>
    %63 = vector.broadcast %61 : vector<1x512xf32> to vector<32x512xf32>
    %64 = arith.mulf %62, %63 : vector<32x512xf32>
    %c496_i32 = arith.constant 496 : i32
    %65 = tpu.dynamic_rotate %6 by %c496_i32 dim 1 : vector<32x512xf32>, i32 -> vector<32x512xf32>
    %66 = arith.mulf %65, %64 : vector<32x512xf32>
    %67 = arith.addf %59, %66 : vector<32x512xf32>
    %68 = vector.extract_strided_slice %7 {offsets = [256, 0], sizes = [32, 1], strides = [1, 1]} : vector<288x1xf32> to vector<32x1xf32>
    %c8 = arith.constant 8 : index
    %c0_16 = arith.constant 0 : index
    %69 = vector.load %arg4[%c8, %c0_16] : memref<32x512xf32, #tpu.memory_space<vmem>>, vector<1x512xf32>
    %70 = vector.broadcast %68 : vector<32x1xf32> to vector<32x512xf32>
    %71 = vector.broadcast %69 : vector<1x512xf32> to vector<32x512xf32>
    %72 = arith.mulf %70, %71 : vector<32x512xf32>
    %c495_i32 = arith.constant 495 : i32
    %73 = tpu.dynamic_rotate %6 by %c495_i32 dim 1 : vector<32x512xf32>, i32 -> vector<32x512xf32>
    %74 = arith.mulf %73, %72 : vector<32x512xf32>
    %75 = arith.addf %67, %74 : vector<32x512xf32>
    %76 = vector.broadcast %8 : vector<32x1xf32> to vector<32x512xf32>
    %77 = arith.addf %75, %76 : vector<32x512xf32>
    %78 = vector.extract_strided_slice %5 {offsets = [32, 0], sizes = [32, 512], strides = [1, 1]} : vector<96x512xf32> to vector<32x512xf32>
    %c0_17 = arith.constant 0 : index
    %c1_18 = arith.constant 1 : index
    %79 = vector.load %arg3[%c0_17, %c1_18] : memref<288x128xf32, #tpu.memory_space<vmem>>, vector<288x1xf32>
    %c0_19 = arith.constant 0 : index
    %c5_20 = arith.constant 5 : index
    %80 = vector.load %arg3[%c0_19, %c5_20] : memref<288x128xf32, #tpu.memory_space<vmem>>, vector<32x1xf32>
    %81 = vector.extract_strided_slice %79 {offsets = [0, 0], sizes = [32, 1], strides = [1, 1]} : vector<288x1xf32> to vector<32x1xf32>
    %c9 = arith.constant 9 : index
    %c0_21 = arith.constant 0 : index
    %82 = vector.load %arg4[%c9, %c0_21] : memref<32x512xf32, #tpu.memory_space<vmem>>, vector<1x512xf32>
    %83 = vector.broadcast %81 : vector<32x1xf32> to vector<32x512xf32>
    %84 = vector.broadcast %82 : vector<1x512xf32> to vector<32x512xf32>
    %85 = arith.mulf %83, %84 : vector<32x512xf32>
    %c34_i32 = arith.constant 34 : i32
    %86 = tpu.dynamic_rotate %78 by %c34_i32 dim 1 : vector<32x512xf32>, i32 -> vector<32x512xf32>
    %87 = arith.mulf %86, %85 : vector<32x512xf32>
    %88 = vector.extract_strided_slice %79 {offsets = [32, 0], sizes = [32, 1], strides = [1, 1]} : vector<288x1xf32> to vector<32x1xf32>
    %c10 = arith.constant 10 : index
    %c0_22 = arith.constant 0 : index
    %89 = vector.load %arg4[%c10, %c0_22] : memref<32x512xf32, #tpu.memory_space<vmem>>, vector<1x512xf32>
    %90 = vector.broadcast %88 : vector<32x1xf32> to vector<32x512xf32>
    %91 = vector.broadcast %89 : vector<1x512xf32> to vector<32x512xf32>
    %92 = arith.mulf %90, %91 : vector<32x512xf32>
    %c32_i32 = arith.constant 32 : i32
    %93 = tpu.dynamic_rotate %78 by %c32_i32 dim 1 : vector<32x512xf32>, i32 -> vector<32x512xf32>
    %94 = arith.mulf %93, %92 : vector<32x512xf32>
    %95 = arith.addf %87, %94 : vector<32x512xf32>
    %96 = vector.extract_strided_slice %79 {offsets = [64, 0], sizes = [32, 1], strides = [1, 1]} : vector<288x1xf32> to vector<32x1xf32>
    %c11 = arith.constant 11 : index
    %c0_23 = arith.constant 0 : index
    %97 = vector.load %arg4[%c11, %c0_23] : memref<32x512xf32, #tpu.memory_space<vmem>>, vector<1x512xf32>
    %98 = vector.broadcast %96 : vector<32x1xf32> to vector<32x512xf32>
    %99 = vector.broadcast %97 : vector<1x512xf32> to vector<32x512xf32>
    %100 = arith.mulf %98, %99 : vector<32x512xf32>
    %c30_i32 = arith.constant 30 : i32
    %101 = tpu.dynamic_rotate %78 by %c30_i32 dim 1 : vector<32x512xf32>, i32 -> vector<32x512xf32>
    %102 = arith.mulf %101, %100 : vector<32x512xf32>
    %103 = arith.addf %95, %102 : vector<32x512xf32>
    %104 = vector.extract_strided_slice %79 {offsets = [96, 0], sizes = [32, 1], strides = [1, 1]} : vector<288x1xf32> to vector<32x1xf32>
    %c12 = arith.constant 12 : index
    %c0_24 = arith.constant 0 : index
    %105 = vector.load %arg4[%c12, %c0_24] : memref<32x512xf32, #tpu.memory_space<vmem>>, vector<1x512xf32>
    %106 = vector.broadcast %104 : vector<32x1xf32> to vector<32x512xf32>
    %107 = vector.broadcast %105 : vector<1x512xf32> to vector<32x512xf32>
    %108 = arith.mulf %106, %107 : vector<32x512xf32>
    %c2_i32 = arith.constant 2 : i32
    %109 = tpu.dynamic_rotate %78 by %c2_i32 dim 1 : vector<32x512xf32>, i32 -> vector<32x512xf32>
    %110 = arith.mulf %109, %108 : vector<32x512xf32>
    %111 = arith.addf %103, %110 : vector<32x512xf32>
    %112 = vector.extract_strided_slice %79 {offsets = [128, 0], sizes = [32, 1], strides = [1, 1]} : vector<288x1xf32> to vector<32x1xf32>
    %113 = vector.broadcast %112 : vector<32x1xf32> to vector<32x512xf32>
    %114 = arith.mulf %78, %113 : vector<32x512xf32>
    %115 = arith.addf %111, %114 : vector<32x512xf32>
    %116 = vector.extract_strided_slice %79 {offsets = [160, 0], sizes = [32, 1], strides = [1, 1]} : vector<288x1xf32> to vector<32x1xf32>
    %c14 = arith.constant 14 : index
    %c0_25 = arith.constant 0 : index
    %117 = vector.load %arg4[%c14, %c0_25] : memref<32x512xf32, #tpu.memory_space<vmem>>, vector<1x512xf32>
    %118 = vector.broadcast %116 : vector<32x1xf32> to vector<32x512xf32>
    %119 = vector.broadcast %117 : vector<1x512xf32> to vector<32x512xf32>
    %120 = arith.mulf %118, %119 : vector<32x512xf32>
    %c510_i32 = arith.constant 510 : i32
    %121 = tpu.dynamic_rotate %78 by %c510_i32 dim 1 : vector<32x512xf32>, i32 -> vector<32x512xf32>
    %122 = arith.mulf %121, %120 : vector<32x512xf32>
    %123 = arith.addf %115, %122 : vector<32x512xf32>
    %124 = vector.extract_strided_slice %79 {offsets = [192, 0], sizes = [32, 1], strides = [1, 1]} : vector<288x1xf32> to vector<32x1xf32>
    %c15 = arith.constant 15 : index
    %c0_26 = arith.constant 0 : index
    %125 = vector.load %arg4[%c15, %c0_26] : memref<32x512xf32, #tpu.memory_space<vmem>>, vector<1x512xf32>
    %126 = vector.broadcast %124 : vector<32x1xf32> to vector<32x512xf32>
    %127 = vector.broadcast %125 : vector<1x512xf32> to vector<32x512xf32>
    %128 = arith.mulf %126, %127 : vector<32x512xf32>
    %c482_i32 = arith.constant 482 : i32
    %129 = tpu.dynamic_rotate %78 by %c482_i32 dim 1 : vector<32x512xf32>, i32 -> vector<32x512xf32>
    %130 = arith.mulf %129, %128 : vector<32x512xf32>
    %131 = arith.addf %123, %130 : vector<32x512xf32>
    %132 = vector.extract_strided_slice %79 {offsets = [224, 0], sizes = [32, 1], strides = [1, 1]} : vector<288x1xf32> to vector<32x1xf32>
    %c16 = arith.constant 16 : index
    %c0_27 = arith.constant 0 : index
    %133 = vector.load %arg4[%c16, %c0_27] : memref<32x512xf32, #tpu.memory_space<vmem>>, vector<1x512xf32>
    %134 = vector.broadcast %132 : vector<32x1xf32> to vector<32x512xf32>
    %135 = vector.broadcast %133 : vector<1x512xf32> to vector<32x512xf32>
    %136 = arith.mulf %134, %135 : vector<32x512xf32>
    %c480_i32 = arith.constant 480 : i32
    %137 = tpu.dynamic_rotate %78 by %c480_i32 dim 1 : vector<32x512xf32>, i32 -> vector<32x512xf32>
    %138 = arith.mulf %137, %136 : vector<32x512xf32>
    %139 = arith.addf %131, %138 : vector<32x512xf32>
    %140 = vector.extract_strided_slice %79 {offsets = [256, 0], sizes = [32, 1], strides = [1, 1]} : vector<288x1xf32> to vector<32x1xf32>
    %c17 = arith.constant 17 : index
    %c0_28 = arith.constant 0 : index
    %141 = vector.load %arg4[%c17, %c0_28] : memref<32x512xf32, #tpu.memory_space<vmem>>, vector<1x512xf32>
    %142 = vector.broadcast %140 : vector<32x1xf32> to vector<32x512xf32>
    %143 = vector.broadcast %141 : vector<1x512xf32> to vector<32x512xf32>
    %144 = arith.mulf %142, %143 : vector<32x512xf32>
    %c478_i32 = arith.constant 478 : i32
    %145 = tpu.dynamic_rotate %78 by %c478_i32 dim 1 : vector<32x512xf32>, i32 -> vector<32x512xf32>
    %146 = arith.mulf %145, %144 : vector<32x512xf32>
    %147 = arith.addf %139, %146 : vector<32x512xf32>
    %148 = vector.broadcast %80 : vector<32x1xf32> to vector<32x512xf32>
    %149 = arith.addf %147, %148 : vector<32x512xf32>
    %150 = vector.extract_strided_slice %5 {offsets = [64, 0], sizes = [32, 512], strides = [1, 1]} : vector<96x512xf32> to vector<32x512xf32>
    %c0_29 = arith.constant 0 : index
    %c2_30 = arith.constant 2 : index
    %151 = vector.load %arg3[%c0_29, %c2_30] : memref<288x128xf32, #tpu.memory_space<vmem>>, vector<288x1xf32>
    %c0_31 = arith.constant 0 : index
    %c6_32 = arith.constant 6 : index
    %152 = vector.load %arg3[%c0_31, %c6_32] : memref<288x128xf32, #tpu.memory_space<vmem>>, vector<32x1xf32>
    %153 = vector.extract_strided_slice %151 {offsets = [0, 0], sizes = [32, 1], strides = [1, 1]} : vector<288x1xf32> to vector<32x1xf32>
    %c18 = arith.constant 18 : index
    %c0_33 = arith.constant 0 : index
    %154 = vector.load %arg4[%c18, %c0_33] : memref<32x512xf32, #tpu.memory_space<vmem>>, vector<1x512xf32>
    %155 = vector.broadcast %153 : vector<32x1xf32> to vector<32x512xf32>
    %156 = vector.broadcast %154 : vector<1x512xf32> to vector<32x512xf32>
    %157 = arith.mulf %155, %156 : vector<32x512xf32>
    %c51_i32 = arith.constant 51 : i32
    %158 = tpu.dynamic_rotate %150 by %c51_i32 dim 1 : vector<32x512xf32>, i32 -> vector<32x512xf32>
    %159 = arith.mulf %158, %157 : vector<32x512xf32>
    %160 = vector.extract_strided_slice %151 {offsets = [32, 0], sizes = [32, 1], strides = [1, 1]} : vector<288x1xf32> to vector<32x1xf32>
    %c19 = arith.constant 19 : index
    %c0_34 = arith.constant 0 : index
    %161 = vector.load %arg4[%c19, %c0_34] : memref<32x512xf32, #tpu.memory_space<vmem>>, vector<1x512xf32>
    %162 = vector.broadcast %160 : vector<32x1xf32> to vector<32x512xf32>
    %163 = vector.broadcast %161 : vector<1x512xf32> to vector<32x512xf32>
    %164 = arith.mulf %162, %163 : vector<32x512xf32>
    %c48_i32 = arith.constant 48 : i32
    %165 = tpu.dynamic_rotate %150 by %c48_i32 dim 1 : vector<32x512xf32>, i32 -> vector<32x512xf32>
    %166 = arith.mulf %165, %164 : vector<32x512xf32>
    %167 = arith.addf %159, %166 : vector<32x512xf32>
    %168 = vector.extract_strided_slice %151 {offsets = [64, 0], sizes = [32, 1], strides = [1, 1]} : vector<288x1xf32> to vector<32x1xf32>
    %c20 = arith.constant 20 : index
    %c0_35 = arith.constant 0 : index
    %169 = vector.load %arg4[%c20, %c0_35] : memref<32x512xf32, #tpu.memory_space<vmem>>, vector<1x512xf32>
    %170 = vector.broadcast %168 : vector<32x1xf32> to vector<32x512xf32>
    %171 = vector.broadcast %169 : vector<1x512xf32> to vector<32x512xf32>
    %172 = arith.mulf %170, %171 : vector<32x512xf32>
    %c45_i32 = arith.constant 45 : i32
    %173 = tpu.dynamic_rotate %150 by %c45_i32 dim 1 : vector<32x512xf32>, i32 -> vector<32x512xf32>
    %174 = arith.mulf %173, %172 : vector<32x512xf32>
    %175 = arith.addf %167, %174 : vector<32x512xf32>
    %176 = vector.extract_strided_slice %151 {offsets = [96, 0], sizes = [32, 1], strides = [1, 1]} : vector<288x1xf32> to vector<32x1xf32>
    %c21 = arith.constant 21 : index
    %c0_36 = arith.constant 0 : index
    %177 = vector.load %arg4[%c21, %c0_36] : memref<32x512xf32, #tpu.memory_space<vmem>>, vector<1x512xf32>
    %178 = vector.broadcast %176 : vector<32x1xf32> to vector<32x512xf32>
    %179 = vector.broadcast %177 : vector<1x512xf32> to vector<32x512xf32>
    %180 = arith.mulf %178, %179 : vector<32x512xf32>
    %c3_i32 = arith.constant 3 : i32
    %181 = tpu.dynamic_rotate %150 by %c3_i32 dim 1 : vector<32x512xf32>, i32 -> vector<32x512xf32>
    %182 = arith.mulf %181, %180 : vector<32x512xf32>
    %183 = arith.addf %175, %182 : vector<32x512xf32>
    %184 = vector.extract_strided_slice %151 {offsets = [128, 0], sizes = [32, 1], strides = [1, 1]} : vector<288x1xf32> to vector<32x1xf32>
    %185 = vector.broadcast %184 : vector<32x1xf32> to vector<32x512xf32>
    %186 = arith.mulf %150, %185 : vector<32x512xf32>
    %187 = arith.addf %183, %186 : vector<32x512xf32>
    %188 = vector.extract_strided_slice %151 {offsets = [160, 0], sizes = [32, 1], strides = [1, 1]} : vector<288x1xf32> to vector<32x1xf32>
    %c23 = arith.constant 23 : index
    %c0_37 = arith.constant 0 : index
    %189 = vector.load %arg4[%c23, %c0_37] : memref<32x512xf32, #tpu.memory_space<vmem>>, vector<1x512xf32>
    %190 = vector.broadcast %188 : vector<32x1xf32> to vector<32x512xf32>
    %191 = vector.broadcast %189 : vector<1x512xf32> to vector<32x512xf32>
    %192 = arith.mulf %190, %191 : vector<32x512xf32>
    %c509_i32 = arith.constant 509 : i32
    %193 = tpu.dynamic_rotate %150 by %c509_i32 dim 1 : vector<32x512xf32>, i32 -> vector<32x512xf32>
    %194 = arith.mulf %193, %192 : vector<32x512xf32>
    %195 = arith.addf %187, %194 : vector<32x512xf32>
    %196 = vector.extract_strided_slice %151 {offsets = [192, 0], sizes = [32, 1], strides = [1, 1]} : vector<288x1xf32> to vector<32x1xf32>
    %c24 = arith.constant 24 : index
    %c0_38 = arith.constant 0 : index
    %197 = vector.load %arg4[%c24, %c0_38] : memref<32x512xf32, #tpu.memory_space<vmem>>, vector<1x512xf32>
    %198 = vector.broadcast %196 : vector<32x1xf32> to vector<32x512xf32>
    %199 = vector.broadcast %197 : vector<1x512xf32> to vector<32x512xf32>
    %200 = arith.mulf %198, %199 : vector<32x512xf32>
    %c467_i32 = arith.constant 467 : i32
    %201 = tpu.dynamic_rotate %150 by %c467_i32 dim 1 : vector<32x512xf32>, i32 -> vector<32x512xf32>
    %202 = arith.mulf %201, %200 : vector<32x512xf32>
    %203 = arith.addf %195, %202 : vector<32x512xf32>
    %204 = vector.extract_strided_slice %151 {offsets = [224, 0], sizes = [32, 1], strides = [1, 1]} : vector<288x1xf32> to vector<32x1xf32>
    %c25 = arith.constant 25 : index
    %c0_39 = arith.constant 0 : index
    %205 = vector.load %arg4[%c25, %c0_39] : memref<32x512xf32, #tpu.memory_space<vmem>>, vector<1x512xf32>
    %206 = vector.broadcast %204 : vector<32x1xf32> to vector<32x512xf32>
    %207 = vector.broadcast %205 : vector<1x512xf32> to vector<32x512xf32>
    %208 = arith.mulf %206, %207 : vector<32x512xf32>
    %c464_i32 = arith.constant 464 : i32
    %209 = tpu.dynamic_rotate %150 by %c464_i32 dim 1 : vector<32x512xf32>, i32 -> vector<32x512xf32>
    %210 = arith.mulf %209, %208 : vector<32x512xf32>
    %211 = arith.addf %203, %210 : vector<32x512xf32>
    %212 = vector.extract_strided_slice %151 {offsets = [256, 0], sizes = [32, 1], strides = [1, 1]} : vector<288x1xf32> to vector<32x1xf32>
    %c26 = arith.constant 26 : index
    %c0_40 = arith.constant 0 : index
    %213 = vector.load %arg4[%c26, %c0_40] : memref<32x512xf32, #tpu.memory_space<vmem>>, vector<1x512xf32>
    %214 = vector.broadcast %212 : vector<32x1xf32> to vector<32x512xf32>
    %215 = vector.broadcast %213 : vector<1x512xf32> to vector<32x512xf32>
    %216 = arith.mulf %214, %215 : vector<32x512xf32>
    %c461_i32 = arith.constant 461 : i32
    %217 = tpu.dynamic_rotate %150 by %c461_i32 dim 1 : vector<32x512xf32>, i32 -> vector<32x512xf32>
    %218 = arith.mulf %217, %216 : vector<32x512xf32>
    %219 = arith.addf %211, %218 : vector<32x512xf32>
    %220 = vector.broadcast %152 : vector<32x1xf32> to vector<32x512xf32>
    %221 = arith.addf %219, %220 : vector<32x512xf32>
    %cst_41 = arith.constant 5.000000e-01 : f32
    %222 = vector.broadcast %cst_41 : f32 to vector<32x512xf32>
    %223 = arith.mulf %222, %77 : vector<32x512xf32>
    %cst_42 = arith.constant 0.707106769 : f32
    %224 = vector.broadcast %cst_42 : f32 to vector<32x512xf32>
    %225 = arith.mulf %77, %224 : vector<32x512xf32>
    %cst_43 = arith.constant 0.000000e+00 : f32
    %226 = vector.broadcast %cst_43 : f32 to vector<32x512xf32>
    %227 = arith.cmpf oge, %225, %226 : vector<32x512xf32>
    %cst_44 = arith.constant 1.000000e+00 : f32
    %cst_45 = arith.constant -1.000000e+00 : f32
    %228 = vector.broadcast %cst_44 : f32 to vector<32x512xf32>
    %229 = vector.broadcast %cst_45 : f32 to vector<32x512xf32>
    %230 = arith.select %227, %228, %229 : vector<32x512xi1>, vector<32x512xf32>
    %231 = math.absf %225 : vector<32x512xf32>
    %cst_46 = arith.constant 0.327591091 : f32
    %232 = vector.broadcast %cst_46 : f32 to vector<32x512xf32>
    %233 = arith.mulf %232, %231 : vector<32x512xf32>
    %cst_47 = arith.constant 1.000000e+00 : f32
    %234 = vector.broadcast %cst_47 : f32 to vector<32x512xf32>
    %235 = arith.addf %234, %233 : vector<32x512xf32>
    %cst_48 = arith.constant 1.000000e+00 : f32
    %236 = vector.broadcast %cst_48 : f32 to vector<32x512xf32>
    %237 = arith.divf %236, %235 : vector<32x512xf32>
    %cst_49 = arith.constant 1.06140542 : f32
    %238 = vector.broadcast %cst_49 : f32 to vector<32x512xf32>
    %239 = arith.mulf %238, %237 : vector<32x512xf32>
    %cst_50 = arith.constant -1.45315206 : f32
    %240 = vector.broadcast %cst_50 : f32 to vector<32x512xf32>
    %241 = arith.addf %239, %240 : vector<32x512xf32>
    %242 = arith.mulf %241, %237 : vector<32x512xf32>
    %cst_51 = arith.constant 1.42141378 : f32
    %243 = vector.broadcast %cst_51 : f32 to vector<32x512xf32>
    %244 = arith.addf %242, %243 : vector<32x512xf32>
    %245 = arith.mulf %244, %237 : vector<32x512xf32>
    %cst_52 = arith.constant -0.284496725 : f32
    %246 = vector.broadcast %cst_52 : f32 to vector<32x512xf32>
    %247 = arith.addf %245, %246 : vector<32x512xf32>
    %248 = arith.mulf %247, %237 : vector<32x512xf32>
    %cst_53 = arith.constant 0.254829586 : f32
    %249 = vector.broadcast %cst_53 : f32 to vector<32x512xf32>
    %250 = arith.addf %248, %249 : vector<32x512xf32>
    %251 = arith.mulf %250, %237 : vector<32x512xf32>
    %cst_54 = arith.constant 0.000000e+00 : f32
    %252 = vector.broadcast %cst_54 : f32 to vector<32x512xf32>
    %253 = arith.subf %252, %231 : vector<32x512xf32>
    %254 = arith.mulf %253, %231 : vector<32x512xf32>
    %255 = math.exp %254 : vector<32x512xf32>
    %256 = arith.mulf %251, %255 : vector<32x512xf32>
    %cst_55 = arith.constant 1.000000e+00 : f32
    %257 = vector.broadcast %cst_55 : f32 to vector<32x512xf32>
    %258 = arith.subf %257, %256 : vector<32x512xf32>
    %259 = arith.mulf %230, %258 : vector<32x512xf32>
    %cst_56 = arith.constant 1.000000e+00 : f32
    %260 = vector.broadcast %cst_56 : f32 to vector<32x512xf32>
    %261 = arith.addf %260, %259 : vector<32x512xf32>
    %262 = arith.mulf %223, %261 : vector<32x512xf32>
    %263 = arith.mulf %262, %149 : vector<32x512xf32>
    %264 = arith.mulf %263, %221 : vector<32x512xf32>
    %c0_57 = arith.constant 0 : index
    %c7_58 = arith.constant 7 : index
    %265 = vector.load %arg3[%c0_57, %c7_58] : memref<288x128xf32, #tpu.memory_space<vmem>>, vector<16x1xf32>
    %c0_59 = arith.constant 0 : index
    %c0_60 = arith.constant 0 : index
    %266 = vector.load %arg2[%c0_59, %c0_60] : memref<16x32xf32, #tpu.memory_space<vmem>>, vector<16x32xf32>
    %cst_61 = arith.constant dense<0.000000e+00> : vector<16x512xf32>
    %267 = tpu.matmul %266, %264, %cst_61 {dimension_numbers = #tpu.dot_dimension_numbers<[1], [0], [0], [1], [0, 0, 1, 1], [], []>} : vector<16x32xf32>, vector<32x512xf32>, vector<16x512xf32> -> vector<16x512xf32>
    %268 = vector.broadcast %265 : vector<16x1xf32> to vector<16x512xf32>
    %269 = arith.addf %267, %268 : vector<16x512xf32>
    %c0_62 = arith.constant 0 : index
    %c0_63 = arith.constant 0 : index
    %270 = vector.load %arg5[%c0_62, %c0_63] : memref<16x512xf32, #tpu.memory_space<vmem>>, vector<16x512xf32>
    tpu.vector_store %arg5[%c0_62, %c0_63], %269 {strides = array<i32>} : memref<16x512xf32, #tpu.memory_space<vmem>>, vector<16x512xf32>,
    return
  }
}

</mosaic_0001>

<bundles_post_ra>
// kernel: feed_forward.1
= control target key start
LH: loop header
LB: loop body
LE: loop exit
PB: predicated region body
PF: predicated region fallthrough
CT: control target
= control target key end

     0   :  { %v11961_v3 = vmov 0.0   ;;  %v4866_v8 = vmov 3   ;;  %vm112_vm0 = vcmask 130048   ;;  %v4867_v33 = vmov 0   ;;  %s4868_s27 = smov 17   ;;  %s4869_s28 = smov 16   ;;  %s11955_s0 = inlined_call_operand.vmem [shape: f32[16,512], index: 0, kind: input, shape index: {}]   ;;  %s11956_s1 = inlined_call_operand.vmem [shape: f32[96,16], index: 1, kind: input, shape index: {}]   ;;  %s11957_s3 = inlined_call_operand.vmem [shape: f32[288,128], index: 3, kind: input, shape index: {}]   ;;  %s11958_s4 = inlined_call_operand.vmem [shape: f32[32,512], index: 4, kind: input, shape index: {}]   ;;  %s11959_s2 = inlined_call_operand.vmem [shape: f32[16,32], index: 2, kind: input, shape index: {}]   ;;  %s11960_s5 = inlined_call_operand.vmem [shape: f32[16,512], index: 5, kind: output, shape index: {}]  }
   0x1   :  { %v21_v0 = vld [vmem:[%s11955_s0 + $0x8] sm:$0xff]  ;;  %v23_v2 = vld [vmem:[%s11955_s0 + $0x18] sm:$0xff]  ;;  %213 = vmatprep.mubr.f32.mxu0 %v11961_v3  ;;  %350 = vmatprep.mubr.f32.mxu1 %v11961_v3  ;;  %v20_v6 = vld [vmem:[%s11955_s0] sm:$0xff]  ;;  %s4870_s29 = smov 15   ;;  %s4871_s30 = smov 1  }
   0x2   :  { %v25_v1 = vld [vmem:[%s11955_s0 + $0x28] sm:$0xff]  ;;  %v27_v5 = vld [vmem:[%s11955_s0 + $0x38] sm:$0xff]  ;;  %v24_v7 = vld [vmem:[%s11955_s0 + $0x20] sm:$0xff]  ;;  %4721 = vset.pattern.permute.xlu1 %v4866_v8  ;;  %4720 = vset.pattern.permute.xlu0 %v4866_v8  ;;  %s4872_s6 = smov 127   ;;  %s4873_s14 = smov 113  }
   0x3   :  { %v4662_v4 = vpack.c.bf16 %v25_v1, %v21_v0  ;;  %v4666_v9 = vpack.c.bf16 %v27_v5, %v23_v2  ;;  %v4664_v10 = vpack.c.bf16 %v24_v7, %v20_v6  ;;  %v22_v11 = vld [vmem:[%s11955_s0 + $0x10] sm:$0xff]  ;;  %v40_v14 = vld [vmem:[%s11956_s1] sm:$0xff]  ;;  %v4973_v17 = vld [vmem:[%s11957_s3 + $0x18] sm:$0xff]  ;;  %s4874_s22 = smov 112   ;;  %s4879_s20 = smov 32  }
   0x4   :  { %v26_v12 = vld [vmem:[%s11955_s0 + $0x30] sm:$0xff]  ;;  %v4967_v16 = vld [vmem:[%s11957_s3] sm:$0xff]  ;;  %v41_v18 = vld [vmem:[%s11956_s1 + $0x8] sm:$0xff]  ;;  %s4881_s12 = smov 2   ;;  %s4884_s7 = smov 96  }
   0x5   :  { %4663 = vmatprep.subr.bf16.mxu0 %v4662_v4  ;;  %v4668_v13 = vpack.c.bf16 %v26_v12, %v22_v11  ;;  %4667 = vmatprep.subr.bf16.mxu1 %v4666_v9  ;;  %v4961_v15 = vld [vmem:[%s11957_s3 + $0x10] sm:$0xff]  ;;  %v4984_v19 = vld [vmem:[%s11957_s3 + $0x8] sm:$0xff]  ;;  %v32_v22 = vld [vmem:[%s11957_s3 + $0x20] sm:$0xff]  ;;  %s4885_s16 = smov 94   ;;  %s4888_s11 = smov 51  }
   0x6   :  { %4665 = vmatpush1.bf16.msra.mxu0 %v4664_v10  ;;  %64 = vperm.xlu1 %4721, %v4961_v15   ;;  %v4992_v20 = vld [vmem:[%s11957_s3 + $0x28] sm:$0xff]  ;;  %v42_v21 = vld [vmem:[%s11956_s1 + $0x10] sm:$0xff]  ;;  %v35_v23 = vld [vmem:[%s11957_s3 + $0x38] sm:$0xff]  ;;  %s4889_s19 = smov 48   ;;  %s4891_s21 = smov 45  }
   0x7   :  { %4669 = vmatpush1.bf16.msra.mxu1 %v4668_v13  ;;  %54 = vperm.xlu0 %4720, %v4967_v16   ;;  %v43_v24 = vld [vmem:[%s11956_s1 + $0x18] sm:$0xff]  ;;  %v34_v25 = vld [vmem:[%s11957_s3 + $0x30] sm:$0xff]  ;;  %v37_v26 = vld [vmem:[%s11957_s3 + $0x48] sm:$0xff]  ;;  %s4894_s9 = smov 83   ;;  %s4896_s17 = smov 80  }
   0x8   :  { %v44_v27 = vld [vmem:[%s11956_s1 + $0x20] sm:$0xff]  ;;  %v39_v29 = vld [vmem:[%s11957_s3 + $0x58] sm:$0xff]  ;;  %v45_v30 = vld [vmem:[%s11956_s1 + $0x28] sm:$0xff] }
   0x9   :  { %4611 = vmatmul.mubr.msk.f32.vlgmr.msra.gmra.mrb[0].mxu0 %vm112_vm0, %v40_v14  ;;  %v36_v28 = vld [vmem:[%s11957_s3 + $0x40] sm:$0xff]  ;;  %v38_v31 = vld [vmem:[%s11957_s3 + $0x50] sm:$0xff]  ;;  %v47_v34 = vld [vmem:[%s11956_s1 + $0x38] sm:$0xff] }
   0xa   :  { %4623 = vmatmul.mubr.msk.f32.vlgmr.msra.gmra.mrb[0].mxu1 %vm112_vm0, %v40_v14  ;;  %219 = vmatprep.mubr.f32.mxu0 %v11961_v3  ;;  %v46_v32 = vld [vmem:[%s11956_s1 + $0x30] sm:$0xff]  ;;  %v48_v35 = vld [vmem:[%s11956_s1 + $0x40] sm:$0xff]  ;;  %v49_v36 = vld [vmem:[%s11956_s1 + $0x48] sm:$0xff] }
   0xb   :  { %356 = vmatprep.mubr.f32.mxu1 %v11961_v3  ;;  %69 = vperm.xlu1 %4721, %v4973_v17   ;;  %v50_v37 = vld [vmem:[%s11956_s1 + $0x50] sm:$0xff]  ;;  %v51_v38 = vld [vmem:[%s11956_s1 + $0x58] sm:$0xff]  ;;  %v435_v39 = vld [vmem:[%s11957_s3 + $0x60] sm:$0xff]  ;;  %s4893_s1 = smov 125  }
   0xc   :  { %59 = vperm.xlu0 %4720, %v4984_v19   ;;  %v436_v40 = vld [vmem:[%s11957_s3 + $0x68] sm:$0xff]  ;;  %v437_v41 = vld [vmem:[%s11957_s3 + $0x70] sm:$0xff]  ;;  %v438_v42 = vld [vmem:[%s11957_s3 + $0x78] sm:$0xff] }
   0xd   :  { %4612 = vmatmul.mubr.msk.f32.gmra.mrb[2].mxu0 %vm112_vm0, %v41_v18  ;;  %v439_v43 = vld [vmem:[%s11957_s3 + $0x80] sm:$0xff]  ;;  %v440_v44 = vld [vmem:[%s11957_s3 + $0x88] sm:$0xff]  ;;  %v441_v45 = vld [vmem:[%s11957_s3 + $0x90] sm:$0xff] }
   0xe   :  { %4624 = vmatmul.mubr.msk.f32.gmra.mrb[2].mxu1 %vm112_vm0, %v41_v18  ;;  %225 = vmatprep.mubr.f32.mxu0 %v11961_v3  ;;  %v442_v46 = vld [vmem:[%s11957_s3 + $0x98] sm:$0xff]  ;;  %v443_v47 = vld [vmem:[%s11957_s3 + $0xa0] sm:$0xff]  ;;  %v444_v48 = vld [vmem:[%s11957_s3 + $0xa8] sm:$0xff] }
   0xf   :  { %362 = vmatprep.mubr.f32.mxu1 %v11961_v3  ;;  %79 = vperm.xlu1 %4721, %v4992_v20   ;;  %v445_v49 = vld [vmem:[%s11957_s3 + $0xb0] sm:$0xff]  ;;  %v446_v50 = vld [vmem:[%s11957_s3 + $0xb8] sm:$0xff] }
  0x10   :  { %74 = vperm.xlu0 %4720, %v32_v22  }
  0x11   :  { %4613 = vmatmul.mubr.msk.f32.gmra.mrb[4].mxu0 %vm112_vm0, %v42_v21 }
  0x12   :  { %4625 = vmatmul.mubr.msk.f32.gmra.mrb[4].mxu1 %vm112_vm0, %v42_v21  ;;  %231 = vmatprep.mubr.f32.mxu0 %v11961_v3 }
  0x13   :  { %368 = vmatprep.mubr.f32.mxu1 %v11961_v3  ;;  %89 = vperm.xlu1 %4721, %v35_v23  }
  0x14   :  { %84 = vperm.xlu0 %4720, %v34_v25  }
  0x15   :  { %4614 = vmatmul.mubr.msk.f32.gmra.mrb[6].mxu0 %vm112_vm0, %v43_v24 }
  0x16   :  { %4626 = vmatmul.mubr.msk.f32.gmra.mrb[6].mxu1 %vm112_vm0, %v43_v24  ;;  %237 = vmatprep.mubr.f32.mxu0 %v11961_v3 }
  0x17   :  { %374 = vmatprep.mubr.f32.mxu1 %v11961_v3  ;;  %99 = vperm.xlu1 %4721, %v37_v26  }
  0x18   :  { %94 = vperm.xlu0 %4720, %v36_v28  }
  0x19   :  { %4615 = vmatmul.mubr.msk.f32.gmra.mrb[8].mxu0 %vm112_vm0, %v44_v27 }
  0x1a   :  { %4627 = vmatmul.mubr.msk.f32.gmra.mrb[8].mxu1 %vm112_vm0, %v44_v27  ;;  %243 = vmatprep.mubr.f32.mxu0 %v11961_v3 }
  0x1b   :  { %380 = vmatprep.mubr.f32.mxu1 %v11961_v3  ;;  %109 = vperm.xlu1 %4721, %v39_v29  }
  0x1c   :  { %104 = vperm.xlu0 %4720, %v38_v31  }
  0x1d   :  { %4616 = vmatmul.mubr.msk.f32.gmra.mrb[10].mxu0 %vm112_vm0, %v45_v30 }
  0x1e   :  { %4628 = vmatmul.mubr.msk.f32.gmra.mrb[10].mxu1 %vm112_vm0, %v45_v30  ;;  %249 = vmatprep.mubr.f32.mxu0 %v11961_v3 }
  0x1f   :  { %386 = vmatprep.mubr.f32.mxu1 %v11961_v3  ;;  %4723 = vset.pattern.permute.xlu1 %v4867_v33 }
  0x20   :  { %471 = vperm.xlu1 %4723, %v4984_v19   ;;  %4722 = vset.pattern.permute.xlu0 %v4867_v33 }
  0x21   :  { %4617 = vmatmul.mubr.msk.f32.gmra.mrb[12].mxu0 %vm112_vm0, %v46_v32  ;;  %466 = vperm.xlu0 %4722, %v4967_v16  }
  0x22   :  { %4629 = vmatmul.mubr.msk.f32.gmra.mrb[12].mxu1 %vm112_vm0, %v46_v32  ;;  %255 = vmatprep.mubr.f32.mxu0 %v11961_v3 }
  0x23   :  { %392 = vmatprep.mubr.f32.mxu1 %v11961_v3 }
  0x24   :  { %476 = vperm.xlu1 %4723, %v4961_v15  }
  0x25   :  { %4618 = vmatmul.mubr.msk.f32.gmra.mrb[14].mxu0 %vm112_vm0, %v47_v34  ;;  %481 = vperm.xlu0 %4722, %v4973_v17  }
  0x26   :  { %4630 = vmatmul.mubr.msk.f32.gmra.mrb[14].mxu1 %vm112_vm0, %v47_v34  ;;  %261 = vmatprep.mubr.f32.mxu0 %v11961_v3 }
  0x27   :  { %398 = vmatprep.mubr.f32.mxu1 %v11961_v3 }
  0x28   :  { %592 = vperm.xlu1 %4723, %v32_v22  }
  0x29   :  { %4619 = vmatmul.mubr.msk.f32.gmra.mrb[16].mxu0 %vm112_vm0, %v48_v35  ;;  %597 = vperm.xlu0 %4722, %v4992_v20  }
  0x2a   :  { %4631 = vmatmul.mubr.msk.f32.gmra.mrb[16].mxu1 %vm112_vm0, %v48_v35  ;;  %267 = vmatprep.mubr.f32.mxu0 %v11961_v3 }
  0x2b   :  { %404 = vmatprep.mubr.f32.mxu1 %v11961_v3 }
  0x2c   :  { %602 = vperm.xlu1 %4723, %v34_v25  }
  0x2d   :  { %4620 = vmatmul.mubr.msk.f32.gmra.mrb[18].mxu0 %vm112_vm0, %v49_v36  ;;  %607 = vperm.xlu0 %4722, %v35_v23  }
  0x2e   :  { %4632 = vmatmul.mubr.msk.f32.gmra.mrb[18].mxu1 %vm112_vm0, %v49_v36  ;;  %273 = vmatprep.mubr.f32.mxu0 %v11961_v3 }
  0x2f   :  { %410 = vmatprep.mubr.f32.mxu1 %v11961_v3 }
  0x30   :  { %732 = vperm.xlu1 %4723, %v36_v28  }
  0x31   :  { %4621 = vmatmul.mubr.msk.f32.gmra.mrb[20].mxu0 %vm112_vm0, %v50_v37  ;;  %737 = vperm.xlu0 %4722, %v37_v26  }
  0x32   :  { %4633 = vmatmul.mubr.msk.f32.gmra.mrb[20].mxu1 %vm112_vm0, %v50_v37  ;;  %279 = vmatprep.mubr.f32.mxu0 %v11961_v3 }
  0x33   :  { %416 = vmatprep.mubr.f32.mxu1 %v11961_v3 }
  0x34   :  { %742 = vperm.xlu1 %4723, %v38_v31  }
  0x35   :  { %4622 = vmatmul.mubr.msk.f32.gmra.mrb[22].mxu0 %vm112_vm0, %v51_v38  ;;  %747 = vperm.xlu0 %4722, %v39_v29  }
  0x36   :  { %4634 = vmatmul.mubr.msk.f32.gmra.mrb[22].mxu1 %vm112_vm0, %v51_v38  ;;  %4509 = vmatprep.mubr.f32.mxu0 %v11961_v3 }
  0x37   :  { %4586 = vmatprep.mubr.f32.mxu1 %v11961_v3 }
  0x38   :  { %872 = vperm.xlu1 %4723, %v435_v39  }
  0x39   :  { %877 = vperm.xlu0 %4722, %v436_v40  }
  0x3c   :  { %882 = vperm.xlu1 %4723, %v437_v41  }
  0x3d   :  { %887 = vperm.xlu0 %4722, %v438_v42  }
  0x40   :  { %1010 = vperm.xlu1 %4723, %v439_v43  }
  0x41   :  { %1015 = vperm.xlu0 %4722, %v440_v44  }
  0x44   :  { %1020 = vperm.xlu1 %4723, %v441_v45  }
  0x45   :  { %1025 = vperm.xlu0 %4722, %v442_v46  }
  0x48   :  { %1064 = vperm.xlu1 %4723, %v443_v47  }
  0x49   :  { %1069 = vperm.xlu0 %4722, %v444_v48  }
  0x4c   :  { %1074 = vperm.xlu1 %4723, %v445_v49  }
  0x4d   :  { %1079 = vperm.xlu0 %4722, %v446_v50  }
  0x85   :  { %v5179_v9 = vpop.permute.xlu1 %64 }
  0x86   :  { %v5131_v51 = vpop.permute.xlu0 %54 }
  0x8a   :  { %v5199_v18 = vpop.permute.xlu1 %69 }
  0x8b   :  { %v5142_v57 = vpop.permute.xlu0 %59 }
  0x8e   :  { %v5219_v27 = vpop.permute.xlu1 %79 }
  0x8f   :  { %v5233_v32 = vpop.permute.xlu0 %74 }
  0x92   :  { %v5241_v34 = vpop.permute.xlu1 %89 }
  0x93   :  { %v5255_v39 = vpop.permute.xlu0 %84 }
  0x96   :  { %v5263_v43 = vpop.permute.xlu1 %99 }
  0x97   :  { %12570 = vst [vmem:[#allocation9_spill] sm:$0xff] %v5263_v43  ;;  %v5283_v50 = vpop.permute.xlu0 %94 }
  0x98   :  { %12576 = vst [vmem:[#allocation15_spill] sm:$0xff] %v5283_v50 }
  0xdc   :  { %v215_v52 = vpop.f32.mrb[0].mxu0 }
  0xdd   :  { %v5134_v53 = vadd.f32 %v215_v52, %v5131_v51  ;;  %v352_v54 = vpop.f32.mrb[0].mxu1  ;;  %v5136_v55 = vpop.f32.mrb[1].mxu0 }
  0xde   :  { %v5138_v56 = vpop.f32.mrb[1].mxu1  ;;  %v5145_v59 = vadd.f32 %v352_v54, %v5131_v51  ;;  %v5275_v46 = vadd.f32 %v5136_v55, %v5131_v51  ;;  %v5289_v52 = vpop.permute.xlu1 %109 }
  0xdf   :  { %521 = vrot.lane.b32.xlu1 %v5134_v53, %s4868_s27  ;;  %12577 = vst [vmem:[#allocation16_spill] sm:$0xff] %v5289_v52  ;;  %v5295_v55 = vadd.f32 %v5138_v56, %v5131_v51 }
  0xe0   :  { %v221_v58 = vpop.f32.mrb[2].mxu0 }
  0xe1   :  { %v5148_v60 = vadd.f32 %v221_v58, %v5142_v57  ;;  %v358_v61 = vpop.f32.mrb[2].mxu1  ;;  %v5150_v62 = vpop.f32.mrb[3].mxu0 }
  0xe2   :  { %v5152_v63 = vpop.f32.mrb[3].mxu1  ;;  %v5161_v1 = vadd.f32 %v358_v61, %v5142_v57  ;;  %v5299_v58 = vadd.f32 %v5150_v62, %v5142_v57  ;;  %v5317_v56 = vpop.permute.xlu1 %471 }
  0xe3   :  { %523 = vrot.lane.b32.xlu0 %v5148_v60, %s4868_s27  ;;  %537 = vrot.lane.b32.xlu1 %v5145_v59, %s4868_s27  ;;  %v5315_v51 = vadd.f32 %v5152_v63, %v5142_v57 }
  0xe4   :  { %v5158_v0 = vpop.f32.mrb[4].mxu0 }
  0xe5   :  { %v5163_v2 = vpop.f32.mrb[4].mxu1  ;;  %v5165_v4 = vpop.f32.mrb[5].mxu0 }
  0xe6   :  { %v5167_v5 = vpop.f32.mrb[5].mxu1 }
  0xe7   :  { %539 = vrot.lane.b32.xlu0 %v5161_v1, %s4868_s27  ;;  %647 = vrot.lane.b32.xlu1 %v5134_v53, %s4869_s28 }
  0xe8   :  { %v5173_v6 = vpop.f32.mrb[6].mxu0 }
  0xe9   :  { %v5175_v7 = vpop.f32.mrb[6].mxu1  ;;  %v5177_v8 = vpop.f32.mrb[7].mxu0 }
  0xea   :  { %v5181_v10 = vpop.f32.mrb[7].mxu1 }
  0xeb   :  { %649 = vrot.lane.b32.xlu0 %v5148_v60, %s4869_s28  ;;  %663 = vrot.lane.b32.xlu1 %v5145_v59, %s4869_s28 }
  0xec   :  { %v5187_v11 = vpop.f32.mrb[8].mxu0 }
  0xed   :  { %v5189_v12 = vpop.f32.mrb[8].mxu1  ;;  %v5191_v13 = vpop.f32.mrb[9].mxu0 }
  0xee   :  { %v5193_v14 = vpop.f32.mrb[9].mxu1 }
  0xef   :  { %665 = vrot.lane.b32.xlu0 %v5161_v1, %s4869_s28  ;;  %787 = vrot.lane.b32.xlu1 %v5134_v53, %s4870_s29 }
  0xf0   :  { %v5201_v20 = vpop.f32.mrb[10].mxu0 }
  0xf1   :  { %v5203_v21 = vpop.f32.mrb[10].mxu1  ;;  %v5205_v22 = vpop.f32.mrb[11].mxu0 }
  0xf2   :  { %v5207_v23 = vpop.f32.mrb[11].mxu1 }
  0xf3   :  { %789 = vrot.lane.b32.xlu0 %v5148_v60, %s4870_s29  ;;  %803 = vrot.lane.b32.xlu1 %v5145_v59, %s4870_s29 }
  0xf4   :  { %v5213_v24 = vpop.f32.mrb[12].mxu0 }
  0xf5   :  { %v5215_v25 = vpop.f32.mrb[12].mxu1  ;;  %v5217_v26 = vpop.f32.mrb[13].mxu0 }
  0xf6   :  { %v5221_v28 = vpop.f32.mrb[13].mxu1 }
  0xf7   :  { %805 = vrot.lane.b32.xlu0 %v5161_v1, %s4870_s29  ;;  %927 = vrot.lane.b32.xlu1 %v5134_v53, %s4871_s30 }
  0xf8   :  { %v5227_v29 = vpop.f32.mrb[14].mxu0 }
  0xf9   :  { %v5229_v30 = vpop.f32.mrb[14].mxu1  ;;  %v5231_v31 = vpop.f32.mrb[15].mxu0 }
  0xfa   :  { %v5235_v33 = vpop.f32.mrb[15].mxu1 }
  0xfb   :  { %929 = vrot.lane.b32.xlu0 %v5148_v60, %s4871_s30  ;;  %943 = vrot.lane.b32.xlu1 %v5145_v59, %s4871_s30 }
  0xfc   :  { %v5243_v35 = vpop.f32.mrb[16].mxu0 }
  0xfd   :  { %12563 = vst [vmem:[#allocation2_spill] sm:$0xff] %v5243_v35  ;;  %v5245_v36 = vpop.f32.mrb[16].mxu1  ;;  %v5247_v37 = vpop.f32.mrb[17].mxu0 }
  0xfe   :  { %12564 = vst [vmem:[#allocation3_spill] sm:$0xff] %v5245_v36  ;;  %12565 = vst [vmem:[#allocation4_spill] sm:$0xff] %v5247_v37  ;;  %v5249_v38 = vpop.f32.mrb[17].mxu1 }
  0xff   :  { %12566 = vst [vmem:[#allocation5_spill] sm:$0xff] %v5249_v38  ;;  %945 = vrot.lane.b32.xlu0 %v5161_v1, %s4871_s30  ;;  %1119 = vrot.lane.b32.xlu1 %v5134_v53, %s4872_s6 }
 0x100   :  { %v5257_v40 = vpop.f32.mrb[18].mxu0 }
 0x101   :  { %12567 = vst [vmem:[#allocation6_spill] sm:$0xff] %v5257_v40  ;;  %v5259_v41 = vpop.f32.mrb[18].mxu1  ;;  %v5261_v42 = vpop.f32.mrb[19].mxu0 }
 0x102   :  { %12568 = vst [vmem:[#allocation7_spill] sm:$0xff] %v5259_v41  ;;  %12569 = vst [vmem:[#allocation8_spill] sm:$0xff] %v5261_v42  ;;  %v5265_v44 = vpop.f32.mrb[19].mxu1  ;;  %v5383_v42 = vadd.f32 %v5163_v2, %v5179_v9  ;;  %v5387_v41 = vadd.f32 %v5173_v6, %v5199_v18 }
 0x103   :  { %12571 = vst [vmem:[#allocation10_spill] sm:$0xff] %v5265_v44  ;;  %1121 = vrot.lane.b32.xlu0 %v5148_v60, %s4872_s6  ;;  %1135 = vrot.lane.b32.xlu1 %v5145_v59, %s4872_s6 }
 0x104   :  { %v5271_v45 = vpop.f32.mrb[20].mxu0 }
 0x105   :  { %12572 = vst [vmem:[#allocation11_spill] sm:$0xff] %v5271_v45  ;;  %v5277_v47 = vpop.f32.mrb[20].mxu1  ;;  %v5279_v48 = vpop.f32.mrb[21].mxu0 }
 0x106   :  { %12573 = vst [vmem:[#allocation12_spill] sm:$0xff] %v5277_v47  ;;  %12574 = vst [vmem:[#allocation13_spill] sm:$0xff] %v5279_v48  ;;  %v5281_v49 = vpop.f32.mrb[21].mxu1 }
 0x107   :  { %12575 = vst [vmem:[#allocation14_spill] sm:$0xff] %v5281_v49  ;;  %1137 = vrot.lane.b32.xlu0 %v5161_v1, %s4872_s6  ;;  %529 = vrot.lane.b32.xlu1 %v5275_v46, %s4868_s27 }
 0x108   :  { %v5291_v54 = vpop.f32.mrb[22].mxu0 }
 0x109   :  { %12578 = vst [vmem:[#allocation17_spill] sm:$0xff] %v5291_v54  ;;  %v5301_v61 = vpop.f32.mrb[22].mxu1  ;;  %v5303_v3 = vpop.f32.mrb[23].mxu0 }
 0x10a   :  { %12579 = vst [vmem:[#allocation18_spill] sm:$0xff] %v5301_v61  ;;  %12580 = vst [vmem:[#allocation19_spill] sm:$0xff] %v5303_v3  ;;  %v5305_v49 = vpop.f32.mrb[23].mxu1  ;;  %v5311_v54 = vpop.permute.xlu0 %104 }
 0x10b   :  { %12581 = vst [vmem:[#allocation20_spill] sm:$0xff] %v5305_v49  ;;  %531 = vrot.lane.b32.xlu0 %v5299_v58, %s4868_s27  ;;  %545 = vrot.lane.b32.xlu1 %v5295_v55, %s4868_s27  ;;  %12582 = vst [vmem:[#allocation21_spill] sm:$0xff] %v5311_v54  ;;  %v5329_v49 = vpop.permute.xlu1 %476  ;;  %v5373_v54 = vadd.f32 %v5158_v0, %v5179_v9  ;;  %v5397_v0 = vadd.f32 %v5175_v7, %v5199_v18 }
 0x10d   :  { %12588 = vst [vmem:[#allocation27_spill] sm:$0xff] %v5397_v0 }
 0x10e   :  { %v5323_v62 = vpop.permute.xlu0 %466 }
 0x10f   :  { %547 = vrot.lane.b32.xlu0 %v5315_v51, %s4868_s27  ;;  %655 = vrot.lane.b32.xlu1 %v5275_v46, %s4869_s28  ;;  %v5337_v63 = vpop.permute.xlu1 %592 }
 0x112   :  { %v5335_v57 = vpop.permute.xlu0 %481 }
 0x113   :  { %657 = vrot.lane.b32.xlu0 %v5299_v58, %s4869_s28  ;;  %671 = vrot.lane.b32.xlu1 %v5295_v55, %s4869_s28  ;;  %12583 = vst [vmem:[#allocation22_spill] sm:$0xff] %v5335_v57  ;;  %v5349_v61 = vpop.permute.xlu1 %602  ;;  %v5678_v57 = vld [vmem:[%s11957_s3 + $0xf8] sm:$0xff] }
 0x116   :  { %v5343_v3 = vpop.permute.xlu0 %597 }
 0x117   :  { %673 = vrot.lane.b32.xlu0 %v5315_v51, %s4869_s28  ;;  %795 = vrot.lane.b32.xlu1 %v5275_v46, %s4870_s29  ;;  %12584 = vst [vmem:[#allocation23_spill] sm:$0xff] %v5343_v3  ;;  %v5357_v48 = vpop.permute.xlu1 %732 }
 0x11a   :  { %v5355_v52 = vpop.permute.xlu0 %607 }
 0x11b   :  { %797 = vrot.lane.b32.xlu0 %v5299_v58, %s4870_s29  ;;  %811 = vrot.lane.b32.xlu1 %v5295_v55, %s4870_s29  ;;  %12585 = vst [vmem:[#allocation24_spill] sm:$0xff] %v5355_v52  ;;  %v5369_v45 = vpop.permute.xlu1 %742 }
 0x11e   :  { %v5363_v47 = vpop.permute.xlu0 %737 }
 0x11f   :  { %813 = vrot.lane.b32.xlu0 %v5315_v51, %s4870_s29  ;;  %935 = vrot.lane.b32.xlu1 %v5275_v46, %s4871_s30  ;;  %12586 = vst [vmem:[#allocation25_spill] sm:$0xff] %v5363_v47  ;;  %v5389_v40 = vpop.permute.xlu1 %872 }
 0x122   :  { %v5379_v44 = vpop.permute.xlu0 %747 }
 0x123   :  { %937 = vrot.lane.b32.xlu0 %v5299_v58, %s4871_s30  ;;  %951 = vrot.lane.b32.xlu1 %v5295_v55, %s4871_s30  ;;  %12587 = vst [vmem:[#allocation26_spill] sm:$0xff] %v5379_v44  ;;  %v5405_v2 = vpop.permute.xlu1 %882 }
 0x126   :  { %v5399_v43 = vpop.permute.xlu0 %877 }
 0x127   :  { %953 = vrot.lane.b32.xlu0 %v5315_v51, %s4871_s30  ;;  %1127 = vrot.lane.b32.xlu1 %v5275_v46, %s4872_s6  ;;  %12589 = vst [vmem:[#allocation28_spill] sm:$0xff] %v5399_v43  ;;  %v5413_v7 = vpop.permute.xlu1 %1010 }
 0x128   :  { %12591 = vst [vmem:[#allocation30_spill] sm:$0xff] %v5413_v7  ;;  %v5457_v7 = vadd.f32 %v5165_v4, %v5179_v9 }
 0x12a   :  { %v5411_v6 = vpop.permute.xlu0 %887 }
 0x12b   :  { %1129 = vrot.lane.b32.xlu0 %v5299_v58, %s4872_s6  ;;  %1143 = vrot.lane.b32.xlu1 %v5295_v55, %s4872_s6  ;;  %12590 = vst [vmem:[#allocation29_spill] sm:$0xff] %v5411_v6  ;;  %v5421_v37 = vpop.permute.xlu1 %1020 }
 0x12c   :  { %12593 = vst [vmem:[#allocation32_spill] sm:$0xff] %v5421_v37 }
 0x12e   :  { %v5419_v38 = vpop.permute.xlu0 %1015 }
 0x12f   :  { %1145 = vrot.lane.b32.xlu0 %v5315_v51, %s4872_s6  ;;  %525 = vrot.lane.b32.xlu1 %v5373_v54, %s4868_s27  ;;  %12592 = vst [vmem:[#allocation31_spill] sm:$0xff] %v5419_v38  ;;  %v5429_v35 = vpop.permute.xlu1 %1064 }
 0x130   :  { %12595 = vst [vmem:[#allocation34_spill] sm:$0xff] %v5429_v35 }
 0x132   :  { %v5427_v36 = vpop.permute.xlu0 %1025 }
 0x133   :  { %527 = vrot.lane.b32.xlu0 %v5387_v41, %s4868_s27  ;;  %541 = vrot.lane.b32.xlu1 %v5383_v42, %s4868_s27  ;;  %12594 = vst [vmem:[#allocation33_spill] sm:$0xff] %v5427_v36  ;;  %v5441_v37 = vpop.permute.xlu1 %1074 }
 0x134   :  { %12597 = vst [vmem:[#allocation36_spill] sm:$0xff] %v5441_v37 }
 0x136   :  { %v5435_v50 = vpop.permute.xlu0 %1069 }
 0x137   :  { %543 = vrot.lane.b32.xlu0 %v5397_v0, %s4868_s27  ;;  %651 = vrot.lane.b32.xlu1 %v5373_v54, %s4869_s28  ;;  %12596 = vst [vmem:[#allocation35_spill] sm:$0xff] %v5435_v50 }
 0x13a   :  { %v5447_v36 = vpop.permute.xlu0 %1079 }
 0x13b   :  { %653 = vrot.lane.b32.xlu0 %v5387_v41, %s4869_s28  ;;  %667 = vrot.lane.b32.xlu1 %v5383_v42, %s4869_s28  ;;  %12598 = vst [vmem:[#allocation37_spill] sm:$0xff] %v5447_v36  ;;  %v5473_v36 = vadd.f32 %v5177_v8, %v5199_v18 }
 0x13d   :  { %12602 = vst [vmem:[#allocation41_spill] sm:$0xff] %v5473_v36 }
 0x13f   :  { %669 = vrot.lane.b32.xlu0 %v5397_v0, %s4869_s28  ;;  %791 = vrot.lane.b32.xlu1 %v5373_v54, %s4870_s29 }
 0x143   :  { %793 = vrot.lane.b32.xlu0 %v5387_v41, %s4870_s29  ;;  %807 = vrot.lane.b32.xlu1 %v5383_v42, %s4870_s29 }
 0x147   :  { %809 = vrot.lane.b32.xlu0 %v5397_v0, %s4870_s29  ;;  %931 = vrot.lane.b32.xlu1 %v5373_v54, %s4871_s30 }
 0x14b   :  { %933 = vrot.lane.b32.xlu0 %v5387_v41, %s4871_s30  ;;  %947 = vrot.lane.b32.xlu1 %v5383_v42, %s4871_s30 }
 0x14f   :  { %949 = vrot.lane.b32.xlu0 %v5397_v0, %s4871_s30  ;;  %1123 = vrot.lane.b32.xlu1 %v5373_v54, %s4872_s6 }
 0x151   :  { %v5449_v38 = vpop.permute.xlu1 %521 }
 0x152   :  { %12599 = vst [vmem:[#allocation38_spill] sm:$0xff] %v5449_v38  ;;  %v5469_v38 = vadd.f32 %v5167_v5, %v5179_v9 }
 0x153   :  { %1125 = vrot.lane.b32.xlu0 %v5387_v41, %s4872_s6  ;;  %1139 = vrot.lane.b32.xlu1 %v5383_v42, %s4872_s6 }
 0x155   :  { %v5459_v37 = vpop.permute.xlu0 %523  ;;  %v5461_v6 = vpop.permute.xlu1 %537 }
 0x156   :  { %12600 = vst [vmem:[#allocation39_spill] sm:$0xff] %v5459_v37  ;;  %12601 = vst [vmem:[#allocation40_spill] sm:$0xff] %v5461_v6  ;;  %v5485_v37 = vadd.f32 %v5181_v10, %v5199_v18 }
 0x157   :  { %1141 = vrot.lane.b32.xlu0 %v5397_v0, %s4872_s6  ;;  %533 = vrot.lane.b32.xlu1 %v5457_v7, %s4868_s27 }
 0x158   :  { %12605 = vst [vmem:[#allocation44_spill] sm:$0xff] %v5485_v37 }
 0x159   :  { %v5475_v4 = vpop.permute.xlu0 %539  ;;  %v5477_v44 = vpop.permute.xlu1 %647 }
 0x15a   :  { %12603 = vst [vmem:[#allocation42_spill] sm:$0xff] %v5475_v4  ;;  %12604 = vst [vmem:[#allocation43_spill] sm:$0xff] %v5477_v44  ;;  %v5582_v4 = vld [vmem:[%s11957_s3 + $0xd8] sm:$0xff] }
 0x15b   :  { %535 = vrot.lane.b32.xlu0 %v5473_v36, %s4868_s27  ;;  %549 = vrot.lane.b32.xlu1 %v5469_v38, %s4868_s27 }
 0x15d   :  { %v5487_v5 = vpop.permute.xlu0 %649  ;;  %v5489_v9 = vpop.permute.xlu1 %663 }
 0x15e   :  { %12606 = vst [vmem:[#allocation45_spill] sm:$0xff] %v5487_v5  ;;  %12607 = vst [vmem:[#allocation46_spill] sm:$0xff] %v5489_v9 }
 0x15f   :  { %551 = vrot.lane.b32.xlu0 %v5485_v37, %s4868_s27  ;;  %659 = vrot.lane.b32.xlu1 %v5457_v7, %s4869_s28 }
 0x161   :  { %v5495_v8 = vpop.permute.xlu0 %665  ;;  %v5497_v44 = vpop.permute.xlu1 %787 }
 0x162   :  { %12608 = vst [vmem:[#allocation47_spill] sm:$0xff] %v5495_v8  ;;  %12609 = vst [vmem:[#allocation48_spill] sm:$0xff] %v5497_v44 }
 0x163   :  { %661 = vrot.lane.b32.xlu0 %v5473_v36, %s4869_s28  ;;  %675 = vrot.lane.b32.xlu1 %v5469_v38, %s4869_s28 }
 0x165   :  { %v5503_v10 = vpop.permute.xlu0 %789  ;;  %v5505_v18 = vpop.permute.xlu1 %803 }
 0x166   :  { %12610 = vst [vmem:[#allocation49_spill] sm:$0xff] %v5503_v10  ;;  %12611 = vst [vmem:[#allocation50_spill] sm:$0xff] %v5505_v18 }
 0x167   :  { %677 = vrot.lane.b32.xlu0 %v5485_v37, %s4869_s28  ;;  %799 = vrot.lane.b32.xlu1 %v5457_v7, %s4870_s29  ;;  %s4882_s28 = smov 126  }
 0x169   :  { %v5511_v5 = vpop.permute.xlu0 %805  ;;  %v5513_v8 = vpop.permute.xlu1 %927 }
 0x16a   :  { %12612 = vst [vmem:[#allocation51_spill] sm:$0xff] %v5511_v5  ;;  %12613 = vst [vmem:[#allocation52_spill] sm:$0xff] %v5513_v8 }
 0x16b   :  { %801 = vrot.lane.b32.xlu0 %v5473_v36, %s4870_s29  ;;  %815 = vrot.lane.b32.xlu1 %v5469_v38, %s4870_s29 }
 0x16d   :  { %v5519_v44 = vpop.permute.xlu0 %929  ;;  %v5521_v10 = vpop.permute.xlu1 %943 }
 0x16e   :  { %12614 = vst [vmem:[#allocation53_spill] sm:$0xff] %v5519_v44  ;;  %12615 = vst [vmem:[#allocation54_spill] sm:$0xff] %v5521_v10 }
 0x16f   :  { %817 = vrot.lane.b32.xlu0 %v5485_v37, %s4870_s29  ;;  %939 = vrot.lane.b32.xlu1 %v5457_v7, %s4871_s30  ;;  %s4880_s29 = smov 30  }
 0x171   :  { %v5527_v18 = vpop.permute.xlu0 %945  ;;  %v5529_v5 = vpop.permute.xlu1 %1119 }
 0x172   :  { %12616 = vst [vmem:[#allocation55_spill] sm:$0xff] %v5527_v18  ;;  %12617 = vst [vmem:[#allocation56_spill] sm:$0xff] %v5529_v5 }
 0x173   :  { %941 = vrot.lane.b32.xlu0 %v5473_v36, %s4871_s30  ;;  %955 = vrot.lane.b32.xlu1 %v5469_v38, %s4871_s30 }
 0x175   :  { %v5535_v8 = vpop.permute.xlu0 %1121  ;;  %v5537_v44 = vpop.permute.xlu1 %1135 }
 0x176   :  { %12618 = vst [vmem:[#allocation57_spill] sm:$0xff] %v5535_v8  ;;  %12619 = vst [vmem:[#allocation58_spill] sm:$0xff] %v5537_v44  ;;  %v5558_v44 = vld [vmem:[%s11957_s3 + $0xc0] sm:$0xff] }
 0x177   :  { %957 = vrot.lane.b32.xlu0 %v5485_v37, %s4871_s30  ;;  %1131 = vrot.lane.b32.xlu1 %v5457_v7, %s4872_s6  ;;  %s4892_s30 = smov 3  }
 0x179   :  { %v5543_v10 = vpop.permute.xlu0 %1137  ;;  %v5545_v18 = vpop.permute.xlu1 %529 }
 0x17a   :  { %12620 = vst [vmem:[#allocation59_spill] sm:$0xff] %v5543_v10  ;;  %12621 = vst [vmem:[#allocation60_spill] sm:$0xff] %v5545_v18  ;;  %v5566_v10 = vld [vmem:[%s11957_s3 + $0xc8] sm:$0xff] }
 0x17b   :  { %1133 = vrot.lane.b32.xlu0 %v5473_v36, %s4872_s6  ;;  %1147 = vrot.lane.b32.xlu1 %v5469_v38, %s4872_s6 }
 0x17d   :  { %v5551_v5 = vpop.permute.xlu0 %531  ;;  %v5553_v8 = vpop.permute.xlu1 %545 }
 0x17e   :  { %12622 = vst [vmem:[#allocation61_spill] sm:$0xff] %v5551_v5  ;;  %12623 = vst [vmem:[#allocation62_spill] sm:$0xff] %v5553_v8  ;;  %v5575_v8 = vld [vmem:[%s11957_s3 + $0xd0] sm:$0xff] }
 0x17f   :  { %1149 = vrot.lane.b32.xlu0 %v5485_v37, %s4872_s6  ;;  %1204 = vperm.xlu1 %4723, %v5558_v44   ;;  %s4875_s6 = smov 111  }
 0x181   :  { %v5568_v9 = vpop.permute.xlu0 %547  ;;  %v5570_v5 = vpop.permute.xlu1 %655 }
 0x182   :  { %12624 = vst [vmem:[#allocation63_spill] sm:$0xff] %v5568_v9  ;;  %12625 = vst [vmem:[#allocation64_spill] sm:$0xff] %v5570_v5 }
 0x183   :  { %1209 = vperm.xlu0 %4722, %v5566_v10   ;;  %1214 = vperm.xlu1 %4723, %v5575_v8  }
 0x185   :  { %v5584_v18 = vpop.permute.xlu0 %657  ;;  %v5586_v6 = vpop.permute.xlu1 %671 }
 0x186   :  { %12626 = vst [vmem:[#allocation65_spill] sm:$0xff] %v5584_v18  ;;  %12627 = vst [vmem:[#allocation66_spill] sm:$0xff] %v5586_v6 }
 0x187   :  { %1219 = vperm.xlu0 %4722, %v5582_v4   ;;  %1259 = vrot.lane.b32.xlu1 %v5134_v53, %s4873_s14 }
 0x189   :  { %v5591_v9 = vpop.permute.xlu0 %673  ;;  %v5593_v5 = vpop.permute.xlu1 %795 }
 0x18a   :  { %12628 = vst [vmem:[#allocation67_spill] sm:$0xff] %v5591_v9  ;;  %12629 = vst [vmem:[#allocation68_spill] sm:$0xff] %v5593_v5 }
 0x18b   :  { %1261 = vrot.lane.b32.xlu0 %v5148_v60, %s4873_s14  ;;  %1263 = vrot.lane.b32.xlu1 %v5373_v54, %s4873_s14 }
 0x18d   :  { %v5599_v52 = vpop.permute.xlu0 %797  ;;  %v5601_v18 = vpop.permute.xlu1 %811 }
 0x18e   :  { %12630 = vst [vmem:[#allocation69_spill] sm:$0xff] %v5599_v52  ;;  %12631 = vst [vmem:[#allocation70_spill] sm:$0xff] %v5601_v18 }
 0x18f   :  { %1265 = vrot.lane.b32.xlu0 %v5387_v41, %s4873_s14  ;;  %1267 = vrot.lane.b32.xlu1 %v5275_v46, %s4873_s14 }
 0x191   :  { %v5607_v6 = vpop.permute.xlu0 %813  ;;  %v5609_v9 = vpop.permute.xlu1 %935 }
 0x192   :  { %12632 = vst [vmem:[#allocation71_spill] sm:$0xff] %v5607_v6  ;;  %12633 = vst [vmem:[#allocation72_spill] sm:$0xff] %v5609_v9 }
 0x193   :  { %1269 = vrot.lane.b32.xlu0 %v5299_v58, %s4873_s14  ;;  %1271 = vrot.lane.b32.xlu1 %v5457_v7, %s4873_s14 }
 0x195   :  { %v5615_v5 = vpop.permute.xlu0 %937  ;;  %v5617_v52 = vpop.permute.xlu1 %951 }
 0x196   :  { %12634 = vst [vmem:[#allocation73_spill] sm:$0xff] %v5615_v5  ;;  %12635 = vst [vmem:[#allocation74_spill] sm:$0xff] %v5617_v52 }
 0x197   :  { %1273 = vrot.lane.b32.xlu0 %v5473_v36, %s4873_s14  ;;  %1275 = vrot.lane.b32.xlu1 %v5145_v59, %s4873_s14 }
 0x199   :  { %v5623_v18 = vpop.permute.xlu0 %953  ;;  %v5625_v6 = vpop.permute.xlu1 %1127 }
 0x19a   :  { %12636 = vst [vmem:[#allocation75_spill] sm:$0xff] %v5623_v18  ;;  %12637 = vst [vmem:[#allocation76_spill] sm:$0xff] %v5625_v6 }
 0x19b   :  { %1277 = vrot.lane.b32.xlu0 %v5161_v1, %s4873_s14  ;;  %1279 = vrot.lane.b32.xlu1 %v5383_v42, %s4873_s14 }
 0x19d   :  { %v5631_v9 = vpop.permute.xlu0 %1129  ;;  %v5633_v5 = vpop.permute.xlu1 %1143 }
 0x19e   :  { %12638 = vst [vmem:[#allocation77_spill] sm:$0xff] %v5631_v9  ;;  %12639 = vst [vmem:[#allocation78_spill] sm:$0xff] %v5633_v5  ;;  %v5654_v5 = vld [vmem:[%s11957_s3 + $0xe0] sm:$0xff] }
 0x19f   :  { %1281 = vrot.lane.b32.xlu0 %v5397_v0, %s4873_s14  ;;  %1283 = vrot.lane.b32.xlu1 %v5295_v55, %s4873_s14 }
 0x1a1   :  { %v5639_v52 = vpop.permute.xlu0 %1145  ;;  %v5641_v18 = vpop.permute.xlu1 %525 }
 0x1a2   :  { %12640 = vst [vmem:[#allocation79_spill] sm:$0xff] %v5639_v52  ;;  %12641 = vst [vmem:[#allocation80_spill] sm:$0xff] %v5641_v18  ;;  %v5662_v18 = vld [vmem:[%s11957_s3 + $0xe8] sm:$0xff] }
 0x1a3   :  { %1285 = vrot.lane.b32.xlu0 %v5315_v51, %s4873_s14  ;;  %1287 = vrot.lane.b32.xlu1 %v5469_v38, %s4873_s14 }
 0x1a5   :  { %v5647_v6 = vpop.permute.xlu0 %527  ;;  %v5649_v9 = vpop.permute.xlu1 %541 }
 0x1a6   :  { %12642 = vst [vmem:[#allocation81_spill] sm:$0xff] %v5647_v6  ;;  %12643 = vst [vmem:[#allocation82_spill] sm:$0xff] %v5649_v9  ;;  %v5671_v9 = vld [vmem:[%s11957_s3 + $0xf0] sm:$0xff] }
 0x1a7   :  { %1289 = vrot.lane.b32.xlu0 %v5485_v37, %s4873_s14  ;;  %1344 = vperm.xlu1 %4723, %v5654_v5   ;;  %s4878_s14 = smov 34  }
 0x1a9   :  { %v5664_v52 = vpop.permute.xlu0 %543  ;;  %v5666_v6 = vpop.permute.xlu1 %651 }
 0x1aa   :  { %12644 = vst [vmem:[#allocation83_spill] sm:$0xff] %v5664_v52  ;;  %12645 = vst [vmem:[#allocation84_spill] sm:$0xff] %v5666_v6 }
 0x1ab   :  { %1349 = vperm.xlu0 %4722, %v5662_v18   ;;  %1354 = vperm.xlu1 %4723, %v5671_v9  }
 0x1ad   :  { %v5680_v50 = vpop.permute.xlu0 %653  ;;  %v5682_v35 = vpop.permute.xlu1 %667 }
 0x1ae   :  { %12646 = vst [vmem:[#allocation85_spill] sm:$0xff] %v5680_v50  ;;  %12647 = vst [vmem:[#allocation86_spill] sm:$0xff] %v5682_v35 }
 0x1af   :  { %1359 = vperm.xlu0 %4722, %v5678_v57   ;;  %1399 = vrot.lane.b32.xlu1 %v5134_v53, %s4874_s22 }
 0x1b1   :  { %v5687_v6 = vpop.permute.xlu0 %669  ;;  %v5689_v52 = vpop.permute.xlu1 %791 }
 0x1b2   :  { %12648 = vst [vmem:[#allocation87_spill] sm:$0xff] %v5687_v6  ;;  %12649 = vst [vmem:[#allocation88_spill] sm:$0xff] %v5689_v52 }
 0x1b3   :  { %1401 = vrot.lane.b32.xlu0 %v5148_v60, %s4874_s22  ;;  %1403 = vrot.lane.b32.xlu1 %v5373_v54, %s4874_s22 }
 0x1b5   :  { %v5695_v43 = vpop.permute.xlu0 %793  ;;  %v5697_v50 = vpop.permute.xlu1 %807 }
 0x1b6   :  { %12650 = vst [vmem:[#allocation89_spill] sm:$0xff] %v5695_v43  ;;  %12651 = vst [vmem:[#allocation90_spill] sm:$0xff] %v5697_v50 }
 0x1b7   :  { %1405 = vrot.lane.b32.xlu0 %v5387_v41, %s4874_s22  ;;  %1407 = vrot.lane.b32.xlu1 %v5275_v46, %s4874_s22 }
 0x1b9   :  { %v5703_v35 = vpop.permute.xlu0 %809  ;;  %v5705_v6 = vpop.permute.xlu1 %931 }
 0x1ba   :  { %12652 = vst [vmem:[#allocation91_spill] sm:$0xff] %v5703_v35  ;;  %12653 = vst [vmem:[#allocation92_spill] sm:$0xff] %v5705_v6 }
 0x1bb   :  { %1409 = vrot.lane.b32.xlu0 %v5299_v58, %s4874_s22  ;;  %1411 = vrot.lane.b32.xlu1 %v5457_v7, %s4874_s22 }
 0x1bd   :  { %v5711_v52 = vpop.permute.xlu0 %933  ;;  %v5713_v43 = vpop.permute.xlu1 %947 }
 0x1be   :  { %12654 = vst [vmem:[#allocation93_spill] sm:$0xff] %v5711_v52  ;;  %12655 = vst [vmem:[#allocation94_spill] sm:$0xff] %v5713_v43 }
 0x1bf   :  { %1413 = vrot.lane.b32.xlu0 %v5473_v36, %s4874_s22  ;;  %1415 = vrot.lane.b32.xlu1 %v5145_v59, %s4874_s22 }
 0x1c1   :  { %v5719_v50 = vpop.permute.xlu0 %949  ;;  %v5721_v35 = vpop.permute.xlu1 %1123 }
 0x1c2   :  { %12656 = vst [vmem:[#allocation95_spill] sm:$0xff] %v5719_v50  ;;  %12657 = vst [vmem:[#allocation96_spill] sm:$0xff] %v5721_v35 }
 0x1c3   :  { %1417 = vrot.lane.b32.xlu0 %v5161_v1, %s4874_s22  ;;  %1419 = vrot.lane.b32.xlu1 %v5383_v42, %s4874_s22 }
 0x1c5   :  { %v5727_v6 = vpop.permute.xlu0 %1125  ;;  %v5729_v52 = vpop.permute.xlu1 %1139 }
 0x1c6   :  { %12658 = vst [vmem:[#allocation97_spill] sm:$0xff] %v5727_v6  ;;  %12659 = vst [vmem:[#allocation98_spill] sm:$0xff] %v5729_v52  ;;  %v5750_v52 = vld [vmem:[%s11957_s3 + $0x100] sm:$0xff] }
 0x1c7   :  { %1421 = vrot.lane.b32.xlu0 %v5397_v0, %s4874_s22  ;;  %1423 = vrot.lane.b32.xlu1 %v5295_v55, %s4874_s22  ;;  %12664 = vst [vmem:[#allocation103_spill] sm:$0xff] %v5750_v52 }
 0x1c9   :  { %v5735_v43 = vpop.permute.xlu0 %1141  ;;  %v5737_v50 = vpop.permute.xlu1 %533 }
 0x1ca   :  { %12660 = vst [vmem:[#allocation99_spill] sm:$0xff] %v5735_v43  ;;  %12661 = vst [vmem:[#allocation100_spill] sm:$0xff] %v5737_v50  ;;  %v5758_v43 = vld [vmem:[%s11957_s3 + $0x108] sm:$0xff] }
 0x1cb   :  { %1425 = vrot.lane.b32.xlu0 %v5315_v51, %s4874_s22  ;;  %1427 = vrot.lane.b32.xlu1 %v5469_v38, %s4874_s22 }
 0x1cd   :  { %v5743_v35 = vpop.permute.xlu0 %535  ;;  %v5745_v6 = vpop.permute.xlu1 %549 }
 0x1ce   :  { %12662 = vst [vmem:[#allocation101_spill] sm:$0xff] %v5743_v35  ;;  %12663 = vst [vmem:[#allocation102_spill] sm:$0xff] %v5745_v6  ;;  %v457_v6 = vld [vmem:[%s11957_s3 + $0x110] sm:$0xff] }
 0x1cf   :  { %1429 = vrot.lane.b32.xlu0 %v5485_v37, %s4874_s22  ;;  %1484 = vperm.xlu1 %4723, %v5750_v52   ;;  %v5771_v52 = vld [vmem:[%s11957_s3 + $0x118] sm:$0xff] }
 0x1d0   :  { %12667 = vst [vmem:[#allocation106_spill] sm:$0xff] %v5771_v52 }
 0x1d1   :  { %v5760_v50 = vpop.permute.xlu0 %551  ;;  %v5762_v35 = vpop.permute.xlu1 %659 }
 0x1d2   :  { %12665 = vst [vmem:[#allocation104_spill] sm:$0xff] %v5760_v50  ;;  %12666 = vst [vmem:[#allocation105_spill] sm:$0xff] %v5762_v35  ;;  %v4876_v50 = vmov 4  }
 0x1d3   :  { %1489 = vperm.xlu0 %4722, %v5758_v43   ;;  %1494 = vperm.xlu1 %4723, %v457_v6  }
 0x1d5   :  { %v5773_v47 = vpop.permute.xlu0 %661  ;;  %v5775_v3 = vpop.permute.xlu1 %675 }
 0x1d6   :  { %12668 = vst [vmem:[#allocation107_spill] sm:$0xff] %v5773_v47  ;;  %12669 = vst [vmem:[#allocation108_spill] sm:$0xff] %v5775_v3 }
 0x1d7   :  { %1499 = vperm.xlu0 %4722, %v5771_v52   ;;  %1539 = vrot.lane.b32.xlu1 %v5134_v53, %s4875_s6 }
 0x1d8   :  { %4724 = vset.pattern.permute.xlu1 %v4876_v50 }
 0x1d9   :  { %v5780_v35 = vpop.permute.xlu0 %677  ;;  %v5786_v6 = vpop.permute.xlu1 %799 }
 0x1da   :  { %12670 = vst [vmem:[#allocation109_spill] sm:$0xff] %v5780_v35  ;;  %12671 = vst [vmem:[#allocation110_spill] sm:$0xff] %v5786_v6  ;;  %v461_v6 = vld [vmem:[%s11957_s3 + $0x10] sm:$0xff] }
 0x1db   :  { %1541 = vrot.lane.b32.xlu0 %v5148_v60, %s4875_s6  ;;  %1543 = vrot.lane.b32.xlu1 %v5373_v54, %s4875_s6 }
 0x1dc   :  { %4725 = vset.pattern.permute.xlu0 %v4876_v50 }
 0x1dd   :  { %v5790_v3 = vpop.permute.xlu0 %801  ;;  %v5794_v47 = vpop.permute.xlu1 %815 }
 0x1de   :  { %12672 = vst [vmem:[#allocation111_spill] sm:$0xff] %v5790_v3  ;;  %12673 = vst [vmem:[#allocation112_spill] sm:$0xff] %v5794_v47 }
 0x1df   :  { %1545 = vrot.lane.b32.xlu0 %v5387_v41, %s4875_s6  ;;  %1547 = vrot.lane.b32.xlu1 %v5275_v46, %s4875_s6 }
 0x1e1   :  { %v5800_v35 = vpop.permute.xlu0 %817  ;;  %v5806_v50 = vpop.permute.xlu1 %939 }
 0x1e2   :  { %12674 = vst [vmem:[#allocation113_spill] sm:$0xff] %v5800_v35  ;;  %12675 = vst [vmem:[#allocation114_spill] sm:$0xff] %v5806_v50 }
 0x1e3   :  { %1549 = vrot.lane.b32.xlu0 %v5299_v58, %s4875_s6  ;;  %1551 = vrot.lane.b32.xlu1 %v5457_v7, %s4875_s6 }
 0x1e5   :  { %v5810_v47 = vpop.permute.xlu0 %941  ;;  %v5814_v3 = vpop.permute.xlu1 %955 }
 0x1e6   :  { %12676 = vst [vmem:[#allocation115_spill] sm:$0xff] %v5810_v47  ;;  %12677 = vst [vmem:[#allocation116_spill] sm:$0xff] %v5814_v3  ;;  %v459_v3 = vld [vmem:[%s11957_s3] sm:$0xff] }
 0x1e7   :  { %1553 = vrot.lane.b32.xlu0 %v5473_v36, %s4875_s6  ;;  %1555 = vrot.lane.b32.xlu1 %v5145_v59, %s4875_s6 }
 0x1e9   :  { %v5820_v35 = vpop.permute.xlu0 %957  ;;  %v5826_v47 = vpop.permute.xlu1 %1131 }
 0x1ea   :  { %12678 = vst [vmem:[#allocation117_spill] sm:$0xff] %v5820_v35  ;;  %12679 = vst [vmem:[#allocation118_spill] sm:$0xff] %v5826_v47  ;;  %v460_v35 = vld [vmem:[%s11957_s3 + $0x8] sm:$0xff]  ;;  %v462_v47 = vld [vmem:[%s11957_s3 + $0x18] sm:$0xff] }
 0x1eb   :  { %1557 = vrot.lane.b32.xlu0 %v5161_v1, %s4875_s6  ;;  %1559 = vrot.lane.b32.xlu1 %v5383_v42, %s4875_s6 }
 0x1ed   :  { %v5833_v50 = vpop.permute.xlu0 %1133 }
 0x1ee   :  { %12680 = vst [vmem:[#allocation119_spill] sm:$0xff] %v5833_v50 }
 0x1ef   :  { %1561 = vrot.lane.b32.xlu0 %v5397_v0, %s4875_s6  ;;  %1563 = vrot.lane.b32.xlu1 %v5295_v55, %s4875_s6  ;;  %v5841_v0 = vpop.permute.xlu1 %1147 }
 0x1f0   :  { %12681 = vst [vmem:[#allocation120_spill] sm:$0xff] %v5841_v0 }
 0x1f3   :  { %1565 = vrot.lane.b32.xlu0 %v5315_v51, %s4875_s6  ;;  %1567 = vrot.lane.b32.xlu1 %v5469_v38, %s4875_s6 }
 0x1f7   :  { %1569 = vrot.lane.b32.xlu0 %v5485_v37, %s4875_s6  ;;  %1622 = vperm.xlu1 %4724, %v459_v3   ;;  %v5846_v37 = vpop.permute.xlu0 %1149  ;;  %v4877_v3 = vmov 1   ;;  %s4883_s6 = smov 98  }
 0x1f8   :  { %12682 = vst [vmem:[#allocation121_spill] sm:$0xff] %v5846_v37 }
 0x1fb   :  { %1627 = vperm.xlu0 %4725, %v460_v35   ;;  %1632 = vperm.xlu1 %4724, %v461_v6   ;;  %v5859_v35 = vadd.f32 %v5201_v20, %v5219_v27 }
 0x1fd   :  { %12686 = vst [vmem:[#allocation125_spill] sm:$0xff] %v5859_v35 }
 0x1fe   :  { %v5848_v50 = vpop.permute.xlu1 %1204 }
 0x1ff   :  { %12683 = vst [vmem:[#allocation122_spill] sm:$0xff] %v5848_v50  ;;  %4726 = vset.pattern.permute.xlu0 %v4877_v3  ;;  %1637 = vperm.xlu1 %4724, %v462_v47   ;;  %v5892_v47 = vadd.f32 %v5213_v24, %v5255_v39 }
 0x200   :  { %1659 = vperm.xlu0 %4726, %v4967_v16   ;;  %v5870_v16 = vadd.f32 %v5227_v29, %v5241_v34 }
 0x201   :  { %12695 = vst [vmem:[#allocation134_spill] sm:$0xff] %v5892_v47 }
 0x202   :  { %v5851_v36 = vpop.permute.xlu0 %1209  ;;  %v5853_v52 = vpop.permute.xlu1 %1214  ;;  %12689 = vst [vmem:[#allocation128_spill] sm:$0xff] %v5870_v16 }
 0x203   :  { %12684 = vst [vmem:[#allocation123_spill] sm:$0xff] %v5851_v36  ;;  %12685 = vst [vmem:[#allocation124_spill] sm:$0xff] %v5853_v52  ;;  %4727 = vset.pattern.permute.xlu1 %v4877_v3  ;;  %v5902_v3 = vadd.f32 %v5231_v31, %v5241_v34 }
 0x204   :  { %1671 = vperm.xlu0 %4726, %v4973_v17   ;;  %1663 = vperm.xlu1 %4727, %v4984_v19   ;;  %v5876_v19 = vadd.f32 %v5187_v11, %v5233_v32 }
 0x205   :  { %12697 = vst [vmem:[#allocation136_spill] sm:$0xff] %v5902_v3 }
 0x206   :  { %v5861_v6 = vpop.permute.xlu0 %1219  ;;  %v5863_v50 = vpop.permute.xlu1 %1259  ;;  %12691 = vst [vmem:[#allocation130_spill] sm:$0xff] %v5876_v19 }
 0x207   :  { %12687 = vst [vmem:[#allocation126_spill] sm:$0xff] %v5861_v6  ;;  %12688 = vst [vmem:[#allocation127_spill] sm:$0xff] %v5863_v50  ;;  %v5918_v6 = vadd.f32 %v5203_v21, %v5219_v27 }
 0x208   :  { %1713 = vrot.lane.b32.xlu0 %v5859_v35, %s4878_s14  ;;  %1667 = vperm.xlu1 %4727, %v4961_v15   ;;  %v5886_v15 = vadd.f32 %v5205_v22, %v5219_v27 }
 0x209   :  { %12701 = vst [vmem:[#allocation140_spill] sm:$0xff] %v5918_v6 }
 0x20a   :  { %v5872_v17 = vpop.permute.xlu0 %1261  ;;  %v5878_v20 = vpop.permute.xlu1 %1263  ;;  %12693 = vst [vmem:[#allocation132_spill] sm:$0xff] %v5886_v15 }
 0x20b   :  { %12690 = vst [vmem:[#allocation129_spill] sm:$0xff] %v5872_v17  ;;  %12692 = vst [vmem:[#allocation131_spill] sm:$0xff] %v5878_v20  ;;  %v5924_v20 = vadd.f32 %v5217_v26, %v5255_v39 }
 0x20c   :  { %1717 = vrot.lane.b32.xlu0 %v5870_v16, %s4878_s14  ;;  %1711 = vrot.lane.b32.xlu1 %v5876_v19, %s4878_s14 }
 0x20d   :  { %12703 = vst [vmem:[#allocation142_spill] sm:$0xff] %v5924_v20 }
 0x20e   :  { %v5888_v29 = vpop.permute.xlu0 %1265  ;;  %v5894_v11 = vpop.permute.xlu1 %1267 }
 0x20f   :  { %12694 = vst [vmem:[#allocation133_spill] sm:$0xff] %v5888_v29  ;;  %12696 = vst [vmem:[#allocation135_spill] sm:$0xff] %v5894_v11  ;;  %v5908_v29 = vadd.f32 %v5191_v13, %v5233_v32 }
 0x210   :  { %1721 = vrot.lane.b32.xlu0 %v5886_v15, %s4878_s14  ;;  %1715 = vrot.lane.b32.xlu1 %v5892_v47, %s4878_s14 }
 0x211   :  { %12699 = vst [vmem:[#allocation138_spill] sm:$0xff] %v5908_v29 }
 0x212   :  { %v5904_v22 = vpop.permute.xlu0 %1269  ;;  %v5910_v24 = vpop.permute.xlu1 %1271 }
 0x213   :  { %12698 = vst [vmem:[#allocation137_spill] sm:$0xff] %v5904_v22  ;;  %12700 = vst [vmem:[#allocation139_spill] sm:$0xff] %v5910_v24  ;;  %v5934_v24 = vadd.f32 %v5229_v30, %v5241_v34 }
 0x214   :  { %1725 = vrot.lane.b32.xlu0 %v5902_v3, %s4878_s14  ;;  %1719 = vrot.lane.b32.xlu1 %v5908_v29, %s4878_s14 }
 0x215   :  { %12705 = vst [vmem:[#allocation144_spill] sm:$0xff] %v5934_v24 }
 0x216   :  { %v5920_v31 = vpop.permute.xlu0 %1273  ;;  %v5926_v13 = vpop.permute.xlu1 %1275 }
 0x217   :  { %12702 = vst [vmem:[#allocation141_spill] sm:$0xff] %v5920_v31  ;;  %12704 = vst [vmem:[#allocation143_spill] sm:$0xff] %v5926_v13  ;;  %v5940_v31 = vadd.f32 %v5189_v12, %v5233_v32  ;;  %v5950_v13 = vadd.f32 %v5207_v23, %v5219_v27  ;;  %v5972_v27 = vadd.f32 %v5193_v14, %v5233_v32  ;;  %v4800_v14 = vld [vmem:[%s11957_s3 + $0x28] sm:$0xff] }
 0x218   :  { %1729 = vrot.lane.b32.xlu0 %v5918_v6, %s4878_s14  ;;  %1723 = vrot.lane.b32.xlu1 %v5924_v20, %s4878_s14 }
 0x219   :  { %12707 = vst [vmem:[#allocation146_spill] sm:$0xff] %v5940_v31  ;;  %12709 = vst [vmem:[#allocation148_spill] sm:$0xff] %v5950_v13 }
 0x21a   :  { %v5936_v21 = vpop.permute.xlu0 %1277  ;;  %v5942_v26 = vpop.permute.xlu1 %1279  ;;  %12715 = vst [vmem:[#allocation154_spill] sm:$0xff] %v5972_v27 }
 0x21b   :  { %12706 = vst [vmem:[#allocation145_spill] sm:$0xff] %v5936_v21  ;;  %12708 = vst [vmem:[#allocation147_spill] sm:$0xff] %v5942_v26  ;;  %v5956_v21 = vadd.f32 %v5215_v25, %v5255_v39  ;;  %v5966_v26 = vadd.f32 %v5235_v33, %v5241_v34  ;;  %v5984_v33 = vadd.f32 %v5221_v28, %v5255_v39  ;;  %v4802_v28 = vld [vmem:[%s11957_s3 + $0x20] sm:$0xff] }
 0x21c   :  { %1733 = vrot.lane.b32.xlu0 %v5934_v24, %s4878_s14  ;;  %1727 = vrot.lane.b32.xlu1 %v5940_v31, %s4878_s14 }
 0x21d   :  { %12711 = vst [vmem:[#allocation150_spill] sm:$0xff] %v5956_v21  ;;  %12713 = vst [vmem:[#allocation152_spill] sm:$0xff] %v5966_v26 }
 0x21e   :  { %v5952_v30 = vpop.permute.xlu0 %1281  ;;  %v5958_v12 = vpop.permute.xlu1 %1283  ;;  %12718 = vst [vmem:[#allocation157_spill] sm:$0xff] %v5984_v33 }
 0x21f   :  { %12710 = vst [vmem:[#allocation149_spill] sm:$0xff] %v5952_v30  ;;  %12712 = vst [vmem:[#allocation151_spill] sm:$0xff] %v5958_v12 }
 0x220   :  { %1737 = vrot.lane.b32.xlu0 %v5950_v13, %s4878_s14  ;;  %1731 = vrot.lane.b32.xlu1 %v5956_v21, %s4878_s14 }
 0x222   :  { %v5968_v23 = vpop.permute.xlu0 %1285  ;;  %v5974_v25 = vpop.permute.xlu1 %1287 }
 0x223   :  { %12714 = vst [vmem:[#allocation153_spill] sm:$0xff] %v5968_v23  ;;  %12716 = vst [vmem:[#allocation155_spill] sm:$0xff] %v5974_v25 }
 0x224   :  { %1741 = vrot.lane.b32.xlu0 %v5966_v26, %s4878_s14  ;;  %1735 = vrot.lane.b32.xlu1 %v5972_v27, %s4878_s14 }
 0x226   :  { %v5980_v12 = vpop.permute.xlu0 %1289  ;;  %v5986_v34 = vpop.permute.xlu1 %1344 }
 0x227   :  { %12717 = vst [vmem:[#allocation156_spill] sm:$0xff] %v5980_v12  ;;  %12719 = vst [vmem:[#allocation158_spill] sm:$0xff] %v5986_v34  ;;  %v4801_v12 = vld [vmem:[%s11957_s3 + $0x38] sm:$0xff] }
 0x228   :  { %1783 = vperm.xlu0 %4726, %v4800_v14   ;;  %1739 = vrot.lane.b32.xlu1 %v5984_v33, %s4878_s14 }
 0x22a   :  { %v5993_v32 = vpop.permute.xlu0 %1349  ;;  %v5995_v25 = vpop.permute.xlu1 %1354 }
 0x22b   :  { %12720 = vst [vmem:[#allocation159_spill] sm:$0xff] %v5993_v32  ;;  %12721 = vst [vmem:[#allocation160_spill] sm:$0xff] %v5995_v25  ;;  %v4803_v25 = vld [vmem:[%s11957_s3 + $0x30] sm:$0xff] }
 0x22c   :  { %1791 = vperm.xlu0 %4726, %v4801_v12   ;;  %1779 = vperm.xlu1 %4727, %v4802_v28  }
 0x22e   :  { %v6003_v39 = vpop.permute.xlu0 %1359  ;;  %v6005_v14 = vpop.permute.xlu1 %1399 }
 0x22f   :  { %12722 = vst [vmem:[#allocation161_spill] sm:$0xff] %v6003_v39  ;;  %12723 = vst [vmem:[#allocation162_spill] sm:$0xff] %v6005_v14  ;;  %v4805_v14 = vld [vmem:[%s11957_s3 + $0x58] sm:$0xff] }
 0x230   :  { %1833 = vrot.lane.b32.xlu0 %v5859_v35, %s4879_s20  ;;  %1787 = vperm.xlu1 %4727, %v4803_v25  }
 0x232   :  { %v6012_v32 = vpop.permute.xlu0 %1401  ;;  %v6014_v12 = vpop.permute.xlu1 %1403 }
 0x233   :  { %12724 = vst [vmem:[#allocation163_spill] sm:$0xff] %v6012_v32  ;;  %12725 = vst [vmem:[#allocation164_spill] sm:$0xff] %v6014_v12 }
 0x234   :  { %1837 = vrot.lane.b32.xlu0 %v5870_v16, %s4879_s20  ;;  %1831 = vrot.lane.b32.xlu1 %v5876_v19, %s4879_s20 }
 0x236   :  { %v6020_v28 = vpop.permute.xlu0 %1405  ;;  %v6022_v39 = vpop.permute.xlu1 %1407 }
 0x237   :  { %12726 = vst [vmem:[#allocation165_spill] sm:$0xff] %v6020_v28  ;;  %12727 = vst [vmem:[#allocation166_spill] sm:$0xff] %v6022_v39 }
 0x238   :  { %1841 = vrot.lane.b32.xlu0 %v5886_v15, %s4879_s20  ;;  %1835 = vrot.lane.b32.xlu1 %v5892_v47, %s4879_s20 }
 0x23a   :  { %v6028_v25 = vpop.permute.xlu0 %1409  ;;  %v6030_v32 = vpop.permute.xlu1 %1411 }
 0x23b   :  { %12728 = vst [vmem:[#allocation167_spill] sm:$0xff] %v6028_v25  ;;  %12729 = vst [vmem:[#allocation168_spill] sm:$0xff] %v6030_v32 }
 0x23c   :  { %1845 = vrot.lane.b32.xlu0 %v5902_v3, %s4879_s20  ;;  %1839 = vrot.lane.b32.xlu1 %v5908_v29, %s4879_s20 }
 0x23e   :  { %v6036_v12 = vpop.permute.xlu0 %1413  ;;  %v6038_v28 = vpop.permute.xlu1 %1415 }
 0x23f   :  { %12730 = vst [vmem:[#allocation169_spill] sm:$0xff] %v6036_v12  ;;  %12731 = vst [vmem:[#allocation170_spill] sm:$0xff] %v6038_v28 }
 0x240   :  { %1849 = vrot.lane.b32.xlu0 %v5918_v6, %s4879_s20  ;;  %1843 = vrot.lane.b32.xlu1 %v5924_v20, %s4879_s20 }
 0x242   :  { %v6044_v34 = vpop.permute.xlu0 %1417  ;;  %v6046_v25 = vpop.permute.xlu1 %1419 }
 0x243   :  { %12732 = vst [vmem:[#allocation171_spill] sm:$0xff] %v6044_v34  ;;  %12733 = vst [vmem:[#allocation172_spill] sm:$0xff] %v6046_v25 }
 0x244   :  { %1853 = vrot.lane.b32.xlu0 %v5934_v24, %s4879_s20  ;;  %1847 = vrot.lane.b32.xlu1 %v5940_v31, %s4879_s20 }
 0x246   :  { %v6052_v32 = vpop.permute.xlu0 %1421  ;;  %v6054_v12 = vpop.permute.xlu1 %1423 }
 0x247   :  { %12734 = vst [vmem:[#allocation173_spill] sm:$0xff] %v6052_v32  ;;  %12735 = vst [vmem:[#allocation174_spill] sm:$0xff] %v6054_v12  ;;  %v4804_v12 = vld [vmem:[%s11957_s3 + $0x48] sm:$0xff] }
 0x248   :  { %1857 = vrot.lane.b32.xlu0 %v5950_v13, %s4879_s20  ;;  %1851 = vrot.lane.b32.xlu1 %v5956_v21, %s4879_s20 }
 0x24a   :  { %v6060_v28 = vpop.permute.xlu0 %1425  ;;  %v6062_v34 = vpop.permute.xlu1 %1427 }
 0x24b   :  { %12736 = vst [vmem:[#allocation175_spill] sm:$0xff] %v6060_v28  ;;  %12737 = vst [vmem:[#allocation176_spill] sm:$0xff] %v6062_v34 }
 0x24c   :  { %1861 = vrot.lane.b32.xlu0 %v5966_v26, %s4879_s20  ;;  %1855 = vrot.lane.b32.xlu1 %v5972_v27, %s4879_s20 }
 0x24e   :  { %v6068_v25 = vpop.permute.xlu0 %1429  ;;  %v6070_v32 = vpop.permute.xlu1 %1484 }
 0x24f   :  { %12738 = vst [vmem:[#allocation177_spill] sm:$0xff] %v6068_v25  ;;  %12739 = vst [vmem:[#allocation178_spill] sm:$0xff] %v6070_v32  ;;  %v4806_v25 = vld [vmem:[%s11957_s3 + $0x40] sm:$0xff] }
 0x250   :  { %1919 = vperm.xlu0 %4726, %v4804_v12   ;;  %1859 = vrot.lane.b32.xlu1 %v5984_v33, %s4879_s20 }
 0x252   :  { %v6077_v28 = vpop.permute.xlu0 %1489  ;;  %v6079_v34 = vpop.permute.xlu1 %1494 }
 0x253   :  { %12740 = vst [vmem:[#allocation179_spill] sm:$0xff] %v6077_v28  ;;  %12741 = vst [vmem:[#allocation180_spill] sm:$0xff] %v6079_v34  ;;  %v4807_v34 = vld [vmem:[%s11957_s3 + $0x50] sm:$0xff] }
 0x254   :  { %1927 = vperm.xlu0 %4726, %v4805_v14   ;;  %1915 = vperm.xlu1 %4727, %v4806_v25  }
 0x256   :  { %v6087_v32 = vpop.permute.xlu0 %1499  ;;  %v6089_v12 = vpop.permute.xlu1 %1539 }
 0x257   :  { %12742 = vst [vmem:[#allocation181_spill] sm:$0xff] %v6087_v32  ;;  %12743 = vst [vmem:[#allocation182_spill] sm:$0xff] %v6089_v12 }
 0x258   :  { %1969 = vrot.lane.b32.xlu0 %v5859_v35, %s4880_s29  ;;  %1923 = vperm.xlu1 %4727, %v4807_v34  }
 0x25a   :  { %v6096_v28 = vpop.permute.xlu0 %1541  ;;  %v6098_v14 = vpop.permute.xlu1 %1543 }
 0x25b   :  { %12744 = vst [vmem:[#allocation183_spill] sm:$0xff] %v6096_v28  ;;  %12745 = vst [vmem:[#allocation184_spill] sm:$0xff] %v6098_v14 }
 0x25c   :  { %1973 = vrot.lane.b32.xlu0 %v5870_v16, %s4880_s29  ;;  %1967 = vrot.lane.b32.xlu1 %v5876_v19, %s4880_s29 }
 0x25e   :  { %v6104_v25 = vpop.permute.xlu0 %1545  ;;  %v6106_v32 = vpop.permute.xlu1 %1547 }
 0x25f   :  { %12746 = vst [vmem:[#allocation185_spill] sm:$0xff] %v6104_v25  ;;  %12747 = vst [vmem:[#allocation186_spill] sm:$0xff] %v6106_v32  ;;  %v4809_v32 = vld [vmem:[%s11957_s3 + $0x78] sm:$0xff] }
 0x260   :  { %1977 = vrot.lane.b32.xlu0 %v5886_v15, %s4880_s29  ;;  %1971 = vrot.lane.b32.xlu1 %v5892_v47, %s4880_s29 }
 0x262   :  { %v6112_v34 = vpop.permute.xlu0 %1549  ;;  %v6114_v28 = vpop.permute.xlu1 %1551 }
 0x263   :  { %12748 = vst [vmem:[#allocation187_spill] sm:$0xff] %v6112_v34  ;;  %12749 = vst [vmem:[#allocation188_spill] sm:$0xff] %v6114_v28 }
 0x264   :  { %1981 = vrot.lane.b32.xlu0 %v5902_v3, %s4880_s29  ;;  %1975 = vrot.lane.b32.xlu1 %v5908_v29, %s4880_s29 }
 0x266   :  { %v6120_v14 = vpop.permute.xlu0 %1553  ;;  %v6122_v25 = vpop.permute.xlu1 %1555 }
 0x267   :  { %12750 = vst [vmem:[#allocation189_spill] sm:$0xff] %v6120_v14  ;;  %12751 = vst [vmem:[#allocation190_spill] sm:$0xff] %v6122_v25 }
 0x268   :  { %1985 = vrot.lane.b32.xlu0 %v5918_v6, %s4880_s29  ;;  %1979 = vrot.lane.b32.xlu1 %v5924_v20, %s4880_s29 }
 0x26a   :  { %v6128_v12 = vpop.permute.xlu0 %1557  ;;  %v6130_v34 = vpop.permute.xlu1 %1559 }
 0x26b   :  { %12752 = vst [vmem:[#allocation191_spill] sm:$0xff] %v6128_v12  ;;  %12753 = vst [vmem:[#allocation192_spill] sm:$0xff] %v6130_v34 }
 0x26c   :  { %1989 = vrot.lane.b32.xlu0 %v5934_v24, %s4880_s29  ;;  %1983 = vrot.lane.b32.xlu1 %v5940_v31, %s4880_s29 }
 0x26e   :  { %v6136_v28 = vpop.permute.xlu0 %1561  ;;  %v6138_v14 = vpop.permute.xlu1 %1563 }
 0x26f   :  { %12754 = vst [vmem:[#allocation193_spill] sm:$0xff] %v6136_v28  ;;  %12755 = vst [vmem:[#allocation194_spill] sm:$0xff] %v6138_v14  ;;  %v4808_v14 = vld [vmem:[%s11957_s3 + $0x68] sm:$0xff] }
 0x270   :  { %1993 = vrot.lane.b32.xlu0 %v5950_v13, %s4880_s29  ;;  %1987 = vrot.lane.b32.xlu1 %v5956_v21, %s4880_s29 }
 0x272   :  { %v6144_v25 = vpop.permute.xlu0 %1565  ;;  %v6146_v12 = vpop.permute.xlu1 %1567 }
 0x273   :  { %12756 = vst [vmem:[#allocation195_spill] sm:$0xff] %v6144_v25  ;;  %12757 = vst [vmem:[#allocation196_spill] sm:$0xff] %v6146_v12 }
 0x274   :  { %1997 = vrot.lane.b32.xlu0 %v5966_v26, %s4880_s29  ;;  %1991 = vrot.lane.b32.xlu1 %v5972_v27, %s4880_s29 }
 0x276   :  { %v6152_v34 = vpop.permute.xlu0 %1569  ;;  %v6154_v28 = vpop.permute.xlu1 %1622 }
 0x277   :  { %12758 = vst [vmem:[#allocation197_spill] sm:$0xff] %v6152_v34  ;;  %12759 = vst [vmem:[#allocation198_spill] sm:$0xff] %v6154_v28  ;;  %v4810_v34 = vld [vmem:[%s11957_s3 + $0x60] sm:$0xff] }
 0x278   :  { %2055 = vperm.xlu0 %4726, %v4808_v14   ;;  %1995 = vrot.lane.b32.xlu1 %v5984_v33, %s4880_s29 }
 0x27a   :  { %v6161_v25 = vpop.permute.xlu0 %1627  ;;  %v6163_v12 = vpop.permute.xlu1 %1632 }
 0x27b   :  { %12760 = vst [vmem:[#allocation199_spill] sm:$0xff] %v6161_v25  ;;  %12761 = vst [vmem:[#allocation200_spill] sm:$0xff] %v6163_v12  ;;  %v4811_v12 = vld [vmem:[%s11957_s3 + $0x70] sm:$0xff] }
 0x27c   :  { %2063 = vperm.xlu0 %4726, %v4809_v32   ;;  %2051 = vperm.xlu1 %4727, %v4810_v34  }
 0x27e   :  { %v6171_v28 = vpop.permute.xlu1 %1637 }
 0x27f   :  { %12762 = vst [vmem:[#allocation201_spill] sm:$0xff] %v6171_v28  ;;  %v6173_v14 = vpop.permute.xlu0 %1659  ;;  %v4813_v28 = vld [vmem:[%s11957_s3 + $0x98] sm:$0xff] }
 0x280   :  { %12763 = vst [vmem:[#allocation202_spill] sm:$0xff] %v6173_v14  ;;  %2105 = vrot.lane.b32.xlu0 %v5859_v35, %s4881_s12  ;;  %2059 = vperm.xlu1 %4727, %v4811_v12  }
 0x283   :  { %v6180_v25 = vpop.permute.xlu0 %1671  ;;  %v6182_v32 = vpop.permute.xlu1 %1663 }
 0x284   :  { %12764 = vst [vmem:[#allocation203_spill] sm:$0xff] %v6180_v25  ;;  %12765 = vst [vmem:[#allocation204_spill] sm:$0xff] %v6182_v32  ;;  %2109 = vrot.lane.b32.xlu0 %v5870_v16, %s4881_s12  ;;  %2103 = vrot.lane.b32.xlu1 %v5876_v19, %s4881_s12 }
 0x287   :  { %v6188_v34 = vpop.permute.xlu0 %1713  ;;  %v6190_v14 = vpop.permute.xlu1 %1667 }
 0x288   :  { %12766 = vst [vmem:[#allocation205_spill] sm:$0xff] %v6188_v34  ;;  %12767 = vst [vmem:[#allocation206_spill] sm:$0xff] %v6190_v14  ;;  %2113 = vrot.lane.b32.xlu0 %v5886_v15, %s4881_s12  ;;  %2107 = vrot.lane.b32.xlu1 %v5892_v47, %s4881_s12 }
 0x28b   :  { %v6196_v12 = vpop.permute.xlu0 %1717  ;;  %v6198_v25 = vpop.permute.xlu1 %1711 }
 0x28c   :  { %12768 = vst [vmem:[#allocation207_spill] sm:$0xff] %v6196_v12  ;;  %12769 = vst [vmem:[#allocation208_spill] sm:$0xff] %v6198_v25  ;;  %2117 = vrot.lane.b32.xlu0 %v5902_v3, %s4881_s12  ;;  %2111 = vrot.lane.b32.xlu1 %v5908_v29, %s4881_s12 }
 0x28f   :  { %v6204_v32 = vpop.permute.xlu0 %1721  ;;  %v6206_v34 = vpop.permute.xlu1 %1715 }
 0x290   :  { %12770 = vst [vmem:[#allocation209_spill] sm:$0xff] %v6204_v32  ;;  %12771 = vst [vmem:[#allocation210_spill] sm:$0xff] %v6206_v34  ;;  %2121 = vrot.lane.b32.xlu0 %v5918_v6, %s4881_s12  ;;  %2115 = vrot.lane.b32.xlu1 %v5924_v20, %s4881_s12 }
 0x293   :  { %v6212_v14 = vpop.permute.xlu0 %1725  ;;  %v6214_v12 = vpop.permute.xlu1 %1719 }
 0x294   :  { %12772 = vst [vmem:[#allocation211_spill] sm:$0xff] %v6212_v14  ;;  %12773 = vst [vmem:[#allocation212_spill] sm:$0xff] %v6214_v12  ;;  %2125 = vrot.lane.b32.xlu0 %v5934_v24, %s4881_s12  ;;  %2119 = vrot.lane.b32.xlu1 %v5940_v31, %s4881_s12 }
 0x297   :  { %v6220_v25 = vpop.permute.xlu0 %1729  ;;  %v6222_v32 = vpop.permute.xlu1 %1723 }
 0x298   :  { %12774 = vst [vmem:[#allocation213_spill] sm:$0xff] %v6220_v25  ;;  %12775 = vst [vmem:[#allocation214_spill] sm:$0xff] %v6222_v32  ;;  %2129 = vrot.lane.b32.xlu0 %v5950_v13, %s4881_s12  ;;  %2123 = vrot.lane.b32.xlu1 %v5956_v21, %s4881_s12  ;;  %v4812_v32 = vld [vmem:[%s11957_s3 + $0x88] sm:$0xff] }
 0x29b   :  { %v6228_v34 = vpop.permute.xlu0 %1733  ;;  %v6230_v14 = vpop.permute.xlu1 %1727 }
 0x29c   :  { %12776 = vst [vmem:[#allocation215_spill] sm:$0xff] %v6228_v34  ;;  %12777 = vst [vmem:[#allocation216_spill] sm:$0xff] %v6230_v14  ;;  %2133 = vrot.lane.b32.xlu0 %v5966_v26, %s4881_s12  ;;  %2127 = vrot.lane.b32.xlu1 %v5972_v27, %s4881_s12 }
 0x29f   :  { %v6236_v12 = vpop.permute.xlu0 %1737  ;;  %v6238_v25 = vpop.permute.xlu1 %1731 }
 0x2a0   :  { %12778 = vst [vmem:[#allocation217_spill] sm:$0xff] %v6236_v12  ;;  %12779 = vst [vmem:[#allocation218_spill] sm:$0xff] %v6238_v25  ;;  %2189 = vperm.xlu0 %4726, %v4812_v32   ;;  %2131 = vrot.lane.b32.xlu1 %v5984_v33, %s4881_s12  ;;  %v4814_v25 = vld [vmem:[%s11957_s3 + $0x80] sm:$0xff] }
 0x2a3   :  { %v6245_v34 = vpop.permute.xlu0 %1741  ;;  %v6247_v14 = vpop.permute.xlu1 %1735 }
 0x2a4   :  { %12780 = vst [vmem:[#allocation219_spill] sm:$0xff] %v6245_v34  ;;  %12781 = vst [vmem:[#allocation220_spill] sm:$0xff] %v6247_v14  ;;  %2197 = vperm.xlu0 %4726, %v4813_v28   ;;  %2185 = vperm.xlu1 %4727, %v4814_v25   ;;  %v4815_v34 = vld [vmem:[%s11957_s3 + $0xa8] sm:$0xff]  ;;  %v4816_v14 = vld [vmem:[%s11957_s3 + $0x90] sm:$0xff] }
 0x2a5   :  { %v4817_v25 = vld [vmem:[%s11957_s3 + $0xb8] sm:$0xff] }
 0x2a7   :  { %v6255_v12 = vpop.permute.xlu0 %1783  ;;  %v6257_v32 = vpop.permute.xlu1 %1739 }
 0x2a8   :  { %12782 = vst [vmem:[#allocation221_spill] sm:$0xff] %v6255_v12  ;;  %12783 = vst [vmem:[#allocation222_spill] sm:$0xff] %v6257_v32  ;;  %2239 = vperm.xlu0 %4726, %v4815_v34   ;;  %2193 = vperm.xlu1 %4727, %v4816_v14   ;;  %v4818_v12 = vld [vmem:[%s11957_s3 + $0xa0] sm:$0xff]  ;;  %v4819_v14 = vld [vmem:[%s11957_s3 + $0xb0] sm:$0xff] }
 0x2ab   :  { %v6265_v28 = vpop.permute.xlu0 %1791  ;;  %v6267_v39 = vpop.permute.xlu1 %1779 }
 0x2ac   :  { %12784 = vst [vmem:[#allocation223_spill] sm:$0xff] %v6265_v28  ;;  %12785 = vst [vmem:[#allocation224_spill] sm:$0xff] %v6267_v39  ;;  %2247 = vperm.xlu0 %4726, %v4817_v25   ;;  %2235 = vperm.xlu1 %4727, %v4818_v12  }
 0x2af   :  { %v6275_v34 = vpop.permute.xlu0 %1833  ;;  %v6277_v32 = vpop.permute.xlu1 %1787 }
 0x2b0   :  { %12786 = vst [vmem:[#allocation225_spill] sm:$0xff] %v6275_v34  ;;  %12787 = vst [vmem:[#allocation226_spill] sm:$0xff] %v6277_v32  ;;  %2289 = vrot.lane.b32.xlu0 %v5859_v35, %s4882_s28  ;;  %2243 = vperm.xlu1 %4727, %v4819_v14  }
 0x2b3   :  { %v6284_v39 = vpop.permute.xlu0 %1837  ;;  %v6286_v25 = vpop.permute.xlu1 %1831 }
 0x2b4   :  { %12788 = vst [vmem:[#allocation227_spill] sm:$0xff] %v6284_v39  ;;  %12789 = vst [vmem:[#allocation228_spill] sm:$0xff] %v6286_v25  ;;  %2293 = vrot.lane.b32.xlu0 %v5870_v16, %s4882_s28  ;;  %2287 = vrot.lane.b32.xlu1 %v5876_v19, %s4882_s28 }
 0x2b7   :  { %v6292_v12 = vpop.permute.xlu0 %1841  ;;  %v6294_v32 = vpop.permute.xlu1 %1835 }
 0x2b8   :  { %12790 = vst [vmem:[#allocation229_spill] sm:$0xff] %v6292_v12  ;;  %12791 = vst [vmem:[#allocation230_spill] sm:$0xff] %v6294_v32  ;;  %2297 = vrot.lane.b32.xlu0 %v5886_v15, %s4882_s28  ;;  %2291 = vrot.lane.b32.xlu1 %v5892_v47, %s4882_s28 }
 0x2bb   :  { %v6300_v14 = vpop.permute.xlu0 %1845  ;;  %v6302_v39 = vpop.permute.xlu1 %1839 }
 0x2bc   :  { %12792 = vst [vmem:[#allocation231_spill] sm:$0xff] %v6300_v14  ;;  %12793 = vst [vmem:[#allocation232_spill] sm:$0xff] %v6302_v39  ;;  %2301 = vrot.lane.b32.xlu0 %v5902_v3, %s4882_s28  ;;  %2295 = vrot.lane.b32.xlu1 %v5908_v29, %s4882_s28 }
 0x2bf   :  { %v6308_v25 = vpop.permute.xlu0 %1849  ;;  %v6310_v28 = vpop.permute.xlu1 %1843 }
 0x2c0   :  { %12794 = vst [vmem:[#allocation233_spill] sm:$0xff] %v6308_v25  ;;  %12795 = vst [vmem:[#allocation234_spill] sm:$0xff] %v6310_v28  ;;  %2305 = vrot.lane.b32.xlu0 %v5918_v6, %s4882_s28  ;;  %2299 = vrot.lane.b32.xlu1 %v5924_v20, %s4882_s28 }
 0x2c3   :  { %v6316_v32 = vpop.permute.xlu0 %1853  ;;  %v6318_v14 = vpop.permute.xlu1 %1847 }
 0x2c4   :  { %12796 = vst [vmem:[#allocation235_spill] sm:$0xff] %v6316_v32  ;;  %12797 = vst [vmem:[#allocation236_spill] sm:$0xff] %v6318_v14  ;;  %2309 = vrot.lane.b32.xlu0 %v5934_v24, %s4882_s28  ;;  %2303 = vrot.lane.b32.xlu1 %v5940_v31, %s4882_s28 }
 0x2c7   :  { %v6324_v39 = vpop.permute.xlu0 %1857  ;;  %v6326_v25 = vpop.permute.xlu1 %1851 }
 0x2c8   :  { %12798 = vst [vmem:[#allocation237_spill] sm:$0xff] %v6324_v39  ;;  %12799 = vst [vmem:[#allocation238_spill] sm:$0xff] %v6326_v25  ;;  %2313 = vrot.lane.b32.xlu0 %v5950_v13, %s4882_s28  ;;  %2307 = vrot.lane.b32.xlu1 %v5956_v21, %s4882_s28 }
 0x2cb   :  { %v6332_v28 = vpop.permute.xlu0 %1861  ;;  %v6334_v32 = vpop.permute.xlu1 %1855 }
 0x2cc   :  { %12800 = vst [vmem:[#allocation239_spill] sm:$0xff] %v6332_v28  ;;  %12801 = vst [vmem:[#allocation240_spill] sm:$0xff] %v6334_v32  ;;  %2317 = vrot.lane.b32.xlu0 %v5966_v26, %s4882_s28  ;;  %2311 = vrot.lane.b32.xlu1 %v5972_v27, %s4882_s28 }
 0x2cf   :  { %v6340_v14 = vpop.permute.xlu0 %1919  ;;  %v6342_v39 = vpop.permute.xlu1 %1859 }
 0x2d0   :  { %12802 = vst [vmem:[#allocation241_spill] sm:$0xff] %v6340_v14  ;;  %12803 = vst [vmem:[#allocation242_spill] sm:$0xff] %v6342_v39  ;;  %2375 = vperm.xlu0 %4726, %v5566_v10   ;;  %2315 = vrot.lane.b32.xlu1 %v5984_v33, %s4882_s28 }
 0x2d3   :  { %v6347_v25 = vpop.permute.xlu0 %1927  ;;  %v6349_v28 = vpop.permute.xlu1 %1915 }
 0x2d4   :  { %12804 = vst [vmem:[#allocation243_spill] sm:$0xff] %v6347_v25  ;;  %12805 = vst [vmem:[#allocation244_spill] sm:$0xff] %v6349_v28  ;;  %2383 = vperm.xlu0 %4726, %v5582_v4   ;;  %2371 = vperm.xlu1 %4727, %v5558_v44  }
 0x2d7   :  { %v6353_v32 = vpop.permute.xlu0 %1969  ;;  %v6355_v34 = vpop.permute.xlu1 %1923 }
 0x2d8   :  { %12806 = vst [vmem:[#allocation245_spill] sm:$0xff] %v6353_v32  ;;  %12807 = vst [vmem:[#allocation246_spill] sm:$0xff] %v6355_v34  ;;  %2425 = vrot.lane.b32.xlu0 %v5859_v35, %s4883_s6  ;;  %2379 = vperm.xlu1 %4727, %v5575_v8  }
 0x2db   :  { %v6360_v10 = vpop.permute.xlu0 %1973  ;;  %v6362_v14 = vpop.permute.xlu1 %1967 }
 0x2dc   :  { %12808 = vst [vmem:[#allocation247_spill] sm:$0xff] %v6360_v10  ;;  %12809 = vst [vmem:[#allocation248_spill] sm:$0xff] %v6362_v14  ;;  %2429 = vrot.lane.b32.xlu0 %v5870_v16, %s4883_s6  ;;  %2423 = vrot.lane.b32.xlu1 %v5876_v19, %s4883_s6 }
 0x2df   :  { %v6368_v44 = vpop.permute.xlu0 %1977  ;;  %v6370_v4 = vpop.permute.xlu1 %1971 }
 0x2e0   :  { %12810 = vst [vmem:[#allocation249_spill] sm:$0xff] %v6368_v44  ;;  %12811 = vst [vmem:[#allocation250_spill] sm:$0xff] %v6370_v4  ;;  %2433 = vrot.lane.b32.xlu0 %v5886_v15, %s4883_s6  ;;  %2427 = vrot.lane.b32.xlu1 %v5892_v47, %s4883_s6 }
 0x2e3   :  { %v6376_v8 = vpop.permute.xlu0 %1981  ;;  %v6378_v10 = vpop.permute.xlu1 %1975 }
 0x2e4   :  { %12812 = vst [vmem:[#allocation251_spill] sm:$0xff] %v6376_v8  ;;  %12813 = vst [vmem:[#allocation252_spill] sm:$0xff] %v6378_v10  ;;  %2437 = vrot.lane.b32.xlu0 %v5902_v3, %s4883_s6  ;;  %2431 = vrot.lane.b32.xlu1 %v5908_v29, %s4883_s6 }
 0x2e7   :  { %v6384_v14 = vpop.permute.xlu0 %1985  ;;  %v6386_v34 = vpop.permute.xlu1 %1979 }
 0x2e8   :  { %12814 = vst [vmem:[#allocation253_spill] sm:$0xff] %v6384_v14  ;;  %12815 = vst [vmem:[#allocation254_spill] sm:$0xff] %v6386_v34  ;;  %2441 = vrot.lane.b32.xlu0 %v5918_v6, %s4883_s6  ;;  %2435 = vrot.lane.b32.xlu1 %v5924_v20, %s4883_s6 }
 0x2eb   :  { %v6392_v4 = vpop.permute.xlu0 %1989  ;;  %v6394_v8 = vpop.permute.xlu1 %1983 }
 0x2ec   :  { %12816 = vst [vmem:[#allocation255_spill] sm:$0xff] %v6392_v4  ;;  %12817 = vst [vmem:[#allocation256_spill] sm:$0xff] %v6394_v8  ;;  %2445 = vrot.lane.b32.xlu0 %v5934_v24, %s4883_s6  ;;  %2439 = vrot.lane.b32.xlu1 %v5940_v31, %s4883_s6 }
 0x2ef   :  { %v6400_v10 = vpop.permute.xlu0 %1993  ;;  %v6402_v14 = vpop.permute.xlu1 %1987 }
 0x2f0   :  { %12818 = vst [vmem:[#allocation257_spill] sm:$0xff] %v6400_v10  ;;  %12819 = vst [vmem:[#allocation258_spill] sm:$0xff] %v6402_v14  ;;  %2449 = vrot.lane.b32.xlu0 %v5950_v13, %s4883_s6  ;;  %2443 = vrot.lane.b32.xlu1 %v5956_v21, %s4883_s6  ;;  %v12179_v14 = vlaneseq }
 0x2f3   :  { %v6408_v34 = vpop.permute.xlu0 %1997  ;;  %v6410_v4 = vpop.permute.xlu1 %1991 }
 0x2f4   :  { %12820 = vst [vmem:[#allocation259_spill] sm:$0xff] %v6408_v34  ;;  %12821 = vst [vmem:[#allocation260_spill] sm:$0xff] %v6410_v4  ;;  %2453 = vrot.lane.b32.xlu0 %v5966_v26, %s4883_s6  ;;  %2447 = vrot.lane.b32.xlu1 %v5972_v27, %s4883_s6  ;;  %v486_v4 = vshrl.u32 %v12179_v14, 7 }
 0x2f6   :  { %v6448_v14 = vsub.s32 3, %v486_v4 }
 0x2f7   :  { %v6416_v8 = vpop.permute.xlu0 %2055  ;;  %v6418_v10 = vpop.permute.xlu1 %1995 }
 0x2f8   :  { %12822 = vst [vmem:[#allocation261_spill] sm:$0xff] %v6416_v8  ;;  %12823 = vst [vmem:[#allocation262_spill] sm:$0xff] %v6418_v10  ;;  %2511 = vperm.xlu0 %4726, %v5662_v18   ;;  %2451 = vrot.lane.b32.xlu1 %v5984_v33, %s4883_s6  ;;  %v6437_v18 = vsub.s32 1, %v486_v4 }
 0x2f9   :  { %12832 = vst [vmem:[#allocation271_spill] sm:$0xff] %v6448_v14 }
 0x2fa   :  { %12828 = vst [vmem:[#allocation267_spill] sm:$0xff] %v6437_v18 }
 0x2fb   :  { %v6423_v28 = vpop.permute.xlu0 %2063  ;;  %v6425_v34 = vpop.permute.xlu1 %2051 }
 0x2fc   :  { %12824 = vst [vmem:[#allocation263_spill] sm:$0xff] %v6423_v28  ;;  %12825 = vst [vmem:[#allocation264_spill] sm:$0xff] %v6425_v34  ;;  %2519 = vperm.xlu0 %4726, %v5678_v57   ;;  %2507 = vperm.xlu1 %4727, %v5654_v5   ;;  %v6439_v28 = vsub.s32 2, %v486_v4  ;;  %v463_v57 = vld [vmem:[%s11958_s4] ss:$8 sm:$0xf] }
 0x2fd   :  { %v6446_v5 = vsub.s32 0, %v486_v4  ;;  %v4636_v4 = vld [vmem:[%s11958_s4 + $0x2] ss:$8 sm:$0xf]  ;;  %v6474_v32 = vrot.slane %v463_v57, %v6448_v14 }
 0x2fe   :  { %12829 = vst [vmem:[#allocation268_spill] sm:$0xff] %v6439_v28  ;;  %v6498_v30 = vrot.slane %v4636_v4, %v6439_v28  ;;  %v6515_v52 = vrot.slane %v4636_v4, %v6448_v14 }
 0x2ff   :  { %v6430_v25 = vpop.permute.xlu0 %2105  ;;  %v6432_v8 = vpop.permute.xlu1 %2059  ;;  %12831 = vst [vmem:[#allocation270_spill] sm:$0xff] %v6446_v5  ;;  %v6471_v10 = vrot.slane %v463_v57, %v6446_v5  ;;  %v6512_v22 = vrot.slane %v4636_v4, %v6446_v5  ;;  %v6525_v36 = vmul.f32 %v6474_v32, %v5317_v56 }
 0x300   :  { %12826 = vst [vmem:[#allocation265_spill] sm:$0xff] %v6430_v25  ;;  %12827 = vst [vmem:[#allocation266_spill] sm:$0xff] %v6432_v8  ;;  %2561 = vrot.lane.b32.xlu0 %v5859_v35, %s4884_s7  ;;  %2515 = vperm.xlu1 %4727, %v5671_v9   ;;  %v4635_v9 = vld [vmem:[%s11958_s4 + $0x1] ss:$8 sm:$0xf]  ;;  %v6463_v25 = vrot.slane %v463_v57, %v6439_v28 }
 0x301   :  { %v6477_v44 = vrot.slane %v4635_v9, %v6437_v18  ;;  %v6480_v39 = vrot.slane %v4635_v9, %v6439_v28  ;;  %v6487_v23 = vrot.slane %v4635_v9, %v6446_v5  ;;  %v6521_v11 = vmul.f32 %v6471_v10, %v5317_v56  ;;  %12838 = vst [vmem:[#allocation277_spill] sm:$0xff] %v6525_v36 }
 0x303   :  { %v6441_v34 = vpop.permute.xlu0 %2109  ;;  %v6450_v8 = vpop.permute.xlu1 %2103  ;;  %12837 = vst [vmem:[#allocation276_spill] sm:$0xff] %v6521_v11  ;;  %v6529_v37 = vmul.f32 %v6477_v44, %v5337_v63  ;;  %v6533_v0 = vmul.f32 %v6480_v39, %v5337_v63 }
 0x304   :  { %12830 = vst [vmem:[#allocation269_spill] sm:$0xff] %v6441_v34  ;;  %12833 = vst [vmem:[#allocation272_spill] sm:$0xff] %v6450_v8  ;;  %2565 = vrot.lane.b32.xlu0 %v5870_v16, %s4884_s7  ;;  %2559 = vrot.lane.b32.xlu1 %v5876_v19, %s4884_s7  ;;  %v6460_v34 = vrot.slane %v463_v57, %v6437_v18  ;;  %v6495_v57 = vrot.slane %v4636_v4, %v6437_v18  ;;  %v4638_v4 = vld [vmem:[%s11958_s4 + $0x5] ss:$8 sm:$0xf] }
 0x305   :  { %12839 = vst [vmem:[#allocation278_spill] sm:$0xff] %v6533_v0  ;;  %v6589_v0 = vrot.slane %v4638_v4, %v6439_v28 }
 0x306   :  { %v6505_v17 = vmul.f32 %v6460_v34, %v5317_v56 }
 0x307   :  { %v6468_v8 = vpop.permute.xlu0 %2113  ;;  %v6482_v12 = vpop.permute.xlu1 %2107 }
 0x308   :  { %12834 = vst [vmem:[#allocation273_spill] sm:$0xff] %v6468_v8  ;;  %12835 = vst [vmem:[#allocation274_spill] sm:$0xff] %v6482_v12  ;;  %2569 = vrot.lane.b32.xlu0 %v5886_v15, %s4884_s7  ;;  %v6490_v8 = vrot.slane %v4635_v9, %v6448_v14  ;;  %2563 = vrot.lane.b32.xlu1 %v5892_v47, %s4884_s7  ;;  %v4637_v12 = vld [vmem:[%s11958_s4 + $0x3] ss:$8 sm:$0xf]  ;;  %v6509_v9 = vmul.f32 %v6463_v25, %v5317_v56 }
 0x309   :  { %v6544_v56 = vmul.f32 %v6487_v23, %v5337_v63  ;;  %v6551_v11 = vrot.slane %v4637_v12, %v6437_v18  ;;  %v6554_v47 = vrot.slane %v4637_v12, %v6439_v28  ;;  %v6584_v15 = vrot.slane %v4638_v4, %v6437_v18  ;;  %v12871_v28 = vld [vmem:[#allocation23_spill] sm:$0xff] }
 0x30a   :  { %v6548_v36 = vmul.f32 %v6490_v8, %v5337_v63  ;;  %v6567_v63 = vrot.slane %v4637_v12, %v6446_v5 }
 0x30b   :  { %v6517_v50 = vpop.permute.xlu0 %2117  ;;  %12841 = vst [vmem:[#allocation280_spill] sm:$0xff] %v6544_v56  ;;  %v6574_v56 = vmul.f32 %v6512_v22, %v5357_v48 }
 0x30c   :  { %12836 = vst [vmem:[#allocation275_spill] sm:$0xff] %v6517_v50  ;;  %v6538_v50 = vpop.permute.xlu1 %2111  ;;  %2573 = vrot.lane.b32.xlu0 %v5902_v3, %s4884_s7  ;;  %12842 = vst [vmem:[#allocation281_spill] sm:$0xff] %v6548_v36  ;;  %2567 = vrot.lane.b32.xlu1 %v5908_v29, %s4884_s7  ;;  %v6564_v3 = vmul.f32 %v6498_v30, %v5357_v48  ;;  %v6570_v36 = vrot.slane %v4637_v12, %v6448_v14 }
 0x30d   :  { %12840 = vst [vmem:[#allocation279_spill] sm:$0xff] %v6538_v50  ;;  %v6560_v50 = vmul.f32 %v6495_v57, %v5357_v48  ;;  %12845 = vst [vmem:[#allocation284_spill] sm:$0xff] %v6574_v56  ;;  %v6578_v29 = vmul.f32 %v6515_v52, %v5357_v48  ;;  %v6592_v12 = vrot.slane %v4638_v4, %v6448_v14 }
 0x30e   :  { %12844 = vst [vmem:[#allocation283_spill] sm:$0xff] %v6564_v3  ;;  %v6596_v56 = vmul.f32 %v6460_v34, %v5329_v49  ;;  %v6600_v48 = vmul.f32 %v6463_v25, %v5329_v49  ;;  %v6668_v14 = vmul.f32 %v6551_v11, %v5405_v2 }
 0x30f   :  { %12843 = vst [vmem:[#allocation282_spill] sm:$0xff] %v6560_v50  ;;  %12846 = vst [vmem:[#allocation285_spill] sm:$0xff] %v6578_v29  ;;  %v6581_v50 = vrot.slane %v4638_v4, %v6446_v5  ;;  %v6586_v3 = vpop.permute.xlu0 %2121  ;;  %v6612_v4 = vmul.f32 %v6474_v32, %v5329_v49 }
 0x310   :  { %12847 = vst [vmem:[#allocation286_spill] sm:$0xff] %v6586_v3  ;;  %12848 = vst [vmem:[#allocation287_spill] sm:$0xff] %v6596_v56  ;;  %v6602_v29 = vpop.permute.xlu1 %2115  ;;  %2577 = vrot.lane.b32.xlu0 %v5918_v6, %s4884_s7  ;;  %v6608_v3 = vmul.f32 %v6471_v10, %v5329_v49  ;;  %v6616_v56 = vmul.f32 %v6477_v44, %v5349_v61  ;;  %2571 = vrot.lane.b32.xlu1 %v5924_v20, %s4884_s7 }
 0x311   :  { %12849 = vst [vmem:[#allocation288_spill] sm:$0xff] %v6600_v48  ;;  %12850 = vst [vmem:[#allocation289_spill] sm:$0xff] %v6602_v29  ;;  %v6620_v48 = vmul.f32 %v6480_v39, %v5349_v61  ;;  %v6626_v29 = vmul.f32 %v6487_v23, %v5349_v61  ;;  %v6634_v49 = vmul.f32 %v6495_v57, %v5369_v45 }
 0x312   :  { %12851 = vst [vmem:[#allocation290_spill] sm:$0xff] %v6608_v3  ;;  %12852 = vst [vmem:[#allocation291_spill] sm:$0xff] %v6612_v4  ;;  %v6630_v3 = vmul.f32 %v6490_v8, %v5349_v61  ;;  %v6646_v4 = vmul.f32 %v6554_v47, %v5389_v40  ;;  %v6650_v61 = vmul.f32 %v6512_v22, %v5369_v45 }
 0x313   :  { %12853 = vst [vmem:[#allocation292_spill] sm:$0xff] %v6616_v56  ;;  %12854 = vst [vmem:[#allocation293_spill] sm:$0xff] %v6620_v48  ;;  %v6638_v56 = vmul.f32 %v6498_v30, %v5369_v45  ;;  %v6642_v48 = vmul.f32 %v6551_v11, %v5389_v40 }
 0x314   :  { %12855 = vst [vmem:[#allocation294_spill] sm:$0xff] %v6626_v29  ;;  %12856 = vst [vmem:[#allocation295_spill] sm:$0xff] %v6630_v3  ;;  %v6654_v3 = vmul.f32 %v6515_v52, %v5369_v45  ;;  %v6664_v29 = vmul.f32 %v6570_v36, %v5389_v40  ;;  %v6674_v45 = vpop.permute.xlu1 %2119  ;;  %2581 = vrot.lane.b32.xlu0 %v5934_v24, %s4884_s7  ;;  %2575 = vrot.lane.b32.xlu1 %v5940_v31, %s4884_s7  ;;  %v12872_v31 = vld [vmem:[#allocation25_spill] sm:$0xff] }
 0x315   :  { %12857 = vst [vmem:[#allocation296_spill] sm:$0xff] %v6634_v49  ;;  %12858 = vst [vmem:[#allocation297_spill] sm:$0xff] %v6638_v56  ;;  %v6656_v49 = vpop.permute.xlu0 %2125  ;;  %v6660_v56 = vmul.f32 %v6567_v63, %v5389_v40  ;;  %v6684_v40 = vmul.f32 %v6463_v25, %v5323_v62  ;;  %v6726_v24 = vmul.f32 %v6498_v30, %v12872_v31 }
 0x316   :  { %12859 = vst [vmem:[#allocation298_spill] sm:$0xff] %v6642_v48  ;;  %12860 = vst [vmem:[#allocation299_spill] sm:$0xff] %v6646_v4  ;;  %v6732_v48 = vmul.f32 %v6512_v22, %v12872_v31 }
 0x317   :  { %12861 = vst [vmem:[#allocation300_spill] sm:$0xff] %v6650_v61  ;;  %12862 = vst [vmem:[#allocation301_spill] sm:$0xff] %v6654_v3  ;;  %v6672_v61 = vmul.f32 %v6554_v47, %v5405_v2  ;;  %v6702_v3 = vmul.f32 %v6474_v32, %v5323_v62 }
 0x318   :  { %12863 = vst [vmem:[#allocation302_spill] sm:$0xff] %v6656_v49  ;;  %12864 = vst [vmem:[#allocation303_spill] sm:$0xff] %v6660_v56  ;;  %v6680_v49 = vmul.f32 %v6460_v34, %v5323_v62  ;;  %v6736_v56 = vmul.f32 %v6515_v52, %v12872_v31  ;;  %2585 = vrot.lane.b32.xlu0 %v5950_v13, %s4884_s7  ;;  %2579 = vrot.lane.b32.xlu1 %v5956_v21, %s4884_s7 }
 0x319   :  { %12865 = vst [vmem:[#allocation304_spill] sm:$0xff] %v6664_v29  ;;  %12866 = vst [vmem:[#allocation305_spill] sm:$0xff] %v6668_v14  ;;  %v6688_v14 = vmul.f32 %v6567_v63, %v5405_v2  ;;  %v6706_v29 = vmul.f32 %v6477_v44, %v12871_v28  ;;  %v6728_v4 = vpop.permute.xlu0 %2129 }
 0x31a   :  { %12867 = vst [vmem:[#allocation306_spill] sm:$0xff] %v6672_v61  ;;  %12868 = vst [vmem:[#allocation307_spill] sm:$0xff] %v6674_v45  ;;  %v6692_v61 = vmul.f32 %v6570_v36, %v5405_v2  ;;  %v6698_v45 = vmul.f32 %v6471_v10, %v5323_v62  ;;  %v6714_v2 = vmul.f32 %v6487_v23, %v12871_v28 }
 0x31b   :  { %12869 = vst [vmem:[#allocation308_spill] sm:$0xff] %v6688_v14  ;;  %v6710_v14 = vmul.f32 %v6480_v39, %v12871_v28  ;;  %v6722_v62 = vmul.f32 %v6495_v57, %v12872_v31  ;;  %12874 = vst [vmem:[#allocation25_spill] sm:$0xff] %v6728_v4 }
 0x31c   :  { %12870 = vst [vmem:[#allocation309_spill] sm:$0xff] %v6692_v61  ;;  %v6718_v61 = vmul.f32 %v6490_v8, %v12871_v28  ;;  %12875 = vst [vmem:[#allocation310_spill] sm:$0xff] %v6736_v56  ;;  %v12876_v28 = vld [vmem:[#allocation28_spill] sm:$0xff]  ;;  %v12882_v56 = vld [vmem:[#allocation34_spill] sm:$0xff]  ;;  %2589 = vrot.lane.b32.xlu0 %v5966_v26, %s4884_s7  ;;  %2583 = vrot.lane.b32.xlu1 %v5972_v27, %s4884_s7 }
 0x31d   :  { %12873 = vst [vmem:[#allocation23_spill] sm:$0xff] %v6722_v62  ;;  %v6740_v20 = vmul.f32 %v6551_v11, %v12876_v28  ;;  %v6744_v6 = vmul.f32 %v6554_v47, %v12876_v28  ;;  %v6746_v62 = vpop.permute.xlu1 %2123  ;;  %v6752_v4 = vmul.f32 %v6567_v63, %v12876_v28  ;;  %v6756_v31 = vmul.f32 %v6570_v36, %v12876_v28 }
 0x31e   :  { %12879 = vst [vmem:[#allocation312_spill] sm:$0xff] %v6746_v62  ;;  %v12885_v62 = vld [vmem:[#allocation35_spill] sm:$0xff]  ;;  %v6778_v28 = vmul.f32 %v6589_v0, %v12882_v56 }
 0x31f   :  { %12877 = vst [vmem:[#allocation28_spill] sm:$0xff] %v6740_v20  ;;  %12878 = vst [vmem:[#allocation311_spill] sm:$0xff] %v6744_v6  ;;  %v6760_v20 = vmul.f32 %v6581_v50, %v12882_v56  ;;  %v6764_v6 = vmul.f32 %v6584_v15, %v12882_v56  ;;  %v6770_v13 = vmul.f32 %v6581_v50, %v12885_v62 }
 0x320   :  { %12880 = vst [vmem:[#allocation313_spill] sm:$0xff] %v6752_v4  ;;  %12881 = vst [vmem:[#allocation314_spill] sm:$0xff] %v6756_v31  ;;  %v6774_v4 = vmul.f32 %v6584_v15, %v12885_v62  ;;  %v6790_v21 = vmul.f32 %v6592_v12, %v12885_v62  ;;  %2647 = vperm.xlu0 %4726, %v5758_v43   ;;  %2587 = vrot.lane.b32.xlu1 %v5984_v33, %s4884_s7 }
 0x321   :  { %12883 = vst [vmem:[#allocation34_spill] sm:$0xff] %v6760_v20  ;;  %12884 = vst [vmem:[#allocation315_spill] sm:$0xff] %v6764_v6  ;;  %v6782_v20 = vmul.f32 %v6592_v12, %v12882_v56  ;;  %v6786_v6 = vmul.f32 %v6589_v0, %v12885_v62  ;;  %v12893_v62 = vld [vmem:[#allocation24_spill] sm:$0xff] }
 0x322   :  { %12886 = vst [vmem:[#allocation35_spill] sm:$0xff] %v6770_v13  ;;  %12887 = vst [vmem:[#allocation316_spill] sm:$0xff] %v6774_v4  ;;  %v12891_v13 = vld [vmem:[#allocation22_spill] sm:$0xff] }
 0x323   :  { %12888 = vst [vmem:[#allocation317_spill] sm:$0xff] %v6778_v28  ;;  %12889 = vst [vmem:[#allocation318_spill] sm:$0xff] %v6786_v6  ;;  %v6794_v31 = vmul.f32 %v6460_v34, %v12891_v13  ;;  %v6798_v4 = vmul.f32 %v6463_v25, %v12891_v13  ;;  %v6800_v28 = vpop.permute.xlu0 %2133  ;;  %v6804_v56 = vmul.f32 %v6471_v10, %v12891_v13  ;;  %v6818_v25 = vpop.permute.xlu1 %2127 }
 0x324   :  { %12890 = vst [vmem:[#allocation319_spill] sm:$0xff] %v6790_v21  ;;  %12892 = vst [vmem:[#allocation22_spill] sm:$0xff] %v6800_v28  ;;  %v6808_v6 = vmul.f32 %v6474_v32, %v12891_v13  ;;  %v6812_v21 = vmul.f32 %v6477_v44, %v12893_v62  ;;  %v6816_v34 = vmul.f32 %v6480_v39, %v12893_v62  ;;  %v12895_v32 = vld [vmem:[#allocation26_spill] sm:$0xff]  ;;  %v12905_v28 = vld [vmem:[#allocation36_spill] sm:$0xff] }
 0x325   :  { %12894 = vst [vmem:[#allocation24_spill] sm:$0xff] %v6818_v25  ;;  %v6824_v10 = vmul.f32 %v6487_v23, %v12893_v62  ;;  %v6828_v13 = vmul.f32 %v6490_v8, %v12893_v62  ;;  %v6832_v44 = vmul.f32 %v6495_v57, %v12895_v32  ;;  %v6836_v39 = vmul.f32 %v6498_v30, %v12895_v32  ;;  %v12900_v8 = vld [vmem:[#allocation29_spill] sm:$0xff] }
 0x326   :  { %v6842_v25 = vmul.f32 %v6512_v22, %v12895_v32  ;;  %v6846_v23 = vmul.f32 %v6515_v52, %v12895_v32  ;;  %v6850_v62 = vmul.f32 %v6551_v11, %v12900_v8  ;;  %v6854_v57 = vmul.f32 %v6554_v47, %v12900_v8  ;;  %v12909_v47 = vld [vmem:[#allocation37_spill] sm:$0xff] }
 0x327   :  { %12896 = vst [vmem:[#allocation26_spill] sm:$0xff] %v6832_v44  ;;  %12897 = vst [vmem:[#allocation320_spill] sm:$0xff] %v6836_v39  ;;  %v6858_v30 = vmul.f32 %v6567_v63, %v12900_v8  ;;  %v6862_v22 = vmul.f32 %v6570_v36, %v12900_v8  ;;  %v6866_v52 = vmul.f32 %v6581_v50, %v12905_v28  ;;  %v6872_v32 = vpop.permute.xlu0 %2189  ;;  %v13035_v39 = vld [vmem:[#allocation298_spill] sm:$0xff] }
 0x328   :  { %12898 = vst [vmem:[#allocation321_spill] sm:$0xff] %v6842_v25  ;;  %12899 = vst [vmem:[#allocation322_spill] sm:$0xff] %v6846_v23  ;;  %v6870_v11 = vmul.f32 %v6584_v15, %v12905_v28  ;;  %v6880_v63 = vmul.f32 %v6584_v15, %v12909_v47  ;;  %v6884_v36 = vmul.f32 %v6589_v0, %v12905_v28  ;;  %v12999_v23 = vld [vmem:[#allocation68_spill] sm:$0xff] }
 0x329   :  { %12901 = vst [vmem:[#allocation29_spill] sm:$0xff] %v6850_v62  ;;  %12902 = vst [vmem:[#allocation323_spill] sm:$0xff] %v6854_v57  ;;  %v6876_v57 = vmul.f32 %v6581_v50, %v12909_v47  ;;  %v6888_v8 = vmul.f32 %v6592_v12, %v12905_v28  ;;  %v6902_v15 = vmul.f32 %v6589_v0, %v12909_v47  ;;  %v12919_v0 = vld [vmem:[#allocation31_spill] sm:$0xff]  ;;  %v12998_v62 = vld [vmem:[#allocation281_spill] sm:$0xff] }
 0x32a   :  { %12903 = vst [vmem:[#allocation324_spill] sm:$0xff] %v6858_v30  ;;  %12904 = vst [vmem:[#allocation325_spill] sm:$0xff] %v6862_v22  ;;  %v13000_v25 = vld [vmem:[#allocation48_spill] sm:$0xff] }
 0x32b   :  { %12906 = vst [vmem:[#allocation36_spill] sm:$0xff] %v6866_v52  ;;  %12907 = vst [vmem:[#allocation326_spill] sm:$0xff] %v6870_v11  ;;  %v6890_v52 = vpop.permute.xlu1 %2131 }
 0x32c   :  { %12908 = vst [vmem:[#allocation327_spill] sm:$0xff] %v6872_v32  ;;  %12910 = vst [vmem:[#allocation37_spill] sm:$0xff] %v6876_v57  ;;  %v12915_v32 = vld [vmem:[#allocation30_spill] sm:$0xff]  ;;  %v12916_v57 = vlaneseq }
 0x32d   :  { %12911 = vst [vmem:[#allocation328_spill] sm:$0xff] %v6880_v63  ;;  %12912 = vst [vmem:[#allocation329_spill] sm:$0xff] %v6884_v36  ;;  %v6895_v50 = vmul.f32 %v12915_v32, %v5134_v53  ;;  %v6906_v36 = vmul.f32 %v6592_v12, %v12909_v47  ;;  %v6912_v43 = vmul.f32 %v12915_v32, %v5275_v46  ;;  %v12920_v47 = vld [vmem:[#allocation32_spill] sm:$0xff] }
 0x32e   :  { %12913 = vst [vmem:[#allocation330_spill] sm:$0xff] %v6888_v8  ;;  %12914 = vst [vmem:[#allocation331_spill] sm:$0xff] %v6890_v52  ;;  %v6898_v11 = vand.u32 127, %v12916_v57  ;;  %v6916_v53 = vmul.f32 %v12915_v32, %v5145_v59  ;;  %v6920_v28 = vmul.f32 %v12915_v32, %v5295_v55  ;;  %v6924_v57 = vmul.f32 %v12919_v0, %v5148_v60  ;;  %v6942_v32 = vpop.permute.xlu0 %2197  ;;  %v12929_v52 = vld [vmem:[#allocation106_spill] sm:$0xff] }
 0x32f   :  { %12917 = vst [vmem:[#allocation30_spill] sm:$0xff] %v6902_v15  ;;  %12918 = vst [vmem:[#allocation332_spill] sm:$0xff] %v6906_v36  ;;  %v6928_v12 = vmul.f32 %v12919_v0, %v5299_v58  ;;  %v6932_v46 = vmul.f32 %v12919_v0, %v5161_v1  ;;  %v6936_v59 = vmul.f32 %v12919_v0, %v5315_v51  ;;  %v12926_v51 = vld [vmem:[#allocation33_spill] sm:$0xff]  ;;  %2655 = vperm.xlu0 %4726, %v12929_v52   ;;  %v12932_v36 = vld [vmem:[#allocation27_spill] sm:$0xff] }
 0x330   :  { %v6940_v55 = vmul.f32 %v12920_v47, %v5373_v54  ;;  %12922 = vst [vmem:[#allocation32_spill] sm:$0xff] %v6942_v32  ;;  %v6946_v60 = vmul.f32 %v12920_v47, %v5457_v7  ;;  %v6950_v58 = vmul.f32 %v12920_v47, %v5383_v42  ;;  %v6954_v1 = vmul.f32 %v12920_v47, %v5469_v38  ;;  %v6960_v54 = vpop.permute.xlu1 %2185  ;;  %v12930_v32 = vld [vmem:[#allocation41_spill] sm:$0xff]  ;;  %v12937_v47 = vld [vmem:[#allocation15_spill] sm:$0xff]  ;;  %v12951_v15 = vld [vmem:[#allocation8_spill] sm:$0xff] }
 0x331   :  { %v6958_v0 = vmul.f32 %v12926_v51, %v5387_v41  ;;  %12928 = vst [vmem:[#allocation336_spill] sm:$0xff] %v6960_v54  ;;  %v6965_v7 = vmul.f32 %v12926_v51, %v12930_v32  ;;  %v6969_v42 = vmul.f32 %v12926_v51, %v12932_v36  ;;  %vm555_vm1 = vcmp.lt.s32.totalorder %v6898_v11, 17  ;;  %v12936_v41 = vld [vmem:[#allocation103_spill] sm:$0xff]  ;;  %v12938_v54 = vld [vmem:[#allocation2_spill] sm:$0xff] }
 0x332   :  { %12921 = vst [vmem:[#allocation31_spill] sm:$0xff] %v6940_v55  ;;  %12923 = vst [vmem:[#allocation333_spill] sm:$0xff] %v6946_v60  ;;  %2643 = vperm.xlu1 %4727, %v12936_v41   ;;  %v12940_v52 = vld [vmem:[#allocation3_spill] sm:$0xff]  ;;  %vm679_vm2 = vcmp.lt.s32.totalorder %v6898_v11, 16  ;;  %v4886_v55 = vmov 5   ;;  %vm819_vm3 = vcmp.lt.s32.totalorder %v6898_v11, 15 }
 0x333   :  { %12924 = vst [vmem:[#allocation334_spill] sm:$0xff] %v6950_v58  ;;  %12925 = vst [vmem:[#allocation335_spill] sm:$0xff] %v6954_v1  ;;  %v12934_v58 = vld [vmem:[#allocation44_spill] sm:$0xff]  ;;  %v6979_v1 = vadd.f32 %v12938_v54, %v12937_v47  ;;  %v6983_v32 = vadd.f32 %v12940_v52, %v12937_v47  ;;  %v12949_v41 = vld [vmem:[#allocation7_spill] sm:$0xff]  ;;  %2697 = vrot.lane.b32.xlu0 %v5859_v35, %s4885_s16  ;;  %vm959_vm4 = vcmp.lt.s32.totalorder %v6898_v11, 1  ;;  %vm1151_vm5 = vcmp.lt.s32.totalorder %v6898_v11, 127 }
 0x334   :  { %12927 = vst [vmem:[#allocation33_spill] sm:$0xff] %v6958_v0  ;;  %12931 = vst [vmem:[#allocation106_spill] sm:$0xff] %v6965_v7  ;;  %v6973_v38 = vmul.f32 %v12926_v51, %v12934_v58  ;;  %v12942_v7 = vld [vmem:[#allocation4_spill] sm:$0xff]  ;;  %v12946_v51 = vld [vmem:[#allocation9_spill] sm:$0xff]  ;;  %4729 = vset.pattern.permute.xlu0 %v4886_v55  ;;  %vm1291_vm6 = vcmp.lt.s32.totalorder %v6898_v11, 113  ;;  %vm1431_vm7 = vcmp.lt.s32.totalorder %v6898_v11, 112 }
 0x335   :  { %12933 = vst [vmem:[#allocation41_spill] sm:$0xff] %v6969_v42  ;;  %12939 = vst [vmem:[#allocation44_spill] sm:$0xff] %v6979_v1  ;;  %v6987_v36 = vadd.f32 %v12942_v7, %v12937_v47  ;;  %v12944_v42 = vld [vmem:[#allocation5_spill] sm:$0xff]  ;;  %v6999_v54 = vadd.f32 %v12949_v41, %v12946_v51  ;;  %v7003_v52 = vadd.f32 %v12951_v15, %v12946_v51  ;;  %v12954_v7 = vld [vmem:[#allocation10_spill] sm:$0xff]  ;;  %v7020_v41 = vpop.permute.xlu1 %2193  ;;  %vm1571_vm8 = vcmp.lt.s32.totalorder %v6898_v11, 111 }
 0x336   :  { %12935 = vst [vmem:[#allocation27_spill] sm:$0xff] %v6973_v38  ;;  %12941 = vst [vmem:[#allocation103_spill] sm:$0xff] %v6983_v32  ;;  %v6991_v58 = vadd.f32 %v12944_v42, %v12937_v47  ;;  %v12947_v38 = vld [vmem:[#allocation6_spill] sm:$0xff]  ;;  %v7005_v32 = vpop.permute.xlu0 %2239  ;;  %v12956_v42 = vld [vmem:[#allocation21_spill] sm:$0xff]  ;;  %vm1743_vm15 = vcmp.lt.s32.totalorder %v6898_v11, 34 }
 0x337   :  { %12943 = vst [vmem:[#allocation15_spill] sm:$0xff] %v6987_v36  ;;  %v6995_v60 = vadd.f32 %v12947_v38, %v12946_v51  ;;  %12950 = vst [vmem:[#allocation4_spill] sm:$0xff] %v6999_v54  ;;  %v7009_v36 = vadd.f32 %v12954_v7, %v12946_v51  ;;  %v12957_v47 = vld [vmem:[#allocation11_spill] sm:$0xff]  ;;  %v12959_v38 = vld [vmem:[#allocation12_spill] sm:$0xff]  ;;  %2701 = vrot.lane.b32.xlu0 %v5870_v16, %s4885_s16 }
 0x338   :  { %12945 = vst [vmem:[#allocation2_spill] sm:$0xff] %v6991_v58  ;;  %12952 = vst [vmem:[#allocation5_spill] sm:$0xff] %v7003_v52  ;;  %v7013_v58 = vadd.f32 %v12957_v47, %v12956_v42  ;;  %v7017_v8 = vadd.f32 %v12959_v38, %v12956_v42  ;;  %v12962_v15 = vld [vmem:[#allocation13_spill] sm:$0xff]  ;;  %v12964_v7 = vld [vmem:[#allocation14_spill] sm:$0xff] }
 0x339   :  { %12948 = vst [vmem:[#allocation3_spill] sm:$0xff] %v6995_v60  ;;  %12953 = vst [vmem:[#allocation9_spill] sm:$0xff] %v7005_v32  ;;  %v7026_v51 = vadd.f32 %v12962_v15, %v12956_v42  ;;  %v7030_v47 = vadd.f32 %v12964_v7, %v12956_v42  ;;  %v12966_v32 = vld [vmem:[#allocation40_spill] sm:$0xff]  ;;  %v12972_v42 = vld [vmem:[#allocation18_spill] sm:$0xff] }
 0x33a   :  { %12955 = vst [vmem:[#allocation6_spill] sm:$0xff] %v7009_v36  ;;  %12958 = vst [vmem:[#allocation7_spill] sm:$0xff] %v7013_v58  ;;  %v12967_v36 = vld [vmem:[#allocation60_spill] sm:$0xff]  ;;  %v12975_v54 = vld [vmem:[#allocation61_spill] sm:$0xff]  ;;  %v7072_v52 = vpop.permute.xlu0 %2247 }
 0x33b   :  { %12960 = vst [vmem:[#allocation8_spill] sm:$0xff] %v7017_v8  ;;  %12961 = vst [vmem:[#allocation10_spill] sm:$0xff] %v7020_v41  ;;  %v560_v38 = vsel %vm555_vm1, %v12967_v36, %v12966_v32  ;;  %v12968_v8 = vld [vmem:[#allocation38_spill] sm:$0xff]  ;;  %v4820_v35 = vld [vmem:[%s11957_s3 + $0x110] sm:$0xff] }
 0x33c   :  { %12963 = vst [vmem:[#allocation21_spill] sm:$0xff] %v7026_v51  ;;  %12965 = vst [vmem:[#allocation11_spill] sm:$0xff] %v7030_v47  ;;  %v564_v41 = vsel %vm555_vm1, %v12968_v8, %v12967_v36  ;;  %2651 = vperm.xlu1 %4727, %v4820_v35   ;;  %v12969_v15 = vld [vmem:[#allocation16_spill] sm:$0xff]  ;;  %v12970_v51 = vld [vmem:[#allocation17_spill] sm:$0xff]  ;;  %v574_v30 = vmul.f32 %v560_v38, %v6684_v40 }
 0x33d   :  { %v7045_v58 = vadd.f32 %v12970_v51, %v12969_v15  ;;  %v7049_v7 = vadd.f32 %v12972_v42, %v12969_v15  ;;  %v12974_v47 = vld [vmem:[#allocation42_spill] sm:$0xff]  ;;  %v12976_v36 = vld [vmem:[#allocation39_spill] sm:$0xff]  ;;  %v12979_v1 = vld [vmem:[#allocation20_spill] sm:$0xff]  ;;  %12982 = vst [vmem:[#allocation60_spill] sm:$0xff] %v7072_v52 }
 0x33e   :  { %v561_v63 = vsel %vm555_vm1, %v12975_v54, %v12974_v47  ;;  %v565_v0 = vsel %vm555_vm1, %v12976_v36, %v12975_v54  ;;  %v12977_v35 = vld [vmem:[#allocation19_spill] sm:$0xff]  ;;  %v7065_v42 = vadd.f32 %v12979_v1, %v12969_v15  ;;  %v573_v54 = vmul.f32 %v564_v41, %v6680_v49  ;;  %v12983_v1 = vld [vmem:[#allocation64_spill] sm:$0xff]  ;;  %v12986_v40 = vld [vmem:[#allocation46_spill] sm:$0xff] }
 0x33f   :  { %12971 = vst [vmem:[#allocation12_spill] sm:$0xff] %v7045_v58  ;;  %12973 = vst [vmem:[#allocation13_spill] sm:$0xff] %v7049_v7  ;;  %v7061_v51 = vadd.f32 %v12977_v35, %v12969_v15  ;;  %v12981_v7 = vld [vmem:[#allocation62_spill] sm:$0xff]  ;;  %v12984_v15 = vld [vmem:[#allocation43_spill] sm:$0xff]  ;;  %v578_v49 = vmul.f32 %v561_v63, %v6509_v9  ;;  %v684_v41 = vsel %vm679_vm2, %v12983_v1, %v12986_v40 }
 0x340   :  { %12980 = vst [vmem:[#allocation40_spill] sm:$0xff] %v7065_v42  ;;  %v568_v22 = vsel %vm555_vm1, %v12981_v7, %v12968_v8  ;;  %v556_v35 = vsel %vm555_vm1, %v12966_v32, %v12981_v7  ;;  %v688_v42 = vsel %vm679_vm2, %v12984_v15, %v12983_v1  ;;  %v577_v8 = vmul.f32 %v565_v0, %v6505_v17  ;;  %v12987_v32 = vld [vmem:[#allocation65_spill] sm:$0xff]  ;;  %v12989_v17 = vld [vmem:[#allocation47_spill] sm:$0xff]  ;;  %v12990_v63 = vld [vmem:[#allocation66_spill] sm:$0xff] }
 0x341   :  { %12978 = vst [vmem:[#allocation14_spill] sm:$0xff] %v7061_v51  ;;  %v7084_v51 = vpop.permute.xlu1 %2235  ;;  %v12988_v38 = vld [vmem:[#allocation45_spill] sm:$0xff]  ;;  %2695 = vrot.lane.b32.xlu1 %v5876_v19, %s4885_s16  ;;  %v685_v9 = vsel %vm679_vm2, %v12987_v32, %v12989_v17  ;;  %v680_v0 = vsel %vm679_vm2, %v12986_v40, %v12990_v63  ;;  %v692_v1 = vsel %vm679_vm2, %v12990_v63, %v12984_v15  ;;  %v12996_v63 = vld [vmem:[#allocation132_spill] sm:$0xff] }
 0x342   :  { %12985 = vst [vmem:[#allocation38_spill] sm:$0xff] %v7084_v51  ;;  %v689_v7 = vsel %vm679_vm2, %v12988_v38, %v12987_v32  ;;  %v572_v51 = vmul.f32 %v568_v22, %v6698_v45  ;;  %4728 = vset.pattern.permute.xlu1 %v4886_v55  ;;  %v575_v52 = vmul.f32 %v556_v35, %v6702_v3  ;;  %v12991_v22 = vld [vmem:[#allocation67_spill] sm:$0xff]  ;;  %v7129_v55 = vpop.permute.xlu0 %2289  ;;  %v12994_v35 = vld [vmem:[#allocation278_spill] sm:$0xff]  ;;  %v13047_v60 = vld [vmem:[#allocation56_spill] sm:$0xff] }
 0x343   :  { %v697_v45 = vmul.f32 %v688_v42, %v6529_v37  ;;  %v681_v32 = vsel %vm679_vm2, %v12989_v17, %v12991_v22  ;;  %v693_v40 = vsel %vm679_vm2, %v12991_v22, %v12988_v38  ;;  %v7127_v19 = vld [vmem:[%s11958_s4 + $0x6] ss:$8 sm:$0xf]  ;;  %12992 = vst [vmem:[#allocation16_spill] sm:$0xff] %v7129_v55  ;;  %v698_v15 = vmul.f32 %v684_v41, %v12994_v35 }
 0x344   :  { %v12993_v3 = vld [vmem:[#allocation63_spill] sm:$0xff]  ;;  %v701_v38 = vmul.f32 %v689_v7, %v6706_v29  ;;  %2705 = vrot.lane.b32.xlu0 %v12996_v63, %s4885_s16  ;;  %v702_v22 = vmul.f32 %v685_v9, %v6710_v14  ;;  %v12997_v55 = vld [vmem:[#allocation280_spill] sm:$0xff]  ;;  %v13001_v41 = vld [vmem:[#allocation134_spill] sm:$0xff]  ;;  %v700_v29 = vmul.f32 %v693_v40, %v6714_v2  ;;  %v703_v7 = vmul.f32 %v681_v32, %v6718_v61 }
 0x345   :  { %v557_v37 = vsel %vm555_vm1, %v12974_v47, %v12993_v3  ;;  %v569_v42 = vsel %vm555_vm1, %v12993_v3, %v12976_v36  ;;  %v7141_v17 = vpop.permute.xlu1 %2243  ;;  %v696_v16 = vmul.f32 %v692_v1, %v12997_v55  ;;  %v699_v47 = vmul.f32 %v680_v0, %v12998_v62  ;;  %2699 = vrot.lane.b32.xlu1 %v13001_v41, %s4885_s16  ;;  %v13004_v62 = vld [vmem:[#allocation276_spill] sm:$0xff]  ;;  %v13005_v0 = vld [vmem:[#allocation277_spill] sm:$0xff]  ;;  %v13006_v35 = vld [vmem:[#allocation50_spill] sm:$0xff] }
 0x346   :  { %12995 = vst [vmem:[#allocation17_spill] sm:$0xff] %v7141_v17  ;;  %v828_v36 = vsel %vm819_vm3, %v13000_v25, %v12999_v23  ;;  %v7158_v3 = vrot.slane %v7127_v19, %v6446_v5  ;;  %v7162_v14 = vrot.slane %v7127_v19, %v6437_v18  ;;  %v576_v9 = vmul.f32 %v569_v42, %v13004_v62  ;;  %v7170_v40 = vpop.permute.xlu0 %2293  ;;  %v13008_v17 = vld [vmem:[#allocation282_spill] sm:$0xff]  ;;  %v13012_v62 = vld [vmem:[#allocation69_spill] sm:$0xff] }
 0x347   :  { %v579_v1 = vmul.f32 %v557_v37, %v13005_v0  ;;  %v713_v55 = vadd.f32 %v697_v45, %v573_v54  ;;  %v824_v2 = vsel %vm819_vm3, %v12999_v23, %v13006_v35  ;;  %13007 = vst [vmem:[#allocation61_spill] sm:$0xff] %v7170_v40  ;;  %v714_v61 = vadd.f32 %v698_v15, %v574_v30  ;;  %v13009_v63 = vld [vmem:[#allocation70_spill] sm:$0xff]  ;;  %v13011_v54 = vld [vmem:[#allocation136_spill] sm:$0xff]  ;;  %v13013_v30 = vld [vmem:[#allocation49_spill] sm:$0xff] }
 0x348   :  { %13002 = vst [vmem:[#allocation18_spill] sm:$0xff] %v7158_v3  ;;  %13003 = vst [vmem:[#allocation42_spill] sm:$0xff] %v7162_v14  ;;  %v717_v32 = vadd.f32 %v701_v38, %v577_v8  ;;  %v837_v41 = vmul.f32 %v828_v36, %v13008_v17  ;;  %v832_v14 = vsel %vm819_vm3, %v13009_v63, %v13000_v25  ;;  %2709 = vrot.lane.b32.xlu0 %v13011_v54, %s4885_s16  ;;  %v13014_v15 = vld [vmem:[#allocation138_spill] sm:$0xff]  ;;  %v13015_v17 = vld [vmem:[#allocation283_spill] sm:$0xff] }
 0x349   :  { %v7178_v37 = vpop.permute.xlu1 %2287  ;;  %v718_v45 = vadd.f32 %v702_v22, %v578_v49  ;;  %v712_v23 = vadd.f32 %v696_v16, %v572_v51  ;;  %v715_v42 = vadd.f32 %v699_v47, %v575_v52  ;;  %v829_v8 = vsel %vm819_vm3, %v13013_v30, %v13012_v62  ;;  %2703 = vrot.lane.b32.xlu1 %v13014_v15, %s4885_s16  ;;  %v13016_v0 = vld [vmem:[#allocation51_spill] sm:$0xff]  ;;  %v13017_v52 = vld [vmem:[#allocation284_spill] sm:$0xff]  ;;  %v13031_v40 = vld [vmem:[#allocation285_spill] sm:$0xff] }
 0x34a   :  { %13010 = vst [vmem:[#allocation39_spill] sm:$0xff] %v7178_v37  ;;  %v716_v38 = vadd.f32 %v700_v29, %v576_v9  ;;  %v719_v25 = vadd.f32 %v703_v7, %v579_v1  ;;  %v838_v36 = vmul.f32 %v824_v2, %v13015_v17  ;;  %v825_v37 = vsel %vm819_vm3, %v13012_v62, %v13016_v0  ;;  %v13018_v49 = vld [vmem:[#allocation71_spill] sm:$0xff]  ;;  %v13019_v47 = vld [vmem:[#allocation52_spill] sm:$0xff]  ;;  %v13020_v29 = vld [vmem:[#allocation74_spill] sm:$0xff]  ;;  %v7206_v9 = vpop.permute.xlu0 %2297 }
 0x34b   :  { %v820_v16 = vsel %vm819_vm3, %v13006_v35, %v13009_v63  ;;  %v836_v51 = vmul.f32 %v832_v14, %v13017_v52  ;;  %v833_v22 = vsel %vm819_vm3, %v13018_v49, %v13013_v30  ;;  %v972_v7 = vsel %vm959_vm4, %v13020_v29, %v13019_v47  ;;  %13021 = vst [vmem:[#allocation19_spill] sm:$0xff] %v7206_v9  ;;  %v13022_v2 = vld [vmem:[#allocation23_spill] sm:$0xff]  ;;  %v13023_v14 = vld [vmem:[#allocation72_spill] sm:$0xff]  ;;  %v13034_v3 = vld [vmem:[#allocation310_spill] sm:$0xff] }
 0x34c   :  { %v853_v1 = vadd.f32 %v837_v41, %v713_v55  ;;  %v841_v62 = vmul.f32 %v829_v8, %v13022_v2  ;;  %v821_v63 = vsel %vm819_vm3, %v13016_v0, %v13018_v49  ;;  %v968_v35 = vsel %vm959_vm4, %v13019_v47, %v13023_v14  ;;  %v13025_v17 = vld [vmem:[#allocation140_spill] sm:$0xff]  ;;  %v13026_v41 = vld [vmem:[#allocation54_spill] sm:$0xff]  ;;  %v13027_v8 = vld [vmem:[#allocation73_spill] sm:$0xff] }
 0x34d   :  { %v7217_v30 = vpop.permute.xlu1 %2291  ;;  %2713 = vrot.lane.b32.xlu0 %v13025_v17, %s4885_s16  ;;  %v842_v52 = vmul.f32 %v825_v37, %v6726_v24  ;;  %v964_v55 = vsel %vm959_vm4, %v13023_v14, %v13026_v41  ;;  %v13028_v2 = vld [vmem:[#allocation53_spill] sm:$0xff]  ;;  %v13029_v49 = vld [vmem:[#allocation75_spill] sm:$0xff]  ;;  %v839_v24 = vmul.f32 %v820_v16, %v13031_v40  ;;  %v840_v37 = vmul.f32 %v833_v22, %v6732_v48  ;;  %v13038_v22 = vld [vmem:[#allocation28_spill] sm:$0xff] }
 0x34e   :  { %13024 = vst [vmem:[#allocation20_spill] sm:$0xff] %v7217_v30  ;;  %v969_v0 = vsel %vm959_vm4, %v13028_v2, %v13027_v8  ;;  %v973_v47 = vsel %vm959_vm4, %v13029_v49, %v13028_v2  ;;  %v13030_v30 = vld [vmem:[#allocation142_spill] sm:$0xff]  ;;  %v13032_v9 = vld [vmem:[#allocation55_spill] sm:$0xff]  ;;  %v852_v17 = vadd.f32 %v836_v51, %v712_v23  ;;  %v843_v58 = vmul.f32 %v821_v63, %v13034_v3  ;;  %v7249_v40 = vpop.permute.xlu0 %2301 }
 0x34f   :  { %2707 = vrot.lane.b32.xlu1 %v13030_v30, %s4885_s16  ;;  %v965_v14 = vsel %vm959_vm4, %v13027_v8, %v13032_v9  ;;  %v13033_v15 = vld [vmem:[#allocation303_spill] sm:$0xff]  ;;  %v977_v44 = vmul.f32 %v968_v35, %v13035_v39  ;;  %v960_v2 = vsel %vm959_vm4, %v13026_v41, %v13020_v29  ;;  %13036 = vst [vmem:[#allocation62_spill] sm:$0xff] %v7249_v40  ;;  %v13041_v39 = vld [vmem:[#allocation144_spill] sm:$0xff] }
 0x350   :  { %v976_v54 = vmul.f32 %v972_v7, %v13033_v15  ;;  %v13037_v48 = vld [vmem:[#allocation299_spill] sm:$0xff]  ;;  %v981_v30 = vmul.f32 %v969_v0, %v13038_v22  ;;  %v961_v23 = vsel %vm959_vm4, %v13032_v9, %v13029_v49  ;;  %v13039_v15 = vld [vmem:[#allocation313_spill] sm:$0xff]  ;;  %v854_v7 = vadd.f32 %v838_v36, %v714_v61  ;;  %v13046_v40 = vld [vmem:[#allocation76_spill] sm:$0xff] }
 0x351   :  { %v978_v16 = vmul.f32 %v964_v55, %v13037_v48  ;;  %v980_v3 = vmul.f32 %v973_v47, %v13039_v15  ;;  %v7258_v51 = vpop.permute.xlu1 %2295  ;;  %2717 = vrot.lane.b32.xlu0 %v13041_v39, %s4885_s16  ;;  %v857_v29 = vadd.f32 %v841_v62, %v717_v32  ;;  %v858_v63 = vadd.f32 %v842_v52, %v718_v45  ;;  %v13042_v35 = vld [vmem:[#allocation311_spill] sm:$0xff]  ;;  %v13043_v55 = vld [vmem:[#allocation146_spill] sm:$0xff]  ;;  %v13044_v48 = vld [vmem:[#allocation304_spill] sm:$0xff] }
 0x352   :  { %13040 = vst [vmem:[#allocation64_spill] sm:$0xff] %v7258_v51  ;;  %v982_v41 = vmul.f32 %v965_v14, %v13042_v35  ;;  %v855_v8 = vadd.f32 %v839_v24, %v715_v42  ;;  %v856_v0 = vadd.f32 %v840_v37, %v716_v38  ;;  %v979_v22 = vmul.f32 %v960_v2, %v13044_v48  ;;  %v13045_v15 = vld [vmem:[#allocation314_spill] sm:$0xff]  ;;  %v7271_v32 = vpop.permute.xlu0 %2305  ;;  %v13052_v38 = vld [vmem:[#allocation59_spill] sm:$0xff] }
 0x353   :  { %2711 = vrot.lane.b32.xlu1 %v13043_v55, %s4885_s16  ;;  %v992_v9 = vadd.f32 %v976_v54, %v852_v17  ;;  %v859_v49 = vadd.f32 %v843_v58, %v719_v25  ;;  %v993_v47 = vadd.f32 %v977_v44, %v853_v1  ;;  %v983_v51 = vmul.f32 %v961_v23, %v13045_v15  ;;  %v13049_v52 = vld [vmem:[#allocation58_spill] sm:$0xff]  ;;  %v13051_v44 = vld [vmem:[#allocation148_spill] sm:$0xff]  ;;  %v13053_v25 = vld [vmem:[#allocation77_spill] sm:$0xff] }
 0x354   :  { %v1160_v61 = vsel %vm1151_vm5, %v13047_v60, %v13046_v40  ;;  %13048 = vst [vmem:[#allocation43_spill] sm:$0xff] %v7271_v32  ;;  %v994_v45 = vadd.f32 %v978_v16, %v854_v7  ;;  %v997_v36 = vadd.f32 %v981_v30, %v857_v29  ;;  %v996_v62 = vadd.f32 %v980_v3, %v856_v0  ;;  %v13054_v17 = vld [vmem:[#allocation57_spill] sm:$0xff]  ;;  %v13055_v24 = vld [vmem:[#allocation78_spill] sm:$0xff]  ;;  %v13058_v29 = vld [vmem:[#allocation315_spill] sm:$0xff] }
 0x355   :  { %v1156_v42 = vsel %vm1151_vm5, %v13046_v40, %v13049_v52  ;;  %v7277_v54 = vpop.permute.xlu1 %2299  ;;  %2721 = vrot.lane.b32.xlu0 %v13051_v44, %s4885_s16  ;;  %v998_v58 = vadd.f32 %v982_v41, %v858_v63  ;;  %v1157_v1 = vsel %vm1151_vm5, %v13053_v25, %v13052_v38  ;;  %v1161_v30 = vsel %vm1151_vm5, %v13054_v17, %v13053_v25  ;;  %v13056_v14 = vld [vmem:[#allocation150_spill] sm:$0xff]  ;;  %v13059_v35 = vld [vmem:[#allocation79_spill] sm:$0xff]  ;;  %v13137_v44 = vld [vmem:[#allocation324_spill] sm:$0xff] }
 0x356   :  { %13050 = vst [vmem:[#allocation46_spill] sm:$0xff] %v7277_v54  ;;  %v1152_v37 = vsel %vm1151_vm5, %v13049_v52, %v13055_v24  ;;  %v995_v2 = vadd.f32 %v979_v22, %v855_v8  ;;  %v1044_v40 = vadd.f32 %v6895_v50, %v992_v9  ;;  %v13057_v16 = vld [vmem:[#allocation34_spill] sm:$0xff]  ;;  %v1164_v3 = vsel %vm1151_vm5, %v13055_v24, %v13047_v60  ;;  %v7310_v8 = vpop.permute.xlu0 %2309  ;;  %v13061_v48 = vld [vmem:[#allocation35_spill] sm:$0xff]  ;;  %v13062_v60 = vld [vmem:[#allocation316_spill] sm:$0xff] }
 0x357   :  { %2715 = vrot.lane.b32.xlu1 %v13056_v14, %s4885_s16  ;;  %v1168_v23 = vmul.f32 %v1160_v61, %v13057_v16  ;;  %v999_v7 = vadd.f32 %v983_v51, %v859_v49  ;;  %v1169_v63 = vmul.f32 %v1156_v42, %v13058_v29  ;;  %v1153_v41 = vsel %vm1151_vm5, %v13052_v38, %v13059_v35  ;;  %v13063_v9 = vld [vmem:[#allocation317_spill] sm:$0xff]  ;;  %v13065_v42 = vld [vmem:[#allocation268_spill] sm:$0xff] }
 0x358   :  { %v1165_v50 = vsel %vm1151_vm5, %v13059_v35, %v13054_v17  ;;  %13060 = vst [vmem:[#allocation65_spill] sm:$0xff] %v7310_v8  ;;  %v1048_v0 = vadd.f32 %v6924_v57, %v996_v62  ;;  %v1172_v22 = vmul.f32 %v1161_v30, %v13061_v48  ;;  %v1173_v51 = vmul.f32 %v1157_v1, %v13062_v60  ;;  %v13066_v57 = vld [vmem:[#allocation271_spill] sm:$0xff]  ;;  %v13067_v17 = vld [vmem:[#allocation318_spill] sm:$0xff] }
 0x359   :  { %v1170_v49 = vmul.f32 %v1152_v37, %v13063_v9  ;;  %v7316_v15 = vpop.permute.xlu1 %2303  ;;  %2725 = vrot.lane.b32.xlu0 %v5966_v26, %s4885_s16  ;;  %v1045_v61 = vadd.f32 %v6912_v43, %v993_v47  ;;  %v1171_v52 = vmul.f32 %v1164_v3, %v6782_v20  ;;  %v7324_v38 = vrot.slane %v7127_v19, %v13065_v42  ;;  %v13068_v43 = vld [vmem:[#allocation319_spill] sm:$0xff]  ;;  %v13134_v26 = vld [vmem:[#allocation29_spill] sm:$0xff] }
 0x35a   :  { %13064 = vst [vmem:[#allocation45_spill] sm:$0xff] %v7316_v15  ;;  %v7328_v62 = vrot.slane %v7127_v19, %v13066_v57  ;;  %v1049_v25 = vadd.f32 %v6928_v12, %v997_v36  ;;  %v1046_v1 = vadd.f32 %v6916_v53, %v994_v45  ;;  %v1174_v30 = vmul.f32 %v1153_v41, %v13067_v17  ;;  %v7342_v16 = vpop.permute.xlu0 %2313  ;;  %v4640_v45 = vld [vmem:[%s11958_s4 + $0x7] ss:$8 sm:$0xf] }
 0x35b   :  { %2719 = vrot.lane.b32.xlu1 %v5972_v27, %s4885_s16  ;;  %v1175_v47 = vmul.f32 %v1165_v50, %v13068_v43  ;;  %v7336_v20 = vadd.f32 %v1168_v23, %v1044_v40  ;;  %v7338_v24 = vadd.f32 %v1169_v63, %v1045_v61  ;;  %v1047_v37 = vadd.f32 %v6920_v28, %v995_v2  ;;  %v4821_v28 = vld [vmem:[%s11957_s3 + $0x8] sm:$0xff]  ;;  %v13072_v2 = vld [vmem:[#allocation100_spill] sm:$0xff]  ;;  %v13075_v41 = vld [vmem:[#allocation101_spill] sm:$0xff] }
 0x35c   :  { %v1050_v19 = vadd.f32 %v6932_v46, %v998_v58  ;;  %13069 = vst [vmem:[#allocation47_spill] sm:$0xff] %v7342_v16  ;;  %v7344_v3 = vadd.f32 %v1172_v22, %v1048_v0  ;;  %v7346_v29 = vadd.f32 %v1173_v51, %v1049_v25  ;;  %v7348_v12 = vadd.f32 %v1170_v49, %v1046_v1  ;;  %v13071_v58 = vld [vmem:[#allocation82_spill] sm:$0xff]  ;;  %v13074_v35 = vld [vmem:[#allocation83_spill] sm:$0xff]  ;;  %v13076_v0 = vld [vmem:[#allocation81_spill] sm:$0xff] }
 0x35d   :  { %v1051_v53 = vadd.f32 %v6936_v59, %v999_v7  ;;  %v7354_v36 = vpop.permute.xlu1 %2307  ;;  %2781 = vperm.xlu0 %4729, %v4821_v28   ;;  %v7359_v46 = vadd.f32 %v1171_v52, %v1047_v37  ;;  %v562_v40 = vsel %vm555_vm1, %v13072_v2, %v13071_v58  ;;  %v13073_v59 = vld [vmem:[#allocation80_spill] sm:$0xff]  ;;  %v563_v50 = vsel %vm555_vm1, %v13075_v41, %v13074_v35  ;;  %v13077_v22 = vld [vmem:[#allocation102_spill] sm:$0xff]  ;;  %v13079_v52 = vld [vmem:[#allocation287_spill] sm:$0xff] }
 0x35e   :  { %13070 = vst [vmem:[#allocation66_spill] sm:$0xff] %v7354_v36  ;;  %v566_v23 = vsel %vm555_vm1, %v13073_v59, %v13072_v2  ;;  %v7371_v7 = vadd.f32 %v1174_v30, %v1050_v19  ;;  %v567_v48 = vsel %vm555_vm1, %v13076_v0, %v13075_v41  ;;  %v570_v60 = vsel %vm555_vm1, %v13077_v22, %v13073_v59  ;;  %v7396_v61 = vpop.permute.xlu0 %2317  ;;  %v13080_v1 = vld [vmem:[#allocation288_spill] sm:$0xff]  ;;  %v13082_v28 = vld [vmem:[#allocation86_spill] sm:$0xff]  ;;  %v13083_v2 = vld [vmem:[#allocation105_spill] sm:$0xff] }
 0x35f   :  { %2723 = vrot.lane.b32.xlu1 %v5984_v33, %s4885_s16  ;;  %v7373_v63 = vadd.f32 %v1175_v47, %v1051_v53  ;;  %v7388_v51 = vrot.slane %v4640_v45, %v6446_v5  ;;  %v7391_v9 = vrot.slane %v4640_v45, %v6437_v18  ;;  %v7394_v49 = vrot.slane %v4640_v45, %v13065_v42  ;;  %v13084_v59 = vld [vmem:[#allocation84_spill] sm:$0xff]  ;;  %v13107_v33 = vld [vmem:[#allocation89_spill] sm:$0xff]  ;;  %v13133_v27 = vld [vmem:[#allocation306_spill] sm:$0xff] }
 0x360   :  { %13078 = vst [vmem:[#allocation67_spill] sm:$0xff] %v7396_v61  ;;  %v581_v25 = vmul.f32 %v566_v23, %v13079_v52  ;;  %v582_v17 = vmul.f32 %v562_v40, %v13080_v1  ;;  %v558_v30 = vsel %vm555_vm1, %v13071_v58, %v13077_v22  ;;  %v7405_v43 = vrot.slane %v4640_v45, %v13066_v57  ;;  %v4822_v58 = vld [vmem:[%s11957_s3] sm:$0xff]  ;;  %v13089_v52 = vld [vmem:[#allocation108_spill] sm:$0xff] }
 0x361   :  { %v7407_v47 = vpop.permute.xlu1 %2311  ;;  %v12272_v37 = vmov 2   ;;  %v585_v19 = vmul.f32 %v567_v48, %v6794_v31  ;;  %v586_v53 = vmul.f32 %v563_v50, %v6798_v4  ;;  %v686_v40 = vsel %vm679_vm2, %v13083_v2, %v13082_v28  ;;  %v13085_v23 = vld [vmem:[#allocation290_spill] sm:$0xff]  ;;  %v13086_v31 = vld [vmem:[#allocation87_spill] sm:$0xff]  ;;  %v13088_v50 = vld [vmem:[#allocation85_spill] sm:$0xff] }
 0x362   :  { %13081 = vst [vmem:[#allocation63_spill] sm:$0xff] %v7407_v47  ;;  %4730 = vset.pattern.permute.xlu0 %v12272_v37  ;;  %v690_v45 = vsel %vm679_vm2, %v13084_v59, %v13083_v2  ;;  %v580_v41 = vmul.f32 %v570_v60, %v13085_v23  ;;  %v13087_v48 = vld [vmem:[#allocation107_spill] sm:$0xff]  ;;  %v694_v1 = vsel %vm679_vm2, %v13089_v52, %v13084_v59  ;;  %v4823_v2 = vld [vmem:[%s11957_s3] sm:$0xff]  ;;  %v13091_v23 = vld [vmem:[#allocation104_spill] sm:$0xff] }
 0x363   :  { %2777 = vperm.xlu1 %4728, %v4822_v58   ;;  %v687_v4 = vsel %vm679_vm2, %v13087_v48, %v13086_v31  ;;  %v691_v22 = vsel %vm679_vm2, %v13088_v50, %v13087_v48  ;;  %2811 = vperm.xlu0 %4730, %v4823_v2   ;;  %v13090_v60 = vld [vmem:[#allocation291_spill] sm:$0xff]  ;;  %v559_v37 = vsel %vm555_vm1, %v13074_v35, %v13091_v23  ;;  %v13092_v47 = vld [vmem:[#allocation109_spill] sm:$0xff]  ;;  %v13097_v16 = vld [vmem:[#allocation88_spill] sm:$0xff] }
 0x364   :  { %v583_v58 = vmul.f32 %v558_v30, %v13090_v60  ;;  %v682_v48 = vsel %vm679_vm2, %v13082_v28, %v13089_v52  ;;  %v695_v59 = vsel %vm679_vm2, %v13092_v47, %v13088_v50  ;;  %v7455_v2 = vld [vmem:[%s11958_s4 + $0x20] ss:$8 sm:$0xf]  ;;  %v7457_v30 = vpop.permute.xlu0 %2375  ;;  %v683_v28 = vsel %vm679_vm2, %v13086_v31, %v13092_v47 }
 0x365   :  { %13093 = vst [vmem:[#allocation278_spill] sm:$0xff] %v7457_v30  ;;  %v13094_v60 = vld [vmem:[#allocation292_spill] sm:$0xff]  ;;  %v13095_v35 = vld [vmem:[#allocation293_spill] sm:$0xff]  ;;  %v13096_v52 = vld [vmem:[#allocation110_spill] sm:$0xff]  ;;  %v7469_v15 = vpop.permute.xlu1 %2315  ;;  %v571_v30 = vsel %vm555_vm1, %v13091_v23, %v13076_v0  ;;  %v7485_v54 = vrot.slane %v7455_v2, %v6446_v5  ;;  %v711_v0 = vmul.f32 %v683_v28, %v6828_v13  ;;  %v7502_v23 = vrot.slane %v7455_v2, %v13065_v42 }
 0x366   :  { %v705_v61 = vmul.f32 %v690_v45, %v13094_v60  ;;  %v706_v36 = vmul.f32 %v686_v40, %v13095_v35  ;;  %v830_v50 = vsel %vm819_vm3, %v13097_v16, %v13096_v52  ;;  %13098 = vst [vmem:[#allocation280_spill] sm:$0xff] %v7469_v15  ;;  %v709_v45 = vmul.f32 %v691_v22, %v6812_v21  ;;  %v13099_v60 = vld [vmem:[#allocation294_spill] sm:$0xff]  ;;  %v4824_v47 = vld [vmem:[%s11957_s3 + $0x10] sm:$0xff]  ;;  %v13100_v31 = vld [vmem:[#allocation295_spill] sm:$0xff] }
 0x367   :  { %v710_v40 = vmul.f32 %v687_v4, %v6816_v34  ;;  %v704_v35 = vmul.f32 %v694_v1, %v13099_v60  ;;  %2785 = vperm.xlu1 %4728, %v4824_v47   ;;  %v707_v8 = vmul.f32 %v682_v48, %v13100_v31  ;;  %v708_v15 = vmul.f32 %v695_v59, %v6824_v10  ;;  %v4825_v34 = vld [vmem:[%s11957_s3 + $0x18] sm:$0xff]  ;;  %v13102_v4 = vld [vmem:[#allocation90_spill] sm:$0xff]  ;;  %v13103_v22 = vld [vmem:[#allocation296_spill] sm:$0xff] }
 0x368   :  { %v7489_v21 = vrot.slane %v7455_v2, %v6437_v18  ;;  %2823 = vperm.xlu0 %4730, %v4825_v34   ;;  %v826_v10 = vsel %vm819_vm3, %v13096_v52, %v13102_v4  ;;  %v845_v1 = vmul.f32 %v830_v50, %v13103_v22  ;;  %v7504_v48 = vpop.permute.xlu0 %2383  ;;  %v584_v59 = vmul.f32 %v571_v30, %v6804_v56  ;;  %v13106_v52 = vld [vmem:[#allocation111_spill] sm:$0xff]  ;;  %v4826_v22 = vld [vmem:[%s11957_s3 + $0x18] sm:$0xff] }
 0x369   :  { %13104 = vst [vmem:[#allocation68_spill] sm:$0xff] %v7504_v48  ;;  %v587_v60 = vmul.f32 %v559_v37, %v6808_v6  ;;  %v721_v47 = vadd.f32 %v705_v61, %v581_v25  ;;  %v722_v31 = vadd.f32 %v706_v36, %v582_v17  ;;  %v7508_v13 = vpop.permute.xlu1 %2371  ;;  %v725_v28 = vadd.f32 %v709_v45, %v585_v19  ;;  %v13108_v6 = vld [vmem:[#allocation297_spill] sm:$0xff]  ;;  %v13109_v36 = vld [vmem:[#allocation91_spill] sm:$0xff] }
 0x36a   :  { %13101 = vst [vmem:[#allocation281_spill] sm:$0xff] %v7489_v21  ;;  %13105 = vst [vmem:[#allocation48_spill] sm:$0xff] %v7508_v13  ;;  %v726_v34 = vadd.f32 %v710_v40, %v586_v53  ;;  %v720_v32 = vadd.f32 %v704_v35, %v580_v41  ;;  %v831_v50 = vsel %vm819_vm3, %v13107_v33, %v13106_v52  ;;  %v13110_v17 = vld [vmem:[#allocation3_spill] sm:$0xff]  ;;  %v13111_v53 = vld [vmem:[#allocation112_spill] sm:$0xff]  ;;  %vm1863_vm2 = vcmp.lt.s32.totalorder %v6898_v11, 32 }
 0x36b   :  { %2789 = vperm.xlu1 %4728, %v4826_v22   ;;  %v723_v56 = vadd.f32 %v707_v8, %v583_v58  ;;  %v724_v30 = vadd.f32 %v708_v15, %v584_v59  ;;  %v846_v61 = vmul.f32 %v826_v10, %v13108_v6  ;;  %v827_v25 = vsel %vm819_vm3, %v13106_v52, %v13109_v36  ;;  %v13113_v58 = vld [vmem:[#allocation26_spill] sm:$0xff]  ;;  %v13114_v40 = vld [vmem:[#allocation113_spill] sm:$0xff]  ;;  %v13116_v10 = vld [vmem:[#allocation92_spill] sm:$0xff] }
 0x36c   :  { %2865 = vrot.lane.b32.xlu0 %v13110_v17, %s4888_s11  ;;  %v727_v37 = vadd.f32 %v711_v0, %v587_v60  ;;  %v861_v19 = vadd.f32 %v845_v1, %v721_v47  ;;  %v822_v41 = vsel %vm819_vm3, %v13102_v4, %v13111_v53  ;;  %v834_v8 = vsel %vm819_vm3, %v13111_v53, %v13097_v16  ;;  %v7532_v15 = vpop.permute.xlu0 %2425  ;;  %v13115_v4 = vld [vmem:[#allocation114_spill] sm:$0xff]  ;;  %v13118_v59 = vld [vmem:[#allocation320_spill] sm:$0xff]  ;;  %v13121_v22 = vld [vmem:[#allocation93_spill] sm:$0xff] }
 0x36d   :  { %13112 = vst [vmem:[#allocation276_spill] sm:$0xff] %v7532_v15  ;;  %v849_v45 = vmul.f32 %v831_v50, %v13113_v58  ;;  %v823_v35 = vsel %vm819_vm3, %v13109_v36, %v13114_v40  ;;  %v835_v0 = vsel %vm819_vm3, %v13114_v40, %v13107_v33  ;;  %v970_v1 = vsel %vm959_vm4, %v13116_v10, %v13115_v4  ;;  %v7547_v16 = vpop.permute.xlu1 %2379  ;;  %v13119_v47 = vld [vmem:[#allocation94_spill] sm:$0xff]  ;;  %v13120_v50 = vld [vmem:[#allocation115_spill] sm:$0xff]  ;;  %v13122_v33 = vld [vmem:[#allocation116_spill] sm:$0xff] }
 0x36e   :  { %13117 = vst [vmem:[#allocation277_spill] sm:$0xff] %v7547_v16  ;;  %v850_v60 = vmul.f32 %v827_v25, %v13118_v59  ;;  %v966_v52 = vsel %vm959_vm4, %v13115_v4, %v13119_v47  ;;  %v971_v6 = vsel %vm959_vm4, %v13121_v22, %v13120_v50  ;;  %v974_v36 = vsel %vm959_vm4, %v13122_v33, %v13116_v10  ;;  %v13124_v58 = vld [vmem:[#allocation300_spill] sm:$0xff]  ;;  %v13125_v25 = vld [vmem:[#allocation301_spill] sm:$0xff]  ;;  %v4827_v13 = vld [vmem:[%s11957_s3 + $0x8] sm:$0xff] }
 0x36f   :  { %v13123_v53 = vmov 2   ;;  %v844_v40 = vmul.f32 %v834_v8, %v13124_v58  ;;  %v847_v59 = vmul.f32 %v822_v41, %v13125_v25  ;;  %v13126_v16 = vld [vmem:[#allocation117_spill] sm:$0xff]  ;;  %v13127_v15 = vld [vmem:[#allocation12_spill] sm:$0xff]  ;;  %v13131_v41 = vld [vmem:[#allocation95_spill] sm:$0xff]  ;;  %v986_v55 = vmul.f32 %v966_v52, %v13133_v27 }
 0x370   :  { %4731 = vset.pattern.permute.xlu1 %v13123_v53  ;;  %v975_v4 = vsel %vm959_vm4, %v13126_v16, %v13121_v22  ;;  %2869 = vrot.lane.b32.xlu0 %v13127_v15, %s4888_s11  ;;  %v13128_v10 = vld [vmem:[#allocation321_spill] sm:$0xff]  ;;  %v13129_v53 = vld [vmem:[#allocation322_spill] sm:$0xff]  ;;  %v967_v25 = vsel %vm959_vm4, %v13120_v50, %v13131_v41  ;;  %v7581_v22 = vpop.permute.xlu0 %2429  ;;  %v989_v39 = vmul.f32 %v971_v6, %v13134_v26  ;;  %v13202_v15 = vld [vmem:[#allocation147_spill] sm:$0xff]  ;;  %vm1999_vm3 = vcmp.lt.s32.totalorder %v6898_v11, 30 }
 0x371   :  { %2815 = vperm.xlu1 %4731, %v4827_v13   ;;  %v848_v48 = vmul.f32 %v835_v0, %v13128_v10  ;;  %v851_v14 = vmul.f32 %v823_v35, %v13129_v53  ;;  %v13130_v8 = vld [vmem:[#allocation305_spill] sm:$0xff]  ;;  %13132 = vst [vmem:[#allocation50_spill] sm:$0xff] %v7581_v22  ;;  %v962_v13 = vsel %vm959_vm4, %v13119_v47, %v13122_v33  ;;  %v13135_v0 = vld [vmem:[#allocation308_spill] sm:$0xff]  ;;  %v7590_v10 = vpop.permute.xlu1 %2423  ;;  %v13138_v22 = vld [vmem:[#allocation323_spill] sm:$0xff] }
 0x372   :  { %v985_v58 = vmul.f32 %v970_v1, %v13130_v8  ;;  %v984_v35 = vmul.f32 %v974_v36, %v13135_v0  ;;  %13136 = vst [vmem:[#allocation282_spill] sm:$0xff] %v7590_v10  ;;  %v862_v1 = vadd.f32 %v846_v61, %v722_v31  ;;  %v865_v53 = vadd.f32 %v849_v45, %v725_v28  ;;  %v13139_v27 = vld [vmem:[#allocation5_spill] sm:$0xff]  ;;  %v4828_v47 = vld [vmem:[%s11957_s3 + $0x10] sm:$0xff] }
 0x373   :  { %v866_v8 = vadd.f32 %v850_v60, %v726_v34  ;;  %v988_v50 = vmul.f32 %v975_v4, %v13137_v44  ;;  %v860_v21 = vadd.f32 %v844_v40, %v720_v32  ;;  %v990_v5 = vmul.f32 %v967_v25, %v13138_v22  ;;  %v13140_v44 = vld [vmem:[#allocation309_spill] sm:$0xff]  ;;  %v13144_v4 = vld [vmem:[#allocation98_spill] sm:$0xff]  ;;  %v13152_v22 = vld [vmem:[#allocation120_spill] sm:$0xff] }
 0x374   :  { %v963_v26 = vsel %vm959_vm4, %v13131_v41, %v13126_v16  ;;  %2873 = vrot.lane.b32.xlu0 %v13139_v27, %s4888_s11  ;;  %v863_v31 = vadd.f32 %v847_v59, %v723_v56  ;;  %v864_v28 = vadd.f32 %v848_v48, %v724_v30  ;;  %v867_v34 = vadd.f32 %v851_v14, %v727_v37  ;;  %v7604_v61 = vpop.permute.xlu0 %2433  ;;  %v13143_v33 = vld [vmem:[#allocation325_spill] sm:$0xff]  ;;  %v13145_v41 = vld [vmem:[#allocation118_spill] sm:$0xff]  ;;  %v13146_v14 = vld [vmem:[#allocation96_spill] sm:$0xff] }
 0x375   :  { %2819 = vperm.xlu1 %4731, %v4828_v47   ;;  %v987_v32 = vmul.f32 %v962_v13, %v13140_v44  ;;  %13141 = vst [vmem:[#allocation70_spill] sm:$0xff] %v7604_v61  ;;  %v1001_v45 = vadd.f32 %v985_v58, %v861_v19  ;;  %v1002_v60 = vadd.f32 %v986_v55, %v862_v1  ;;  %v7606_v16 = vpop.permute.xlu1 %2427  ;;  %v13147_v37 = vld [vmem:[#allocation99_spill] sm:$0xff]  ;;  %v13150_v59 = vld [vmem:[#allocation14_spill] sm:$0xff]  ;;  %v13151_v58 = vld [vmem:[#allocation44_spill] sm:$0xff] }
 0x376   :  { %v1005_v52 = vadd.f32 %v989_v39, %v865_v53  ;;  %v1000_v6 = vadd.f32 %v984_v35, %v860_v21  ;;  %13142 = vst [vmem:[#allocation69_spill] sm:$0xff] %v7606_v16  ;;  %v991_v36 = vmul.f32 %v963_v26, %v13143_v33  ;;  %v1004_v40 = vadd.f32 %v988_v50, %v864_v28  ;;  %v13148_v55 = vld [vmem:[#allocation119_spill] sm:$0xff]  ;;  %v13149_v21 = vld [vmem:[#allocation97_spill] sm:$0xff]  ;;  %v13156_v50 = vld [vmem:[#allocation36_spill] sm:$0xff] }
 0x377   :  { %v1158_v56 = vsel %vm1151_vm5, %v13145_v41, %v13144_v4  ;;  %v1162_v48 = vsel %vm1151_vm5, %v13146_v14, %v13145_v41  ;;  %v1006_v30 = vadd.f32 %v990_v5, %v866_v8  ;;  %v1159_v39 = vsel %vm1151_vm5, %v13148_v55, %v13147_v37  ;;  %v13153_v0 = vld [vmem:[#allocation121_spill] sm:$0xff]  ;;  %v13155_v53 = vld [vmem:[#allocation31_spill] sm:$0xff]  ;;  %v13157_v47 = vld [vmem:[#allocation326_spill] sm:$0xff] }
 0x378   :  { %v1163_v19 = vsel %vm1151_vm5, %v13149_v21, %v13148_v55  ;;  %2877 = vrot.lane.b32.xlu0 %v13150_v59, %s4888_s11  ;;  %v1003_v25 = vadd.f32 %v987_v32, %v863_v31  ;;  %v1154_v5 = vsel %vm1151_vm5, %v13144_v4, %v13152_v22  ;;  %v1166_v13 = vsel %vm1151_vm5, %v13152_v22, %v13146_v14  ;;  %v7641_v1 = vpop.permute.xlu0 %2437  ;;  %v13159_v33 = vld [vmem:[#allocation33_spill] sm:$0xff] }
 0x379   :  { %2863 = vrot.lane.b32.xlu1 %v13151_v58, %s4888_s11  ;;  %v1155_v35 = vsel %vm1151_vm5, %v13147_v37, %v13153_v0  ;;  %13154 = vst [vmem:[#allocation49_spill] sm:$0xff] %v7641_v1  ;;  %v1052_v8 = vadd.f32 %v13155_v53, %v1000_v6  ;;  %v1176_v26 = vmul.f32 %v1162_v48, %v13156_v50  ;;  %v7650_v44 = vpop.permute.xlu1 %2431  ;;  %v13160_v41 = vld [vmem:[#allocation37_spill] sm:$0xff]  ;;  %v13161_v37 = vld [vmem:[#allocation328_spill] sm:$0xff]  ;;  %v13163_v53 = vld [vmem:[#allocation330_spill] sm:$0xff] }
 0x37a   :  { %v1177_v31 = vmul.f32 %v1158_v56, %v13157_v47  ;;  %v1167_v28 = vsel %vm1151_vm5, %v13153_v0, %v13149_v21  ;;  %13158 = vst [vmem:[#allocation283_spill] sm:$0xff] %v7650_v44  ;;  %v1007_v32 = vadd.f32 %v991_v36, %v867_v34  ;;  %v1056_v4 = vadd.f32 %v13159_v33, %v1004_v40  ;;  %v13162_v22 = vld [vmem:[#allocation329_spill] sm:$0xff]  ;;  %v13164_v50 = vld [vmem:[#allocation30_spill] sm:$0xff]  ;;  %v13165_v47 = vld [vmem:[#allocation4_spill] sm:$0xff] }
 0x37b   :  { %v1180_v14 = vmul.f32 %v1163_v19, %v13160_v41  ;;  %v1181_v55 = vmul.f32 %v1159_v39, %v13161_v37  ;;  %v1178_v6 = vmul.f32 %v1154_v5, %v13162_v22  ;;  %v1179_v48 = vmul.f32 %v1166_v13, %v13163_v53  ;;  %v13166_v21 = vld [vmem:[#allocation7_spill] sm:$0xff]  ;;  %v13167_v0 = vld [vmem:[#allocation333_spill] sm:$0xff]  ;;  %v13168_v36 = vld [vmem:[#allocation106_spill] sm:$0xff] }
 0x37c   :  { %v1182_v56 = vmul.f32 %v1155_v35, %v13164_v50  ;;  %2881 = vrot.lane.b32.xlu0 %v13165_v47, %s4888_s11  ;;  %v1053_v34 = vadd.f32 %v13167_v0, %v1001_v45  ;;  %v1057_v40 = vadd.f32 %v13168_v36, %v1005_v52  ;;  %v13169_v33 = vld [vmem:[#allocation332_spill] sm:$0xff]  ;;  %v7667_v39 = vrot.slane %v7455_v2, %v13066_v57  ;;  %v7669_v5 = vpop.permute.xlu0 %2441  ;;  %v13172_v35 = vld [vmem:[#allocation334_spill] sm:$0xff]  ;;  %v13173_v37 = vld [vmem:[#allocation335_spill] sm:$0xff] }
 0x37d   :  { %2867 = vrot.lane.b32.xlu1 %v13166_v21, %s4888_s11  ;;  %v1183_v19 = vmul.f32 %v1167_v28, %v13169_v33  ;;  %13171 = vst [vmem:[#allocation284_spill] sm:$0xff] %v7669_v5  ;;  %v7671_v13 = vadd.f32 %v1176_v26, %v1052_v8  ;;  %v1054_v41 = vadd.f32 %v13172_v35, %v1002_v60  ;;  %v13174_v53 = vld [vmem:[#allocation41_spill] sm:$0xff]  ;;  %v7676_v16 = vpop.permute.xlu1 %2435  ;;  %v13176_v2 = vld [vmem:[#allocation27_spill] sm:$0xff]  ;;  %v13193_v1 = vld [vmem:[#allocation6_spill] sm:$0xff] }
 0x37e   :  { %13170 = vst [vmem:[#allocation51_spill] sm:$0xff] %v7667_v39  ;;  %v1055_v22 = vadd.f32 %v13173_v37, %v1003_v25  ;;  %v1058_v50 = vadd.f32 %v13174_v53, %v1006_v30  ;;  %13175 = vst [vmem:[#allocation71_spill] sm:$0xff] %v7676_v16  ;;  %v7678_v45 = vadd.f32 %v1177_v31, %v1053_v34  ;;  %v13177_v60 = vld [vmem:[#allocation13_spill] sm:$0xff]  ;;  %v13178_v30 = vld [vmem:[#allocation15_spill] sm:$0xff] }
 0x37f   :  { %v7680_v52 = vadd.f32 %v1180_v14, %v1056_v4  ;;  %v7682_v28 = vadd.f32 %v1181_v55, %v1057_v40  ;;  %v1059_v0 = vadd.f32 %v13176_v2, %v1007_v32  ;;  %v7685_v36 = vadd.f32 %v1178_v6, %v1054_v41  ;;  %v13180_v31 = vld [vmem:[#allocation122_spill] sm:$0xff]  ;;  %v13186_v41 = vld [vmem:[#allocation135_spill] sm:$0xff]  ;;  %v13188_v53 = vld [vmem:[#allocation124_spill] sm:$0xff] }
 0x380   :  { %v7687_v8 = vadd.f32 %v1179_v48, %v1055_v22  ;;  %v7689_v26 = vadd.f32 %v1182_v56, %v1058_v50  ;;  %2885 = vrot.lane.b32.xlu0 %v13177_v60, %s4888_s11  ;;  %v13181_v4 = vld [vmem:[#allocation18_spill] sm:$0xff]  ;;  %v1245_v6 = vmul.f32 %v7324_v38, %v13180_v31  ;;  %v7704_v48 = vpop.permute.xlu0 %2445  ;;  %v13184_v56 = vld [vmem:[#allocation123_spill] sm:$0xff]  ;;  %v1246_v33 = vmul.f32 %v7328_v62, %v13180_v31  ;;  %v13194_v61 = vld [vmem:[#allocation21_spill] sm:$0xff] }
 0x381   :  { %2871 = vrot.lane.b32.xlu1 %v13178_v30, %s4888_s11  ;;  %v7696_v25 = vadd.f32 %v1183_v19, %v1059_v0  ;;  %v1243_v14 = vmul.f32 %v13181_v4, %v13180_v31  ;;  %v13182_v32 = vld [vmem:[#allocation42_spill] sm:$0xff]  ;;  %13183 = vst [vmem:[#allocation74_spill] sm:$0xff] %v7704_v48  ;;  %v1247_v34 = vmul.f32 %v13181_v4, %v13184_v56  ;;  %v7714_v35 = vpop.permute.xlu1 %2439  ;;  %v13187_v37 = vld [vmem:[#allocation127_spill] sm:$0xff]  ;;  %v13190_v48 = vld [vmem:[#allocation129_spill] sm:$0xff] }
 0x382   :  { %v1244_v55 = vmul.f32 %v13182_v32, %v13180_v31  ;;  %v1248_v40 = vmul.f32 %v13182_v32, %v13184_v56  ;;  %v1249_v19 = vmul.f32 %v7324_v38, %v13184_v56  ;;  %13185 = vst [vmem:[#allocation23_spill] sm:$0xff] %v7714_v35  ;;  %v1300_v22 = vsel %vm1291_vm6, %v13187_v37, %v13186_v41  ;;  %v13189_v31 = vld [vmem:[#allocation137_spill] sm:$0xff]  ;;  %v13191_v35 = vld [vmem:[#allocation139_spill] sm:$0xff] }
 0x383   :  { %13179 = vst [vmem:[#allocation52_spill] sm:$0xff] %v7696_v25  ;;  %v1251_v50 = vmul.f32 %v13181_v4, %v13188_v53  ;;  %v1252_v2 = vmul.f32 %v13182_v32, %v13188_v53  ;;  %v1250_v0 = vmul.f32 %v7328_v62, %v13184_v56  ;;  %v1301_v16 = vsel %vm1291_vm6, %v13190_v48, %v13189_v31  ;;  %v13192_v5 = vld [vmem:[#allocation131_spill] sm:$0xff]  ;;  %v13195_v56 = vld [vmem:[#allocation126_spill] sm:$0xff]  ;;  %v13196_v30 = vld [vmem:[#allocation141_spill] sm:$0xff] }
 0x384   :  { %v1302_v10 = vsel %vm1291_vm6, %v13192_v5, %v13191_v35  ;;  %v1253_v44 = vmul.f32 %v7324_v38, %v13188_v53  ;;  %2889 = vrot.lane.b32.xlu0 %v13193_v1, %s4888_s11  ;;  %v1255_v39 = vmul.f32 %v13181_v4, %v13195_v56  ;;  %v13197_v60 = vld [vmem:[#allocation133_spill] sm:$0xff]  ;;  %v1256_v47 = vmul.f32 %v13182_v32, %v13195_v56  ;;  %v7750_v59 = vpop.permute.xlu0 %2449  ;;  %v13199_v57 = vld [vmem:[#allocation143_spill] sm:$0xff] }
 0x385   :  { %2875 = vrot.lane.b32.xlu1 %v13194_v61, %s4888_s11  ;;  %v1303_v21 = vsel %vm1291_vm6, %v13197_v60, %v13196_v30  ;;  %v1254_v58 = vmul.f32 %v7328_v62, %v13188_v53  ;;  %13198 = vst [vmem:[#allocation72_spill] sm:$0xff] %v7750_v59  ;;  %v1308_v1 = vmul.f32 %v1300_v22, %v1243_v14  ;;  %v13200_v4 = vld [vmem:[#allocation145_spill] sm:$0xff]  ;;  %v7762_v32 = vpop.permute.xlu1 %2443  ;;  %v13204_v25 = vld [vmem:[#allocation151_spill] sm:$0xff] }
 0x386   :  { %v1296_v61 = vsel %vm1291_vm6, %v13186_v41, %v13199_v57  ;;  %v1297_v42 = vsel %vm1291_vm6, %v13189_v31, %v13200_v4  ;;  %v1257_v18 = vmul.f32 %v7324_v38, %v13195_v56  ;;  %13201 = vst [vmem:[#allocation54_spill] sm:$0xff] %v7762_v32  ;;  %v1312_v27 = vmul.f32 %v1301_v16, %v1247_v34  ;;  %v13203_v22 = vld [vmem:[#allocation149_spill] sm:$0xff]  ;;  %v13205_v16 = vld [vmem:[#allocation40_spill] sm:$0xff]  ;;  %v13206_v34 = vld [vmem:[#allocation103_spill] sm:$0xff] }
 0x387   :  { %v1316_v53 = vmul.f32 %v1302_v10, %v1251_v50  ;;  %v1298_v14 = vsel %vm1291_vm6, %v13191_v35, %v13202_v15  ;;  %v1299_v41 = vsel %vm1291_vm6, %v13196_v30, %v13203_v22  ;;  %v1320_v59 = vmul.f32 %v1303_v21, %v1255_v39  ;;  %v13207_v39 = vld [vmem:[#allocation153_spill] sm:$0xff] }
 0x388   :  { %v1292_v38 = vsel %vm1291_vm6, %v13199_v57, %v13204_v25  ;;  %v1304_v10 = vsel %vm1291_vm6, %v13204_v25, %v13187_v37  ;;  %2893 = vrot.lane.b32.xlu0 %v13205_v16, %s4888_s11  ;;  %v1309_v30 = vmul.f32 %v1296_v61, %v1244_v55  ;;  %v1313_v21 = vmul.f32 %v1297_v42, %v1248_v40  ;;  %v7793_v35 = vpop.permute.xlu0 %2453 }
 0x389   :  { %2879 = vrot.lane.b32.xlu1 %v13206_v34, %s4888_s11  ;;  %v1293_v57 = vsel %vm1291_vm6, %v13200_v4, %v13207_v39  ;;  %v1305_v25 = vsel %vm1291_vm6, %v13207_v39, %v13190_v48  ;;  %13208 = vst [vmem:[#allocation73_spill] sm:$0xff] %v7793_v35  ;;  %v7796_v37 = vadd.f32 %v1308_v1, %v7336_v20  ;;  %v7800_v61 = vpop.permute.xlu1 %2447  ;;  %v13210_v4 = vld [vmem:[#allocation155_spill] sm:$0xff]  ;;  %v13222_v39 = vld [vmem:[#allocation186_spill] sm:$0xff] }
 0x38a   :  { %v1317_v50 = vmul.f32 %v1298_v14, %v1252_v2  ;;  %v1321_v31 = vmul.f32 %v1299_v41, %v1256_v47  ;;  %v1258_v42 = vmul.f32 %v7328_v62, %v13195_v56  ;;  %13209 = vst [vmem:[#allocation53_spill] sm:$0xff] %v7800_v61  ;;  %v1310_v55 = vmul.f32 %v1292_v38, %v1245_v6  ;;  %v4829_v62 = vld [vmem:[%s11957_s3 + $0x28] sm:$0xff]  ;;  %v13211_v6 = vld [vmem:[#allocation8_spill] sm:$0xff]  ;;  %v13220_v41 = vld [vmem:[#allocation170_spill] sm:$0xff] }
 0x38b   :  { %v1311_v40 = vmul.f32 %v1304_v10, %v1246_v33  ;;  %v1294_v32 = vsel %vm1291_vm6, %v13202_v15, %v13210_v4  ;;  %v1306_v20 = vsel %vm1291_vm6, %v13210_v4, %v13192_v5  ;;  %v7811_v1 = vadd.f32 %v1312_v27, %v7344_v3  ;;  %v13241_v61 = vld [vmem:[#allocation161_spill] sm:$0xff] }
 0x38c   :  { %v1314_v47 = vmul.f32 %v1293_v57, %v1249_v19  ;;  %v1315_v48 = vmul.f32 %v1305_v25, %v1250_v0  ;;  %2935 = vperm.xlu0 %4730, %v4829_v62   ;;  %v7820_v15 = vadd.f32 %v1316_v53, %v7671_v13  ;;  %v7823_v5 = vadd.f32 %v1320_v59, %v7680_v52  ;;  %v7831_v33 = vpop.permute.xlu0 %2511  ;;  %v13213_v0 = vld [vmem:[#allocation156_spill] sm:$0xff]  ;;  %v13216_v53 = vld [vmem:[#allocation162_spill] sm:$0xff]  ;;  %v13228_v62 = vld [vmem:[#allocation11_spill] sm:$0xff] }
 0x38d   :  { %2883 = vrot.lane.b32.xlu1 %v13211_v6, %s4888_s11  ;;  %v7826_v3 = vadd.f32 %v1309_v30, %v7338_v24  ;;  %v7829_v27 = vadd.f32 %v1313_v21, %v7346_v29  ;;  %13212 = vst [vmem:[#allocation75_spill] sm:$0xff] %v7831_v33  ;;  %v1318_v19 = vmul.f32 %v1294_v32, %v1253_v44  ;;  %v7841_v13 = vpop.permute.xlu1 %2451  ;;  %v13223_v57 = vld [vmem:[#allocation182_spill] sm:$0xff]  ;;  %v13239_v33 = vld [vmem:[#allocation165_spill] sm:$0xff] }
 0x38e   :  { %v1319_v2 = vmul.f32 %v1306_v20, %v1254_v58  ;;  %v1295_v56 = vsel %vm1291_vm6, %v13203_v22, %v13213_v0  ;;  %v1307_v59 = vsel %vm1291_vm6, %v13213_v0, %v13197_v60  ;;  %13214 = vst [vmem:[#allocation285_spill] sm:$0xff] %v7841_v13  ;;  %v7844_v24 = vadd.f32 %v1317_v50, %v7678_v45  ;;  %v13215_v60 = vld [vmem:[#allocation166_spill] sm:$0xff] }
 0x38f   :  { %v7847_v29 = vadd.f32 %v1321_v31, %v7682_v28  ;;  %v1326_v58 = vadd.f32 %v1310_v55, %v7348_v12  ;;  %v7851_v44 = vadd.f32 %v1311_v40, %v7359_v46  ;;  %v7854_v52 = vadd.f32 %v1314_v47, %v7371_v7  ;;  %v4830_v28 = vld [vmem:[%s11957_s3 + $0x38] sm:$0xff]  ;;  %v13217_v12 = vld [vmem:[#allocation2_spill] sm:$0xff] }
 0x390   :  { %v7857_v32 = vadd.f32 %v1315_v48, %v7373_v63  ;;  %v1440_v45 = vsel %vm1431_vm7, %v13216_v53, %v13215_v60  ;;  %2943 = vperm.xlu0 %4730, %v4830_v28   ;;  %v1322_v46 = vmul.f32 %v1295_v56, %v1257_v18  ;;  %v1323_v14 = vmul.f32 %v1307_v59, %v1258_v42  ;;  %v13218_v7 = vld [vmem:[#allocation158_spill] sm:$0xff]  ;;  %v7874_v10 = vpop.permute.xlu0 %2519  ;;  %v13230_v56 = vld [vmem:[#allocation159_spill] sm:$0xff] }
 0x391   :  { %2887 = vrot.lane.b32.xlu1 %v13217_v12, %s4888_s11  ;;  %v1383_v22 = vmul.f32 %v7388_v51, %v13218_v7  ;;  %v13219_v63 = vld [vmem:[#allocation174_spill] sm:$0xff]  ;;  %13221 = vst [vmem:[#allocation55_spill] sm:$0xff] %v7874_v10  ;;  %v7877_v30 = vadd.f32 %v1318_v19, %v7685_v36  ;;  %v7880_v21 = vadd.f32 %v1319_v2, %v7687_v8  ;;  %v7888_v50 = vpop.permute.xlu1 %2507  ;;  %v13229_v2 = vld [vmem:[#allocation52_spill] sm:$0xff] }
 0x392   :  { %v1432_v38 = vsel %vm1431_vm7, %v13220_v41, %v13219_v63  ;;  %v1385_v18 = vmul.f32 %v7394_v49, %v13218_v7  ;;  %v1580_v25 = vsel %vm1571_vm8, %v13223_v57, %v13222_v39  ;;  %13224 = vst [vmem:[#allocation303_spill] sm:$0xff] %v7888_v50  ;;  %v1384_v42 = vmul.f32 %v7391_v9, %v13218_v7  ;;  %v13225_v55 = vld [vmem:[#allocation178_spill] sm:$0xff]  ;;  %v13236_v50 = vld [vmem:[#allocation168_spill] sm:$0xff] }
 0x393   :  { %v1448_v31 = vmul.f32 %v1440_v45, %v1383_v22  ;;  %v1523_v36 = vmul.f32 %v7485_v54, %v13225_v55  ;;  %v13226_v40 = vld [vmem:[#allocation194_spill] sm:$0xff]  ;;  %v7900_v20 = vmul.f32 %v7405_v43, %v13218_v7  ;;  %v1525_v48 = vmul.f32 %v7502_v23, %v13225_v55 }
 0x394   :  { %v13227_v8 = vld [vmem:[#allocation190_spill] sm:$0xff]  ;;  %v1450_v47 = vmul.f32 %v1432_v38, %v1385_v18  ;;  %2985 = vrot.lane.b32.xlu0 %v13110_v17, %s4889_s19  ;;  %v7909_v19 = vadd.f32 %v1322_v46, %v7689_v26  ;;  %v7912_v0 = vadd.f32 %v1323_v14, %v13229_v2  ;;  %v1387_v59 = vmul.f32 %v7388_v51, %v13230_v56  ;;  %v7916_v28 = vpop.permute.xlu0 %2561  ;;  %v13233_v18 = vld [vmem:[#allocation167_spill] sm:$0xff] }
 0x395   :  { %v1572_v4 = vsel %vm1571_vm8, %v13227_v8, %v13226_v40  ;;  %2891 = vrot.lane.b32.xlu1 %v13228_v62, %s4888_s11  ;;  %v1588_v45 = vmul.f32 %v1580_v25, %v1523_v36  ;;  %13231 = vst [vmem:[#allocation310_spill] sm:$0xff] %v7916_v28  ;;  %v1388_v7 = vmul.f32 %v7391_v9, %v13230_v56  ;;  %v7926_v46 = vpop.permute.xlu1 %2515  ;;  %v13234_v2 = vld [vmem:[#allocation163_spill] sm:$0xff]  ;;  %v13235_v36 = vld [vmem:[#allocation160_spill] sm:$0xff] }
 0x396   :  { %v1389_v22 = vmul.f32 %v7394_v49, %v13230_v56  ;;  %v7924_v38 = vmul.f32 %v7405_v43, %v13230_v56  ;;  %v1590_v26 = vmul.f32 %v1572_v4, %v1525_v48  ;;  %13232 = vst [vmem:[#allocation298_spill] sm:$0xff] %v7926_v46  ;;  %v1464_v14 = vadd.f32 %v1448_v31, %v7796_v37  ;;  %v13237_v28 = vld [vmem:[#allocation164_spill] sm:$0xff]  ;;  %v13238_v56 = vld [vmem:[#allocation169_spill] sm:$0xff]  ;;  %v4831_v46 = vld [vmem:[%s11957_s3 + $0x20] sm:$0xff] }
 0x397   :  { %v1441_v25 = vsel %vm1431_vm7, %v13234_v2, %v13233_v18  ;;  %v1391_v10 = vmul.f32 %v7388_v51, %v13235_v36  ;;  %v1442_v13 = vsel %vm1431_vm7, %v13237_v28, %v13236_v50  ;;  %v1443_v4 = vsel %vm1431_vm7, %v13239_v33, %v13238_v56  ;;  %v13240_v48 = vld [vmem:[#allocation12_spill] sm:$0xff] }
 0x398   :  { %v1392_v37 = vmul.f32 %v7391_v9, %v13235_v36  ;;  %v1466_v31 = vadd.f32 %v1450_v47, %v1326_v58  ;;  %2989 = vrot.lane.b32.xlu0 %v13240_v48, %s4889_s19  ;;  %v1395_v35 = vmul.f32 %v7388_v51, %v13241_v61  ;;  %v1393_v17 = vmul.f32 %v7394_v49, %v13235_v36  ;;  %v7956_v6 = vpop.permute.xlu0 %2565 }
 0x399   :  { %2931 = vperm.xlu1 %4731, %v4831_v46   ;;  %v1394_v62 = vmul.f32 %v7405_v43, %v13235_v36  ;;  %v1604_v12 = vadd.f32 %v1588_v45, %v1464_v14  ;;  %13242 = vst [vmem:[#allocation299_spill] sm:$0xff] %v7956_v6  ;;  %v1452_v58 = vmul.f32 %v1441_v25, %v1387_v59  ;;  %v4642_v46 = vld [vmem:[%s11958_s4 + $0x21] ss:$8 sm:$0xf]  ;;  %v7963_v51 = vpop.permute.xlu1 %2559 }
 0x39a   :  { %v1456_v47 = vmul.f32 %v1442_v13, %v1391_v10  ;;  %v1396_v48 = vmul.f32 %v7391_v9, %v13241_v61  ;;  %v1606_v34 = vadd.f32 %v1590_v26, %v1466_v31  ;;  %13243 = vst [vmem:[#allocation28_spill] sm:$0xff] %v7963_v51  ;;  %v1460_v16 = vmul.f32 %v1443_v4, %v1395_v35  ;;  %v13244_v13 = vld [vmem:[#allocation198_spill] sm:$0xff]  ;;  %v13246_v9 = vld [vmem:[#allocation171_spill] sm:$0xff]  ;;  %v13248_v25 = vld [vmem:[#allocation5_spill] sm:$0xff] }
 0x39b   :  { %v1436_v45 = vsel %vm1431_vm7, %v13215_v60, %v13220_v41  ;;  %v1397_v59 = vmul.f32 %v7394_v49, %v13241_v61  ;;  %v7972_v10 = vadd.f32 %v13244_v13, %v1604_v12  ;;  %v1437_v26 = vsel %vm1431_vm7, %v13233_v18, %v13246_v9  ;;  %v4832_v49 = vld [vmem:[%s11957_s3 + $0x30] sm:$0xff]  ;;  %v13249_v60 = vld [vmem:[#allocation267_spill] sm:$0xff]  ;;  %v13253_v18 = vld [vmem:[#allocation270_spill] sm:$0xff] }
 0x39c   :  { %v1398_v14 = vmul.f32 %v7405_v43, %v13241_v61  ;;  %v7981_v35 = vadd.f32 %v13244_v13, %v1606_v34  ;;  %2993 = vrot.lane.b32.xlu0 %v13248_v25, %s4889_s19  ;;  %v7989_v12 = vrot.slane %v4642_v46, %v13249_v60  ;;  %v13251_v41 = vld [vmem:[#allocation268_spill] sm:$0xff]  ;;  %v7995_v4 = vrot.slane %v4642_v46, %v13253_v18  ;;  %v13255_v43 = vld [vmem:[#allocation271_spill] sm:$0xff]  ;;  %v8000_v61 = vpop.permute.xlu0 %2569 }
 0x39d   :  { %13245 = vst [vmem:[#allocation313_spill] sm:$0xff] %v7972_v10  ;;  %2939 = vperm.xlu1 %4731, %v4832_v49   ;;  %v7992_v36 = vrot.slane %v4642_v46, %v13251_v41  ;;  %v7998_v34 = vrot.slane %v4642_v46, %v13255_v43  ;;  %13257 = vst [vmem:[#allocation58_spill] sm:$0xff] %v8000_v61  ;;  %v1468_v31 = vadd.f32 %v1452_v58, %v7811_v1  ;;  %v13258_v51 = vld [vmem:[#allocation175_spill] sm:$0xff]  ;;  %v13269_v61 = vld [vmem:[#allocation173_spill] sm:$0xff] }
 0x39e   :  { %13247 = vst [vmem:[#allocation311_spill] sm:$0xff] %v7981_v35  ;;  %13250 = vst [vmem:[#allocation304_spill] sm:$0xff] %v7989_v12  ;;  %v8004_v6 = vadd.f32 %v1456_v47, %v7820_v15  ;;  %v1449_v49 = vmul.f32 %v1436_v45, %v1384_v42  ;;  %v1433_v12 = vsel %vm1431_vm7, %v13246_v9, %v13258_v51  ;;  %v13262_v25 = vld [vmem:[#allocation183_spill] sm:$0xff]  ;;  %v8020_v15 = vmul.f32 0.70710677, %v7972_v10  ;;  %v13263_v42 = vld [vmem:[#allocation172_spill] sm:$0xff] }
 0x39f   :  { %13252 = vst [vmem:[#allocation314_spill] sm:$0xff] %v7992_v36  ;;  %13254 = vst [vmem:[#allocation76_spill] sm:$0xff] %v7995_v4  ;;  %v8010_v36 = vpop.permute.xlu1 %2563  ;;  %v8013_v4 = vadd.f32 %v1460_v16, %v7823_v5  ;;  %v1453_v46 = vmul.f32 %v1437_v26, %v1388_v7  ;;  %v1438_v58 = vsel %vm1431_vm7, %v13236_v50, %v13263_v42  ;;  %v13264_v47 = vld [vmem:[#allocation179_spill] sm:$0xff]  ;;  %v8033_v7 = vmul.f32 0.70710677, %v7981_v35  ;;  %v13267_v26 = vld [vmem:[#allocation14_spill] sm:$0xff] }
 0x3a0   :  { %13256 = vst [vmem:[#allocation56_spill] sm:$0xff] %v7998_v34  ;;  %13259 = vst [vmem:[#allocation59_spill] sm:$0xff] %v8010_v36  ;;  %v13261_v34 = vld [vmem:[#allocation187_spill] sm:$0xff]  ;;  %v1527_v45 = vmul.f32 %v7485_v54, %v13264_v47  ;;  %2997 = vrot.lane.b32.xlu0 %v13267_v26, %s4889_s19  ;;  %v13268_v36 = vld [vmem:[#allocation44_spill] sm:$0xff]  ;;  %v1439_v50 = vsel %vm1431_vm7, %v13238_v56, %v13269_v61  ;;  %v1444_v10 = vsel %vm1431_vm7, %v13219_v63, %v13216_v53 }
 0x3a1   :  { %13260 = vst [vmem:[#allocation77_spill] sm:$0xff] %v8013_v4  ;;  %v1581_v1 = vsel %vm1571_vm8, %v13262_v25, %v13261_v34  ;;  %v13265_v9 = vld [vmem:[#allocation195_spill] sm:$0xff]  ;;  %2983 = vrot.lane.b32.xlu1 %v13268_v36, %s4889_s19  ;;  %v1454_v4 = vmul.f32 %v1433_v12, %v1389_v22  ;;  %v1529_v35 = vmul.f32 %v7502_v23, %v13264_v47  ;;  %v13271_v36 = vld [vmem:[#allocation176_spill] sm:$0xff]  ;;  %vm3992_vm9 = vcmp.ge.f32.partialorder %v8020_v15, 0.0 }
 0x3a2   :  { %v13266_v16 = vld [vmem:[#allocation191_spill] sm:$0xff]  ;;  %v1445_v26 = vsel %vm1431_vm7, %v13258_v51, %v13234_v2  ;;  %v1434_v56 = vsel %vm1431_vm7, %v13263_v42, %v13271_v36  ;;  %v1446_v53 = vsel %vm1431_vm7, %v13271_v36, %v13237_v28  ;;  %v1592_v63 = vmul.f32 %v1581_v1, %v1527_v45 }
 0x3a3   :  { %v1573_v5 = vsel %vm1571_vm8, %v13266_v16, %v13265_v9  ;;  %v8049_v9 = vpop.permute.xlu0 %2573  ;;  %v8063_v22 = vpop.permute.xlu1 %2567  ;;  %v1457_v12 = vmul.f32 %v1438_v58, %v1392_v37  ;;  %v8070_v51 = vand.u32 2147483647, %v8020_v15  ;;  %v1461_v43 = vmul.f32 %v1439_v50, %v1396_v48  ;;  %v13274_v37 = vld [vmem:[#allocation4_spill] sm:$0xff] }
 0x3a4   :  { %13270 = vst [vmem:[#allocation57_spill] sm:$0xff] %v8049_v9  ;;  %13272 = vst [vmem:[#allocation78_spill] sm:$0xff] %v8063_v22  ;;  %v13273_v9 = vld [vmem:[#allocation177_spill] sm:$0xff]  ;;  %v1594_v2 = vmul.f32 %v1573_v5, %v1529_v35  ;;  %v1451_v42 = vmul.f32 %v1444_v10, %v7900_v20  ;;  %v8078_v36 = vand.u32 2147483647, %v8033_v7  ;;  %3001 = vrot.lane.b32.xlu0 %v13274_v37, %s4889_s19  ;;  %vm3994_vm10 = vcmp.ge.f32.partialorder %v8033_v7, 0.0 }
 0x3a5   :  { %v1435_v25 = vsel %vm1431_vm7, %v13269_v61, %v13273_v9  ;;  %v1447_v28 = vsel %vm1431_vm7, %v13273_v9, %v13239_v33  ;;  %v13275_v61 = vld [vmem:[#allocation7_spill] sm:$0xff]  ;;  %v1455_v35 = vmul.f32 %v1445_v26, %v7924_v38  ;;  %v1470_v48 = vadd.f32 %v1454_v4, %v7854_v52 }
 0x3a6   :  { %2987 = vrot.lane.b32.xlu1 %v13275_v61, %s4889_s19  ;;  %v1458_v1 = vmul.f32 %v1434_v56, %v1393_v17  ;;  %v1459_v20 = vmul.f32 %v1446_v53, %v1394_v62  ;;  %v1465_v58 = vadd.f32 %v1449_v49, %v7826_v3  ;;  %v8090_v33 = vadd.f32 %v1453_v46, %v7829_v27  ;;  %v13278_v27 = vld [vmem:[#allocation199_spill] sm:$0xff]  ;;  %v13282_v49 = vld [vmem:[#allocation281_spill] sm:$0xff]  ;;  %v13285_v53 = vld [vmem:[#allocation188_spill] sm:$0xff] }
 0x3a7   :  { %v8086_v10 = vpop.permute.xlu0 %2577  ;;  %v1462_v45 = vmul.f32 %v1435_v25, %v1397_v59  ;;  %v1608_v9 = vadd.f32 %v1592_v63, %v1468_v31  ;;  %v8092_v5 = vpop.permute.xlu1 %2571  ;;  %v8095_v50 = vadd.f32 %v1457_v12, %v7844_v24  ;;  %v1463_v22 = vmul.f32 %v1447_v28, %v1398_v14  ;;  %v13279_v59 = vld [vmem:[#allocation13_spill] sm:$0xff]  ;;  %v13280_v24 = vld [vmem:[#allocation15_spill] sm:$0xff]  ;;  %v13286_v63 = vld [vmem:[#allocation184_spill] sm:$0xff] }
 0x3a8   :  { %13276 = vst [vmem:[#allocation34_spill] sm:$0xff] %v8086_v10  ;;  %13277 = vst [vmem:[#allocation315_spill] sm:$0xff] %v8092_v5  ;;  %v1610_v38 = vadd.f32 %v1594_v2, %v1470_v48  ;;  %v4040_v52 = vmul.f32 0.3275911, %v8070_v51  ;;  %v8099_v17 = vadd.f32 %v1461_v43, %v7847_v29  ;;  %v1467_v62 = vadd.f32 %v1451_v42, %v7851_v44  ;;  %v13287_v42 = vld [vmem:[#allocation180_spill] sm:$0xff]  ;;  %v13291_v48 = vld [vmem:[#allocation21_spill] sm:$0xff] }
 0x3a9   :  { %v4042_v3 = vmul.f32 0.3275911, %v8078_v36  ;;  %v8104_v4 = vadd.f32 %v13278_v27, %v1608_v9  ;;  %3005 = vrot.lane.b32.xlu0 %v13279_v59, %s4889_s19  ;;  %v8111_v14 = vadd.f32 %v1455_v35, %v7857_v32  ;;  %v1474_v25 = vadd.f32 %v1458_v1, %v7877_v30  ;;  %v13283_v30 = vld [vmem:[#allocation51_spill] sm:$0xff]  ;;  %v13289_v28 = vld [vmem:[#allocation192_spill] sm:$0xff] }
 0x3aa   :  { %2991 = vrot.lane.b32.xlu1 %v13280_v24, %s4889_s19  ;;  %v8115_v29 = vadd.f32 %v1459_v20, %v7880_v21  ;;  %v8118_v44 = vadd.f32 %v13278_v27, %v1610_v38  ;;  %v8123_v31 = vadd.f32 %v1462_v45, %v7909_v19  ;;  %v1524_v46 = vmul.f32 %v13282_v49, %v13225_v55 }
 0x3ab   :  { %v8120_v43 = vpop.permute.xlu0 %2581  ;;  %v1576_v32 = vsel %vm1571_vm8, %v13222_v39, %v13227_v8  ;;  %v1526_v21 = vmul.f32 %v13283_v30, %v13225_v55  ;;  %v8133_v26 = vpop.permute.xlu1 %2575  ;;  %v8136_v56 = vadd.f32 %v1463_v22, %v7912_v0  ;;  %v1582_v19 = vsel %vm1571_vm8, %v13286_v63, %v13285_v53  ;;  %v13288_v8 = vld [vmem:[#allocation196_spill] sm:$0xff]  ;;  %v13290_v22 = vld [vmem:[#allocation6_spill] sm:$0xff] }
 0x3ac   :  { %13281 = vst [vmem:[#allocation79_spill] sm:$0xff] %v8120_v43  ;;  %13284 = vst [vmem:[#allocation35_spill] sm:$0xff] %v8133_v26  ;;  %v1528_v12 = vmul.f32 %v13282_v49, %v13264_v47  ;;  %v4056_v2 = vadd.f32 1.0, %v4040_v52  ;;  %v1531_v39 = vmul.f32 %v7485_v54, %v13287_v42  ;;  %v1574_v55 = vsel %vm1571_vm8, %v13289_v28, %v13288_v8 }
 0x3ad   :  { %v4058_v35 = vadd.f32 1.0, %v4042_v3  ;;  %v8151_v0 = vmul.f32 0.70710677, %v8104_v4  ;;  %3009 = vrot.lane.b32.xlu0 %v13290_v22, %s4889_s19  ;;  %v1589_v1 = vmul.f32 %v1576_v32, %v1524_v46  ;;  %v1584_v20 = vsel %vm1571_vm8, %v13226_v40, %v13223_v57  ;;  %v13294_v40 = vld [vmem:[#allocation181_spill] sm:$0xff] }
 0x3ae   :  { %2995 = vrot.lane.b32.xlu1 %v13291_v48, %s4889_s19  ;;  %v1533_v45 = vmul.f32 %v7502_v23, %v13287_v42  ;;  %v8164_v9 = vmul.f32 0.70710677, %v8118_v44  ;;  %v1596_v52 = vmul.f32 %v1582_v19, %v1531_v39  ;;  %v1532_v3 = vmul.f32 %v13282_v49, %v13287_v42  ;;  %v4643_v39 = vld [vmem:[%s11958_s4 + $0x22] ss:$8 sm:$0xf] }
 0x3af   :  { %v8166_v38 = vpop.permute.xlu0 %2585  ;;  %v8172_v46 = vmul.f32 %v13283_v30, %v13264_v47  ;;  %v8176_v32 = vmul.f32 %v13283_v30, %v13287_v42  ;;  %v8178_v57 = vpop.permute.xlu1 %2579  ;;  %v1535_v43 = vmul.f32 %v7485_v54, %v13294_v40  ;;  %v1536_v5 = vmul.f32 %v13282_v49, %v13294_v40  ;;  %v13296_v54 = vld [vmem:[#allocation103_spill] sm:$0xff]  ;;  %v13297_v49 = vld [vmem:[#allocation189_spill] sm:$0xff]  ;;  %v13303_v48 = vld [vmem:[#allocation200_spill] sm:$0xff] }
 0x3b0   :  { %13292 = vst [vmem:[#allocation316_spill] sm:$0xff] %v8166_v38  ;;  %13293 = vst [vmem:[#allocation317_spill] sm:$0xff] %v8178_v57  ;;  %v1598_v19 = vmul.f32 %v1574_v55, %v1533_v45  ;;  %4736 = vrcp.f32 %v4056_v2  ;;  %v1591_v47 = vmul.f32 %v1584_v20, %v1526_v21  ;;  %v1537_v38 = vmul.f32 %v7502_v23, %v13294_v40  ;;  %v13295_v57 = vld [vmem:[#allocation40_spill] sm:$0xff]  ;;  %v13298_v2 = vld [vmem:[#allocation185_spill] sm:$0xff] }
 0x3b1   :  { %4738 = vrcp.f32 %v4058_v35  ;;  %v8190_v42 = vand.u32 2147483647, %v8151_v0  ;;  %3013 = vrot.lane.b32.xlu0 %v13295_v57, %s4889_s19  ;;  %v1583_v55 = vsel %vm1571_vm8, %v13298_v2, %v13297_v49  ;;  %v1605_v45 = vadd.f32 %v1589_v1, %v1465_v58 }
 0x3b2   :  { %2999 = vrot.lane.b32.xlu1 %v13296_v54, %s4889_s19  ;;  %v8202_v21 = vmul.f32 %v13283_v30, %v13294_v40  ;;  %v8205_v23 = vand.u32 2147483647, %v8164_v9  ;;  %v1612_v20 = vadd.f32 %v1596_v52, %v8004_v6  ;;  %v1577_v26 = vsel %vm1571_vm8, %v13261_v34, %v13266_v16  ;;  %v4644_v34 = vld [vmem:[%s11958_s4 + $0x23] ss:$8 sm:$0xf] }
 0x3b3   :  { %v8207_v35 = vpop.permute.xlu0 %2589  ;;  %v8215_v10 = vrot.slane %v4643_v39, %v13249_v60  ;;  %v8218_v58 = vrot.slane %v4643_v39, %v13251_v41  ;;  %v8220_v30 = vpop.permute.xlu1 %2583  ;;  %v1578_v1 = vsel %vm1571_vm8, %v13285_v53, %v13289_v28  ;;  %v1614_v40 = vadd.f32 %v1598_v19, %v1474_v25  ;;  %v4833_v25 = vld [vmem:[%s11957_s3 + $0x48] sm:$0xff]  ;;  %v13304_v53 = vld [vmem:[#allocation8_spill] sm:$0xff] }
 0x3b4   :  { %13299 = vst [vmem:[#allocation318_spill] sm:$0xff] %v8207_v35  ;;  %13301 = vst [vmem:[#allocation82_spill] sm:$0xff] %v8220_v30  ;;  %v8227_v6 = vadd.f32 %v13244_v13, %v1605_v45  ;;  %v8230_v52 = vrot.slane %v4643_v39, %v13253_v18  ;;  %v1600_v16 = vmul.f32 %v1583_v55, %v1535_v43  ;;  %v4044_v30 = vmul.f32 0.3275911, %v8190_v42 }
 0x3b5   :  { %13300 = vst [vmem:[#allocation319_spill] sm:$0xff] %v8218_v58  ;;  %v1607_v35 = vadd.f32 %v1591_v47, %v1467_v62  ;;  %v8237_v61 = vadd.f32 %v13303_v48, %v1612_v20  ;;  %3071 = vperm.xlu0 %4730, %v4833_v25   ;;  %v1593_v28 = vmul.f32 %v1577_v26, %v1528_v12  ;;  %v4046_v19 = vmul.f32 0.3275911, %v8205_v23  ;;  %v13305_v62 = vld [vmem:[#allocation271_spill] sm:$0xff]  ;;  %v13308_v20 = vld [vmem:[#allocation193_spill] sm:$0xff] }
 0x3b6   :  { %13302 = vst [vmem:[#allocation100_spill] sm:$0xff] %v8230_v52  ;;  %3003 = vrot.lane.b32.xlu1 %v13304_v53, %s4889_s19  ;;  %v8246_v45 = vadd.f32 %v13303_v48, %v1614_v40  ;;  %v8249_v43 = vrot.slane %v4643_v39, %v13305_v62  ;;  %v1597_v55 = vmul.f32 %v1578_v1, %v1532_v3  ;;  %v13311_v40 = vld [vmem:[#allocation183_spill] sm:$0xff]  ;;  %v8450_v7 = vmul.f32 0.5, %v8104_v4  ;;  %v4842_v4 = vld [vmem:[%s11957_s3 + $0x70] sm:$0xff] }
 0x3b7   :  { %v8251_v47 = vpop.permute.xlu0 %2647  ;;  %v1579_v25 = vsel %vm1571_vm8, %v13297_v49, %v13308_v20  ;;  %v8258_v52 = vadd.f32 %v13244_v13, %v1607_v35  ;;  %v8261_v26 = vrot.slane %v4644_v34, %v13249_v60  ;;  %v8263_v12 = vpop.permute.xlu1 %2587  ;;  %v13312_v53 = vld [vmem:[#allocation195_spill] sm:$0xff]  ;;  %v1586_v3 = vsel %vm1571_vm8, %v13288_v8, %v13286_v63  ;;  %v13315_v35 = vld [vmem:[#allocation77_spill] sm:$0xff]  ;;  %v13317_v8 = vld [vmem:[#allocation2_spill] sm:$0xff] }
 0x3b8   :  { %13306 = vst [vmem:[#allocation80_spill] sm:$0xff] %v8249_v43  ;;  %13307 = vst [vmem:[#allocation83_spill] sm:$0xff] %v8251_v47  ;;  %v1585_v39 = vsel %vm1571_vm8, %v13312_v53, %v13311_v40  ;;  %v8274_v49 = vmul.f32 0.70710677, %v8227_v6  ;;  %v8277_v13 = vrot.slane %v4644_v34, %v13251_v41  ;;  %v8280_v1 = vadd.f32 %v1600_v16, %v13315_v35  ;;  %v4834_v63 = vld [vmem:[%s11957_s3 + $0x58] sm:$0xff] }
 0x3b9   :  { %13309 = vst [vmem:[#allocation101_spill] sm:$0xff] %v8261_v26  ;;  %13310 = vst [vmem:[#allocation81_spill] sm:$0xff] %v8263_v12  ;;  %v13316_v12 = vld [vmem:[#allocation197_spill] sm:$0xff]  ;;  %v4060_v53 = vadd.f32 1.0, %v4044_v30  ;;  %v8287_v40 = vmul.f32 0.70710677, %v8237_v61  ;;  %3079 = vperm.xlu0 %4730, %v4834_v63   ;;  %v1609_v16 = vadd.f32 %v1593_v28, %v8090_v33  ;;  %v1601_v35 = vmul.f32 %v1579_v25, %v1536_v5 }
 0x3ba   :  { %13313 = vst [vmem:[#allocation102_spill] sm:$0xff] %v8274_v49  ;;  %13314 = vst [vmem:[#allocation287_spill] sm:$0xff] %v8277_v13  ;;  %v1575_v47 = vsel %vm1571_vm8, %v13308_v20, %v13316_v12  ;;  %3007 = vrot.lane.b32.xlu1 %v13317_v8, %s4889_s19  ;;  %v8294_v41 = vpop.eup %4736  ;;  %v4062_v60 = vadd.f32 1.0, %v4046_v19  ;;  %v8298_v20 = vmul.f32 0.70710677, %v8246_v45  ;;  %v8305_v26 = vadd.f32 %v1597_v55, %v8095_v50  ;;  %v4835_v25 = vld [vmem:[%s11957_s3 + $0x68] sm:$0xff] }
 0x3bb   :  { %v8300_v30 = vpop.permute.xlu0 %2655  ;;  %v8302_v13 = vpop.eup %4738  ;;  %v1595_v63 = vmul.f32 %v1585_v39, %v8172_v46  ;;  %v1599_v43 = vmul.f32 %v1586_v3, %v8176_v32  ;;  %v8310_v57 = vmul.f32 0.70710677, %v8258_v52  ;;  %v1587_v5 = vsel %vm1571_vm8, %v13316_v12, %v13298_v2  ;;  %13342 = vst [vmem:[#allocation296_spill] sm:$0xff] %v8450_v7 }
 0x3bc   :  { %13318 = vst [vmem:[#allocation288_spill] sm:$0xff] %v8300_v30  ;;  %v8312_v33 = vpop.permute.xlu1 %2643  ;;  %v1602_v28 = vmul.f32 %v1575_v47, %v1537_v38  ;;  %v4025_v19 = vand.u32 2147483647, %v8274_v49  ;;  %v8320_v50 = vrot.slane %v4644_v34, %v13253_v18  ;;  %v4104_v46 = vmul.f32 1.0614054, %v8294_v41  ;;  %v13323_v38 = vld [vmem:[#allocation11_spill] sm:$0xff] }
 0x3bd   :  { %13319 = vst [vmem:[#allocation86_spill] sm:$0xff] %v8310_v57  ;;  %13320 = vst [vmem:[#allocation105_spill] sm:$0xff] %v8312_v33  ;;  %4740 = vrcp.f32 %v4060_v53  ;;  %v8324_v32 = vand.u32 2147483647, %v8287_v40  ;;  %v8327_v55 = vrot.slane %v4644_v34, %v13305_v62  ;;  %3207 = vperm.xlu0 %4730, %v4835_v25   ;;  %v8335_v2 = vadd.f32 %v1601_v35, %v8099_v17 }
 0x3be   :  { %13321 = vst [vmem:[#allocation84_spill] sm:$0xff] %v8320_v50  ;;  %3011 = vrot.lane.b32.xlu1 %v13323_v38, %s4889_s19  ;;  %v4106_v47 = vmul.f32 1.0614054, %v8302_v13  ;;  %4742 = vrcp.f32 %v4062_v60  ;;  %v8339_v12 = vand.u32 2147483647, %v8298_v20  ;;  %v1611_v34 = vadd.f32 %v1595_v63, %v8111_v14  ;;  %v13326_v60 = vld [vmem:[#allocation313_spill] sm:$0xff] }
 0x3bf   :  { %13322 = vst [vmem:[#allocation290_spill] sm:$0xff] %v8327_v55  ;;  %v8341_v39 = vpop.permute.xlu0 %2697  ;;  %v8345_v3 = vadd.f32 %v1599_v43, %v8115_v29  ;;  %v8348_v53 = vmul.f32 %v1587_v5, %v8202_v21  ;;  %v4027_v25 = vand.u32 2147483647, %v8310_v57  ;;  %v1618_v35 = vadd.f32 %v1602_v28, %v8123_v31  ;;  %v4836_v63 = vld [vmem:[%s11957_s3 + $0x78] sm:$0xff]  ;;  %v4837_v31 = vld [vmem:[%s11957_s3 + $0x40] sm:$0xff]  ;;  %v13329_v5 = vld [vmem:[#allocation311_spill] sm:$0xff] }
 0x3c0   :  { %13324 = vst [vmem:[#allocation87_spill] sm:$0xff] %v8341_v39  ;;  %v8351_v17 = vpop.permute.xlu1 %2651  ;;  %v8355_v30 = vmul.f32 0.5, %v13326_v60  ;;  %v4248_v33 = vsub.f32 0.0, %v8070_v51  ;;  %v4249_v39 = vsub.f32 0.0, %v4025_v19  ;;  %v8359_v14 = vmul.f32 0.5, %v8227_v6 }
 0x3c1   :  { %13325 = vst [vmem:[#allocation107_spill] sm:$0xff] %v8351_v17  ;;  %v4120_v29 = vadd.f32 -1.4531521, %v4104_v46  ;;  %v8362_v43 = vadd.f32 %v13278_v27, %v1609_v16  ;;  %v4048_v21 = vmul.f32 0.3275911, %v8324_v32  ;;  %3215 = vperm.xlu0 %4730, %v4836_v63   ;;  %v8372_v28 = vmul.f32 0.5, %v13329_v5 }
 0x3c2   :  { %13327 = vst [vmem:[#allocation85_spill] sm:$0xff] %v8355_v30  ;;  %13328 = vst [vmem:[#allocation108_spill] sm:$0xff] %v8359_v14  ;;  %3067 = vperm.xlu1 %4731, %v4837_v31   ;;  %v4122_v6 = vadd.f32 -1.4531521, %v4106_v47  ;;  %v4050_v16 = vmul.f32 0.3275911, %v8339_v12  ;;  %v4264_v31 = vmul.f32 %v4248_v33, %v8070_v51  ;;  %v4265_v5 = vmul.f32 %v4249_v39, %v4025_v19 }
 0x3c3   :  { %13330 = vst [vmem:[#allocation291_spill] sm:$0xff] %v8372_v28  ;;  %v8376_v46 = vpop.permute.xlu0 %2701  ;;  %v4041_v60 = vmul.f32 0.3275911, %v4025_v19  ;;  %v4043_v17 = vmul.f32 0.3275911, %v4027_v25  ;;  %v4250_v14 = vsub.f32 0.0, %v8078_v36  ;;  %v4136_v49 = vmul.f32 %v8294_v41, %v4120_v29 }
 0x3c4   :  { %13331 = vst [vmem:[#allocation104_spill] sm:$0xff] %v8376_v46  ;;  %v4251_v63 = vsub.f32 0.0, %v4027_v25  ;;  %v8379_v57 = vpop.permute.xlu1 %2695  ;;  %v8382_v30 = vmul.f32 0.5, %v8258_v52  ;;  %v13334_v28 = vld [vmem:[#allocation201_spill] sm:$0xff]  ;;  %v8391_v46 = vadd.f32 %v13278_v27, %v1611_v34  ;;  %v8394_v62 = vmul.f32 0.70710677, %v8362_v43 }
 0x3c5   :  { %13332 = vst [vmem:[#allocation109_spill] sm:$0xff] %v8379_v57  ;;  %v8387_v47 = vadd.f32 %v13334_v28, %v8280_v1  ;;  %v4064_v18 = vadd.f32 1.0, %v4048_v21  ;;  %v4838_v52 = vld [vmem:[%s11957_s3 + $0x88] sm:$0xff]  ;;  %v4839_v51 = vld [vmem:[%s11957_s3 + $0x50] sm:$0xff]  ;;  %v12360_v1 = vmov -1.0   ;;  %v4138_v33 = vmul.f32 %v8302_v13, %v4122_v6 }
 0x3c6   :  { %13333 = vst [vmem:[#allocation292_spill] sm:$0xff] %v8382_v30  ;;  %13335 = vst [vmem:[#allocation293_spill] sm:$0xff] %v8394_v62  ;;  %3341 = vperm.xlu0 %4730, %v4838_v52   ;;  %3075 = vperm.xlu1 %4731, %v4839_v51   ;;  %v8406_v27 = vsel %vm3992_vm9, 1.0, %v12360_v1  ;;  %v4066_v19 = vadd.f32 1.0, %v4050_v16  ;;  %v4057_v29 = vadd.f32 1.0, %v4041_v60  ;;  %v4059_v21 = vadd.f32 1.0, %v4043_v17 }
 0x3c7   :  { %v8409_v39 = vpop.permute.xlu0 %2705  ;;  %v8411_v34 = vpop.eup %4740  ;;  %v4266_v52 = vmul.f32 %v4250_v14, %v8078_v36  ;;  %v4267_v51 = vmul.f32 %v4251_v63, %v4027_v25  ;;  %v4280_v55 = vmul.f32 1.442695, %v4264_v31  ;;  %v4282_v15 = vmul.f32 1.442695, %v4265_v5  ;;  %v4840_v36 = vld [vmem:[%s11957_s3 + $0xa8] sm:$0xff]  ;;  %v4841_v25 = vld [vmem:[%s11957_s3 + $0x60] sm:$0xff] }
 0x3c8   :  { %13336 = vst [vmem:[#allocation110_spill] sm:$0xff] %v8409_v39  ;;  %v8414_v57 = vpop.permute.xlu1 %2699  ;;  %v8416_v30 = vpop.eup %4742  ;;  %v8419_v1 = vadd.f32 %v13334_v28, %v1618_v35  ;;  %v8422_v6 = vmul.f32 0.70710677, %v8387_v47  ;;  %v4152_v16 = vadd.f32 1.4214138, %v4136_v49  ;;  %4744 = vrcp.f32 %v4064_v18 }
 0x3c9   :  { %13337 = vst [vmem:[#allocation88_spill] sm:$0xff] %v8414_v57  ;;  %v8425_v39 = vmul.f32 0.70710677, %v8391_v46  ;;  %v4029_v17 = vand.u32 2147483647, %v8394_v62  ;;  %v13339_v35 = vmov -1.0   ;;  %4746 = vrcp.f32 %v4066_v19 }
 0x3ca   :  { %3391 = vperm.xlu0 %4730, %v4840_v36   ;;  %3203 = vperm.xlu1 %4731, %v4841_v25   ;;  %v8437_v49 = vsel %vm3994_vm10, 1.0, %v13339_v35  ;;  %v4154_v14 = vadd.f32 1.4214138, %v4138_v33  ;;  %v4108_v60 = vmul.f32 1.0614054, %v8411_v34  ;;  %v8444_v63 = vadd.f32 %v8348_v53, %v8136_v56 }
 0x3cb   :  { %13338 = vst [vmem:[#allocation294_spill] sm:$0xff] %v8425_v39  ;;  %v8440_v18 = vpop.permute.xlu0 %2709  ;;  %v4284_v31 = vmul.f32 1.442695, %v4266_v52  ;;  %v4286_v5 = vmul.f32 1.442695, %v4267_v51  ;;  %4748 = vrcp.f32 %v4057_v29  ;;  %v4168_v56 = vmul.f32 %v8294_v41, %v4152_v16  ;;  %v13343_v51 = vld [vmem:[#allocation3_spill] sm:$0xff] }
 0x3cc   :  { %13340 = vst [vmem:[#allocation295_spill] sm:$0xff] %v8440_v18  ;;  %v4110_v36 = vmul.f32 1.0614054, %v8416_v30  ;;  %v8447_v25 = vpop.permute.xlu1 %2703  ;;  %v8453_v33 = vmul.f32 0.70710677, %v8419_v1  ;;  %4750 = vrcp.f32 %v4059_v21  ;;  %v4170_v29 = vmul.f32 %v8302_v13, %v4154_v14 }
 0x3cd   :  { %13341 = vst [vmem:[#allocation90_spill] sm:$0xff] %v8447_v25  ;;  %v8456_v19 = vand.u32 2147483647, %v8422_v6  ;;  %v4031_v53 = vand.u32 2147483647, %v8425_v39  ;;  %v8467_v57 = vmul.f32 0.5, %v8362_v43  ;;  %4752 = vpow2.f32 %v4280_v55 }
 0x3ce   :  { %v4045_v52 = vmul.f32 0.3275911, %v4029_v17  ;;  %3121 = vrot.lane.b32.xlu0 %v13343_v51, %s4891_s21  ;;  %3211 = vperm.xlu1 %4731, %v4842_v4   ;;  %v4124_v21 = vadd.f32 -1.4531521, %v4108_v60  ;;  %v4252_v16 = vsub.f32 0.0, %v8190_v42  ;;  %v8473_v25 = vmul.f32 0.5, %v8118_v44 }
 0x3cf   :  { %13344 = vst [vmem:[#allocation111_spill] sm:$0xff] %v8467_v57  ;;  %v8470_v18 = vpop.permute.xlu0 %2713  ;;  %v4126_v39 = vadd.f32 -1.4531521, %v4110_v36  ;;  %v4253_v7 = vsub.f32 0.0, %v4029_v17  ;;  %4754 = vpow2.f32 %v4282_v15  ;;  %v8478_v4 = vmul.f32 0.5, %v8391_v46  ;;  %v13349_v44 = vld [vmem:[#allocation5_spill] sm:$0xff] }
 0x3d0   :  { %13345 = vst [vmem:[#allocation89_spill] sm:$0xff] %v8470_v18  ;;  %13346 = vst [vmem:[#allocation297_spill] sm:$0xff] %v8473_v25  ;;  %v8475_v62 = vpop.permute.xlu1 %2707  ;;  %v8481_v43 = vand.u32 2147483647, %v8453_v33  ;;  %v4052_v14 = vmul.f32 0.3275911, %v8456_v19  ;;  %v4140_v36 = vmul.f32 %v8411_v34, %v4124_v21  ;;  %4756 = vpow2.f32 %v4284_v31 }
 0x3d1   :  { %13347 = vst [vmem:[#allocation91_spill] sm:$0xff] %v8475_v62  ;;  %13348 = vst [vmem:[#allocation112_spill] sm:$0xff] %v8478_v4  ;;  %v4184_v60 = vadd.f32 -0.28449672, %v4168_v56  ;;  %v4047_v57 = vmul.f32 0.3275911, %v4031_v53  ;;  %v4268_v62 = vmul.f32 %v4252_v16, %v8190_v42  ;;  %v4142_v4 = vmul.f32 %v8416_v30, %v4126_v39 }
 0x3d2   :  { %v4061_v18 = vadd.f32 1.0, %v4045_v52  ;;  %v4254_v55 = vsub.f32 0.0, %v8205_v23  ;;  %3129 = vrot.lane.b32.xlu0 %v13349_v44, %s4891_s21  ;;  %v4843_v15 = vld [vmem:[%s11957_s3 + $0x80] sm:$0xff]  ;;  %v4186_v46 = vadd.f32 -0.28449672, %v4170_v29  ;;  %vm3996_vm11 = vcmp.ge.f32.partialorder %v8151_v0, 0.0  ;;  %v8495_v52 = vpop.eup %4744 }
 0x3d3   :  { %3337 = vperm.xlu1 %4731, %v4843_v15   ;;  %v8493_v56 = vpop.permute.xlu0 %2717  ;;  %v4255_v25 = vsub.f32 0.0, %v4031_v53  ;;  %v4269_v50 = vmul.f32 %v4253_v7, %v4029_v17  ;;  %v8500_v58 = vpop.eup %4746  ;;  %4758 = vpow2.f32 %v4286_v5  ;;  %v8504_v29 = vadd.f32 %v13303_v48, %v8305_v26  ;;  %v4844_v17 = vld [vmem:[%s11957_s3 + $0xa0] sm:$0xff] }
 0x3d4   :  { %13350 = vst [vmem:[#allocation26_spill] sm:$0xff] %v8493_v56  ;;  %v8498_v38 = vpop.permute.xlu1 %2711  ;;  %v4054_v42 = vmul.f32 0.3275911, %v8481_v43  ;;  %v4068_v21 = vadd.f32 1.0, %v4052_v14  ;;  %v4200_v16 = vmul.f32 %v8294_v41, %v4184_v60  ;;  %v4063_v15 = vadd.f32 1.0, %v4047_v57 }
 0x3d5   :  { %13351 = vst [vmem:[#allocation113_spill] sm:$0xff] %v8498_v38  ;;  %4760 = vrcp.f32 %v4061_v18  ;;  %v4270_v39 = vmul.f32 %v4254_v55, %v8205_v23  ;;  %v8514_v31 = vpop.eup %4748  ;;  %v4202_v26 = vmul.f32 %v8302_v13, %v4186_v46  ;;  %v4156_v5 = vadd.f32 1.4214138, %v4140_v36 }
 0x3d6   :  { %3137 = vrot.lane.b32.xlu0 %v13274_v37, %s4891_s21  ;;  %13352 = vst [vmem:[#allocation114_spill] sm:$0xff] %v8514_v31  ;;  %v4288_v7 = vmul.f32 1.442695, %v4268_v62  ;;  %v4112_v14 = vmul.f32 1.0614054, %v8495_v52  ;;  %v8520_v18 = vpop.eup %4750  ;;  %v4271_v60 = vmul.f32 %v4255_v25, %v4031_v53  ;;  %v4070_v62 = vadd.f32 1.0, %v4054_v42 }
 0x3d7   :  { %3387 = vperm.xlu1 %4731, %v4844_v17   ;;  %v8518_v57 = vpop.permute.xlu0 %2721  ;;  %13354 = vst [vmem:[#allocation320_spill] sm:$0xff] %v8520_v18  ;;  %v4158_v23 = vadd.f32 1.4214138, %v4142_v4  ;;  %v4290_v55 = vmul.f32 1.442695, %v4269_v50  ;;  %v1651_v17 = vadd.f32 %v13303_v48, %v8345_v3  ;;  %4762 = vrcp.f32 %v4068_v21  ;;  %v4753_v36 = vpop.eup %4752  ;;  %v13357_v50 = vld [vmem:[#allocation44_spill] sm:$0xff] }
 0x3d8   :  { %13353 = vst [vmem:[#allocation92_spill] sm:$0xff] %v8518_v57  ;;  %v4114_v56 = vmul.f32 1.0614054, %v8500_v58  ;;  %v8523_v38 = vpop.permute.xlu1 %2715  ;;  %v8528_v46 = vmul.f32 0.70710677, %v8504_v29  ;;  %vm3998_vm12 = vcmp.ge.f32.partialorder %v8164_v9, 0.0  ;;  %4764 = vrcp.f32 %v4063_v15 }
 0x3d9   :  { %13355 = vst [vmem:[#allocation94_spill] sm:$0xff] %v8523_v38  ;;  %v4216_v31 = vadd.f32 0.2548296, %v4200_v16  ;;  %v4292_v4 = vmul.f32 1.442695, %v4270_v39  ;;  %v8535_v25 = vpop.eup %4754  ;;  %v4172_v3 = vmul.f32 %v8411_v34, %v4156_v5  ;;  %4766 = vpow2.f32 %v4288_v7 }
 0x3da   :  { %13356 = vst [vmem:[#allocation115_spill] sm:$0xff] %v8528_v46  ;;  %3145 = vrot.lane.b32.xlu0 %v13290_v22, %s4891_s21  ;;  %13358 = vst [vmem:[#allocation93_spill] sm:$0xff] %v8535_v25  ;;  %v4218_v48 = vadd.f32 0.2548296, %v4202_v26  ;;  %v4128_v53 = vadd.f32 -1.4531521, %v4112_v14  ;;  %v4174_v16 = vmul.f32 %v8416_v30, %v4158_v23  ;;  %4768 = vpow2.f32 %v4290_v55  ;;  %v4757_v5 = vpop.eup %4756 }
 0x3db   :  { %3119 = vrot.lane.b32.xlu1 %v13357_v50, %s4891_s21  ;;  %v8538_v42 = vpop.permute.xlu0 %2725  ;;  %v8543_v21 = vsel %vm3996_vm11, 1.0, %v13339_v35  ;;  %v4130_v15 = vadd.f32 -1.4531521, %v4114_v56  ;;  %v4294_v38 = vmul.f32 1.442695, %v4271_v60  ;;  %4770 = vrcp.f32 %v4070_v62  ;;  %v4845_v56 = vld [vmem:[%s11957_s3 + $0xc8] sm:$0xff] }
 0x3dc   :  { %13359 = vst [vmem:[#allocation116_spill] sm:$0xff] %v8538_v42  ;;  %v8546_v39 = vpop.permute.xlu1 %2719  ;;  %v8548_v57 = vmul.f32 0.70710677, %v1651_v17  ;;  %v4033_v26 = vand.u32 2147483647, %v8528_v46  ;;  %v4232_v7 = vmul.f32 %v8294_v41, %v4216_v31  ;;  %v8555_v0 = vsel %vm3998_vm12, 1.0, %v13339_v35 }
 0x3dd   :  { %13360 = vst [vmem:[#allocation300_spill] sm:$0xff] %v8546_v39  ;;  %4772 = vpow2.f32 %v4292_v4  ;;  %v8558_v14 = vmul.f32 0.5, %v8237_v61  ;;  %v8565_v23 = vpop.eup %4758  ;;  %v4234_v41 = vmul.f32 %v8302_v13, %v4218_v48  ;;  %v4188_v31 = vadd.f32 -0.28449672, %v4172_v3 }
 0x3de   :  { %13361 = vst [vmem:[#allocation301_spill] sm:$0xff] %v8548_v57  ;;  %3527 = vperm.xlu0 %4730, %v4845_v56   ;;  %13363 = vst [vmem:[#allocation321_spill] sm:$0xff] %v8565_v23  ;;  %vm4000_vm13 = vcmp.ge.f32.partialorder %v8287_v40, 0.0  ;;  %v4144_v9 = vmul.f32 %v8495_v52, %v4128_v53  ;;  %v4190_v55 = vadd.f32 -0.28449672, %v4174_v16  ;;  %v8575_v62 = vmul.f32 0.5, %v8504_v29 }
 0x3df   :  { %13362 = vst [vmem:[#allocation117_spill] sm:$0xff] %v8558_v14  ;;  %3127 = vrot.lane.b32.xlu1 %v13280_v24, %s4891_s21  ;;  %v8570_v60 = vpop.permute.xlu0 %2781  ;;  %v8572_v61 = vpop.eup %4760  ;;  %v8578_v4 = vmul.f32 0.5, %v8246_v45  ;;  %v4146_v56 = vmul.f32 %v8500_v58, %v4130_v15  ;;  %4774 = vpow2.f32 %v4294_v38  ;;  %v8583_v13 = vmul.f32 0.5, %v1651_v17 }
 0x3e0   :  { %13364 = vst [vmem:[#allocation322_spill] sm:$0xff] %v8570_v60  ;;  %13365 = vst [vmem:[#allocation305_spill] sm:$0xff] %v8572_v61  ;;  %v8581_v42 = vpop.permute.xlu1 %2723  ;;  %v4035_v40 = vand.u32 2147483647, %v8548_v57  ;;  %v4049_v48 = vmul.f32 0.3275911, %v4033_v26  ;;  %v4312_v3 = vmul.f32 %v4753_v36, %v4232_v7  ;;  %v4314_v38 = vmul.f32 %v4757_v5, %v4234_v41 }
 0x3e1   :  { %13366 = vst [vmem:[#allocation95_spill] sm:$0xff] %v8575_v62  ;;  %13367 = vst [vmem:[#allocation306_spill] sm:$0xff] %v8578_v4  ;;  %vm4002_vm14 = vcmp.ge.f32.partialorder %v8298_v20, 0.0  ;;  %v8588_v53 = vsel %vm4000_vm13, 1.0, %v13339_v35  ;;  %v4256_v29 = vsub.f32 0.0, %v8324_v32  ;;  %v8595_v45 = vpop.eup %4762  ;;  %v4204_v17 = vmul.f32 %v8411_v34, %v4188_v31  ;;  %v13453_v61 = vld [vmem:[#allocation226_spill] sm:$0xff] }
 0x3e2   :  { %13368 = vst [vmem:[#allocation29_spill] sm:$0xff] %v8581_v42  ;;  %13369 = vst [vmem:[#allocation308_spill] sm:$0xff] %v8583_v13  ;;  %3257 = vrot.lane.b32.xlu0 %v13343_v51, %s4892_s30  ;;  %v4160_v36 = vadd.f32 1.4214138, %v4144_v9  ;;  %v4257_v16 = vsub.f32 0.0, %v4033_v26  ;;  %v8598_v15 = vpop.eup %4764  ;;  %v4206_v7 = vmul.f32 %v8416_v30, %v4190_v55  ;;  %v4258_v42 = vsub.f32 0.0, %v8339_v12 }
 0x3e3   :  { %3135 = vrot.lane.b32.xlu1 %v13296_v54, %s4891_s21  ;;  %13370 = vst [vmem:[#allocation324_spill] sm:$0xff] %v8598_v15  ;;  %v4162_v13 = vadd.f32 1.4214138, %v4146_v56  ;;  %v1653_v60 = vadd.f32 %v13334_v28, %v8335_v2  ;;  %v4767_v62 = vpop.eup %4766  ;;  %v4051_v23 = vmul.f32 0.3275911, %v4035_v40  ;;  %v4065_v25 = vadd.f32 1.0, %v4049_v48  ;;  %v8608_v31 = vpop.permute.xlu0 %2811 }
 0x3e4   :  { %v8604_v39 = vpop.permute.xlu1 %2777  ;;  %v4259_v5 = vsub.f32 0.0, %v4035_v40  ;;  %v1655_v41 = vadd.f32 %v13334_v28, %v8444_v63  ;;  %13372 = vst [vmem:[#allocation309_spill] sm:$0xff] %v8608_v31  ;;  %v8610_v9 = vpop.eup %4768  ;;  %v4328_v55 = vsub.f32 1.0, %v4312_v3  ;;  %v8615_v56 = vsel %vm4002_vm14, 1.0, %v13339_v35 }
 0x3e5   :  { %13371 = vst [vmem:[#allocation323_spill] sm:$0xff] %v8604_v39  ;;  %13373 = vst [vmem:[#allocation325_spill] sm:$0xff] %v8610_v9  ;;  %v4272_v2 = vmul.f32 %v4256_v29, %v8324_v32  ;;  %v4116_v39 = vmul.f32 1.0614054, %v8595_v45  ;;  %v8623_v28 = vpop.eup %4770  ;;  %v4330_v63 = vsub.f32 1.0, %v4314_v38  ;;  %v4176_v3 = vmul.f32 %v8495_v52, %v4160_v36 }
 0x3e6   :  { %3265 = vrot.lane.b32.xlu0 %v13349_v44, %s4892_s30  ;;  %v4220_v48 = vadd.f32 0.2548296, %v4204_v17  ;;  %v4273_v31 = vmul.f32 %v4257_v16, %v4033_v26  ;;  %v4222_v9 = vadd.f32 0.2548296, %v4206_v7  ;;  %v4178_v57 = vmul.f32 %v8500_v58, %v4162_v13 }
 0x3e7   :  { %3143 = vrot.lane.b32.xlu1 %v13317_v8, %s4891_s21  ;;  %v4773_v20 = vpop.eup %4772  ;;  %v4274_v32 = vmul.f32 %v4258_v42, %v8339_v12  ;;  %v8628_v29 = vmul.f32 0.70710677, %v1653_v60  ;;  %v4067_v46 = vadd.f32 1.0, %v4051_v23  ;;  %4776 = vrcp.f32 %v4065_v25  ;;  %v8634_v38 = vpop.permute.xlu0 %2823  ;;  %v4846_v12 = vld [vmem:[%s11957_s3 + $0xc0] sm:$0xff] }
 0x3e8   :  { %v8630_v4 = vpop.permute.xlu1 %2785  ;;  %v4275_v14 = vmul.f32 %v4259_v5, %v4035_v40  ;;  %v8632_v44 = vmul.f32 0.70710677, %v1655_v41  ;;  %13377 = vst [vmem:[#allocation99_spill] sm:$0xff] %v8634_v38  ;;  %v8637_v17 = vmul.f32 %v4328_v55, %v8406_v27  ;;  %v4296_v26 = vmul.f32 1.442695, %v4272_v2  ;;  %v13407_v38 = vld [vmem:[#allocation208_spill] sm:$0xff] }
 0x3e9   :  { %13374 = vst [vmem:[#allocation98_spill] sm:$0xff] %v8628_v29  ;;  %13375 = vst [vmem:[#allocation118_spill] sm:$0xff] %v8630_v4  ;;  %v4118_v36 = vmul.f32 1.0614054, %v8623_v28  ;;  %v4132_v13 = vadd.f32 -1.4531521, %v4116_v39  ;;  %v8645_v25 = vpop.eup %4774  ;;  %v8648_v42 = vmul.f32 %v4330_v63, %v8437_v49  ;;  %v4236_v27 = vmul.f32 %v8411_v34, %v4220_v48 }
 0x3ea   :  { %13376 = vst [vmem:[#allocation96_spill] sm:$0xff] %v8632_v44  ;;  %13378 = vst [vmem:[#allocation119_spill] sm:$0xff] %v8637_v17  ;;  %3273 = vrot.lane.b32.xlu0 %v13274_v37, %s4892_s30  ;;  %v4192_v23 = vadd.f32 -0.28449672, %v4176_v3  ;;  %v4298_v40 = vmul.f32 1.442695, %v4273_v31  ;;  %v4238_v16 = vmul.f32 %v8416_v30, %v4222_v9  ;;  %4778 = vrcp.f32 %v4067_v46 }
 0x3eb   :  { %3523 = vperm.xlu1 %4731, %v4846_v12   ;;  %13379 = vst [vmem:[#allocation97_spill] sm:$0xff] %v8645_v25  ;;  %13380 = vst [vmem:[#allocation120_spill] sm:$0xff] %v8648_v42  ;;  %v4194_v39 = vadd.f32 -0.28449672, %v4178_v57  ;;  %v4300_v7 = vmul.f32 1.442695, %v4274_v32  ;;  %v8662_v34 = vpop.permute.xlu0 %2865  ;;  %4780 = vpow2.f32 %v4296_v26  ;;  %v4148_v31 = vmul.f32 %v8595_v45, %v4132_v13 }
 0x3ec   :  { %v4037_v5 = vand.u32 2147483647, %v8628_v29  ;;  %v8653_v55 = vpop.permute.xlu1 %2789  ;;  %v4302_v2 = vmul.f32 1.442695, %v4275_v14  ;;  %v8656_v12 = vmul.f32 0.5, %v8387_v47  ;;  %13383 = vst [vmem:[#allocation36_spill] sm:$0xff] %v8662_v34  ;;  %v4316_v47 = vmul.f32 %v4767_v62, %v4236_v27 }
 0x3ed   :  { %13381 = vst [vmem:[#allocation121_spill] sm:$0xff] %v8653_v55  ;;  %v8659_v49 = vand.u32 2147483647, %v8632_v44  ;;  %v8664_v30 = vmul.f32 0.5, %v1653_v60  ;;  %v4134_v57 = vadd.f32 -1.4531521, %v4118_v36  ;;  %v4208_v46 = vmul.f32 %v8495_v52, %v4192_v23 }
 0x3ee   :  { %13382 = vst [vmem:[#allocation31_spill] sm:$0xff] %v8656_v12  ;;  %3281 = vrot.lane.b32.xlu0 %v13290_v22, %s4892_s30  ;;  %v8673_v14 = vmul.f32 0.5, %v8419_v1  ;;  %v4260_v9 = vsub.f32 0.0, %v8456_v19  ;;  %v4318_v63 = vmul.f32 %v4773_v20, %v4238_v16  ;;  %v4210_v60 = vmul.f32 %v8500_v58, %v4194_v39  ;;  %v4847_v27 = vld [vmem:[%s11957_s3 + $0x98] sm:$0xff]  ;;  %v13418_v29 = vld [vmem:[#allocation216_spill] sm:$0xff]  ;;  %v13449_v17 = vld [vmem:[#allocation230_spill] sm:$0xff] }
 0x3ef   :  { %13384 = vst [vmem:[#allocation326_spill] sm:$0xff] %v8664_v30  ;;  %3255 = vrot.lane.b32.xlu1 %v13357_v50, %s4892_s30  ;;  %4782 = vpow2.f32 %v4298_v40  ;;  %v4053_v48 = vmul.f32 0.3275911, %v4037_v5  ;;  %v8677_v3 = vmul.f32 0.5, %v1655_v41  ;;  %v4055_v32 = vmul.f32 0.3275911, %v8659_v49  ;;  %v8680_v36 = vpop.permute.xlu0 %2869 }
 0x3f0   :  { %13385 = vst [vmem:[#allocation33_spill] sm:$0xff] %v8673_v14  ;;  %4784 = vpow2.f32 %v4300_v7  ;;  %v4261_v26 = vsub.f32 0.0, %v4037_v5  ;;  %13387 = vst [vmem:[#allocation328_spill] sm:$0xff] %v8680_v36  ;;  %v8682_v62 = vpop.permute.xlu1 %2815  ;;  %vm4004_vm0 = vcmp.ge.f32.partialorder %v8422_v6, 0.0  ;;  %v4150_v1 = vmul.f32 %v8623_v28, %v4134_v57  ;;  %v4848_v6 = vld [vmem:[%s11957_s3 + $0xb8] sm:$0xff]  ;;  %v13403_v36 = vld [vmem:[#allocation211_spill] sm:$0xff] }
 0x3f1   :  { %13386 = vst [vmem:[#allocation37_spill] sm:$0xff] %v8677_v3  ;;  %13388 = vst [vmem:[#allocation329_spill] sm:$0xff] %v8682_v62  ;;  %v4164_v13 = vadd.f32 1.4214138, %v4148_v31  ;;  %v4262_v20 = vsub.f32 0.0, %v8481_v43  ;;  %v8692_v41 = vpop.eup %4776  ;;  %v4332_v23 = vsub.f32 1.0, %v4316_v47  ;;  %v4276_v16 = vmul.f32 %v4260_v9, %v8456_v19 }
 0x3f2   :  { %3349 = vperm.xlu0 %4730, %v4847_v27   ;;  %13389 = vst [vmem:[#allocation330_spill] sm:$0xff] %v8692_v41  ;;  %v4224_v40 = vadd.f32 0.2548296, %v4208_v46  ;;  %vm4006_vm1 = vcmp.ge.f32.partialorder %v8453_v33, 0.0  ;;  %v4334_v39 = vsub.f32 1.0, %v4318_v63  ;;  %4786 = vpow2.f32 %v4302_v2  ;;  %v13406_v62 = vld [vmem:[#allocation212_spill] sm:$0xff] }
 0x3f3   :  { %3263 = vrot.lane.b32.xlu1 %v13280_v24, %s4892_s30  ;;  %v4226_v7 = vadd.f32 0.2548296, %v4210_v60  ;;  %v4069_v57 = vadd.f32 1.0, %v4053_v48  ;;  %v8699_v31 = vsel %vm4004_vm0, 1.0, %v13339_v35  ;;  %v4071_v27 = vadd.f32 1.0, %v4055_v32  ;;  %v8702_v4 = vpop.permute.xlu0 %2873  ;;  %v13394_v48 = vld [vmem:[#allocation204_spill] sm:$0xff] }
 0x3f4   :  { %v4263_v3 = vsub.f32 0.0, %v8659_v49  ;;  %v4277_v55 = vmul.f32 %v4261_v26, %v4037_v5  ;;  %13390 = vst [vmem:[#allocation30_spill] sm:$0xff] %v8702_v4  ;;  %v8704_v47 = vpop.permute.xlu1 %2819  ;;  %v8707_v33 = vsel %vm4006_vm1, 1.0, %v13339_v35  ;;  %v4166_v19 = vadd.f32 1.4214138, %v4150_v1  ;;  %v8716_v5 = vpop.eup %4778  ;;  %v13395_v32 = vld [vmem:[#allocation304_spill] sm:$0xff] }
 0x3f5   :  { %13391 = vst [vmem:[#allocation333_spill] sm:$0xff] %v8704_v47  ;;  %v4180_v2 = vmul.f32 %v8595_v45, %v4164_v13  ;;  %v4278_v46 = vmul.f32 %v4262_v20, %v8481_v43  ;;  %13392 = vst [vmem:[#allocation106_spill] sm:$0xff] %v8716_v5  ;;  %v8719_v9 = vmul.f32 %v4332_v23, %v8543_v21  ;;  %v4304_v60 = vmul.f32 1.442695, %v4276_v16  ;;  %v4781_v43 = vpop.eup %4780  ;;  %v13397_v20 = vld [vmem:[#allocation209_spill] sm:$0xff]  ;;  %v13399_v23 = vld [vmem:[#allocation203_spill] sm:$0xff] }
 0x3f6   :  { %3399 = vperm.xlu0 %4730, %v4848_v6   ;;  %v4240_v63 = vmul.f32 %v8495_v52, %v4224_v40  ;;  %v1700_v26 = vmul.f32 %v13395_v32, %v13394_v48  ;;  %v8725_v1 = vmul.f32 %v4334_v39, %v8555_v0  ;;  %v4242_v13 = vmul.f32 %v8500_v58, %v4226_v7  ;;  %v13398_v6 = vld [vmem:[#allocation205_spill] sm:$0xff]  ;;  %v13409_v30 = vld [vmem:[#allocation214_spill] sm:$0xff] }
 0x3f7   :  { %3271 = vrot.lane.b32.xlu1 %v13296_v54, %s4892_s30  ;;  %13393 = vst [vmem:[#allocation332_spill] sm:$0xff] %v8719_v9  ;;  %4788 = vrcp.f32 %v4069_v57  ;;  %v1753_v47 = vsel %vm1743_vm15, %v13398_v6, %v13397_v20  ;;  %v8733_v21 = vmul.f32 %v4263_v3, %v8659_v49  ;;  %v8735_v52 = vmul.f32 1.442695, %v4277_v55  ;;  %v8739_v16 = vpop.permute.xlu0 %2877  ;;  %v4849_v55 = vld [vmem:[%s11957_s3 + $0xe8] sm:$0xff]  ;;  %v13408_v4 = vld [vmem:[#allocation213_spill] sm:$0xff]  ;;  %v13417_v54 = vld [vmem:[#allocation12_spill] sm:$0xff] }
 0x3f8   :  { %13396 = vst [vmem:[#allocation334_spill] sm:$0xff] %v8725_v1  ;;  %4790 = vrcp.f32 %v4071_v27  ;;  %v1708_v40 = vmul.f32 %v13395_v32, %v13399_v23  ;;  %13400 = vst [vmem:[#allocation335_spill] sm:$0xff] %v8739_v16  ;;  %v8741_v0 = vpop.permute.xlu1 %2863  ;;  %v4182_v39 = vmul.f32 %v8623_v28, %v4166_v19  ;;  %v4196_v7 = vadd.f32 -0.28449672, %v4180_v2  ;;  %v13404_v27 = vld [vmem:[#allocation207_spill] sm:$0xff]  ;;  %v13405_v19 = vld [vmem:[#allocation202_spill] sm:$0xff] }
 0x3f9   :  { %13401 = vst [vmem:[#allocation41_spill] sm:$0xff] %v8741_v0  ;;  %v8743_v58 = vpop.eup %4782  ;;  %v4308_v57 = vmul.f32 1.442695, %v4278_v46  ;;  %v1755_v49 = vsel %vm1743_vm15, %v13404_v27, %v13403_v36  ;;  %v4320_v0 = vmul.f32 %v4781_v43, %v4240_v63  ;;  %4792 = vpow2.f32 %v4304_v60  ;;  %v13411_v60 = vld [vmem:[#allocation314_spill] sm:$0xff] }
 0x3fa   :  { %13402 = vst [vmem:[#allocation27_spill] sm:$0xff] %v8743_v58  ;;  %3663 = vperm.xlu0 %4730, %v4849_v55   ;;  %v4785_v3 = vpop.eup %4784  ;;  %v8755_v16 = vmul.f32 %v1753_v47, %v1700_v26  ;;  %v1696_v2 = vmul.f32 %v13395_v32, %v13405_v19  ;;  %v1752_v34 = vsel %vm1743_vm15, %v13407_v38, %v13406_v62  ;;  %v13410_v58 = vld [vmem:[#allocation210_spill] sm:$0xff]  ;;  %v8934_v15 = vmul.f32 1.442695, %v8733_v21 }
 0x3fb   :  { %3279 = vrot.lane.b32.xlu1 %v13317_v8, %s4892_s30  ;;  %v4322_v46 = vmul.f32 %v4785_v3, %v4242_v13  ;;  %v1749_v55 = vsel %vm1743_vm15, %v13397_v20, %v13408_v4  ;;  %v1754_v47 = vsel %vm1743_vm15, %v13410_v58, %v13409_v30  ;;  %v8771_v63 = vmul.f32 %v1755_v49, %v1708_v40  ;;  %v13412_v43 = vld [vmem:[#allocation206_spill] sm:$0xff]  ;;  %v13413_v3 = vld [vmem:[#allocation215_spill] sm:$0xff]  ;;  %v8782_v20 = vpop.permute.xlu0 %2881 }
 0x3fc   :  { %v1701_v26 = vmul.f32 %v13411_v60, %v13394_v48  ;;  %v1704_v13 = vmul.f32 %v13395_v32, %v13412_v43  ;;  %v1751_v25 = vsel %vm1743_vm15, %v13403_v36, %v13413_v3  ;;  %13414 = vst [vmem:[#allocation122_spill] sm:$0xff] %v8782_v20  ;;  %v8784_v5 = vpop.permute.xlu1 %2867  ;;  %v8786_v8 = vpop.eup %4786  ;;  %v4198_v40 = vadd.f32 -0.28449672, %v4182_v39  ;;  %v4850_v36 = vld [vmem:[%s11957_s3 + $0x90] sm:$0xff]  ;;  %13452 = vst [vmem:[#allocation145_spill] sm:$0xff] %v8934_v15 }
 0x3fd   :  { %13415 = vst [vmem:[#allocation18_spill] sm:$0xff] %v8784_v5  ;;  %13416 = vst [vmem:[#allocation42_spill] sm:$0xff] %v8786_v8  ;;  %v4212_v49 = vmul.f32 %v8595_v45, %v4196_v7  ;;  %4794 = vpow2.f32 %v4308_v57  ;;  %v1709_v32 = vmul.f32 %v13411_v60, %v13399_v23  ;;  %v4336_v20 = vsub.f32 1.0, %v4320_v0 }
 0x3fe   :  { %3125 = vrot.lane.b32.xlu0 %v13417_v54, %s4891_s21  ;;  %v8796_v44 = vmul.f32 %v1752_v34, %v1696_v2  ;;  %v8798_v5 = vmul.f32 %v1749_v55, %v1701_v26  ;;  %v8800_v39 = vmul.f32 %v1754_v47, %v1704_v13  ;;  %v4338_v7 = vsub.f32 1.0, %v4322_v46  ;;  %v13420_v34 = vld [vmem:[#allocation56_spill] sm:$0xff]  ;;  %v13421_v55 = vld [vmem:[#allocation217_spill] sm:$0xff] }
 0x3ff   :  { %3345 = vperm.xlu1 %4731, %v4850_v36   ;;  %v8802_v57 = vmul.f32 %v1751_v25, %v1709_v32  ;;  %v1697_v8 = vmul.f32 %v13411_v60, %v13405_v19  ;;  %v1748_v24 = vsel %vm1743_vm15, %v13406_v62, %v13418_v29  ;;  %v13419_v36 = vld [vmem:[#allocation76_spill] sm:$0xff]  ;;  %v1702_v2 = vmul.f32 %v13420_v34, %v13394_v48  ;;  %v8822_v47 = vpop.permute.xlu0 %2885 }
 0x400   :  { %v1699_v0 = vmul.f32 %v13419_v36, %v13394_v48  ;;  %v1745_v25 = vsel %vm1743_vm15, %v13408_v4, %v13421_v55  ;;  %v1757_v46 = vsel %vm1743_vm15, %v13421_v55, %v13398_v6  ;;  %13422 = vst [vmem:[#allocation123_spill] sm:$0xff] %v8822_v47  ;;  %v8824_v26 = vpop.permute.xlu1 %2871  ;;  %v4214_v13 = vmul.f32 %v8623_v28, %v4198_v40  ;;  %v13425_v48 = vld [vmem:[#allocation218_spill] sm:$0xff]  ;;  %v13426_v4 = vld [vmem:[#allocation219_spill] sm:$0xff]  ;;  %v4851_v55 = vld [vmem:[%s11957_s3 + $0xb0] sm:$0xff] }
 0x401   :  { %13423 = vst [vmem:[#allocation135_spill] sm:$0xff] %v8824_v26  ;;  %v8826_v62 = vpop.eup %4788  ;;  %v4228_v32 = vadd.f32 0.2548296, %v4212_v49  ;;  %v1750_v14 = vsel %vm1743_vm15, %v13409_v30, %v13425_v48  ;;  %v1759_v12 = vsel %vm1743_vm15, %v13426_v4, %v13404_v27  ;;  %v13427_v6 = vld [vmem:[#allocation14_spill] sm:$0xff]  ;;  %v8845_v49 = vmul.f32 %v4336_v20, %v8588_v53 }
 0x402   :  { %13424 = vst [vmem:[#allocation127_spill] sm:$0xff] %v8826_v62  ;;  %3133 = vrot.lane.b32.xlu0 %v13427_v6, %s4891_s21  ;;  %v8842_v40 = vpop.eup %4790  ;;  %v8847_v26 = vmul.f32 %v1748_v24, %v1697_v8  ;;  %v1705_v30 = vmul.f32 %v13411_v60, %v13412_v43  ;;  %v1707_v27 = vmul.f32 %v13419_v36, %v13399_v23  ;;  %v13446_v62 = vld [vmem:[#allocation319_spill] sm:$0xff]  ;;  %4796 = vpow2.f32 %v8735_v52 }
 0x403   :  { %3395 = vperm.xlu1 %4731, %v4851_v55   ;;  %13428 = vst [vmem:[#allocation124_spill] sm:$0xff] %v8842_v40  ;;  %13429 = vst [vmem:[#allocation137_spill] sm:$0xff] %v8845_v49  ;;  %v8854_v47 = vmul.f32 %v4338_v7, %v8615_v56  ;;  %v8856_v50 = vmul.f32 %v1757_v46, %v1699_v0  ;;  %v8858_v22 = vmul.f32 %v1745_v25, %v1702_v2  ;;  %v4793_v53 = vpop.eup %4792  ;;  %v8872_v60 = vpop.permute.xlu0 %2889  ;;  %v13435_v2 = vld [vmem:[#allocation220_spill] sm:$0xff]  ;;  %v13436_v25 = vld [vmem:[#allocation222_spill] sm:$0xff] }
 0x404   :  { %v1710_v55 = vmul.f32 %v13420_v34, %v13399_v23  ;;  %v8862_v20 = vmul.f32 %v1750_v14, %v1705_v30  ;;  %v1747_v24 = vsel %vm1743_vm15, %v13413_v3, %v13426_v4  ;;  %v8868_v8 = vmul.f32 %v1759_v12, %v1707_v27  ;;  %13433 = vst [vmem:[#allocation126_spill] sm:$0xff] %v8872_v60  ;;  %v8874_v7 = vpop.permute.xlu1 %2875  ;;  %v4852_v12 = vld [vmem:[%s11957_s3 + $0xe0] sm:$0xff]  ;;  %v13437_v46 = vld [vmem:[#allocation221_spill] sm:$0xff]  ;;  %v13443_v60 = vld [vmem:[#allocation224_spill] sm:$0xff] }
 0x405   :  { %13430 = vst [vmem:[#allocation129_spill] sm:$0xff] %v8854_v47  ;;  %v1695_v56 = vmul.f32 %v13419_v36, %v13405_v19  ;;  %13434 = vst [vmem:[#allocation141_spill] sm:$0xff] %v8874_v7  ;;  %v4230_v0 = vadd.f32 0.2548296, %v4214_v13  ;;  %v4244_v23 = vmul.f32 %v8595_v45, %v4228_v32  ;;  %v1698_v14 = vmul.f32 %v13420_v34, %v13405_v19  ;;  %v13438_v4 = vld [vmem:[#allocation229_spill] sm:$0xff]  ;;  %v13442_v7 = vld [vmem:[#allocation227_spill] sm:$0xff] }
 0x406   :  { %13431 = vst [vmem:[#allocation139_spill] sm:$0xff] %v8862_v20  ;;  %13432 = vst [vmem:[#allocation131_spill] sm:$0xff] %v8868_v8  ;;  %v1744_v3 = vsel %vm1743_vm15, %v13418_v29, %v13435_v2  ;;  %3141 = vrot.lane.b32.xlu0 %v13279_v59, %s4891_s21  ;;  %v1756_v45 = vsel %vm1743_vm15, %v13435_v2, %v13407_v38  ;;  %v1746_v19 = vsel %vm1743_vm15, %v13425_v48, %v13436_v25  ;;  %v13439_v30 = vld [vmem:[#allocation225_spill] sm:$0xff]  ;;  %v13440_v38 = vld [vmem:[#allocation223_spill] sm:$0xff] }
 0x407   :  { %3659 = vperm.xlu1 %4731, %v4852_v12   ;;  %v1758_v29 = vsel %vm1743_vm15, %v13436_v25, %v13410_v58  ;;  %v1820_v13 = vmul.f32 %v8215_v10, %v13437_v46  ;;  %v4795_v32 = vpop.eup %4794  ;;  %v1873_v27 = vsel %vm1863_vm2, %v13439_v30, %v13438_v4  ;;  %v1828_v2 = vmul.f32 %v8215_v10, %v13440_v38  ;;  %v13441_v12 = vld [vmem:[#allocation231_spill] sm:$0xff]  ;;  %v13444_v25 = vld [vmem:[#allocation232_spill] sm:$0xff]  ;;  %v13447_v47 = vld [vmem:[#allocation233_spill] sm:$0xff]  ;;  %v8928_v9 = vpop.permute.xlu0 %2893 }
 0x408   :  { %v1875_v48 = vsel %vm1863_vm2, %v13442_v7, %v13441_v12  ;;  %v1816_v58 = vmul.f32 %v8215_v10, %v13443_v60  ;;  %v13445_v40 = vld [vmem:[#allocation228_spill] sm:$0xff]  ;;  %v1821_v37 = vmul.f32 %v13446_v62, %v13437_v46  ;;  %v1869_v41 = vsel %vm1863_vm2, %v13438_v4, %v13447_v47  ;;  %v13448_v49 = vld [vmem:[#allocation234_spill] sm:$0xff]  ;;  %13450 = vst [vmem:[#allocation133_spill] sm:$0xff] %v8928_v9  ;;  %v8930_v1 = vpop.permute.xlu1 %2879  ;;  %v13455_v8 = vld [vmem:[#allocation7_spill] sm:$0xff] }
 0x409   :  { %v1872_v35 = vsel %vm1863_vm2, %v13445_v40, %v13444_v25  ;;  %v1874_v42 = vsel %vm1863_vm2, %v13449_v17, %v13448_v49  ;;  %13451 = vst [vmem:[#allocation143_spill] sm:$0xff] %v8930_v1  ;;  %v4246_v51 = vmul.f32 %v8623_v28, %v4230_v0  ;;  %v4324_v18 = vmul.f32 %v4793_v53, %v4244_v23  ;;  %v13454_v4 = vld [vmem:[#allocation40_spill] sm:$0xff] }
 0x40a   :  { %v1824_v59 = vmul.f32 %v8215_v10, %v13453_v61  ;;  %3149 = vrot.lane.b32.xlu0 %v13454_v4, %s4891_s21  ;;  %v1703_v9 = vmul.f32 %v13419_v36, %v13412_v43  ;;  %v1706_v1 = vmul.f32 %v13420_v34, %v13412_v43  ;;  %v1885_v28 = vmul.f32 %v1873_v27, %v1820_v13  ;;  %v13458_v13 = vld [vmem:[#allocation235_spill] sm:$0xff] }
 0x40b   :  { %3123 = vrot.lane.b32.xlu1 %v13455_v8, %s4891_s21  ;;  %v1893_v0 = vmul.f32 %v1875_v48, %v1828_v2  ;;  %v8946_v21 = vmul.f32 %v1747_v24, %v1710_v55  ;;  %v1881_v53 = vmul.f32 %v1872_v35, %v1816_v58  ;;  %v1886_v23 = vmul.f32 %v1869_v41, %v1821_v37  ;;  %v8956_v15 = vpop.permute.xlu0 %2935  ;;  %v13468_v58 = vld [vmem:[#allocation239_spill] sm:$0xff] }
 0x40c   :  { %v1889_v6 = vmul.f32 %v1874_v42, %v1824_v59  ;;  %v8948_v10 = vmul.f32 %v1756_v45, %v1695_v56  ;;  %v8950_v20 = vmul.f32 %v1744_v3, %v1698_v14  ;;  %v8952_v4 = vmul.f32 %v1758_v29, %v1703_v9  ;;  %13456 = vst [vmem:[#allocation147_spill] sm:$0xff] %v8956_v15  ;;  %v8958_v36 = vpop.permute.xlu1 %2883  ;;  %v13459_v59 = vld [vmem:[#allocation236_spill] sm:$0xff]  ;;  %v4853_v42 = vld [vmem:[%s11957_s3 + $0xd8] sm:$0xff] }
 0x40d   :  { %v8954_v8 = vmul.f32 %v1746_v19, %v1706_v1  ;;  %13457 = vst [vmem:[#allocation149_spill] sm:$0xff] %v8958_v36  ;;  %v4326_v43 = vmul.f32 %v4795_v32, %v4246_v51  ;;  %v4340_v34 = vsub.f32 1.0, %v4324_v18  ;;  %v1871_v37 = vsel %vm1863_vm2, %v13441_v12, %v13458_v13  ;;  %v13460_v51 = vld [vmem:[#allocation21_spill] sm:$0xff]  ;;  %v13462_v45 = vld [vmem:[#allocation100_spill] sm:$0xff] }
 0x40e   :  { %v1868_v35 = vsel %vm1863_vm2, %v13444_v25, %v13459_v59  ;;  %3535 = vperm.xlu0 %4730, %v4853_v42   ;;  %v8975_v18 = vadd.f32 %v1885_v28, %v8755_v16  ;;  %v8978_v41 = vadd.f32 %v1893_v0, %v8771_v63  ;;  %v1829_v9 = vmul.f32 %v13446_v62, %v13440_v38  ;;  %v13461_v16 = vld [vmem:[#allocation237_spill] sm:$0xff]  ;;  %v13463_v29 = vld [vmem:[#allocation80_spill] sm:$0xff]  ;;  %v13473_v42 = vld [vmem:[#allocation11_spill] sm:$0xff] }
 0x40f   :  { %3131 = vrot.lane.b32.xlu1 %v13460_v51, %s4891_s21  ;;  %v1817_v1 = vmul.f32 %v13446_v62, %v13443_v60  ;;  %v8985_v55 = vadd.f32 %v1881_v53, %v8796_v44  ;;  %v8988_v24 = vadd.f32 %v1886_v23, %v8798_v5  ;;  %v8991_v56 = vadd.f32 %v1889_v6, %v8800_v39  ;;  %v9001_v32 = vpop.permute.xlu0 %2943  ;;  %v13467_v12 = vld [vmem:[#allocation8_spill] sm:$0xff] }
 0x410   :  { %v1877_v63 = vsel %vm1863_vm2, %v13461_v16, %v13439_v30  ;;  %v1894_v14 = vmul.f32 %v1871_v37, %v1829_v9  ;;  %v1819_v19 = vmul.f32 %v13462_v45, %v13437_v46  ;;  %v1822_v44 = vmul.f32 %v13463_v29, %v13437_v46  ;;  %13464 = vst [vmem:[#allocation151_spill] sm:$0xff] %v9001_v32  ;;  %v9003_v5 = vpop.permute.xlu1 %2887  ;;  %v13466_v30 = vld [vmem:[#allocation238_spill] sm:$0xff]  ;;  %v4854_v46 = vld [vmem:[%s11957_s3 + $0x108] sm:$0xff]  ;;  %v13469_v0 = vld [vmem:[#allocation240_spill] sm:$0xff] }
 0x411   :  { %v1882_v3 = vmul.f32 %v1868_v35, %v1817_v1  ;;  %13465 = vst [vmem:[#allocation153_spill] sm:$0xff] %v9003_v5  ;;  %v4342_v27 = vsub.f32 1.0, %v4326_v43  ;;  %v9006_v39 = vmul.f32 %v4340_v34, %v8699_v31  ;;  %v1865_v6 = vsel %vm1863_vm2, %v13447_v47, %v13461_v16  ;;  %v13472_v35 = vld [vmem:[#allocation242_spill] sm:$0xff]  ;;  %v13512_v36 = vld [vmem:[#allocation320_spill] sm:$0xff] }
 0x412   :  { %v1870_v2 = vsel %vm1863_vm2, %v13448_v49, %v13466_v30  ;;  %3799 = vperm.xlu0 %4730, %v4854_v46   ;;  %v1884_v31 = vmul.f32 %v1877_v63, %v1819_v19  ;;  %v1825_v48 = vmul.f32 %v13446_v62, %v13453_v61  ;;  %v1867_v47 = vsel %vm1863_vm2, %v13458_v13, %v13468_v58  ;;  %v13482_v46 = vld [vmem:[#allocation14_spill] sm:$0xff] }
 0x413   :  { %3139 = vrot.lane.b32.xlu1 %v13467_v12, %s4891_s21  ;;  %v1879_v49 = vsel %vm1863_vm2, %v13468_v58, %v13442_v7  ;;  %v1827_v25 = vmul.f32 %v13462_v45, %v13440_v38  ;;  %v1830_v28 = vmul.f32 %v13463_v29, %v13440_v38  ;;  %v1864_v62 = vsel %vm1863_vm2, %v13459_v59, %v13469_v0  ;;  %v9047_v13 = vpop.permute.xlu0 %2985 }
 0x414   :  { %v1876_v53 = vsel %vm1863_vm2, %v13469_v0, %v13445_v40  ;;  %v1887_v23 = vmul.f32 %v1865_v6, %v1822_v44  ;;  %v1890_v43 = vmul.f32 %v1870_v2, %v1825_v48  ;;  %v1815_v7 = vmul.f32 %v13462_v45, %v13443_v60  ;;  %13470 = vst [vmem:[#allocation155_spill] sm:$0xff] %v9047_v13  ;;  %v9049_v38 = vpop.permute.xlu1 %2891  ;;  %v13475_v2 = vld [vmem:[#allocation245_spill] sm:$0xff]  ;;  %v13483_v48 = vld [vmem:[#allocation131_spill] sm:$0xff] }
 0x415   :  { %v1818_v34 = vmul.f32 %v13463_v29, %v13443_v60  ;;  %13471 = vst [vmem:[#allocation156_spill] sm:$0xff] %v9049_v38  ;;  %v1892_v37 = vmul.f32 %v1879_v49, %v1827_v25  ;;  %v1895_v59 = vmul.f32 %v1867_v47, %v1830_v28  ;;  %v1878_v40 = vsel %vm1863_vm2, %v13472_v35, %v13449_v17  ;;  %v13487_v0 = vld [vmem:[#allocation243_spill] sm:$0xff] }
 0x416   :  { %3261 = vrot.lane.b32.xlu0 %v13417_v54, %s4892_s30  ;;  %v1880_v60 = vmul.f32 %v1876_v53, %v1815_v7  ;;  %v1823_v1 = vmul.f32 %v13462_v45, %v13453_v61  ;;  %v1866_v52 = vsel %vm1863_vm2, %v13466_v30, %v13472_v35  ;;  %v9067_v16 = vmul.f32 %v4342_v27, %v8707_v33  ;;  %v13474_v30 = vld [vmem:[#allocation249_spill] sm:$0xff]  ;;  %v13488_v53 = vld [vmem:[#allocation244_spill] sm:$0xff]  ;;  %v13494_v35 = vld [vmem:[#allocation114_spill] sm:$0xff] }
 0x417   :  { %3147 = vrot.lane.b32.xlu1 %v13473_v42, %s4891_s21  ;;  %v1883_v9 = vmul.f32 %v1864_v62, %v1818_v34  ;;  %v9070_v17 = vadd.f32 %v1894_v14, %v8802_v57  ;;  %v9073_v63 = vadd.f32 %v1882_v3, %v8847_v26  ;;  %v1826_v19 = vmul.f32 %v13463_v29, %v13453_v61  ;;  %v9087_v57 = vpop.permute.xlu0 %2989  ;;  %v13478_v26 = vld [vmem:[#allocation145_spill] sm:$0xff]  ;;  %v13479_v3 = vld [vmem:[#allocation139_spill] sm:$0xff] }
 0x418   :  { %v9078_v44 = vadd.f32 %v1884_v31, %v8856_v50  ;;  %v9081_v45 = vadd.f32 %v1887_v23, %v8858_v22  ;;  %v1888_v6 = vmul.f32 %v1878_v40, %v1823_v1  ;;  %v2009_v33 = vsel %vm1999_vm3, %v13475_v2, %v13474_v30  ;;  %13476 = vst [vmem:[#allocation166_spill] sm:$0xff] %v9087_v57  ;;  %v9089_v14 = vpop.permute.xlu1 %2931  ;;  %v13480_v29 = vld [vmem:[#allocation241_spill] sm:$0xff]  ;;  %v4855_v31 = vld [vmem:[%s11957_s3 + $0xd0] sm:$0xff]  ;;  %v13497_v1 = vld [vmem:[#allocation247_spill] sm:$0xff] }
 0x419   :  { %13477 = vst [vmem:[#allocation162_spill] sm:$0xff] %v9089_v14  ;;  %4798 = vpow2.f32 %v13478_v26  ;;  %v9093_v61 = vadd.f32 %v1890_v43, %v13479_v3  ;;  %v1891_v50 = vmul.f32 %v1866_v52, %v1826_v19  ;;  %v13481_v27 = vld [vmem:[#allocation101_spill] sm:$0xff]  ;;  %v9103_v58 = vadd.f32 %v1892_v37, %v13483_v48  ;;  %v13489_v43 = vld [vmem:[#allocation287_spill] sm:$0xff]  ;;  %v13500_v26 = vld [vmem:[#allocation252_spill] sm:$0xff] }
 0x41a   :  { %v1956_v22 = vmul.f32 %v13481_v27, %v13480_v29  ;;  %3269 = vrot.lane.b32.xlu0 %v13482_v46, %s4892_s30  ;;  %v9106_v47 = vadd.f32 %v1895_v59, %v8946_v21  ;;  %v9109_v49 = vadd.f32 %v1880_v60, %v8948_v10  ;;  %v9112_v25 = vadd.f32 %v1883_v9, %v8950_v20  ;;  %v13491_v21 = vld [vmem:[#allocation246_spill] sm:$0xff]  ;;  %v13496_v9 = vld [vmem:[#allocation251_spill] sm:$0xff]  ;;  %v13498_v19 = vld [vmem:[#allocation13_spill] sm:$0xff] }
 0x41b   :  { %3531 = vperm.xlu1 %4731, %v4855_v31   ;;  %v1964_v62 = vmul.f32 %v13481_v27, %v13487_v0  ;;  %v1952_v23 = vmul.f32 %v13481_v27, %v13488_v53  ;;  %v1957_v7 = vmul.f32 %v13489_v43, %v13480_v29  ;;  %v9121_v34 = vadd.f32 %v1888_v6, %v8952_v4  ;;  %v9129_v37 = vpop.permute.xlu0 %2993  ;;  %v4856_v6 = vld [vmem:[%s11957_s3 + $0x100] sm:$0xff]  ;;  %v13501_v3 = vld [vmem:[#allocation248_spill] sm:$0xff]  ;;  %v13523_v54 = vld [vmem:[#allocation271_spill] sm:$0xff] }
 0x41c   :  { %13484 = vst [vmem:[#allocation158_spill] sm:$0xff] %v9106_v47  ;;  %13485 = vst [vmem:[#allocation174_spill] sm:$0xff] %v9109_v49  ;;  %v2021_v28 = vmul.f32 %v2009_v33, %v1956_v22  ;;  %v1960_v10 = vmul.f32 %v13481_v27, %v13491_v21  ;;  %v9127_v20 = vmul.f32 %v13489_v43, %v13487_v0  ;;  %v9131_v59 = vpop.permute.xlu1 %2939  ;;  %v4105_v40 = vmul.f32 1.0614054, %v13494_v35  ;;  %v13499_v33 = vld [vmem:[#allocation305_spill] sm:$0xff]  ;;  %v13502_v27 = vld [vmem:[#allocation84_spill] sm:$0xff] }
 0x41d   :  { %13486 = vst [vmem:[#allocation170_spill] sm:$0xff] %v9112_v25  ;;  %13490 = vst [vmem:[#allocation186_spill] sm:$0xff] %v9121_v34  ;;  %v9135_v60 = vadd.f32 %v1891_v50, %v8954_v8  ;;  %v2011_v4 = vsel %vm1999_vm3, %v13497_v1, %v13496_v9  ;;  %v9143_v52 = vmul.f32 %v13489_v43, %v13488_v53  ;;  %v4109_v8 = vmul.f32 1.0614054, %v13499_v33  ;;  %v13503_v31 = vld [vmem:[#allocation290_spill] sm:$0xff]  ;;  %v13541_v47 = vld [vmem:[#allocation119_spill] sm:$0xff] }
 0x41e   :  { %13492 = vst [vmem:[#allocation182_spill] sm:$0xff] %v9129_v37  ;;  %13493 = vst [vmem:[#allocation178_spill] sm:$0xff] %v9131_v59  ;;  %3277 = vrot.lane.b32.xlu0 %v13498_v19, %s4892_s30  ;;  %v2008_v50 = vsel %vm1999_vm3, %v13501_v3, %v13500_v26  ;;  %v9157_v22 = vmul.f32 %v13502_v27, %v13480_v29  ;;  %v9161_v48 = vmul.f32 %v13503_v31, %v13480_v29 }
 0x41f   :  { %13495 = vst [vmem:[#allocation194_spill] sm:$0xff] %v9135_v60  ;;  %3795 = vperm.xlu1 %4731, %v4856_v6   ;;  %v9165_v59 = vmul.f32 %v13489_v43, %v13491_v21  ;;  %v9167_v6 = vpop.eup %4796  ;;  %v9170_v57 = vadd.f32 %v2021_v28, %v8975_v18  ;;  %v9174_v14 = vmul.f32 %v13502_v27, %v13487_v0  ;;  %v4645_v43 = vld [vmem:[%s11958_s4 + $0x24] ss:$8 sm:$0xf]  ;;  %v9198_v13 = vpop.permute.xlu0 %2997  ;;  %v4121_v5 = vadd.f32 -1.4531521, %v4105_v40 }
 0x420   :  { %13504 = vst [vmem:[#allocation190_spill] sm:$0xff] %v9167_v6  ;;  %v9178_v32 = vmul.f32 %v13503_v31, %v13487_v0  ;;  %v9182_v29 = vmul.f32 %v13502_v27, %v13488_v53  ;;  %v2029_v38 = vmul.f32 %v2011_v4, %v1964_v62  ;;  %v9189_v18 = vmul.f32 %v13503_v31, %v13488_v53  ;;  %v4646_v0 = vld [vmem:[%s11958_s4 + $0x26] ss:$8 sm:$0xf]  ;;  %v9200_v37 = vpop.permute.xlu1 %2983 }
 0x421   :  { %13505 = vst [vmem:[#allocation52_spill] sm:$0xff] %v9170_v57  ;;  %v9193_v28 = vmul.f32 %v13502_v27, %v13491_v21  ;;  %13507 = vst [vmem:[#allocation167_spill] sm:$0xff] %v9198_v13  ;;  %v2017_v15 = vmul.f32 %v2008_v50, %v1952_v23  ;;  %v9204_v62 = vmul.f32 %v13503_v31, %v13491_v21  ;;  %v13510_v53 = vld [vmem:[#allocation40_spill] sm:$0xff]  ;;  %v13511_v4 = vld [vmem:[#allocation7_spill] sm:$0xff]  ;;  %v4125_v27 = vadd.f32 -1.4531521, %v4109_v8 }
 0x422   :  { %13508 = vst [vmem:[#allocation163_spill] sm:$0xff] %v9200_v37  ;;  %3285 = vrot.lane.b32.xlu0 %v13510_v53, %s4892_s30  ;;  %v4107_v19 = vmul.f32 1.0614054, %v13512_v36  ;;  %v13513_v6 = vld [vmem:[#allocation253_spill] sm:$0xff]  ;;  %v13514_v40 = vld [vmem:[#allocation267_spill] sm:$0xff]  ;;  %v13516_v50 = vld [vmem:[#allocation268_spill] sm:$0xff]  ;;  %v9231_v57 = vrot.slane %v4645_v43, %v13523_v54 }
 0x423   :  { %13506 = vst [vmem:[#allocation159_spill] sm:$0xff] %v9193_v28  ;;  %13509 = vst [vmem:[#allocation160_spill] sm:$0xff] %v9204_v62  ;;  %3259 = vrot.lane.b32.xlu1 %v13511_v4, %s4892_s30  ;;  %v2005_v37 = vsel %vm1999_vm3, %v13474_v30, %v13513_v6  ;;  %v9216_v23 = vrot.slane %v4645_v43, %v13514_v40  ;;  %v9219_v21 = vrot.slane %v4645_v43, %v13516_v50  ;;  %v13518_v31 = vld [vmem:[#allocation270_spill] sm:$0xff]  ;;  %v9224_v53 = vpop.eup %4798  ;;  %v13526_v60 = vld [vmem:[#allocation324_spill] sm:$0xff]  ;;  %v9247_v25 = vpop.permute.xlu0 %3001 }
 0x424   :  { %v9222_v13 = vrot.slane %v4645_v43, %v13518_v31  ;;  %13520 = vst [vmem:[#allocation165_spill] sm:$0xff] %v9224_v53  ;;  %v13521_v4 = vld [vmem:[#allocation254_spill] sm:$0xff]  ;;  %13524 = vst [vmem:[#allocation161_spill] sm:$0xff] %v9231_v57  ;;  %v9234_v30 = vrot.slane %v4646_v0, %v13518_v31  ;;  %v4111_v34 = vmul.f32 1.0614054, %v13526_v60  ;;  %v9242_v53 = vrot.slane %v4646_v0, %v13514_v40  ;;  %v9249_v43 = vpop.permute.xlu1 %2987 }
 0x425   :  { %13515 = vst [vmem:[#allocation168_spill] sm:$0xff] %v9216_v23  ;;  %13517 = vst [vmem:[#allocation164_spill] sm:$0xff] %v9219_v21  ;;  %v13522_v8 = vld [vmem:[#allocation250_spill] sm:$0xff]  ;;  %v9239_v21 = vadd.f32 %v2029_v38, %v8978_v41  ;;  %v4137_v57 = vmul.f32 %v13494_v35, %v4121_v5  ;;  %v9254_v49 = vadd.f32 %v2017_v15, %v8985_v55  ;;  %v13535_v38 = vld [vmem:[#allocation3_spill] sm:$0xff]  ;;  %vm2135_vm10 = vcmp.lt.s32.totalorder %v6898_v11, 2 }
 0x426   :  { %13519 = vst [vmem:[#allocation169_spill] sm:$0xff] %v9222_v13  ;;  %v2010_v46 = vsel %vm1999_vm3, %v13522_v8, %v13521_v4  ;;  %13525 = vst [vmem:[#allocation198_spill] sm:$0xff] %v9234_v30  ;;  %v13527_v23 = vld [vmem:[#allocation102_spill] sm:$0xff]  ;;  %v9245_v13 = vrot.slane %v4646_v0, %v13516_v50  ;;  %v13533_v30 = vld [vmem:[#allocation293_spill] sm:$0xff]  ;;  %v2022_v62 = vmul.f32 %v2005_v37, %v1957_v7  ;;  %3441 = vrot.lane.b32.xlu0 %v13535_v38, %s4893_s1 }
 0x427   :  { %vm3993_vm4 = vcmp.ge.f32.partialorder %v13527_v23, 0.0  ;;  %13528 = vst [vmem:[#allocation171_spill] sm:$0xff] %v9239_v21  ;;  %13529 = vst [vmem:[#allocation175_spill] sm:$0xff] %v9242_v53  ;;  %vm3997_vm5 = vcmp.ge.f32.partialorder %v13533_v30, 0.0  ;;  %3267 = vrot.lane.b32.xlu1 %v13460_v51, %s4892_s30  ;;  %v4141_v5 = vmul.f32 %v13499_v33, %v4125_v27  ;;  %v13537_v55 = vld [vmem:[#allocation334_spill] sm:$0xff]  ;;  %v13538_v37 = vld [vmem:[#allocation332_spill] sm:$0xff]  ;;  %v9286_v27 = vpop.permute.xlu0 %3005 }
 0x428   :  { %13530 = vst [vmem:[#allocation187_spill] sm:$0xff] %v9245_v13  ;;  %13531 = vst [vmem:[#allocation172_spill] sm:$0xff] %v9247_v25  ;;  %v9259_v41 = vld [vmem:[%s11958_s4 + $0x27] ss:$8 sm:$0xf]  ;;  %v2025_v25 = vmul.f32 %v2010_v46, %v1960_v10  ;;  %v4366_v7 = vadd.f32 1.0, %v13537_v55  ;;  %v9288_v55 = vpop.permute.xlu1 %2991 }
 0x429   :  { %13532 = vst [vmem:[#allocation179_spill] sm:$0xff] %v9249_v43  ;;  %13534 = vst [vmem:[#allocation191_spill] sm:$0xff] %v9254_v49  ;;  %v4123_v43 = vadd.f32 -1.4531521, %v4107_v19  ;;  %v13536_v13 = vld [vmem:[#allocation255_spill] sm:$0xff]  ;;  %v4364_v53 = vadd.f32 1.0, %v13538_v37  ;;  %v9273_v49 = vrot.slane %v4646_v0, %v13523_v54  ;;  %v9279_v46 = vrot.slane %v9259_v41, %v13518_v31 }
 0x42a   :  { %v2007_v15 = vsel %vm1999_vm3, %v13496_v9, %v13536_v13  ;;  %v13540_v21 = vld [vmem:[#allocation120_spill] sm:$0xff]  ;;  %v4360_v51 = vadd.f32 1.0, %v13541_v47  ;;  %v4127_v38 = vadd.f32 -1.4531521, %v4111_v34  ;;  %v9283_v10 = vrot.slane %v9259_v41, %v13514_v40  ;;  %v13544_v9 = vld [vmem:[#allocation137_spill] sm:$0xff]  ;;  %13545 = vst [vmem:[#allocation199_spill] sm:$0xff] %v9286_v27 }
 0x42b   :  { %13539 = vst [vmem:[#allocation173_spill] sm:$0xff] %v9273_v49  ;;  %v4362_v28 = vadd.f32 1.0, %v13540_v21  ;;  %13542 = vst [vmem:[#allocation176_spill] sm:$0xff] %v9279_v46  ;;  %v4368_v19 = vadd.f32 1.0, %v13544_v9  ;;  %v4153_v0 = vadd.f32 1.4214138, %v4137_v57  ;;  %v2030_v21 = vmul.f32 %v2007_v15, %v9127_v20  ;;  %3275 = vrot.lane.b32.xlu1 %v13467_v12, %s4892_s30 }
 0x42c   :  { %13543 = vst [vmem:[#allocation177_spill] sm:$0xff] %v9283_v10  ;;  %13546 = vst [vmem:[#allocation281_spill] sm:$0xff] %v9288_v55  ;;  %v13547_v37 = vld [vmem:[#allocation256_spill] sm:$0xff]  ;;  %v13548_v34 = vld [vmem:[#allocation5_spill] sm:$0xff]  ;;  %v4157_v10 = vadd.f32 1.4214138, %v4141_v5  ;;  %v4139_v9 = vmul.f32 %v13512_v36, %v4123_v43  ;;  %v9301_v46 = vadd.f32 %v2022_v62, %v8988_v24  ;;  %v9304_v57 = vadd.f32 %v2025_v25, %v8991_v56 }
 0x42d   :  { %v2004_v47 = vsel %vm1999_vm3, %v13500_v26, %v13547_v37  ;;  %3449 = vrot.lane.b32.xlu0 %v13548_v34, %s4893_s1  ;;  %v13550_v20 = vld [vmem:[#allocation297_spill] sm:$0xff]  ;;  %v13552_v55 = vld [vmem:[#allocation296_spill] sm:$0xff]  ;;  %v13554_v27 = vld [vmem:[#allocation291_spill] sm:$0xff]  ;;  %v4143_v43 = vmul.f32 %v13526_v60, %v4127_v38  ;;  %vm2319_vm13 = vcmp.lt.s32.totalorder %v6898_v11, 126  ;;  %vm2895_vm14 = vcmp.lt.s32.totalorder %v6898_v11, 51 }
 0x42e   :  { %13549 = vst [vmem:[#allocation51_spill] sm:$0xff] %v9304_v57  ;;  %v9307_v15 = vmul.f32 %v4366_v7, %v13550_v20  ;;  %v9310_v26 = vmul.f32 %v4364_v53, %v13552_v55  ;;  %v9313_v49 = vmul.f32 %v4362_v28, %v13554_v27  ;;  %v13556_v40 = vld [vmem:[#allocation85_spill] sm:$0xff]  ;;  %v13558_v5 = vld [vmem:[#allocation330_spill] sm:$0xff]  ;;  %v2018_v62 = vmul.f32 %v2004_v47, %v9143_v52  ;;  %v9325_v20 = vpop.permute.xlu0 %3009  ;;  %v9327_v53 = vpop.permute.xlu1 %2995  ;;  %v13564_v38 = vld [vmem:[#allocation4_spill] sm:$0xff] }
 0x42f   :  { %v9316_v12 = vmul.f32 %v4360_v51, %v13556_v40  ;;  %v4113_v24 = vmul.f32 1.0614054, %v13558_v5  ;;  %v13559_v56 = vld [vmem:[#allocation129_spill] sm:$0xff]  ;;  %13562 = vst [vmem:[#allocation181_spill] sm:$0xff] %v9325_v20  ;;  %13563 = vst [vmem:[#allocation189_spill] sm:$0xff] %v9327_v53  ;;  %v4169_v28 = vmul.f32 %v13494_v35, %v4153_v0  ;;  %v9331_v51 = vadd.f32 %v2030_v21, %v9070_v17  ;;  %v13565_v27 = vld [vmem:[#allocation86_spill] sm:$0xff] }
 0x430   :  { %13551 = vst [vmem:[#allocation188_spill] sm:$0xff] %v9307_v15  ;;  %13553 = vst [vmem:[#allocation184_spill] sm:$0xff] %v9310_v26  ;;  %v4370_v25 = vadd.f32 1.0, %v13559_v56  ;;  %v13560_v57 = vld [vmem:[#allocation117_spill] sm:$0xff]  ;;  %v4372_v40 = vadd.f32 1.0, %v9006_v39  ;;  %3283 = vrot.lane.b32.xlu1 %v13473_v42, %s4892_s30  ;;  %v4173_v52 = vmul.f32 %v13499_v33, %v4157_v10  ;;  %vm3995_vm6 = vcmp.ge.f32.partialorder %v13565_v27, 0.0 }
 0x431   :  { %13555 = vst [vmem:[#allocation180_spill] sm:$0xff] %v9313_v49  ;;  %13557 = vst [vmem:[#allocation196_spill] sm:$0xff] %v9316_v12  ;;  %v9323_v7 = vmul.f32 %v4368_v19, %v13560_v57  ;;  %3457 = vrot.lane.b32.xlu0 %v13564_v38, %s4893_s1  ;;  %v4155_v19 = vadd.f32 1.4214138, %v4139_v9  ;;  %v13566_v55 = vld [vmem:[#allocation257_spill] sm:$0xff]  ;;  %v4374_v17 = vadd.f32 1.0, %v9067_v16  ;;  %v9365_v16 = vrot.slane %v9259_v41, %v13516_v50 }
 0x432   :  { %v2001_v0 = vsel %vm1999_vm3, %v13513_v6, %v13566_v55  ;;  %v2013_v39 = vsel %vm1999_vm3, %v13566_v55, %v13475_v2  ;;  %v13567_v21 = vld [vmem:[#allocation127_spill] sm:$0xff]  ;;  %v13568_v57 = vld [vmem:[#allocation258_spill] sm:$0xff]  ;;  %v13569_v9 = vmov -1.0   ;;  %v4159_v6 = vadd.f32 1.4214138, %v4143_v43  ;;  %v9367_v55 = vpop.permute.xlu0 %3013  ;;  %v9369_v15 = vpop.permute.xlu1 %2999  ;;  %v13624_v20 = vld [vmem:[#allocation93_spill] sm:$0xff] }
 0x433   :  { %13561 = vst [vmem:[#allocation192_spill] sm:$0xff] %v9323_v7  ;;  %v4117_v47 = vmul.f32 1.0614054, %v13567_v21  ;;  %v2006_v10 = vsel %vm1999_vm3, %v13521_v4, %v13568_v57  ;;  %v9357_v56 = vsel %vm3993_vm4, 1.0, %v13569_v9  ;;  %v4129_v7 = vadd.f32 -1.4531521, %v4113_v24 }
 0x434   :  { %v13570_v49 = vld [vmem:[#allocation294_spill] sm:$0xff]  ;;  %v9361_v2 = vadd.f32 %v2018_v62, %v9073_v63  ;;  %13571 = vst [vmem:[#allocation185_spill] sm:$0xff] %v9365_v16  ;;  %13572 = vst [vmem:[#allocation200_spill] sm:$0xff] %v9367_v55  ;;  %v9374_v4 = vsel %vm3997_vm5, 1.0, %v13569_v9  ;;  %v4185_v23 = vadd.f32 -0.28449672, %v4169_v28  ;;  %v2020_v43 = vmul.f32 %v2013_v39, %v9157_v22 }
 0x435   :  { %vm3999_vm7 = vcmp.ge.f32.partialorder %v13570_v49, 0.0  ;;  %13573 = vst [vmem:[#allocation193_spill] sm:$0xff] %v9369_v15  ;;  %v2023_v24 = vmul.f32 %v2001_v0, %v9161_v48  ;;  %v13574_v63 = vld [vmem:[#allocation6_spill] sm:$0xff]  ;;  %v13575_v62 = vld [vmem:[#allocation44_spill] sm:$0xff]  ;;  %v4189_v12 = vadd.f32 -0.28449672, %v4173_v52  ;;  %v4171_v26 = vmul.f32 %v13512_v36, %v4155_v19 }
 0x436   :  { %3465 = vrot.lane.b32.xlu0 %v13574_v63, %s4893_s1  ;;  %3439 = vrot.lane.b32.xlu1 %v13575_v62, %s4893_s1  ;;  %v2026_v16 = vmul.f32 %v2006_v10, %v9165_v59  ;;  %v13576_v30 = vld [vmem:[#allocation259_spill] sm:$0xff]  ;;  %v9390_v22 = vrot.slane %v9259_v41, %v13523_v54  ;;  %v4133_v48 = vadd.f32 -1.4531521, %v4117_v47  ;;  %v13579_v19 = vld [vmem:[#allocation260_spill] sm:$0xff]  ;;  %v4175_v39 = vmul.f32 %v13526_v60, %v4159_v6  ;;  %v13580_v10 = vld [vmem:[#allocation306_spill] sm:$0xff]  ;;  %v9412_v53 = vpop.permute.xlu0 %3071 }
 0x437   :  { %v2015_v28 = vsel %vm1999_vm3, %v13576_v30, %v13497_v1  ;;  %v13578_v0 = vld [vmem:[#allocation115_spill] sm:$0xff]  ;;  %v2003_v52 = vsel %vm1999_vm3, %v13536_v13, %v13576_v30  ;;  %v2012_v59 = vsel %vm1999_vm3, %v13579_v19, %v13501_v3  ;;  %v4145_v1 = vmul.f32 %v13558_v5, %v4129_v7  ;;  %v13584_v15 = vld [vmem:[#allocation33_spill] sm:$0xff]  ;;  %13586 = vst [vmem:[#allocation313_spill] sm:$0xff] %v9412_v53  ;;  %v9414_v13 = vpop.permute.xlu1 %3003  ;;  %v13589_v6 = vld [vmem:[#allocation98_spill] sm:$0xff] }
 0x438   :  { %13577 = vst [vmem:[#allocation183_spill] sm:$0xff] %v9390_v22  ;;  %vm4001_vm8 = vcmp.ge.f32.partialorder %v13578_v0, 0.0  ;;  %v9404_v41 = vmul.f32 %v4370_v25, %v13580_v10  ;;  %v13582_v47 = vld [vmem:[#allocation31_spill] sm:$0xff]  ;;  %v9410_v55 = vmul.f32 %v4374_v17, %v13584_v15  ;;  %13587 = vst [vmem:[#allocation311_spill] sm:$0xff] %v9414_v13  ;;  %v4201_v30 = vmul.f32 %v13494_v35, %v4185_v23  ;;  %v4857_v7 = vld [vmem:[%s11957_s3 + $0xf8] sm:$0xff] }
 0x439   :  { %v9407_v22 = vmul.f32 %v4372_v40, %v13582_v47  ;;  %v2028_v3 = vmul.f32 %v2015_v28, %v9174_v14  ;;  %v2000_v25 = vsel %vm1999_vm3, %v13547_v37, %v13579_v19  ;;  %v13588_v15 = vld [vmem:[#allocation15_spill] sm:$0xff]  ;;  %v4205_v40 = vmul.f32 %v13499_v33, %v4189_v12  ;;  %v13590_v19 = vld [vmem:[#allocation262_spill] sm:$0xff]  ;;  %v13596_v47 = vld [vmem:[#allocation96_spill] sm:$0xff] }
 0x43a   :  { %13581 = vst [vmem:[#allocation195_spill] sm:$0xff] %v9404_v41  ;;  %13585 = vst [vmem:[#allocation197_spill] sm:$0xff] %v9410_v55  ;;  %3671 = vperm.xlu0 %4730, %v4857_v7   ;;  %3447 = vrot.lane.b32.xlu1 %v13588_v15, %s4893_s1  ;;  %v4187_v17 = vadd.f32 -0.28449672, %v4171_v26  ;;  %vm4005_vm9 = vcmp.ge.f32.partialorder %v13589_v6, 0.0  ;;  %v9430_v14 = vadd.f32 %v2020_v43, %v9078_v44  ;;  %v13591_v43 = vld [vmem:[#allocation301_spill] sm:$0xff] }
 0x43b   :  { %13583 = vst [vmem:[#allocation77_spill] sm:$0xff] %v9407_v22  ;;  %v2031_v23 = vmul.f32 %v2003_v52, %v9178_v32  ;;  %v2016_v37 = vmul.f32 %v2012_v59, %v9182_v29  ;;  %v4149_v28 = vmul.f32 %v13567_v21, %v4133_v48  ;;  %v2002_v10 = vsel %vm1999_vm3, %v13568_v57, %v13590_v19  ;;  %v9452_v52 = vpop.permute.xlu0 %3079  ;;  %v9454_v57 = vpop.permute.xlu1 %3007  ;;  %v13606_v41 = vld [vmem:[#allocation170_spill] sm:$0xff]  ;;  %v13620_v13 = vld [vmem:[#allocation263_spill] sm:$0xff] }
 0x43c   :  { %v2014_v12 = vsel %vm1999_vm3, %v13590_v19, %v13522_v8  ;;  %v4191_v44 = vadd.f32 -0.28449672, %v4175_v39  ;;  %v4161_v26 = vadd.f32 1.4214138, %v4145_v1  ;;  %vm4003_vm11 = vcmp.ge.f32.partialorder %v13591_v43, 0.0  ;;  %13594 = vst [vmem:[#allocation304_spill] sm:$0xff] %v9452_v52 }
 0x43d   :  { %v9446_v32 = vadd.f32 %v2023_v24, %v9081_v45  ;;  %v9449_v29 = vadd.f32 %v2026_v16, %v9093_v61  ;;  %v2019_v48 = vmul.f32 %v2000_v25, %v9189_v18  ;;  %13595 = vst [vmem:[#allocation209_spill] sm:$0xff] %v9454_v57  ;;  %v4217_v59 = vadd.f32 0.2548296, %v4201_v30  ;;  %v13598_v39 = vld [vmem:[#allocation3_spill] sm:$0xff]  ;;  %v13600_v24 = vld [vmem:[#allocation158_spill] sm:$0xff] }
 0x43e   :  { %vm4007_vm12 = vcmp.ge.f32.partialorder %v13596_v47, 0.0  ;;  %v9458_v8 = vadd.f32 %v2028_v3, %v9103_v58  ;;  %3577 = vrot.lane.b32.xlu0 %v13598_v39, %s4894_s9  ;;  %v13599_v45 = vld [vmem:[#allocation103_spill] sm:$0xff]  ;;  %v4221_v61 = vadd.f32 0.2548296, %v4205_v40  ;;  %v9467_v18 = vsel %vm3995_vm6, 1.0, %v13569_v9  ;;  %v13603_v3 = vld [vmem:[#allocation160_spill] sm:$0xff] }
 0x43f   :  { %13592 = vst [vmem:[#allocation201_spill] sm:$0xff] %v9446_v32  ;;  %13593 = vst [vmem:[#allocation204_spill] sm:$0xff] %v9449_v29  ;;  %3455 = vrot.lane.b32.xlu1 %v13599_v45, %s4893_s1  ;;  %v4203_v16 = vmul.f32 %v13512_v36, %v4187_v17  ;;  %v9471_v1 = vadd.f32 %v2031_v23, %v13600_v24  ;;  %v13602_v58 = vld [vmem:[#allocation159_spill] sm:$0xff]  ;;  %v2027_v25 = vmul.f32 %v2002_v10, %v13603_v3  ;;  %v13604_v19 = vld [vmem:[#allocation174_spill] sm:$0xff]  ;;  %v9496_v3 = vpop.permute.xlu1 %3011 }
 0x440   :  { %13597 = vst [vmem:[#allocation205_spill] sm:$0xff] %v9458_v8  ;;  %v2024_v30 = vmul.f32 %v2014_v12, %v13602_v58  ;;  %v4165_v7 = vadd.f32 1.4214138, %v4149_v28  ;;  %v9476_v55 = vadd.f32 %v2016_v37, %v13604_v19  ;;  %v9481_v40 = vsel %vm3999_vm7, 1.0, %v13569_v9  ;;  %v13608_v24 = vld [vmem:[#allocation261_spill] sm:$0xff]  ;;  %v13609_v12 = vld [vmem:[#allocation168_spill] sm:$0xff]  ;;  %v9494_v37 = vpop.permute.xlu0 %3207 }
 0x441   :  { %13601 = vst [vmem:[#allocation203_spill] sm:$0xff] %v9471_v1  ;;  %v4207_v27 = vmul.f32 %v13526_v60, %v4191_v44  ;;  %v4177_v17 = vmul.f32 %v13558_v5, %v4161_v26  ;;  %v9486_v23 = vadd.f32 %v2019_v48, %v13606_v41  ;;  %v2092_v58 = vmul.f32 %v13609_v12, %v13608_v24  ;;  %v13610_v28 = vld [vmem:[#allocation164_spill] sm:$0xff]  ;;  %v13613_v44 = vld [vmem:[#allocation169_spill] sm:$0xff]  ;;  %v13615_v48 = vld [vmem:[#allocation2_spill] sm:$0xff] }
 0x442   :  { %13605 = vst [vmem:[#allocation211_spill] sm:$0xff] %v9476_v55  ;;  %v9492_v10 = vmul.f32 %v13610_v28, %v13608_v24  ;;  %13611 = vst [vmem:[#allocation202_spill] sm:$0xff] %v9494_v37  ;;  %v4233_v49 = vmul.f32 %v13494_v35, %v4217_v59  ;;  %v9501_v19 = vmul.f32 %v13613_v44, %v13608_v24  ;;  %v13614_v41 = vld [vmem:[#allocation161_spill] sm:$0xff]  ;;  %3585 = vrot.lane.b32.xlu0 %v13548_v34, %s4894_s9  ;;  %v13618_v35 = vld [vmem:[#allocation194_spill] sm:$0xff] }
 0x443   :  { %13607 = vst [vmem:[#allocation207_spill] sm:$0xff] %v9486_v23  ;;  %13612 = vst [vmem:[#allocation212_spill] sm:$0xff] %v9496_v3  ;;  %v9505_v26 = vmul.f32 %v13614_v41, %v13608_v24  ;;  %3463 = vrot.lane.b32.xlu1 %v13615_v48, %s4893_s1  ;;  %v4237_v22 = vmul.f32 %v13499_v33, %v4221_v61  ;;  %v4219_v37 = vadd.f32 0.2548296, %v4203_v16  ;;  %v13616_v3 = vld [vmem:[#allocation186_spill] sm:$0xff]  ;;  %v9521_v24 = vsel %vm4001_vm8, 1.0, %v13569_v9 }
 0x444   :  { %v9513_v57 = vadd.f32 %v2024_v30, %v13616_v3  ;;  %v9516_v59 = vadd.f32 %v2027_v25, %v13618_v35  ;;  %v4181_v53 = vmul.f32 %v13567_v21, %v4165_v7  ;;  %v2100_v52 = vmul.f32 %v13609_v12, %v13620_v13  ;;  %v13621_v30 = vld [vmem:[#allocation264_spill] sm:$0xff]  ;;  %v9540_v7 = vpop.permute.xlu0 %3215  ;;  %v9542_v35 = vpop.permute.xlu1 %3067  ;;  %v13625_v34 = vld [vmem:[#allocation273_spill] sm:$0xff]  ;;  %v13629_v23 = vld [vmem:[#allocation106_spill] sm:$0xff] }
 0x445   :  { %v9528_v33 = vmul.f32 %v13610_v28, %v13620_v13  ;;  %v4223_v61 = vadd.f32 0.2548296, %v4207_v27  ;;  %v4193_v16 = vadd.f32 -0.28449672, %v4177_v17  ;;  %v2088_v25 = vmul.f32 %v13609_v12, %v13621_v30  ;;  %13622 = vst [vmem:[#allocation214_spill] sm:$0xff] %v9540_v7  ;;  %13623 = vst [vmem:[#allocation210_spill] sm:$0xff] %v9542_v35 }
 0x446   :  { %13617 = vst [vmem:[#allocation208_spill] sm:$0xff] %v9513_v57  ;;  %13619 = vst [vmem:[#allocation213_spill] sm:$0xff] %v9516_v59  ;;  %v9534_v3 = vmul.f32 %v13610_v28, %v13621_v30  ;;  %v9538_v0 = vmul.f32 %v13613_v44, %v13620_v13  ;;  %v4313_v42 = vmul.f32 %v13624_v20, %v4233_v49  ;;  %v13626_v27 = vld [vmem:[#allocation265_spill] sm:$0xff]  ;;  %3593 = vrot.lane.b32.xlu0 %v13564_v38, %s4894_s9  ;;  %v4858_v59 = vld [vmem:[%s11957_s3 + $0xf0] sm:$0xff] }
 0x447   :  { %v2145_v17 = vsel %vm2135_vm10, %v13626_v27, %v13625_v34  ;;  %3667 = vperm.xlu1 %4731, %v4858_v59   ;;  %v13627_v57 = vld [vmem:[#allocation325_spill] sm:$0xff]  ;;  %v4235_v7 = vmul.f32 %v13512_v36, %v4219_v37  ;;  %v9559_v20 = vsel %vm4005_vm9, 1.0, %v13569_v9  ;;  %v9563_v49 = vmul.f32 %v13614_v41, %v13620_v13  ;;  %v13635_v1 = vld [vmem:[#allocation124_spill] sm:$0xff] }
 0x448   :  { %v4317_v39 = vmul.f32 %v13627_v57, %v4237_v22  ;;  %13628 = vst [vmem:[#allocation314_spill] sm:$0xff] %v9559_v20  ;;  %v9567_v35 = vmul.f32 %v13613_v44, %v13621_v30  ;;  %v4197_v38 = vadd.f32 -0.28449672, %v4181_v53  ;;  %v4115_v59 = vmul.f32 1.0614054, %v13629_v23  ;;  %v9581_v37 = vpop.permute.xlu0 %3341  ;;  %v9583_v55 = vpop.permute.xlu1 %3075 }
 0x449   :  { %v9572_v22 = vmul.f32 %v13614_v41, %v13621_v30  ;;  %v4239_v36 = vmul.f32 %v13526_v60, %v4223_v61  ;;  %v4209_v6 = vmul.f32 %v13558_v5, %v4193_v16  ;;  %v9579_v13 = vsel %vm4003_vm11, 1.0, %v13569_v9  ;;  %13632 = vst [vmem:[#allocation216_spill] sm:$0xff] %v9581_v37  ;;  %13633 = vst [vmem:[#allocation76_spill] sm:$0xff] %v9583_v55  ;;  %v13636_v61 = vld [vmem:[#allocation266_spill] sm:$0xff]  ;;  %v13639_v37 = vld [vmem:[#allocation269_spill] sm:$0xff] }
 0x44a   :  { %13631 = vst [vmem:[#allocation215_spill] sm:$0xff] %v9579_v13  ;;  %v2157_v57 = vmul.f32 %v2145_v17, %v2092_v58  ;;  %v4329_v53 = vsub.f32 1.0, %v4313_v42  ;;  %v9588_v30 = vsel %vm4007_vm12, 1.0, %v13569_v9  ;;  %v4119_v60 = vmul.f32 1.0614054, %v13635_v1  ;;  %3601 = vrot.lane.b32.xlu0 %v13574_v63, %s4894_s9  ;;  %v13637_v9 = vld [vmem:[#allocation321_spill] sm:$0xff] }
 0x44b   :  { %13630 = vst [vmem:[#allocation206_spill] sm:$0xff] %v9572_v22  ;;  %13634 = vst [vmem:[#allocation56_spill] sm:$0xff] %v9588_v30  ;;  %v2096_v16 = vmul.f32 %v13609_v12, %v13636_v61  ;;  %v9595_v43 = vmul.f32 %v13610_v28, %v13636_v61  ;;  %v9600_v58 = vld [vmem:[%s11958_s4 + $0x40] ss:$8 sm:$0xf]  ;;  %v4333_v42 = vsub.f32 1.0, %v4317_v39  ;;  %v4315_v47 = vmul.f32 %v13637_v9, %v4235_v7 }
 0x44c   :  { %v13638_v17 = vld [vmem:[#allocation275_spill] sm:$0xff]  ;;  %v9611_v28 = vmul.f32 %v13613_v44, %v13636_v61  ;;  %3575 = vrot.lane.b32.xlu1 %v13575_v62, %s4894_s9  ;;  %v4213_v55 = vmul.f32 %v13567_v21, %v4197_v38  ;;  %v4131_v30 = vadd.f32 -1.4531521, %v4115_v59  ;;  %v13642_v63 = vld [vmem:[#allocation272_spill] sm:$0xff]  ;;  %v9622_v7 = vmul.f32 %v13614_v41, %v13636_v61  ;;  %v13643_v9 = vld [vmem:[#allocation97_spill] sm:$0xff]  ;;  %v9632_v38 = vpop.permute.xlu0 %3391  ;;  %v9634_v59 = vpop.permute.xlu1 %3203 }
 0x44d   :  { %v2147_v12 = vsel %vm2135_vm10, %v13639_v37, %v13638_v17  ;;  %v13641_v13 = vld [vmem:[#allocation279_spill] sm:$0xff]  ;;  %v4319_v8 = vmul.f32 %v13643_v9, %v4239_v36  ;;  %v4225_v20 = vadd.f32 0.2548296, %v4209_v6  ;;  %v13644_v44 = vld [vmem:[#allocation52_spill] sm:$0xff]  ;;  %v9630_v62 = vrot.slane %v9600_v58, %v13518_v31  ;;  %13646 = vst [vmem:[#allocation219_spill] sm:$0xff] %v9632_v38  ;;  %13647 = vst [vmem:[#allocation220_spill] sm:$0xff] %v9634_v59 }
 0x44e   :  { %13640 = vst [vmem:[#allocation217_spill] sm:$0xff] %v9611_v28  ;;  %v2144_v39 = vsel %vm2135_vm10, %v13642_v63, %v13641_v13  ;;  %v9626_v28 = vadd.f32 %v2157_v57, %v13644_v44  ;;  %v4345_v29 = vmul.f32 %v4329_v53, %v9357_v56  ;;  %v4135_v32 = vadd.f32 -1.4531521, %v4119_v60  ;;  %v13648_v41 = vld [vmem:[#allocation286_spill] sm:$0xff]  ;;  %v4859_v6 = vld [vmem:[%s11957_s3 + $0x118] sm:$0xff]  ;;  %v13655_v38 = vld [vmem:[#allocation171_spill] sm:$0xff] }
 0x44f   :  { %13645 = vst [vmem:[#allocation218_spill] sm:$0xff] %v9630_v62  ;;  %v2165_v22 = vmul.f32 %v2147_v12, %v2100_v52  ;;  %v2141_v36 = vsel %vm2135_vm10, %v13625_v34, %v13648_v41  ;;  %3807 = vperm.xlu0 %4730, %v4859_v6   ;;  %v4349_v57 = vmul.f32 %v4333_v42, %v9374_v4  ;;  %v4331_v61 = vsub.f32 1.0, %v4315_v47  ;;  %v13649_v44 = vld [vmem:[#allocation289_spill] sm:$0xff]  ;;  %v13650_v62 = vld [vmem:[#allocation274_spill] sm:$0xff]  ;;  %v13652_v42 = vld [vmem:[#allocation307_spill] sm:$0xff] }
 0x450   :  { %v2153_v9 = vmul.f32 %v2144_v39, %v2088_v25  ;;  %v2146_v56 = vsel %vm2135_vm10, %v13650_v62, %v13649_v44  ;;  %3583 = vrot.lane.b32.xlu1 %v13588_v15, %s4894_s9  ;;  %v4229_v52 = vadd.f32 0.2548296, %v4213_v55  ;;  %v4147_v34 = vmul.f32 %v13629_v23, %v4131_v30  ;;  %v13651_v53 = vld [vmem:[#allocation302_spill] sm:$0xff]  ;;  %v9662_v39 = vpop.permute.xlu0 %3121  ;;  %v9664_v55 = vpop.permute.xlu1 %3211 }
 0x451   :  { %v2143_v60 = vsel %vm2135_vm10, %v13638_v17, %v13651_v53  ;;  %v4335_v12 = vsub.f32 1.0, %v4319_v8  ;;  %v4241_v4 = vmul.f32 %v13558_v5, %v4225_v20  ;;  %v2158_v25 = vmul.f32 %v2141_v36, %v9492_v10  ;;  %13653 = vst [vmem:[#allocation222_spill] sm:$0xff] %v9662_v39  ;;  %13654 = vst [vmem:[#allocation221_spill] sm:$0xff] %v9664_v55  ;;  %v13656_v5 = vld [vmem:[#allocation12_spill] sm:$0xff]  ;;  %v13657_v17 = vld [vmem:[#allocation191_spill] sm:$0xff] }
 0x452   :  { %v2140_v47 = vsel %vm2135_vm10, %v13641_v13, %v13652_v42  ;;  %v4361_v30 = vadd.f32 1.0, %v4345_v29  ;;  %v4151_v6 = vmul.f32 %v13635_v1, %v4135_v32  ;;  %v9668_v59 = vadd.f32 %v2165_v22, %v13655_v38  ;;  %v13658_v38 = vld [vmem:[#allocation267_spill] sm:$0xff] }
 0x453   :  { %v2161_v8 = vmul.f32 %v2146_v56, %v2096_v16  ;;  %3445 = vrot.lane.b32.xlu0 %v13656_v5, %s4893_s1  ;;  %v4365_v10 = vadd.f32 1.0, %v4349_v57  ;;  %v4347_v20 = vmul.f32 %v4331_v61, %v9467_v18  ;;  %v9674_v36 = vadd.f32 %v2153_v9, %v13657_v17  ;;  %v13660_v61 = vld [vmem:[#allocation27_spill] sm:$0xff]  ;;  %v13661_v56 = vld [vmem:[#allocation25_spill] sm:$0xff] }
 0x454   :  { %v2166_v13 = vmul.f32 %v2143_v60, %v9528_v33  ;;  %3591 = vrot.lane.b32.xlu1 %v13599_v45, %s4894_s9  ;;  %v12482_v29 = vmov 6   ;;  %v4245_v32 = vmul.f32 %v13567_v21, %v4229_v52  ;;  %v4163_v22 = vadd.f32 1.4214138, %v4147_v34  ;;  %v9695_v21 = vpop.permute.xlu0 %3129  ;;  %v9697_v52 = vpop.permute.xlu1 %3337  ;;  %v13666_v17 = vld [vmem:[#allocation51_spill] sm:$0xff] }
 0x455   :  { %4733 = vset.pattern.permute.xlu0 %v12482_v29  ;;  %v2154_v16 = vmul.f32 %v2140_v47, %v9534_v3  ;;  %v9684_v57 = vrot.slane %v9600_v58, %v13658_v38  ;;  %v4351_v18 = vmul.f32 %v4335_v12, %v9481_v40  ;;  %v4321_v9 = vmul.f32 %v13660_v61, %v4241_v4  ;;  %v13664_v3 = vld [vmem:[#allocation108_spill] sm:$0xff]  ;;  %v13667_v12 = vld [vmem:[#allocation14_spill] sm:$0xff] }
 0x456   :  { %v9689_v33 = vadd.f32 %v2158_v25, %v9301_v46  ;;  %v2149_v60 = vsel %vm2135_vm10, %v13661_v56, %v13626_v27  ;;  %13662 = vst [vmem:[#allocation225_spill] sm:$0xff] %v9695_v21  ;;  %13663 = vst [vmem:[#allocation223_spill] sm:$0xff] %v9697_v52  ;;  %v9700_v34 = vmul.f32 %v4361_v30, %v13664_v3  ;;  %v4167_v47 = vadd.f32 1.4214138, %v4151_v6  ;;  %v13668_v27 = vld [vmem:[#allocation111_spill] sm:$0xff]  ;;  %v13670_v30 = vld [vmem:[#allocation312_spill] sm:$0xff] }
 0x457   :  { %13659 = vst [vmem:[#allocation229_spill] sm:$0xff] %v9684_v57  ;;  %v9703_v40 = vadd.f32 %v2161_v8, %v13666_v17  ;;  %v2137_v46 = vsel %vm2135_vm10, %v13648_v41, %v13661_v56  ;;  %3453 = vrot.lane.b32.xlu0 %v13667_v12, %s4893_s1  ;;  %v9712_v4 = vmul.f32 %v4365_v10, %v13668_v27  ;;  %v4363_v25 = vadd.f32 1.0, %v4347_v20  ;;  %v13671_v8 = vld [vmem:[#allocation190_spill] sm:$0xff]  ;;  %v13736_v52 = vld [vmem:[#allocation175_spill] sm:$0xff] }
 0x458   :  { %13665 = vst [vmem:[#allocation231_spill] sm:$0xff] %v9700_v34  ;;  %v9715_v61 = vadd.f32 %v2166_v13, %v9331_v51  ;;  %v2142_v6 = vsel %vm2135_vm10, %v13649_v44, %v13670_v30  ;;  %3599 = vrot.lane.b32.xlu1 %v13615_v48, %s4894_s9  ;;  %v4325_v41 = vmul.f32 %v13671_v8, %v4245_v32  ;;  %v4367_v20 = vadd.f32 1.0, %v4351_v18  ;;  %v13672_v17 = vld [vmem:[#allocation22_spill] sm:$0xff]  ;;  %v9738_v32 = vpop.permute.xlu0 %3137  ;;  %v13681_v8 = vld [vmem:[#allocation112_spill] sm:$0xff]  ;;  %v13767_v21 = vld [vmem:[#allocation43_spill] sm:$0xff] }
 0x459   :  { %13669 = vst [vmem:[#allocation227_spill] sm:$0xff] %v9712_v4  ;;  %v4179_v56 = vmul.f32 %v13629_v23, %v4163_v22  ;;  %v9726_v3 = vadd.f32 %v2154_v16, %v9361_v2  ;;  %v2156_v10 = vmul.f32 %v2149_v60, %v9501_v19  ;;  %v4337_v51 = vsub.f32 1.0, %v4321_v9  ;;  %13674 = vst [vmem:[#allocation232_spill] sm:$0xff] %v9738_v32  ;;  %v9740_v22 = vpop.permute.xlu1 %3387  ;;  %v13676_v16 = vld [vmem:[#allocation24_spill] sm:$0xff]  ;;  %v13677_v9 = vld [vmem:[#allocation13_spill] sm:$0xff] }
 0x45a   :  { %v2159_v13 = vmul.f32 %v2137_v46, %v9505_v26  ;;  %v2151_v44 = vsel %vm2135_vm10, %v13672_v17, %v13639_v37  ;;  %v9736_v27 = vrot.slane %v9600_v58, %v13516_v50  ;;  %13675 = vst [vmem:[#allocation228_spill] sm:$0xff] %v9740_v22  ;;  %v4183_v2 = vmul.f32 %v13635_v1, %v4167_v47  ;;  %v13679_v60 = vld [vmem:[#allocation292_spill] sm:$0xff]  ;;  %v13683_v34 = vld [vmem:[#allocation206_spill] sm:$0xff] }
 0x45b   :  { %v2162_v19 = vmul.f32 %v2142_v6, %v9595_v43  ;;  %v2139_v26 = vsel %vm2135_vm10, %v13651_v53, %v13672_v17  ;;  %v2136_v37 = vsel %vm2135_vm10, %v13652_v42, %v13676_v16  ;;  %v2148_v18 = vsel %vm2135_vm10, %v13676_v16, %v13642_v63  ;;  %3461 = vrot.lane.b32.xlu0 %v13677_v9, %s4893_s1  ;;  %v4860_v53 = vld [vmem:[%s11957_s3 + $0x110] sm:$0xff]  ;;  %v13735_v22 = vld [vmem:[#allocation198_spill] sm:$0xff] }
 0x45c   :  { %13673 = vst [vmem:[#allocation224_spill] sm:$0xff] %v9736_v27  ;;  %v9760_v43 = vrot.slane %v9600_v58, %v13523_v54  ;;  %3803 = vperm.xlu1 %4731, %v4860_v53   ;;  %v9766_v47 = vmul.f32 %v4363_v25, %v13679_v60  ;;  %v4341_v42 = vsub.f32 1.0, %v4325_v41  ;;  %v4195_v46 = vadd.f32 -0.28449672, %v4179_v56  ;;  %v9777_v4 = vpop.permute.xlu0 %3145  ;;  %v13686_v56 = vld [vmem:[#allocation201_spill] sm:$0xff]  ;;  %v13701_v27 = vld [vmem:[#allocation207_spill] sm:$0xff] }
 0x45d   :  { %v2172_v6 = vadd.f32 %v2156_v10, %v9430_v14  ;;  %v2164_v63 = vmul.f32 %v2151_v44, %v9538_v0  ;;  %v9771_v17 = vmul.f32 %v4367_v20, %v13681_v8  ;;  %v4353_v58 = vmul.f32 %v4337_v51, %v9521_v24  ;;  %13684 = vst [vmem:[#allocation230_spill] sm:$0xff] %v9777_v4  ;;  %v9779_v25 = vpop.permute.xlu1 %3119  ;;  %v13687_v10 = vld [vmem:[#allocation204_spill] sm:$0xff]  ;;  %v13688_v20 = vld [vmem:[#allocation125_spill] sm:$0xff]  ;;  %v13689_v44 = vld [vmem:[#allocation327_spill] sm:$0xff] }
 0x45e   :  { %13678 = vst [vmem:[#allocation319_spill] sm:$0xff] %v9760_v43  ;;  %13680 = vst [vmem:[#allocation233_spill] sm:$0xff] %v9766_v47  ;;  %v2167_v16 = vmul.f32 %v2139_v26, %v9563_v49  ;;  %v2152_v29 = vmul.f32 %v2148_v18, %v9567_v35  ;;  %v2155_v53 = vmul.f32 %v2136_v37, %v13683_v34  ;;  %v4199_v41 = vadd.f32 -0.28449672, %v4183_v2  ;;  %v13690_v24 = vld [vmem:[#allocation132_spill] sm:$0xff]  ;;  %v13692_v34 = vld [vmem:[#allocation331_spill] sm:$0xff] }
 0x45f   :  { %13682 = vst [vmem:[#allocation234_spill] sm:$0xff] %v9771_v17  ;;  %13685 = vst [vmem:[#allocation226_spill] sm:$0xff] %v9779_v25  ;;  %v2175_v14 = vadd.f32 %v2159_v13, %v13686_v56  ;;  %v9783_v0 = vadd.f32 %v2162_v19, %v13687_v10  ;;  %v2204_v60 = vmul.f32 %v13689_v44, %v13688_v20  ;;  %v13691_v35 = vld [vmem:[#allocation40_spill] sm:$0xff]  ;;  %v13693_v2 = vld [vmem:[#allocation7_spill] sm:$0xff]  ;;  %v4369_v47 = vadd.f32 1.0, %v4353_v58 }
 0x460   :  { %v2205_v49 = vmul.f32 %v13689_v44, %v13690_v24  ;;  %3469 = vrot.lane.b32.xlu0 %v13691_v35, %s4893_s1  ;;  %v2138_v51 = vsel %vm2135_vm10, %v13670_v30, %v13692_v34  ;;  %v2150_v13 = vsel %vm2135_vm10, %v13692_v34, %v13650_v62  ;;  %3443 = vrot.lane.b32.xlu1 %v13693_v2, %s4893_s1  ;;  %v13694_v19 = vld [vmem:[#allocation314_spill] sm:$0xff]  ;;  %v13695_v18 = vld [vmem:[#allocation205_spill] sm:$0xff]  ;;  %v13696_v56 = vld [vmem:[#allocation140_spill] sm:$0xff]  ;;  %v13698_v24 = vmov 6  }
 0x461   :  { %v4357_v26 = vmul.f32 %v4341_v42, %v13694_v19  ;;  %v4211_v37 = vmul.f32 %v13629_v23, %v4195_v46  ;;  %v2180_v8 = vadd.f32 %v2164_v63, %v13695_v18  ;;  %v2206_v10 = vmul.f32 %v13689_v44, %v13696_v56  ;;  %v13697_v20 = vld [vmem:[#allocation148_spill] sm:$0xff]  ;;  %4732 = vset.pattern.permute.xlu1 %v13698_v24  ;;  %v13699_v17 = vld [vmem:[#allocation203_spill] sm:$0xff]  ;;  %v9812_v42 = vpop.permute.xlu0 %3527  ;;  %v9814_v46 = vpop.permute.xlu1 %3127  ;;  %v13704_v19 = vld [vmem:[#allocation217_spill] sm:$0xff] }
 0x462   :  { %v2207_v30 = vmul.f32 %v13689_v44, %v13697_v20  ;;  %v2183_v62 = vadd.f32 %v2167_v16, %v13699_v17  ;;  %v13700_v34 = vld [vmem:[#allocation211_spill] sm:$0xff]  ;;  %v2171_v57 = vadd.f32 %v2155_v53, %v13701_v27  ;;  %13702 = vst [vmem:[#allocation235_spill] sm:$0xff] %v9812_v42  ;;  %13703 = vst [vmem:[#allocation236_spill] sm:$0xff] %v9814_v46  ;;  %v13706_v27 = vld [vmem:[#allocation128_spill] sm:$0xff]  ;;  %vm3151_vm15 = vcmp.lt.s32.totalorder %v6898_v11, 45 }
 0x463   :  { %v2168_v43 = vadd.f32 %v2152_v29, %v13700_v34  ;;  %v4215_v63 = vmul.f32 %v13635_v1, %v4199_v41  ;;  %v2160_v18 = vmul.f32 %v2150_v13, %v13704_v19  ;;  %v2163_v56 = vmul.f32 %v2138_v51, %v9622_v7  ;;  %v13705_v29 = vld [vmem:[#allocation3_spill] sm:$0xff]  ;;  %v13707_v58 = vld [vmem:[#allocation32_spill] sm:$0xff]  ;;  %v13709_v13 = vld [vmem:[#allocation130_spill] sm:$0xff] }
 0x464   :  { %v9820_v44 = vadd.f32 %v2204_v60, %v2172_v6  ;;  %v9823_v17 = vadd.f32 %v2205_v49, %v9626_v28  ;;  %3713 = vrot.lane.b32.xlu0 %v13705_v29, %s4896_s17  ;;  %v2212_v16 = vmul.f32 %v13707_v58, %v13706_v27  ;;  %v13708_v53 = vld [vmem:[#allocation136_spill] sm:$0xff]  ;;  %v13711_v51 = vld [vmem:[#allocation21_spill] sm:$0xff]  ;;  %v4227_v6 = vadd.f32 0.2548296, %v4211_v37  ;;  %v13712_v24 = vld [vmem:[#allocation95_spill] sm:$0xff] }
 0x465   :  { %v2213_v41 = vmul.f32 %v13707_v58, %v13708_v53  ;;  %v13710_v20 = vld [vmem:[#allocation336_spill] sm:$0xff]  ;;  %3451 = vrot.lane.b32.xlu1 %v13711_v51, %s4893_s1  ;;  %v9836_v28 = vadd.f32 %v2206_v10, %v9689_v33  ;;  %v9838_v60 = vadd.f32 %v2207_v30, %v2175_v14  ;;  %v4373_v49 = vadd.f32 1.0, %v4357_v26  ;;  %v9849_v46 = vpop.permute.xlu0 %3257  ;;  %v9851_v37 = vpop.permute.xlu1 %3135  ;;  %v13720_v26 = vld [vmem:[#allocation213_spill] sm:$0xff] }
 0x466   :  { %v2200_v7 = vmul.f32 %v13710_v20, %v13709_v13  ;;  %v9841_v34 = vmul.f32 %v4369_v47, %v13712_v24  ;;  %v13714_v19 = vld [vmem:[#allocation144_spill] sm:$0xff]  ;;  %v13716_v13 = vld [vmem:[#allocation138_spill] sm:$0xff]  ;;  %13717 = vst [vmem:[#allocation100_spill] sm:$0xff] %v9849_v46  ;;  %13718 = vst [vmem:[#allocation80_spill] sm:$0xff] %v9851_v37  ;;  %v4231_v33 = vadd.f32 0.2548296, %v4215_v63  ;;  %v2179_v30 = vadd.f32 %v2163_v56, %v13720_v26 }
 0x467   :  { %v2214_v27 = vmul.f32 %v13707_v58, %v13714_v19  ;;  %v13715_v53 = vld [vmem:[#allocation152_spill] sm:$0xff]  ;;  %v2201_v25 = vmul.f32 %v13710_v20, %v13716_v13  ;;  %v13721_v47 = vld [vmem:[#allocation146_spill] sm:$0xff]  ;;  %v9866_v37 = vadd.f32 %v2213_v41, %v9668_v59  ;;  %v13765_v46 = vld [vmem:[#allocation39_spill] sm:$0xff]  ;;  %vm3015_vm0 = vcmp.lt.s32.totalorder %v6898_v11, 48 }
 0x468   :  { %13713 = vst [vmem:[#allocation237_spill] sm:$0xff] %v9841_v34  ;;  %v2215_v42 = vmul.f32 %v13707_v58, %v13715_v53  ;;  %v13719_v14 = vld [vmem:[#allocation208_spill] sm:$0xff]  ;;  %v2202_v24 = vmul.f32 %v13710_v20, %v13721_v47  ;;  %v13722_v34 = vld [vmem:[#allocation154_spill] sm:$0xff]  ;;  %v13723_v58 = vld [vmem:[#allocation5_spill] sm:$0xff]  ;;  %v9861_v53 = vadd.f32 %v2212_v16, %v2180_v8  ;;  %v9863_v13 = vadd.f32 %v2200_v7, %v2168_v43 }
 0x469   :  { %v2176_v10 = vadd.f32 %v2160_v18, %v13719_v14  ;;  %v2203_v19 = vmul.f32 %v13710_v20, %v13722_v34  ;;  %3721 = vrot.lane.b32.xlu0 %v13723_v58, %s4896_s17  ;;  %v13724_v63 = vld [vmem:[#allocation8_spill] sm:$0xff]  ;;  %v4243_v18 = vmul.f32 %v13629_v23, %v4227_v6  ;;  %v13725_v56 = vld [vmem:[#allocation134_spill] sm:$0xff]  ;;  %v13729_v16 = vld [vmem:[#allocation157_spill] sm:$0xff]  ;;  %v9880_v59 = vadd.f32 %v2201_v25, %v9674_v36  ;;  %v9887_v23 = vpop.permute.xlu0 %3265  ;;  %v9889_v6 = vpop.permute.xlu1 %3143 }
 0x46a   :  { %3459 = vrot.lane.b32.xlu1 %v13724_v63, %s4893_s1  ;;  %v13726_v14 = vld [vmem:[#allocation10_spill] sm:$0xff]  ;;  %v9883_v41 = vadd.f32 %v2214_v27, %v9715_v61  ;;  %v9885_v7 = vadd.f32 %v2215_v42, %v2183_v62  ;;  %13732 = vst [vmem:[#allocation240_spill] sm:$0xff] %v9887_v23  ;;  %13733 = vst [vmem:[#allocation242_spill] sm:$0xff] %v9889_v6  ;;  %v13737_v36 = vld [vmem:[#allocation187_spill] sm:$0xff]  ;;  %v9903_v42 = vadd.f32 %v2202_v24, %v9726_v3  ;;  %vm4438_vm9 = vcmask 261120  }
 0x46b   :  { %v2208_v26 = vmul.f32 %v13726_v14, %v13725_v56  ;;  %v13727_v47 = vld [vmem:[#allocation142_spill] sm:$0xff]  ;;  %v2211_v43 = vmul.f32 %v13726_v14, %v13729_v16  ;;  %v4247_v56 = vmul.f32 %v13635_v1, %v4231_v33  ;;  %v13738_v61 = vld [vmem:[#allocation173_spill] sm:$0xff]  ;;  %v13739_v62 = vld [vmem:[#allocation4_spill] sm:$0xff]  ;;  %v9905_v16 = vadd.f32 %v2203_v19, %v2171_v57 }
 0x46c   :  { %v2209_v20 = vmul.f32 %v13726_v14, %v13727_v47  ;;  %v13728_v34 = vld [vmem:[#allocation150_spill] sm:$0xff]  ;;  %13730 = vst [vmem:[#allocation238_spill] sm:$0xff] %v9883_v41  ;;  %13731 = vst [vmem:[#allocation239_spill] sm:$0xff] %v9885_v7  ;;  %v13734_v47 = vld [vmem:[#allocation9_spill] sm:$0xff]  ;;  %vm3287_vm1 = vcmp.lt.s32.totalorder %v6898_v11, 3  ;;  %vm3471_vm2 = vcmp.lt.s32.totalorder %v6898_v11, 125 }
 0x46d   :  { %v2210_v8 = vmul.f32 %v13726_v14, %v13728_v34  ;;  %v2275_v34 = vmul.f32 %v13735_v22, %v13734_v47  ;;  %v2276_v14 = vmul.f32 %v13736_v52, %v13734_v47  ;;  %v2277_v25 = vmul.f32 %v13737_v36, %v13734_v47  ;;  %3729 = vrot.lane.b32.xlu0 %v13739_v62, %s4896_s17  ;;  %v13742_v1 = vld [vmem:[#allocation11_spill] sm:$0xff]  ;;  %v13743_v33 = vld [vmem:[#allocation326_spill] sm:$0xff]  ;;  %v13749_v19 = vld [vmem:[#allocation16_spill] sm:$0xff] }
 0x46e   :  { %v2278_v27 = vmul.f32 %v13738_v61, %v13734_v47  ;;  %13740 = vst [vmem:[#allocation249_spill] sm:$0xff] %v9903_v42  ;;  %13741 = vst [vmem:[#allocation245_spill] sm:$0xff] %v9905_v16  ;;  %3467 = vrot.lane.b32.xlu1 %v13742_v1, %s4893_s1  ;;  %v9910_v7 = vmul.f32 %v4373_v49, %v13743_v33  ;;  %v13745_v41 = vld [vmem:[#allocation42_spill] sm:$0xff]  ;;  %v9913_v23 = vadd.f32 %v2208_v26, %v2176_v10  ;;  %v13748_v24 = vld [vmem:[#allocation19_spill] sm:$0xff]  ;;  %v9934_v26 = vpop.permute.xlu0 %3273  ;;  %s4897_s1 = smov 77  }
 0x46f   :  { %v4323_v6 = vmul.f32 %v13745_v41, %v4243_v18  ;;  %v9916_v47 = vadd.f32 %v2209_v20, %v9703_v40  ;;  %v9919_v32 = vadd.f32 %v2210_v8, %v9783_v0  ;;  %v9921_v3 = vadd.f32 %v2211_v43, %v2179_v30  ;;  %v4649_v57 = vld [vmem:[%s11958_s4 + $0x41] ss:$8 sm:$0xf]  ;;  %13751 = vst [vmem:[#allocation101_spill] sm:$0xff] %v9934_v26  ;;  %v9936_v0 = vpop.permute.xlu1 %3523 }
 0x470   :  { %13744 = vst [vmem:[#allocation145_spill] sm:$0xff] %v9910_v7  ;;  %v2329_v49 = vsel %vm2319_vm13, %v13749_v19, %v13748_v24  ;;  %v13750_v18 = vld [vmem:[#allocation60_spill] sm:$0xff]  ;;  %13752 = vst [vmem:[#allocation131_spill] sm:$0xff] %v9936_v0  ;;  %v13753_v30 = vld [vmem:[#allocation165_spill] sm:$0xff]  ;;  %vm3607_vm3 = vcmp.lt.s32.totalorder %v6898_v11, 83  ;;  %vm2455_vm4 = vcmp.lt.s32.totalorder %v6898_v11, 98 }
 0x471   :  { %13746 = vst [vmem:[#allocation139_spill] sm:$0xff] %v9919_v32  ;;  %13747 = vst [vmem:[#allocation241_spill] sm:$0xff] %v9921_v3  ;;  %v2283_v10 = vmul.f32 %v13735_v22, %v13750_v18  ;;  %v2284_v40 = vmul.f32 %v13736_v52, %v13750_v18  ;;  %v4327_v20 = vmul.f32 %v13753_v30, %v4247_v56  ;;  %v13754_v8 = vld [vmem:[#allocation38_spill] sm:$0xff]  ;;  %v13761_v16 = vld [vmem:[#allocation44_spill] sm:$0xff]  ;;  %v4339_v42 = vsub.f32 1.0, %v4323_v6 }
 0x472   :  { %v2271_v43 = vmul.f32 %v13735_v22, %v13754_v8  ;;  %v2272_v41 = vmul.f32 %v13736_v52, %v13754_v8  ;;  %v9945_v33 = vmul.f32 %v13737_v36, %v13750_v18  ;;  %v9949_v7 = vmul.f32 %v13738_v61, %v13750_v18  ;;  %v13757_v3 = vld [vmem:[#allocation6_spill] sm:$0xff]  ;;  %3711 = vrot.lane.b32.xlu1 %v13761_v16, %s4896_s17  ;;  %v13764_v26 = vld [vmem:[#allocation64_spill] sm:$0xff]  ;;  %v13770_v4 = vld [vmem:[#allocation65_spill] sm:$0xff]  ;;  %v9988_v55 = vpop.permute.xlu0 %3281 }
 0x473   :  { %3737 = vrot.lane.b32.xlu0 %v13757_v3, %s4896_s17  ;;  %v9955_v56 = vmul.f32 %v13737_v36, %v13754_v8  ;;  %v9959_v30 = vmul.f32 %v13738_v61, %v13754_v8  ;;  %v9962_v32 = vrot.slane %v4649_v57, %v13518_v31  ;;  %v2340_v18 = vmul.f32 %v2329_v49, %v2275_v34  ;;  %v13766_v8 = vld [vmem:[#allocation17_spill] sm:$0xff]  ;;  %v13768_v6 = vld [vmem:[#allocation46_spill] sm:$0xff]  ;;  %v13769_v34 = vld [vmem:[#allocation20_spill] sm:$0xff] }
 0x474   :  { %13755 = vst [vmem:[#allocation243_spill] sm:$0xff] %v9945_v33  ;;  %13756 = vst [vmem:[#allocation244_spill] sm:$0xff] %v9949_v7  ;;  %v13762_v7 = vld [vmem:[#allocation62_spill] sm:$0xff]  ;;  %v13763_v33 = vld [vmem:[#allocation61_spill] sm:$0xff]  ;;  %v2330_v49 = vsel %vm2319_vm13, %v13769_v34, %v13768_v6  ;;  %vm3743_vm5 = vcmp.lt.s32.totalorder %v6898_v11, 80  ;;  %vm2591_vm6 = vcmp.lt.s32.totalorder %v6898_v11, 96 }
 0x475   :  { %13758 = vst [vmem:[#allocation287_spill] sm:$0xff] %v9955_v56  ;;  %13759 = vst [vmem:[#allocation246_spill] sm:$0xff] %v9959_v30  ;;  %v2331_v0 = vsel %vm2319_vm13, %v13763_v33, %v13762_v7  ;;  %v2328_v56 = vsel %vm2319_vm13, %v13765_v46, %v13764_v26  ;;  %v2279_v30 = vmul.f32 %v13735_v22, %v13766_v8  ;;  %v9990_v46 = vpop.permute.xlu1 %3255  ;;  %v4343_v22 = vsub.f32 1.0, %v4327_v20  ;;  %v13773_v3 = vld [vmem:[#allocation45_spill] sm:$0xff]  ;;  %v13774_v62 = vld [vmem:[#allocation47_spill] sm:$0xff] }
 0x476   :  { %13760 = vst [vmem:[#allocation114_spill] sm:$0xff] %v9962_v32  ;;  %v2325_v32 = vsel %vm2319_vm13, %v13748_v24, %v13767_v21  ;;  %v2327_v39 = vsel %vm2319_vm13, %v13762_v7, %v13770_v4  ;;  %13771 = vst [vmem:[#allocation251_spill] sm:$0xff] %v9988_v55  ;;  %v2324_v24 = vsel %vm2319_vm13, %v13764_v26, %v13773_v3  ;;  %v13775_v58 = vld [vmem:[#allocation66_spill] sm:$0xff]  ;;  %3719 = vrot.lane.b32.xlu1 %v13588_v15, %s4896_s17  ;;  %v13776_v55 = vld [vmem:[#allocation215_spill] sm:$0xff] }
 0x477   :  { %13772 = vst [vmem:[#allocation247_spill] sm:$0xff] %v9990_v46  ;;  %v2321_v34 = vsel %vm2319_vm13, %v13767_v21, %v13774_v62  ;;  %v2333_v7 = vsel %vm2319_vm13, %v13774_v62, %v13749_v19  ;;  %v2326_v20 = vsel %vm2319_vm13, %v13768_v6, %v13775_v58  ;;  %v4861_v46 = vld [vmem:[%s11957_s3 + $0x8] sm:$0xff]  ;;  %v2348_v26 = vmul.f32 %v2331_v0, %v2283_v10  ;;  %v10020_v0 = vpop.permute.xlu0 %3349 }
 0x478   :  { %3933 = vperm.xlu0 %4733, %v4861_v46   ;;  %v2336_v3 = vmul.f32 %v2328_v56, %v2271_v43  ;;  %v2280_v21 = vmul.f32 %v13736_v52, %v13766_v8  ;;  %v4355_v62 = vmul.f32 %v4339_v42, %v13776_v55  ;;  %v2341_v19 = vmul.f32 %v2325_v32, %v2276_v14  ;;  %v13782_v32 = vld [vmem:[#allocation56_spill] sm:$0xff] }
 0x479   :  { %v2344_v29 = vmul.f32 %v2330_v49, %v2279_v30  ;;  %v2349_v35 = vmul.f32 %v2327_v39, %v2284_v40  ;;  %v10018_v6 = vmul.f32 %v13737_v36, %v13766_v8  ;;  %v2337_v58 = vmul.f32 %v2324_v24, %v2272_v41  ;;  %v10022_v43 = vpop.permute.xlu1 %3263  ;;  %v4651_v40 = vld [vmem:[%s11958_s4 + $0x43] ss:$8 sm:$0xf] }
 0x47a   :  { %v2342_v9 = vmul.f32 %v2321_v34, %v2277_v25  ;;  %v2343_v46 = vmul.f32 %v2333_v7, %v2278_v27  ;;  %v2345_v10 = vmul.f32 %v2326_v20, %v2280_v21  ;;  %13778 = vst [vmem:[#allocation252_spill] sm:$0xff] %v10022_v43  ;;  %v10025_v52 = vadd.f32 %v2340_v18, %v9820_v44  ;;  %v13801_v49 = vld [vmem:[#allocation309_spill] sm:$0xff] }
 0x47b   :  { %13777 = vst [vmem:[#allocation305_spill] sm:$0xff] %v10018_v6  ;;  %v10029_v55 = vmul.f32 %v13738_v61, %v13766_v8  ;;  %v10032_v39 = vrot.slane %v4649_v57, %v13658_v38  ;;  %v10037_v14 = vmul.f32 %v4343_v22, %v13782_v32  ;;  %v10040_v36 = vadd.f32 %v2348_v26, %v9861_v53  ;;  %v4650_v61 = vld [vmem:[%s11958_s4 + $0x42] ss:$8 sm:$0xf] }
 0x47c   :  { %13779 = vst [vmem:[#allocation248_spill] sm:$0xff] %v10025_v52  ;;  %3587 = vrot.lane.b32.xlu0 %v13711_v51, %s4894_s9  ;;  %v10043_v25 = vadd.f32 %v2336_v3, %v9863_v13  ;;  %v10046_v44 = vrot.slane %v4649_v57, %v13516_v50  ;;  %3727 = vrot.lane.b32.xlu1 %v13599_v45, %s4896_s17  ;;  %v10053_v27 = vadd.f32 1.0, %v4355_v62  ;;  %v13804_v32 = vld [vmem:[#allocation30_spill] sm:$0xff]  ;;  %v13812_v52 = vld [vmem:[#allocation328_spill] sm:$0xff]  ;;  %v13821_v43 = vld [vmem:[#allocation133_spill] sm:$0xff]  ;;  %vm2727_vm7 = vcmp.lt.s32.totalorder %v6898_v11, 94 }
 0x47d   :  { %13780 = vst [vmem:[#allocation84_spill] sm:$0xff] %v10029_v55  ;;  %13781 = vst [vmem:[#allocation290_spill] sm:$0xff] %v10032_v39  ;;  %v10056_v42 = vadd.f32 %v2341_v19, %v9823_v17  ;;  %v10059_v53 = vadd.f32 %v2344_v29, %v9913_v23  ;;  %v10062_v13 = vadd.f32 %v2349_v35, %v9866_v37  ;;  %v4652_v35 = vld [vmem:[%s11958_s4 + $0x44] ss:$8 sm:$0xf]  ;;  %v10085_v37 = vpop.permute.xlu0 %3399  ;;  %v10087_v23 = vpop.permute.xlu1 %3271  ;;  %vm3879_vm8 = vcmp.lt.s32.totalorder %v6898_v11, 77 }
 0x47e   :  { %13783 = vst [vmem:[#allocation320_spill] sm:$0xff] %v10037_v14  ;;  %13784 = vst [vmem:[#allocation253_spill] sm:$0xff] %v10040_v36  ;;  %v10065_v3 = vrot.slane %v4649_v57, %v13523_v54  ;;  %v10071_v41 = vadd.f32 %v2337_v58, %v9880_v59  ;;  %v10074_v56 = vadd.f32 %v2342_v9, %v9836_v28  ;;  %v13798_v57 = vld [vmem:[#allocation67_spill] sm:$0xff]  ;;  %v13813_v14 = vld [vmem:[#allocation333_spill] sm:$0xff] }
 0x47f   :  { %13785 = vst [vmem:[#allocation254_spill] sm:$0xff] %v10043_v25  ;;  %13786 = vst [vmem:[#allocation250_spill] sm:$0xff] %v10046_v44  ;;  %v10077_v17 = vadd.f32 %v2343_v46, %v9838_v60  ;;  %v10080_v29 = vadd.f32 %v2345_v10, %v9916_v47  ;;  %v10093_v9 = vsel %vm2319_vm13, %v13770_v4, %v13798_v57  ;;  %v13807_v44 = vld [vmem:[#allocation329_spill] sm:$0xff]  ;;  %v13811_v36 = vld [vmem:[#allocation335_spill] sm:$0xff] }
 0x480   :  { %13787 = vst [vmem:[#allocation324_spill] sm:$0xff] %v10053_v27  ;;  %13788 = vst [vmem:[#allocation102_spill] sm:$0xff] %v10056_v42  ;;  %v10099_v28 = vsel %vm2319_vm13, %v13798_v57, %v13763_v33  ;;  %v2834_v60 = vrot.slane %v4650_v61, %v13658_v38  ;;  %3595 = vrot.lane.b32.xlu0 %v13724_v63, %s4894_s9  ;;  %v2838_v58 = vrot.slane %v4650_v61, %v13516_v50  ;;  %v4653_v33 = vld [vmem:[%s11958_s4 + $0x45] ss:$8 sm:$0xf] }
 0x481   :  { %13789 = vst [vmem:[#allocation293_spill] sm:$0xff] %v10059_v53  ;;  %13790 = vst [vmem:[#allocation255_spill] sm:$0xff] %v10062_v13  ;;  %v2830_v59 = vrot.slane %v4650_v61, %v13518_v31  ;;  %v2842_v4 = vrot.slane %v4650_v61, %v13523_v54  ;;  %v10109_v47 = vrot.slane %v4651_v40, %v13658_v38  ;;  %3735 = vrot.lane.b32.xlu1 %v13615_v48, %s4896_s17  ;;  %v10139_v26 = vpop.permute.xlu0 %3663  ;;  %v10141_v21 = vpop.permute.xlu1 %3279  ;;  %v13805_v61 = vld [vmem:[#allocation36_spill] sm:$0xff] }
 0x482   :  { %13791 = vst [vmem:[#allocation334_spill] sm:$0xff] %v10065_v3  ;;  %13792 = vst [vmem:[#allocation332_spill] sm:$0xff] %v10071_v41  ;;  %v10117_v30 = vrot.slane %v4651_v40, %v13516_v50  ;;  %v10120_v18 = vrot.slane %v4651_v40, %v13518_v31  ;;  %v10123_v8 = vrot.slane %v4651_v40, %v13523_v54 }
 0x483   :  { %13793 = vst [vmem:[#allocation120_spill] sm:$0xff] %v10074_v56  ;;  %13794 = vst [vmem:[#allocation119_spill] sm:$0xff] %v10077_v17  ;;  %v10126_v34 = vrot.slane %v4652_v35, %v13658_v38  ;;  %v2848_v22 = vmul.f32 %v2834_v60, %v13801_v49  ;;  %v10131_v24 = vrot.slane %v4652_v35, %v13516_v50 }
 0x484   :  { %13795 = vst [vmem:[#allocation137_spill] sm:$0xff] %v10080_v29  ;;  %13796 = vst [vmem:[#allocation256_spill] sm:$0xff] %v10085_v37  ;;  %v10134_v7 = vrot.slane %v4652_v35, %v13518_v31  ;;  %v10137_v20 = vrot.slane %v4652_v35, %v13523_v54  ;;  %v2849_v62 = vmul.f32 %v2838_v58, %v13801_v49  ;;  %3603 = vrot.lane.b32.xlu0 %v13742_v1, %s4894_s9  ;;  %v13806_v35 = vld [vmem:[#allocation99_spill] sm:$0xff]  ;;  %v13817_v37 = vld [vmem:[#allocation41_spill] sm:$0xff] }
 0x485   :  { %13797 = vst [vmem:[#allocation297_spill] sm:$0xff] %v10087_v23  ;;  %13799 = vst [vmem:[#allocation296_spill] sm:$0xff] %v10093_v9  ;;  %v10145_v19 = vmul.f32 %v2830_v59, %v13801_v49  ;;  %v10148_v46 = vmul.f32 %v2842_v4, %v13801_v49  ;;  %v10151_v10 = vrot.slane %v4653_v33, %v13658_v38  ;;  %v4862_v49 = vld [vmem:[%s11957_s3] sm:$0xff]  ;;  %v10182_v25 = vpop.permute.xlu1 %3345 }
 0x486   :  { %13800 = vst [vmem:[#allocation291_spill] sm:$0xff] %v10099_v28  ;;  %13802 = vst [vmem:[#allocation85_spill] sm:$0xff] %v10139_v26  ;;  %v2905_v40 = vsel %vm2895_vm14, %v13805_v61, %v13804_v32  ;;  %v2860_v57 = vmul.f32 %v2834_v60, %v13806_v35  ;;  %v2861_v27 = vmul.f32 %v2838_v58, %v13806_v35  ;;  %3929 = vperm.xlu1 %4732, %v4862_v49   ;;  %v10180_v49 = vpop.permute.xlu0 %3125  ;;  %v13818_v9 = vld [vmem:[#allocation126_spill] sm:$0xff] }
 0x487   :  { %13803 = vst [vmem:[#allocation330_spill] sm:$0xff] %v10141_v21  ;;  %v2859_v3 = vmul.f32 %v2830_v59, %v13806_v35  ;;  %v2852_v39 = vmul.f32 %v2834_v60, %v13807_v44  ;;  %v2862_v29 = vmul.f32 %v2842_v4, %v13806_v35  ;;  %v10169_v17 = vrot.slane %v4653_v33, %v13516_v50 }
 0x488   :  { %v10172_v56 = vrot.slane %v4653_v33, %v13518_v31  ;;  %v2853_v41 = vmul.f32 %v2838_v58, %v13807_v44  ;;  %v2851_v13 = vmul.f32 %v2830_v59, %v13807_v44  ;;  %v2854_v53 = vmul.f32 %v2842_v4, %v13807_v44  ;;  %13810 = vst [vmem:[#allocation86_spill] sm:$0xff] %v10182_v25  ;;  %v13814_v44 = vld [vmem:[#allocation122_spill] sm:$0xff] }
 0x489   :  { %v10178_v42 = vrot.slane %v4653_v33, %v13523_v54  ;;  %v10184_v35 = vmul.f32 %v2905_v40, %v2852_v39  ;;  %v2907_v26 = vsel %vm2895_vm14, %v13812_v52, %v13811_v36  ;;  %v2856_v55 = vmul.f32 %v2834_v60, %v13813_v14  ;;  %3847 = vrot.lane.b32.xlu0 %v13761_v16, %s4897_s1  ;;  %v13815_v39 = vld [vmem:[#allocation123_spill] sm:$0xff] }
 0x48a   :  { %13808 = vst [vmem:[#allocation129_spill] sm:$0xff] %v10172_v56  ;;  %v2857_v6 = vmul.f32 %v2838_v58, %v13813_v14  ;;  %v2901_v33 = vsel %vm2895_vm14, %v13804_v32, %v13814_v44  ;;  %v2903_v40 = vsel %vm2895_vm14, %v13811_v36, %v13815_v39  ;;  %v2855_v25 = vmul.f32 %v2830_v59, %v13813_v14  ;;  %v13816_v58 = vld [vmem:[#allocation135_spill] sm:$0xff]  ;;  %v13819_v59 = vld [vmem:[#allocation141_spill] sm:$0xff] }
 0x48b   :  { %13809 = vst [vmem:[#allocation117_spill] sm:$0xff] %v10178_v42  ;;  %v2858_v60 = vmul.f32 %v2842_v4, %v13813_v14  ;;  %3579 = vrot.lane.b32.xlu1 %v13693_v2, %s4894_s9  ;;  %v2904_v28 = vsel %vm2895_vm14, %v13817_v37, %v13816_v58  ;;  %v2897_v32 = vsel %vm2895_vm14, %v13814_v44, %v13818_v9  ;;  %v13820_v14 = vld [vmem:[#allocation18_spill] sm:$0xff]  ;;  %v13822_v16 = vld [vmem:[#allocation143_spill] sm:$0xff]  ;;  %v10236_v42 = vpop.permute.xlu1 %3395  ;;  %v13824_v56 = vld [vmem:[#allocation149_spill] sm:$0xff] }
 0x48c   :  { %v2909_v36 = vsel %vm2895_vm14, %v13818_v9, %v13805_v61  ;;  %v2906_v4 = vsel %vm2895_vm14, %v13820_v14, %v13819_v59  ;;  %v10222_v23 = vmul.f32 %v2907_v26, %v2860_v57  ;;  %v2899_v21 = vsel %vm2895_vm14, %v13815_v39, %v13821_v43  ;;  %v3134_v61 = vpop.permute.xlu0 %3133  ;;  %13823 = vst [vmem:[#allocation257_spill] sm:$0xff] %v10236_v42  ;;  %v13825_v42 = vld [vmem:[#allocation147_spill] sm:$0xff] }
 0x48d   :  { %v2911_v44 = vsel %vm2895_vm14, %v13821_v43, %v13812_v52  ;;  %v2900_v9 = vsel %vm2895_vm14, %v13816_v58, %v13822_v16  ;;  %v10238_v26 = vmul.f32 %v2901_v33, %v2853_v41  ;;  %v10240_v57 = vmul.f32 %v2903_v40, %v2861_v27  ;;  %3855 = vrot.lane.b32.xlu0 %v13588_v15, %s4897_s1 }
 0x48e   :  { %v2902_v39 = vsel %vm2895_vm14, %v13819_v59, %v13824_v56  ;;  %v10249_v43 = vsel %vm3151_vm15, %v10180_v49, %v3134_v61  ;;  %v10253_v52 = vmul.f32 %v2904_v28, %v2848_v22  ;;  %v10255_v58 = vmul.f32 %v2909_v36, %v2851_v13  ;;  %v4654_v13 = vld [vmem:[%s11958_s4 + $0x47] ss:$8 sm:$0xf] }
 0x48f   :  { %v10257_v41 = vmul.f32 %v2897_v32, %v2854_v53  ;;  %v10259_v27 = vmul.f32 %v2906_v4, %v2856_v55  ;;  %3581 = vrot.lane.b32.xlu1 %v13656_v5, %s4894_s9  ;;  %v10263_v33 = vmul.f32 %v2911_v44, %v2859_v3  ;;  %v10265_v40 = vmul.f32 %v2899_v21, %v2862_v29  ;;  %v13827_v55 = vld [vmem:[#allocation153_spill] sm:$0xff]  ;;  %v10286_v21 = vpop.permute.xlu1 %3659  ;;  %v13830_v32 = vld [vmem:[#allocation155_spill] sm:$0xff]  ;;  %v13831_v44 = vld [vmem:[#allocation156_spill] sm:$0xff] }
 0x490   :  { %v10267_v59 = vmul.f32 %v2900_v9, %v2849_v62  ;;  %v2972_v15 = vmul.f32 %v10109_v47, %v13825_v42  ;;  %v10274_v53 = vmul.f32 %v2902_v39, %v2857_v6  ;;  %v2908_v28 = vsel %vm2895_vm14, %v13827_v55, %v13817_v37  ;;  %v3142_v22 = vpop.permute.xlu0 %3141  ;;  %13828 = vst [vmem:[#allocation258_spill] sm:$0xff] %v10286_v21  ;;  %v13829_v62 = vld [vmem:[#allocation182_spill] sm:$0xff] }
 0x491   :  { %v2973_v3 = vmul.f32 %v10117_v30, %v13825_v42  ;;  %v10284_v29 = vmul.f32 %v10120_v18, %v13825_v42  ;;  %v2896_v6 = vsel %vm2895_vm14, %v13822_v16, %v13827_v55  ;;  %v3025_v37 = vsel %vm3015_vm0, %v13830_v32, %v13829_v62  ;;  %3863 = vrot.lane.b32.xlu0 %v13599_v45, %s4897_s1  ;;  %v13836_v55 = vld [vmem:[#allocation151_spill] sm:$0xff] }
 0x492   :  { %13826 = vst [vmem:[#allocation127_spill] sm:$0xff] %v10274_v53  ;;  %v10298_v36 = vmul.f32 %v10123_v8, %v13825_v42  ;;  %v10302_v4 = vsel %vm3151_vm15, %v3134_v61, %v3142_v22  ;;  %v2910_v16 = vsel %vm2895_vm14, %v13831_v44, %v13820_v14  ;;  %v10313_v9 = vrot.slane %v4654_v13, %v13518_v31  ;;  %v13850_v53 = vld [vmem:[#allocation172_spill] sm:$0xff] }
 0x493   :  { %3589 = vrot.lane.b32.xlu1 %v13667_v12, %s4894_s9  ;;  %v10316_v42 = vrot.slane %v4654_v13, %v13658_v38  ;;  %v10319_v61 = vrot.slane %v4654_v13, %v13516_v50  ;;  %v10322_v39 = vmul.f32 %v2908_v28, %v10145_v19  ;;  %v2898_v14 = vsel %vm2895_vm14, %v13824_v56, %v13831_v44 }
 0x494   :  { %13832 = vst [vmem:[#allocation294_spill] sm:$0xff] %v10313_v9  ;;  %v2980_v21 = vmul.f32 %v10109_v47, %v13836_v55  ;;  %v10331_v45 = vrot.slane %v4654_v13, %v13523_v54  ;;  %v10334_v9 = vmul.f32 %v2896_v6, %v10148_v46  ;;  %v2979_v19 = vmul.f32 %v10120_v18, %v13836_v55  ;;  %v3150_v28 = vpop.permute.xlu0 %3149  ;;  %v13842_v6 = vld [vmem:[#allocation162_spill] sm:$0xff] }
 0x495   :  { %13833 = vst [vmem:[#allocation259_spill] sm:$0xff] %v10316_v42  ;;  %13834 = vst [vmem:[#allocation115_spill] sm:$0xff] %v10319_v61  ;;  %v3037_v42 = vmul.f32 %v3025_v37, %v2972_v15  ;;  %v2981_v61 = vmul.f32 %v10117_v30, %v13836_v55  ;;  %v10342_v56 = vmul.f32 %v2910_v16, %v2855_v25  ;;  %3871 = vrot.lane.b32.xlu0 %v13615_v48, %s4897_s1  ;;  %v13844_v16 = vld [vmem:[#allocation13_spill] sm:$0xff] }
 0x496   :  { %13835 = vst [vmem:[#allocation260_spill] sm:$0xff] %v10322_v39  ;;  %13837 = vst [vmem:[#allocation306_spill] sm:$0xff] %v10331_v45  ;;  %v10340_v39 = vpop.permute.xlu1 %3123  ;;  %v2982_v44 = vmul.f32 %v10123_v8, %v13836_v55  ;;  %v10348_v13 = vsel %vm3151_vm15, %v3142_v22, %v3150_v28  ;;  %v10353_v15 = vsel %vm3151_vm15, %v3150_v28, %v10180_v49  ;;  %v4657_v49 = vld [vmem:[%s11958_s4 + $0x62] ss:$8 sm:$0xf] }
 0x497   :  { %13838 = vst [vmem:[#allocation31_spill] sm:$0xff] %v10334_v9  ;;  %13839 = vst [vmem:[#allocation33_spill] sm:$0xff] %v10342_v56  ;;  %v10357_v46 = vmul.f32 %v2898_v14, %v2858_v60  ;;  %v2968_v25 = vmul.f32 %v10109_v47, %v13842_v6  ;;  %v2969_v37 = vmul.f32 %v10117_v30, %v13842_v6  ;;  %3597 = vrot.lane.b32.xlu1 %v13844_v16, %s4894_s9  ;;  %v13845_v55 = vld [vmem:[#allocation167_spill] sm:$0xff]  ;;  %v13846_v60 = vld [vmem:[#allocation166_spill] sm:$0xff] }
 0x498   :  { %13840 = vst [vmem:[#allocation98_spill] sm:$0xff] %v10348_v13  ;;  %v10365_v22 = vmul.f32 %v10120_v18, %v13842_v6  ;;  %v3027_v14 = vsel %vm3015_vm0, %v13846_v60, %v13845_v55  ;;  %v13847_v28 = vld [vmem:[#allocation178_spill] sm:$0xff]  ;;  %v10390_v9 = vadd.f32 %v3037_v42, %v10184_v35  ;;  %v13862_v16 = vld [vmem:[#allocation281_spill] sm:$0xff] }
 0x499   :  { %13841 = vst [vmem:[#allocation262_spill] sm:$0xff] %v10357_v46  ;;  %v2976_v48 = vmul.f32 %v10109_v47, %v13847_v28  ;;  %v10380_v45 = vmul.f32 %v10117_v30, %v13847_v28  ;;  %v10384_v46 = vmul.f32 %v10123_v8, %v13842_v6  ;;  %v4655_v56 = vld [vmem:[%s11958_s4 + $0x60] ss:$8 sm:$0xf]  ;;  %v3021_v47 = vsel %vm3015_vm0, %v13829_v62, %v13850_v53 }
 0x49a   :  { %13843 = vst [vmem:[#allocation301_spill] sm:$0xff] %v10365_v22  ;;  %13849 = vst [vmem:[#allocation158_spill] sm:$0xff] %v10390_v9  ;;  %v10398_v30 = vmul.f32 %v10120_v18, %v13847_v28  ;;  %v10402_v6 = vmul.f32 %v10123_v8, %v13847_v28  ;;  %v3132_v5 = vpop.permute.xlu1 %3131  ;;  %3715 = vrot.lane.b32.xlu0 %v13693_v2, %s4896_s17  ;;  %v10414_v62 = vrot.slane %v4657_v49, %v13518_v31  ;;  %v13857_v28 = vld [vmem:[#allocation40_spill] sm:$0xff]  ;;  %v13861_v2 = vld [vmem:[#allocation199_spill] sm:$0xff] }
 0x49b   :  { %13848 = vst [vmem:[#allocation96_spill] sm:$0xff] %v10384_v46  ;;  %v10404_v46 = vpop.permute.xlu0 %3535  ;;  %v10409_v35 = vsel %vm3151_vm15, %v10340_v39, %v3132_v5  ;;  %v10417_v18 = vrot.slane %v4657_v49, %v13658_v38  ;;  %v10420_v8 = vrot.slane %v4657_v49, %v13516_v50  ;;  %v3045_v42 = vmul.f32 %v3027_v14, %v2980_v21  ;;  %v13863_v21 = vld [vmem:[#allocation163_spill] sm:$0xff] }
 0x49c   :  { %13851 = vst [vmem:[#allocation159_spill] sm:$0xff] %v10398_v30  ;;  %13852 = vst [vmem:[#allocation160_spill] sm:$0xff] %v10402_v6  ;;  %3605 = vrot.lane.b32.xlu1 %v13857_v28, %s4894_s9  ;;  %v10428_v9 = vrot.slane %v4655_v56, %v13658_v38  ;;  %v10431_v6 = vrot.slane %v4657_v49, %v13523_v54  ;;  %v3038_v30 = vmul.f32 %v3021_v47, %v2973_v3  ;;  %v13866_v47 = vld [vmem:[#allocation189_spill] sm:$0xff] }
 0x49d   :  { %13853 = vst [vmem:[#allocation174_spill] sm:$0xff] %v10404_v46  ;;  %13854 = vst [vmem:[#allocation170_spill] sm:$0xff] %v10409_v35  ;;  %v10425_v46 = vrot.slane %v4655_v56, %v13518_v31  ;;  %v3023_v35 = vsel %vm3015_vm0, %v13845_v55, %v13861_v2  ;;  %v3024_v14 = vsel %vm3015_vm0, %v13863_v21, %v13862_v16  ;;  %v13867_v55 = vld [vmem:[#allocation179_spill] sm:$0xff] }
 0x49e   :  { %13855 = vst [vmem:[#allocation261_spill] sm:$0xff] %v10417_v18  ;;  %13856 = vst [vmem:[#allocation168_spill] sm:$0xff] %v10420_v8  ;;  %v10442_v31 = vrot.slane %v4655_v56, %v13516_v50  ;;  %v3026_v38 = vsel %vm3015_vm0, %v13867_v55, %v13866_v47  ;;  %v3140_v28 = vpop.permute.xlu1 %3139  ;;  %3723 = vrot.lane.b32.xlu0 %v13711_v51, %s4896_s17  ;;  %v13874_v51 = vld [vmem:[#allocation3_spill] sm:$0xff]  ;;  %v3061_v13 = vadd.f32 %v3045_v42, %v10222_v23 }
 0x49f   :  { %13858 = vst [vmem:[#allocation164_spill] sm:$0xff] %v10425_v46  ;;  %13859 = vst [vmem:[#allocation169_spill] sm:$0xff] %v10428_v9  ;;  %v13865_v46 = vld [vmem:[#allocation181_spill] sm:$0xff]  ;;  %v13868_v9 = vld [vmem:[#allocation200_spill] sm:$0xff] }
 0x4a0   :  { %13860 = vst [vmem:[#allocation161_spill] sm:$0xff] %v10431_v6  ;;  %13864 = vst [vmem:[#allocation186_spill] sm:$0xff] %v10442_v31  ;;  %v3017_v49 = vsel %vm3015_vm0, %v13850_v53, %v13865_v46  ;;  %v3029_v3 = vsel %vm3015_vm0, %v13865_v46, %v13830_v32  ;;  %v3031_v50 = vsel %vm3015_vm0, %v13868_v9, %v13846_v60  ;;  %v3800_v31 = vpop.permute.xlu0 %3799  ;;  %3849 = vrot.lane.b32.xlu1 %v13874_v51, %s4897_s1 }
 0x4a1   :  { %v10463_v53 = vsel %vm3151_vm15, %v3132_v5, %v3140_v28  ;;  %v10468_v32 = vmul.f32 %v10414_v62, %v3800_v31  ;;  %v10471_v46 = vmul.f32 %v10417_v18, %v3800_v31  ;;  %v10474_v55 = vmul.f32 %v10420_v8, %v3800_v31  ;;  %v13873_v5 = vld [vmem:[#allocation193_spill] sm:$0xff] }
 0x4a2   :  { %13869 = vst [vmem:[#allocation194_spill] sm:$0xff] %v10463_v53  ;;  %v3046_v60 = vmul.f32 %v3023_v35, %v2981_v61  ;;  %v3019_v22 = vsel %vm3015_vm0, %v13861_v2, %v13868_v9  ;;  %v3020_v53 = vsel %vm3015_vm0, %v13862_v16, %v13873_v5  ;;  %v3039_v61 = vmul.f32 %v3017_v49, %v10298_v36  ;;  %v13876_v9 = vld [vmem:[#allocation304_spill] sm:$0xff]  ;;  %v3148_v16 = vpop.permute.xlu1 %3147 }
 0x4a3   :  { %13870 = vst [vmem:[#allocation263_spill] sm:$0xff] %v10468_v32  ;;  %13871 = vst [vmem:[#allocation264_spill] sm:$0xff] %v10471_v46  ;;  %v10487_v32 = vmul.f32 %v10431_v6, %v3800_v31  ;;  %v3033_v46 = vmul.f32 %v3024_v14, %v2968_v25  ;;  %v3041_v35 = vmul.f32 %v3026_v38, %v2976_v48  ;;  %3731 = vrot.lane.b32.xlu0 %v13724_v63, %s4896_s17  ;;  %v13883_v14 = vld [vmem:[#allocation4_spill] sm:$0xff] }
 0x4a4   :  { %13872 = vst [vmem:[#allocation93_spill] sm:$0xff] %v10474_v55  ;;  %v3036_v55 = vmul.f32 %v3029_v3, %v10284_v29  ;;  %v3044_v2 = vmul.f32 %v3031_v50, %v2979_v19  ;;  %v3116_v8 = vmul.f32 %v10126_v34, %v13876_v9  ;;  %v10494_v18 = vpop.permute.xlu0 %3261  ;;  %v10497_v51 = vrot.slane %v4655_v56, %v13523_v54  ;;  %v13878_v19 = vld [vmem:[#allocation5_spill] sm:$0xff] }
 0x4a5   :  { %13875 = vst [vmem:[#allocation273_spill] sm:$0xff] %v10487_v32  ;;  %v3047_v31 = vmul.f32 %v3019_v22, %v2982_v44  ;;  %v3034_v32 = vmul.f32 %v3020_v53, %v2969_v37  ;;  %v10501_v29 = vsel %vm3151_vm15, %v3140_v28, %v3148_v16  ;;  %v10506_v48 = vsel %vm3151_vm15, %v3148_v16, %v10340_v39  ;;  %v13884_v3 = vld [vmem:[#allocation209_spill] sm:$0xff] }
 0x4a6   :  { %13877 = vst [vmem:[#allocation265_spill] sm:$0xff] %v10497_v51  ;;  %v10511_v50 = vadd.f32 %v3038_v30, %v10238_v26  ;;  %v3062_v38 = vadd.f32 %v3046_v60, %v10240_v57  ;;  %v3181_v23 = vmul.f32 %v10249_v43, %v3116_v8  ;;  %v3117_v36 = vmul.f32 %v10131_v24, %v13876_v9  ;;  %v13879_v43 = vld [vmem:[#allocation311_spill] sm:$0xff]  ;;  %v10539_v30 = vpop.permute.xlu1 %3531  ;;  %v13882_v8 = vld [vmem:[#allocation313_spill] sm:$0xff] }
 0x4a7   :  { %3857 = vrot.lane.b32.xlu1 %v13878_v19, %s4897_s1  ;;  %v10520_v56 = vadd.f32 %v3033_v46, %v10253_v52  ;;  %v10523_v39 = vadd.f32 %v3036_v55, %v10255_v58  ;;  %v10526_v44 = vadd.f32 %v3039_v61, %v10257_v41  ;;  %v10529_v26 = vadd.f32 %v3041_v35, %v10259_v27  ;;  %v13880_v52 = vld [vmem:[#allocation214_spill] sm:$0xff] }
 0x4a8   :  { %v3060_v57 = vadd.f32 %v3044_v2, %v10263_v33  ;;  %v3022_v25 = vsel %vm3015_vm0, %v13866_v47, %v13879_v43  ;;  %v3182_v37 = vmul.f32 %v10302_v4, %v3117_v36  ;;  %v3252_v22 = vmul.f32 %v10151_v10, %v13880_v52  ;;  %v3270_v58 = vpop.permute.xlu0 %3269  ;;  %13881 = vst [vmem:[#allocation325_spill] sm:$0xff] %v10539_v30 }
 0x4a9   :  { %v3063_v41 = vadd.f32 %v3047_v31, %v10265_v40  ;;  %v10543_v27 = vadd.f32 %v3034_v32, %v10267_v59  ;;  %v10547_v33 = vmul.f32 %v10126_v34, %v13882_v8  ;;  %v3299_v42 = vsel %vm3287_vm1, %v10494_v18, %v3270_v58  ;;  %3739 = vrot.lane.b32.xlu0 %v13742_v1, %s4896_s17  ;;  %v13888_v31 = vld [vmem:[#allocation168_spill] sm:$0xff] }
 0x4aa   :  { %v10556_v4 = vmul.f32 %v10131_v24, %v13882_v8  ;;  %v3197_v28 = vadd.f32 %v3181_v23, %v3061_v13  ;;  %v3115_v40 = vmul.f32 %v10134_v7, %v13876_v9  ;;  %v3317_v59 = vmul.f32 %v3299_v42, %v3252_v22  ;;  %v13894_v42 = vld [vmem:[#allocation301_spill] sm:$0xff] }
 0x4ab   :  { %3865 = vrot.lane.b32.xlu1 %v13883_v14, %s4897_s1  ;;  %v3042_v49 = vmul.f32 %v3022_v25, %v10380_v45  ;;  %v3028_v47 = vsel %vm3015_vm0, %v13884_v3, %v13863_v21  ;;  %v3118_v55 = vmul.f32 %v10137_v20, %v13876_v9  ;;  %v3253_v13 = vmul.f32 %v10169_v17, %v13880_v52  ;;  %v3796_v45 = vpop.permute.xlu1 %3795  ;;  %v4863_v21 = vld [vmem:[%s11957_s3 + $0x10] sm:$0xff]  ;;  %v13886_v9 = vld [vmem:[#allocation261_spill] sm:$0xff]  ;;  %v13891_v25 = vld [vmem:[#allocation6_spill] sm:$0xff] }
 0x4ac   :  { %v3365_v53 = vmul.f32 %v10020_v0, %v13667_v12  ;;  %v3198_v32 = vadd.f32 %v3182_v37, %v3062_v38  ;;  %v3180_v46 = vmul.f32 %v10353_v15, %v3115_v40  ;;  %v3333_v60 = vadd.f32 %v3317_v59, %v3197_v28  ;;  %v3278_v61 = vpop.permute.xlu0 %3277  ;;  %v13890_v15 = vld [vmem:[#allocation98_spill] sm:$0xff]  ;;  %v13895_v59 = vld [vmem:[#allocation76_spill] sm:$0xff] }
 0x4ad   :  { %v3295_v35 = vsel %vm3287_vm1, %v3270_v58, %v3278_v61  ;;  %3937 = vperm.xlu0 %4733, %v4863_v21   ;;  %v10580_v2 = vmul.f32 %v10414_v62, %v3796_v45  ;;  %v10583_v16 = vmul.f32 %v13886_v9, %v3796_v45  ;;  %v10586_v38 = vmul.f32 %v13888_v31, %v3796_v45  ;;  %v13898_v21 = vld [vmem:[#allocation117_spill] sm:$0xff] }
 0x4ae   :  { %v3183_v23 = vmul.f32 %v13890_v15, %v3118_v55  ;;  %v3318_v36 = vmul.f32 %v3295_v35, %v3253_v13  ;;  %v10592_v37 = vadd.f32 %v3365_v53, %v3333_v60  ;;  %v10595_v22 = vmul.f32 %v10431_v6, %v3796_v45  ;;  %v13896_v13 = vld [vmem:[#allocation13_spill] sm:$0xff]  ;;  %v13915_v6 = vld [vmem:[#allocation160_spill] sm:$0xff] }
 0x4af   :  { %13885 = vst [vmem:[#allocation106_spill] sm:$0xff] %v10580_v2  ;;  %13887 = vst [vmem:[#allocation124_spill] sm:$0xff] %v10583_v16  ;;  %3873 = vrot.lane.b32.xlu1 %v13891_v25, %s4897_s1  ;;  %v3016_v58 = vsel %vm3015_vm0, %v13873_v5, %v13884_v3  ;;  %v3032_v28 = vmul.f32 %v3028_v47, %v13894_v42  ;;  %v10604_v40 = vmul.f32 %v10134_v7, %v13882_v8  ;;  %v13897_v45 = vld [vmem:[#allocation129_spill] sm:$0xff]  ;;  %v10614_v3 = vpop.permute.xlu1 %3259  ;;  %v13899_v42 = vld [vmem:[#allocation170_spill] sm:$0xff] }
 0x4b0   :  { %13889 = vst [vmem:[#allocation266_spill] sm:$0xff] %v10586_v38  ;;  %13892 = vst [vmem:[#allocation321_spill] sm:$0xff] %v10592_v37  ;;  %v3112_v55 = vmul.f32 %v10126_v34, %v13895_v59  ;;  %v3366_v53 = vmul.f32 %v10020_v0, %v13896_v13  ;;  %v3334_v60 = vadd.f32 %v3318_v36, %v3198_v32  ;;  %v3286_v5 = vpop.permute.xlu0 %3285  ;;  %v13900_v32 = vld [vmem:[#allocation7_spill] sm:$0xff] }
 0x4b1   :  { %13893 = vst [vmem:[#allocation275_spill] sm:$0xff] %v10595_v22  ;;  %v3251_v35 = vmul.f32 %v13897_v45, %v13880_v52  ;;  %v3254_v15 = vmul.f32 %v13898_v21, %v13880_v52  ;;  %v3196_v47 = vadd.f32 %v3180_v46, %v3060_v57  ;;  %v3291_v38 = vsel %vm3287_vm1, %v3278_v61, %v3286_v5  ;;  %v13901_v52 = vld [vmem:[#allocation12_spill] sm:$0xff]  ;;  %v13904_v61 = vld [vmem:[#allocation179_spill] sm:$0xff] }
 0x4b2   :  { %v3177_v22 = vmul.f32 %v13899_v42, %v3112_v55  ;;  %v3303_v16 = vsel %vm3287_vm1, %v3286_v5, %v10494_v18  ;;  %3851 = vrot.lane.b32.xlu0 %v13900_v32, %s4897_s1  ;;  %v3199_v36 = vadd.f32 %v3183_v23, %v3063_v41  ;;  %v10626_v54 = vadd.f32 %v3366_v53, %v3334_v60  ;;  %v13903_v57 = vld [vmem:[#allocation212_spill] sm:$0xff] }
 0x4b3   :  { %v3316_v2 = vmul.f32 %v3303_v16, %v3251_v35  ;;  %v3319_v30 = vmul.f32 %v3291_v38, %v3254_v15  ;;  %3717 = vrot.lane.b32.xlu1 %v13901_v52, %s4896_s17  ;;  %v3018_v46 = vsel %vm3015_vm0, %v13879_v43, %v13903_v57  ;;  %v3030_v18 = vsel %vm3015_vm0, %v13903_v57, %v13904_v61  ;;  %v13905_v16 = vld [vmem:[#allocation221_spill] sm:$0xff]  ;;  %v13906_v55 = vld [vmem:[#allocation40_spill] sm:$0xff]  ;;  %v3268_v15 = vpop.permute.xlu1 %3267 }
 0x4b4   :  { %13902 = vst [vmem:[#allocation269_spill] sm:$0xff] %v10626_v54  ;;  %v3113_v41 = vmul.f32 %v10131_v24, %v13895_v59  ;;  %v3248_v38 = vmul.f32 %v10151_v10, %v13905_v16  ;;  %v3364_v23 = vmul.f32 %v10020_v0, %v13901_v52  ;;  %v3367_v53 = vmul.f32 %v10020_v0, %v13906_v55  ;;  %v10644_v43 = vpop.permute.xlu0 %3441  ;;  %v13907_v5 = vld [vmem:[#allocation96_spill] sm:$0xff]  ;;  %v13908_v54 = vld [vmem:[#allocation21_spill] sm:$0xff]  ;;  %v13909_v0 = vld [vmem:[#allocation194_spill] sm:$0xff] }
 0x4b5   :  { %v3332_v60 = vadd.f32 %v3316_v2, %v3196_v47  ;;  %v3335_v35 = vadd.f32 %v3319_v30, %v3199_v36  ;;  %v3035_v42 = vmul.f32 %v3016_v58, %v13907_v5  ;;  %v10649_v57 = vmul.f32 %v10137_v20, %v13882_v8  ;;  %v13912_v8 = vld [vmem:[#allocation127_spill] sm:$0xff] }
 0x4b6   :  { %v3193_v61 = vadd.f32 %v3177_v22, %v10529_v26  ;;  %v3298_v32 = vsel %vm3287_vm1, %v10614_v3, %v3268_v15  ;;  %3859 = vrot.lane.b32.xlu0 %v13908_v54, %s4897_s1  ;;  %v3178_v30 = vmul.f32 %v13909_v0, %v3113_v41  ;;  %v3058_v36 = vadd.f32 %v3042_v49, %v13912_v8  ;;  %v13913_v26 = vld [vmem:[#allocation260_spill] sm:$0xff]  ;;  %v13914_v5 = vld [vmem:[#allocation159_spill] sm:$0xff] }
 0x4b7   :  { %v3313_v2 = vmul.f32 %v3298_v32, %v3248_v38  ;;  %3725 = vrot.lane.b32.xlu1 %v13667_v12, %s4896_s17  ;;  %v10660_v58 = vadd.f32 %v3364_v23, %v3332_v60  ;;  %v10662_v47 = vadd.f32 %v3367_v53, %v3335_v35  ;;  %v10666_v22 = vadd.f32 %v3032_v28, %v13913_v26  ;;  %v3276_v49 = vpop.permute.xlu1 %3275  ;;  %v13917_v60 = vld [vmem:[#allocation31_spill] sm:$0xff]  ;;  %v13918_v35 = vld [vmem:[#allocation202_spill] sm:$0xff] }
 0x4b8   :  { %v3040_v37 = vmul.f32 %v3030_v18, %v13914_v5  ;;  %v3043_v31 = vmul.f32 %v3018_v46, %v13915_v6  ;;  %v3111_v41 = vmul.f32 %v10134_v7, %v13895_v59  ;;  %v3114_v32 = vmul.f32 %v10137_v20, %v13895_v59  ;;  %v3450_v23 = vpop.permute.xlu0 %3449  ;;  %v13943_v54 = vld [vmem:[#allocation223_spill] sm:$0xff] }
 0x4b9   :  { %13910 = vst [vmem:[#allocation279_spill] sm:$0xff] %v10660_v58  ;;  %13911 = vst [vmem:[#allocation272_spill] sm:$0xff] %v10662_v47  ;;  %v10674_v38 = vadd.f32 %v3313_v2, %v3193_v61  ;;  %v3249_v53 = vmul.f32 %v10169_v17, %v13905_v16  ;;  %v10679_v28 = vadd.f32 %v3035_v42, %v13917_v60  ;;  %v13919_v2 = vld [vmem:[#allocation33_spill] sm:$0xff]  ;;  %v13944_v47 = vld [vmem:[#allocation15_spill] sm:$0xff] }
 0x4ba   :  { %v10683_v18 = vmul.f32 %v10151_v10, %v13918_v35  ;;  %v10688_v6 = vsel %vm3471_vm2, %v10644_v43, %v3450_v23  ;;  %v3294_v59 = vsel %vm3287_vm1, %v3268_v15, %v3276_v49  ;;  %3867 = vrot.lane.b32.xlu0 %v13724_v63, %s4897_s1  ;;  %v3194_v46 = vadd.f32 %v3178_v30, %v3058_v36  ;;  %v13947_v58 = vld [vmem:[#allocation228_spill] sm:$0xff] }
 0x4bb   :  { %13916 = vst [vmem:[#allocation97_spill] sm:$0xff] %v10674_v38  ;;  %v3176_v61 = vmul.f32 %v10506_v48, %v3111_v41  ;;  %v3179_v42 = vmul.f32 %v10501_v29, %v3114_v32  ;;  %v3314_v0 = vmul.f32 %v3294_v59, %v3249_v53  ;;  %3733 = vrot.lane.b32.xlu1 %v13896_v13, %s4896_s17  ;;  %v13920_v48 = vld [vmem:[#allocation262_spill] sm:$0xff]  ;;  %v3284_v32 = vpop.permute.xlu1 %3283  ;;  %v13942_v38 = vld [vmem:[#allocation44_spill] sm:$0xff] }
 0x4bc   :  { %v3056_v8 = vadd.f32 %v3040_v37, %v13919_v2  ;;  %v10701_v26 = vmul.f32 %v10169_v17, %v13918_v35  ;;  %v3243_v15 = vmul.f32 %v13897_v45, %v13918_v35  ;;  %v10707_v30 = vmul.f32 %v13898_v21, %v13918_v35  ;;  %v3458_v5 = vpop.permute.xlu0 %3457  ;;  %v13922_v53 = vld [vmem:[#allocation210_spill] sm:$0xff] }
 0x4bd   :  { %v3059_v36 = vadd.f32 %v3043_v31, %v13920_v48  ;;  %v10710_v29 = vadd.f32 %v3314_v0, %v3194_v46  ;;  %v3247_v41 = vmul.f32 %v13897_v45, %v13905_v16  ;;  %v3250_v37 = vmul.f32 %v13898_v21, %v13905_v16 }
 0x4be   :  { %v10718_v60 = vmul.f32 %v10126_v34, %v13922_v53  ;;  %v10722_v35 = vsel %vm3471_vm2, %v3450_v23, %v3458_v5  ;;  %v3290_v31 = vsel %vm3287_vm1, %v3276_v49, %v3284_v32  ;;  %v3302_v59 = vsel %vm3287_vm1, %v3284_v32, %v10614_v3  ;;  %3875 = vrot.lane.b32.xlu0 %v13742_v1, %s4897_s1  ;;  %v13923_v34 = vld [vmem:[#allocation222_spill] sm:$0xff]  ;;  %v13938_v1 = vld [vmem:[#allocation259_spill] sm:$0xff] }
 0x4bf   :  { %13921 = vst [vmem:[#allocation52_spill] sm:$0xff] %v10710_v29  ;;  %v3192_v16 = vadd.f32 %v3176_v61, %v3056_v8  ;;  %v3195_v46 = vadd.f32 %v3179_v42, %v3059_v36  ;;  %v3312_v0 = vmul.f32 %v3302_v59, %v3247_v41  ;;  %v3315_v2 = vmul.f32 %v3290_v31, %v3250_v37  ;;  %v13924_v23 = vld [vmem:[#allocation230_spill] sm:$0xff]  ;;  %v13925_v42 = vld [vmem:[#allocation3_spill] sm:$0xff]  ;;  %v13926_v8 = vld [vmem:[#allocation216_spill] sm:$0xff]  ;;  %v10759_v59 = vpop.permute.xlu1 %3439 }
 0x4c0   :  { %3741 = vrot.lane.b32.xlu1 %v13906_v55, %s4896_s17  ;;  %v3165_v48 = vsel %vm3151_vm15, %v13924_v23, %v13923_v34  ;;  %v10739_v49 = vmul.f32 %v10131_v24, %v13922_v53  ;;  %v10743_v3 = vmul.f32 %v10134_v7, %v13922_v53  ;;  %v10747_v61 = vmul.f32 %v10137_v20, %v13922_v53  ;;  %v13927_v41 = vld [vmem:[#allocation225_spill] sm:$0xff]  ;;  %v3466_v31 = vpop.permute.xlu0 %3465  ;;  %v13930_v20 = vld [vmem:[#allocation100_spill] sm:$0xff]  ;;  %v13931_v53 = vld [vmem:[#allocation251_spill] sm:$0xff] }
 0x4c1   :  { %v3356_v36 = vmul.f32 %v13926_v8, %v13925_v42  ;;  %v3161_v37 = vsel %vm3151_vm15, %v13923_v34, %v13927_v41  ;;  %v10755_v32 = vadd.f32 %v3312_v0, %v3192_v16  ;;  %v10757_v24 = vadd.f32 %v3315_v2, %v3195_v46  ;;  %v13932_v0 = vld [vmem:[#allocation232_spill] sm:$0xff] }
 0x4c2   :  { %v10763_v7 = vmul.f32 %v13926_v8, %v13878_v19  ;;  %v3301_v42 = vsel %vm3287_vm1, %v13931_v53, %v13930_v20  ;;  %v10771_v29 = vsel %vm3471_vm2, %v3458_v5, %v3466_v31  ;;  %v10776_v16 = vsel %vm3471_vm2, %v3466_v31, %v10644_v43  ;;  %v4864_v43 = vld [vmem:[%s11957_s3 + $0x18] sm:$0xff]  ;;  %v13933_v34 = vld [vmem:[#allocation220_spill] sm:$0xff] }
 0x4c3   :  { %13928 = vst [vmem:[#allocation286_spill] sm:$0xff] %v10755_v32  ;;  %13929 = vst [vmem:[#allocation289_spill] sm:$0xff] %v10757_v24  ;;  %v10780_v46 = vmul.f32 %v13926_v8, %v13883_v14  ;;  %v10784_v19 = vmul.f32 %v13926_v8, %v13891_v25  ;;  %v3157_v2 = vsel %vm3151_vm15, %v13927_v41, %v13932_v0 }
 0x4c4   :  { %v3172_v5 = vmul.f32 %v3165_v48, %v10604_v40  ;;  %3941 = vperm.xlu1 %4732, %v4864_v43   ;;  %v3173_v14 = vmul.f32 %v3161_v37, %v10547_v33  ;;  %v3153_v25 = vsel %vm3151_vm15, %v13932_v0, %v13924_v23  ;;  %v10802_v8 = vmul.f32 %v10151_v10, %v13933_v34  ;;  %v13934_v48 = vld [vmem:[#allocation240_spill] sm:$0xff]  ;;  %v10818_v37 = vpop.permute.xlu0 %3671  ;;  %v3448_v10 = vpop.permute.xlu1 %3447  ;;  %v13937_v43 = vld [vmem:[#allocation294_spill] sm:$0xff] }
 0x4c5   :  { %v10806_v40 = vmul.f32 %v10169_v17, %v13933_v34  ;;  %v3297_v41 = vsel %vm3287_vm1, %v13930_v20, %v13934_v48  ;;  %v3308_v31 = vmul.f32 %v3301_v42, %v3243_v15  ;;  %v3239_v33 = vmul.f32 %v13897_v45, %v13933_v34  ;;  %13935 = vst [vmem:[#allocation274_spill] sm:$0xff] %v10818_v37  ;;  %v13936_v17 = vld [vmem:[#allocation219_spill] sm:$0xff] }
 0x4c6   :  { %v10816_v23 = vmul.f32 %v13898_v21, %v13933_v34  ;;  %v3174_v0 = vmul.f32 %v3157_v2, %v10556_v4  ;;  %v3427_v24 = vmul.f32 %v13937_v43, %v13936_v17  ;;  %v3428_v63 = vmul.f32 %v13938_v1, %v13936_v17  ;;  %v13939_v20 = vld [vmem:[#allocation115_spill] sm:$0xff]  ;;  %v13940_v4 = vld [vmem:[#allocation306_spill] sm:$0xff] }
 0x4c7   :  { %v10828_v15 = vsel %vm3471_vm2, %v10759_v59, %v3448_v10  ;;  %v3175_v45 = vmul.f32 %v3153_v25, %v10649_v57  ;;  %v3188_v21 = vadd.f32 %v3172_v5, %v10523_v39  ;;  %v3429_v42 = vmul.f32 %v13939_v20, %v13936_v17  ;;  %v13941_v34 = vld [vmem:[#allocation158_spill] sm:$0xff]  ;;  %v13946_v5 = vld [vmem:[#allocation101_spill] sm:$0xff] }
 0x4c8   :  { %v3430_v2 = vmul.f32 %v13940_v4, %v13936_v17  ;;  %3853 = vrot.lane.b32.xlu1 %v13901_v52, %s4897_s1  ;;  %v3189_v37 = vadd.f32 %v3173_v14, %v13941_v34  ;;  %v10841_v32 = vmul.f32 %v13943_v54, %v13942_v38  ;;  %v10845_v57 = vmul.f32 %v13943_v54, %v13944_v47  ;;  %v10856_v14 = vpop.permute.xlu0 %3577  ;;  %v3456_v47 = vpop.permute.xlu1 %3455 }
 0x4c9   :  { %v3309_v39 = vmul.f32 %v3297_v41, %v10683_v18  ;;  %v3293_v25 = vsel %vm3287_vm1, %v13934_v48, %v13946_v5  ;;  %v3324_v17 = vadd.f32 %v3308_v31, %v3188_v21  ;;  %v10854_v52 = vmul.f32 %v13937_v43, %v13947_v58  ;;  %v13949_v18 = vld [vmem:[#allocation236_spill] sm:$0xff]  ;;  %v13950_v41 = vld [vmem:[#allocation226_spill] sm:$0xff] }
 0x4ca   :  { %13945 = vst [vmem:[#allocation302_spill] sm:$0xff] %v10845_v57  ;;  %v10860_v38 = vmul.f32 %v13938_v1, %v13947_v58  ;;  %v3190_v34 = vadd.f32 %v3174_v0, %v10511_v50  ;;  %v3160_v54 = vsel %vm3151_vm15, %v13950_v41, %v13949_v18  ;;  %v3289_v48 = vsel %vm3287_vm1, %v13946_v5, %v13931_v53  ;;  %v13952_v50 = vld [vmem:[#allocation235_spill] sm:$0xff]  ;;  %v13953_v0 = vld [vmem:[#allocation164_spill] sm:$0xff]  ;;  %v13954_v57 = vld [vmem:[#allocation169_spill] sm:$0xff] }
 0x4cb   :  { %v10873_v31 = vsel %vm3471_vm2, %v3448_v10, %v3456_v47  ;;  %v3191_v21 = vadd.f32 %v3175_v45, %v10526_v44  ;;  %v3492_v1 = vmul.f32 %v10688_v6, %v3427_v24  ;;  %v3563_v43 = vmul.f32 %v13953_v0, %v13952_v50  ;;  %v13955_v53 = vld [vmem:[#allocation242_spill] sm:$0xff] }
 0x4cc   :  { %13948 = vst [vmem:[#allocation307_spill] sm:$0xff] %v10860_v38  ;;  %13951 = vst [vmem:[#allocation171_spill] sm:$0xff] %v10873_v31  ;;  %3861 = vrot.lane.b32.xlu1 %v13667_v12, %s4897_s1  ;;  %v3564_v4 = vmul.f32 %v13954_v57, %v13952_v50  ;;  %v3325_v20 = vadd.f32 %v3309_v39, %v3189_v37  ;;  %v3164_v10 = vsel %vm3151_vm15, %v13955_v53, %v13950_v41  ;;  %v13956_v44 = vld [vmem:[#allocation186_spill] sm:$0xff]  ;;  %v13957_v12 = vld [vmem:[#allocation80_spill] sm:$0xff]  ;;  %v3586_v39 = vpop.permute.xlu0 %3585  ;;  %v3464_v58 = vpop.permute.xlu1 %3463 }
 0x4cd   :  { %v3310_v5 = vmul.f32 %v3293_v25, %v10701_v26  ;;  %v3565_v6 = vmul.f32 %v13956_v44, %v13952_v50  ;;  %v3169_v24 = vmul.f32 %v3160_v54, %v10718_v60  ;;  %v3156_v45 = vsel %vm3151_vm15, %v13949_v18, %v13957_v12  ;;  %v13958_v31 = vld [vmem:[#allocation247_spill] sm:$0xff]  ;;  %v13959_v38 = vld [vmem:[#allocation330_spill] sm:$0xff]  ;;  %v13960_v44 = vld [vmem:[#allocation252_spill] sm:$0xff] }
 0x4ce   :  { %v3311_v57 = vmul.f32 %v3289_v48, %v10707_v30  ;;  %v3372_v37 = vadd.f32 %v3356_v36, %v3324_v17  ;;  %v3300_v26 = vsel %vm3287_vm1, %v13959_v38, %v13958_v31  ;;  %v3617_v25 = vsel %vm3607_vm3, %v10856_v14, %v3586_v39 }
 0x4cf   :  { %v10905_v54 = vsel %vm3471_vm2, %v3456_v47, %v3464_v58  ;;  %v10910_v30 = vsel %vm3471_vm2, %v3464_v58, %v10759_v59  ;;  %v3168_v60 = vmul.f32 %v3164_v10, %v10743_v3  ;;  %v3493_v17 = vmul.f32 %v10722_v35, %v3428_v63 }
 0x4d0   :  { %v3508_v36 = vadd.f32 %v3492_v1, %v3372_v37  ;;  %v3628_v18 = vmul.f32 %v3617_v25, %v3563_v43  ;;  %3869 = vrot.lane.b32.xlu1 %v13896_v13, %s4897_s1  ;;  %v3170_v41 = vmul.f32 %v3156_v45, %v10739_v49  ;;  %v3152_v47 = vsel %vm3151_vm15, %v13957_v12, %v13955_v53  ;;  %v3594_v13 = vpop.permute.xlu0 %3593  ;;  %v10928_v3 = vpop.permute.xlu1 %3667  ;;  %v13962_v53 = vld [vmem:[#allocation297_spill] sm:$0xff] }
 0x4d1   :  { %v3326_v48 = vadd.f32 %v3310_v5, %v3190_v34  ;;  %v3373_v58 = vadd.f32 %v10763_v7, %v3325_v20  ;;  %v3327_v59 = vadd.f32 %v3311_v57, %v3191_v21  ;;  %v3296_v63 = vsel %vm3287_vm1, %v13958_v31, %v13960_v44  ;;  %13961 = vst [vmem:[#allocation191_spill] sm:$0xff] %v10928_v3 }
 0x4d2   :  { %v3304_v1 = vmul.f32 %v3300_v26, %v3239_v33  ;;  %v10926_v35 = vadd.f32 %v3628_v18, %v3508_v36  ;;  %v3185_v49 = vadd.f32 %v3169_v24, %v10520_v56  ;;  %v3494_v43 = vmul.f32 %v10771_v29, %v3429_v42 }
 0x4d3   :  { %v3613_v34 = vsel %vm3607_vm3, %v3586_v39, %v3594_v13  ;;  %v3566_v7 = vmul.f32 %v10497_v51, %v13952_v50  ;;  %v3184_v20 = vadd.f32 %v3168_v60, %v10666_v22  ;;  %v3509_v57 = vadd.f32 %v3493_v17, %v3373_v58  ;;  %v13969_v17 = vld [vmem:[#allocation171_spill] sm:$0xff] }
 0x4d4   :  { %v3495_v33 = vmul.f32 %v10776_v16, %v3430_v2  ;;  %v3629_v31 = vmul.f32 %v3613_v34, %v3564_v4  ;;  %3877 = vrot.lane.b32.xlu1 %v13906_v55, %s4897_s1  ;;  %v3186_v21 = vadd.f32 %v3170_v41, %v10543_v27  ;;  %v3171_v56 = vmul.f32 %v3152_v47, %v10747_v61  ;;  %v3602_v2 = vpop.permute.xlu0 %3601  ;;  %v3576_v55 = vpop.permute.xlu1 %3575  ;;  %v13970_v47 = vld [vmem:[#allocation161_spill] sm:$0xff]  ;;  %v13972_v58 = vld [vmem:[#allocation243_spill] sm:$0xff]  ;;  %v13976_v34 = vld [vmem:[#allocation306_spill] sm:$0xff] }
 0x4d5   :  { %v3305_v29 = vmul.f32 %v3296_v63, %v10802_v8  ;;  %v3374_v42 = vadd.f32 %v10780_v46, %v3326_v48  ;;  %v3292_v22 = vsel %vm3287_vm1, %v13960_v44, %v13962_v53  ;;  %v3320_v50 = vadd.f32 %v3304_v1, %v3184_v20 }
 0x4d6   :  { %v3375_v16 = vadd.f32 %v10784_v19, %v3327_v59  ;;  %v10949_v4 = vadd.f32 %v3629_v31, %v3509_v57  ;;  %v3288_v27 = vsel %vm3287_vm1, %v13962_v53, %v13959_v38  ;;  %v3609_v46 = vsel %vm3607_vm3, %v3594_v13, %v3602_v2  ;;  %v13963_v38 = vld [vmem:[#allocation131_spill] sm:$0xff]  ;;  %v13973_v59 = vld [vmem:[#allocation296_spill] sm:$0xff]  ;;  %v13977_v57 = vld [vmem:[#allocation302_spill] sm:$0xff] }
 0x4d7   :  { %v3510_v61 = vadd.f32 %v3494_v43, %v3374_v42  ;;  %v3621_v8 = vsel %vm3607_vm3, %v3602_v2, %v10856_v14  ;;  %v3488_v19 = vmul.f32 %v10828_v15, %v10854_v52  ;;  %v3630_v5 = vmul.f32 %v3609_v46, %v3565_v6  ;;  %v13966_v6 = vld [vmem:[#allocation168_spill] sm:$0xff]  ;;  %v13982_v2 = vld [vmem:[#allocation223_spill] sm:$0xff] }
 0x4d8   :  { %v3511_v10 = vadd.f32 %v3495_v33, %v3375_v16  ;;  %v3631_v44 = vmul.f32 %v3621_v8, %v3566_v7  ;;  %v3187_v24 = vadd.f32 %v3171_v56, %v10679_v28  ;;  %v3321_v12 = vadd.f32 %v3305_v29, %v3185_v49  ;;  %v3808_v60 = vpop.permute.xlu0 %3807  ;;  %v3584_v15 = vpop.permute.xlu1 %3583  ;;  %v13974_v13 = vld [vmem:[#allocation228_spill] sm:$0xff]  ;;  %v13975_v49 = vld [vmem:[#allocation115_spill] sm:$0xff]  ;;  %v13978_v29 = vld [vmem:[#allocation169_spill] sm:$0xff] }
 0x4d9   :  { %v3306_v45 = vmul.f32 %v3292_v22, %v10806_v40  ;;  %v3559_v37 = vmul.f32 %v13953_v0, %v13963_v38  ;;  %v3307_v39 = vmul.f32 %v3288_v27, %v10816_v23  ;;  %v3368_v26 = vadd.f32 %v10841_v32, %v3320_v50  ;;  %v13968_v32 = vld [vmem:[#allocation307_spill] sm:$0xff]  ;;  %v13979_v22 = vld [vmem:[#allocation244_spill] sm:$0xff]  ;;  %v13983_v8 = vld [vmem:[#allocation2_spill] sm:$0xff] }
 0x4da   :  { %v10968_v25 = vadd.f32 %v3630_v5, %v3510_v61  ;;  %v10970_v14 = vadd.f32 %v3631_v44, %v3511_v10  ;;  %v3616_v52 = vsel %vm3607_vm3, %v3576_v55, %v3584_v15  ;;  %v10975_v28 = vmul.f32 %v10414_v62, %v3808_v60  ;;  %v13980_v50 = vld [vmem:[#allocation291_spill] sm:$0xff]  ;;  %v14050_v0 = vld [vmem:[#allocation268_spill] sm:$0xff] }
 0x4db   :  { %v10978_v40 = vmul.f32 %v13886_v9, %v3808_v60  ;;  %v10981_v36 = vmul.f32 %v13966_v6, %v3808_v60  ;;  %v3504_v23 = vadd.f32 %v3488_v19, %v3368_v26  ;;  %v3489_v18 = vmul.f32 %v13969_v17, %v13968_v32  ;;  %v13981_v16 = vld [vmem:[#allocation103_spill] sm:$0xff]  ;;  %v13987_v26 = vld [vmem:[#allocation186_spill] sm:$0xff] }
 0x4dc   :  { %13964 = vst [vmem:[#allocation27_spill] sm:$0xff] %v10975_v28  ;;  %v3624_v41 = vmul.f32 %v3616_v52, %v3559_v37  ;;  %v10986_v48 = vmul.f32 %v13970_v47, %v3808_v60  ;;  %v2350_v63 = vmul.f32 %v13973_v59, %v13972_v58  ;;  %v3322_v1 = vadd.f32 %v3306_v45, %v3186_v21  ;;  %v10997_v56 = vpop.permute.xlu0 %3445  ;;  %v3592_v53 = vpop.permute.xlu1 %3591  ;;  %v13986_v37 = vld [vmem:[#allocation39_spill] sm:$0xff]  ;;  %v14039_v28 = vld [vmem:[#allocation276_spill] sm:$0xff] }
 0x4dd   :  { %13965 = vst [vmem:[#allocation25_spill] sm:$0xff] %v10978_v40  ;;  %13967 = vst [vmem:[#allocation108_spill] sm:$0xff] %v10981_v36  ;;  %v3425_v43 = vmul.f32 %v13975_v49, %v13974_v13  ;;  %v3426_v7 = vmul.f32 %v13976_v34, %v13974_v13  ;;  %v3323_v20 = vadd.f32 %v3307_v39, %v3187_v24  ;;  %v13984_v24 = vld [vmem:[#allocation63_spill] sm:$0xff]  ;;  %v14038_v40 = vld [vmem:[#allocation70_spill] sm:$0xff] }
 0x4de   :  { %13971 = vst [vmem:[#allocation51_spill] sm:$0xff] %v10986_v48  ;;  %v3369_v33 = vadd.f32 %v13977_v57, %v3321_v12  ;;  %v10995_v31 = vadd.f32 %v3624_v41, %v3504_v23  ;;  %v3560_v42 = vmul.f32 %v13978_v29, %v13963_v38  ;;  %v2351_v21 = vmul.f32 %v13980_v50, %v13979_v22  ;;  %v13985_v12 = vld [vmem:[#allocation45_spill] sm:$0xff]  ;;  %v13988_v23 = vld [vmem:[#allocation256_spill] sm:$0xff]  ;;  %v13991_v22 = vld [vmem:[#allocation246_spill] sm:$0xff] }
 0x4df   :  { %v3354_v27 = vmul.f32 %v13982_v2, %v13981_v16  ;;  %v3490_v61 = vmul.f32 %v10905_v54, %v3425_v43  ;;  %v3612_v46 = vsel %vm3607_vm3, %v3584_v15, %v3592_v53  ;;  %v3355_v10 = vmul.f32 %v13982_v2, %v13983_v8  ;;  %v13992_v50 = vld [vmem:[#allocation280_spill] sm:$0xff]  ;;  %v13993_v16 = vld [vmem:[#allocation66_spill] sm:$0xff] }
 0x4e0   :  { %v3505_v19 = vadd.f32 %v3489_v18, %v3369_v33  ;;  %v3491_v5 = vmul.f32 %v10910_v30, %v3426_v7  ;;  %v3625_v44 = vmul.f32 %v3612_v46, %v3560_v42  ;;  %v2320_v45 = vsel %vm2319_vm13, %v13985_v12, %v13984_v24  ;;  %v13989_v30 = vld [vmem:[#allocation294_spill] sm:$0xff]  ;;  %v3454_v17 = vpop.permute.xlu0 %3453  ;;  %v3600_v41 = vpop.permute.xlu1 %3599  ;;  %v13990_v33 = vld [vmem:[#allocation287_spill] sm:$0xff] }
 0x4e1   :  { %v2332_v54 = vsel %vm2319_vm13, %v13984_v24, %v13986_v37  ;;  %v3370_v39 = vadd.f32 %v3354_v27, %v3322_v1  ;;  %v3561_v60 = vmul.f32 %v13987_v26, %v13963_v38  ;;  %v3371_v15 = vadd.f32 %v3355_v10, %v3323_v20  ;;  %v13994_v27 = vld [vmem:[#allocation20_spill] sm:$0xff]  ;;  %v13999_v10 = vld [vmem:[#allocation259_spill] sm:$0xff] }
 0x4e2   :  { %v11021_v52 = vadd.f32 %v3625_v44, %v3505_v19  ;;  %v3435_v32 = vmul.f32 %v13989_v30, %v13988_v23  ;;  %v3562_v18 = vmul.f32 %v10497_v51, %v13963_v38  ;;  %v3483_v59 = vsel %vm3471_vm2, %v10997_v56, %v3454_v17  ;;  %v14000_v44 = vld [vmem:[#allocation238_spill] sm:$0xff]  ;;  %v14002_v12 = vld [vmem:[#allocation239_spill] sm:$0xff] }
 0x4e3   :  { %v3506_v58 = vadd.f32 %v3490_v61, %v3370_v39  ;;  %v3608_v1 = vsel %vm3607_vm3, %v3592_v53, %v3600_v41  ;;  %v3620_v13 = vsel %vm3607_vm3, %v3600_v41, %v3576_v55  ;;  %v3507_v43 = vadd.f32 %v3491_v5, %v3371_v15  ;;  %v13995_v61 = vld [vmem:[#allocation279_spill] sm:$0xff]  ;;  %v4424_v39 = vld [vmem:[%s11957_s3] sm:$0xff] }
 0x4e4   :  { %v3500_v7 = vmul.f32 %v3483_v59, %v3435_v32  ;;  %v3626_v20 = vmul.f32 %v3608_v1, %v3561_v60  ;;  %v3627_v57 = vmul.f32 %v3620_v13, %v3562_v18  ;;  %v2338_v42 = vmul.f32 %v2320_v45, %v13990_v33  ;;  %v3462_v5 = vpop.permute.xlu0 %3461  ;;  %v4425_v60 = vld [vmem:[%s11957_s3 + $0x8] sm:$0xff]  ;;  %v14007_v18 = vld [vmem:[#allocation305_spill] sm:$0xff]  ;;  %v14010_v13 = vld [vmem:[#allocation320_spill] sm:$0xff] }
 0x4e5   :  { %v2339_v38 = vmul.f32 %v2332_v54, %v13991_v22  ;;  %v2322_v2 = vsel %vm2319_vm13, %v13993_v16, %v13992_v50  ;;  %v2334_v53 = vsel %vm2319_vm13, %v13992_v50, %v13994_v27  ;;  %v3436_v19 = vmul.f32 %v13999_v10, %v13988_v23  ;;  %v3804_v54 = vpop.permute.xlu1 %3803  ;;  %v14018_v50 = vld [vmem:[#allocation278_spill] sm:$0xff]  ;;  %v14019_v16 = vld [vmem:[#allocation176_spill] sm:$0xff]  ;;  %v14053_v26 = vld [vmem:[#allocation11_spill] sm:$0xff] }
 0x4e6   :  { %v11045_v55 = vadd.f32 %v3500_v7, %v13995_v61  ;;  %v11047_v46 = vadd.f32 %v3626_v20, %v3506_v58  ;;  %v11049_v8 = vadd.f32 %v3627_v57, %v3507_v43  ;;  %v11054_v24 = vadd.f32 %v2350_v63, %v14000_v44  ;;  %v14008_v58 = vld [vmem:[#allocation84_spill] sm:$0xff]  ;;  %v14014_v7 = vld [vmem:[#allocation321_spill] sm:$0xff] }
 0x4e7   :  { %v11057_v45 = vadd.f32 %v2351_v21, %v14002_v12  ;;  %v3479_v37 = vsel %vm3471_vm2, %v3454_v17, %v3462_v5  ;;  %v11069_v63 = vmul.f32 %v10414_v62, %v3804_v54  ;;  %v11072_v21 = vmul.f32 %v13886_v9, %v3804_v54  ;;  %v14012_v62 = vld [vmem:[#allocation249_spill] sm:$0xff] }
 0x4e8   :  { %13996 = vst [vmem:[#allocation14_spill] sm:$0xff] %v11045_v55  ;;  %13997 = vst [vmem:[#allocation111_spill] sm:$0xff] %v11047_v46  ;;  %v3501_v15 = vmul.f32 %v3479_v37, %v3436_v19  ;;  %v11075_v32 = vmul.f32 %v13966_v6, %v3804_v54  ;;  %v4898_v17 = vmov 7   ;;  %v2346_v41 = vmul.f32 %v2322_v2, %v14007_v18  ;;  %v3470_v33 = vpop.permute.xlu0 %3469  ;;  %v14020_v61 = vld [vmem:[#allocation177_spill] sm:$0xff]  ;;  %v14052_v46 = vld [vmem:[#allocation8_spill] sm:$0xff] }
 0x4e9   :  { %13998 = vst [vmem:[#allocation312_spill] sm:$0xff] %v11049_v8  ;;  %14001 = vst [vmem:[#allocation190_spill] sm:$0xff] %v11054_v24  ;;  %4734 = vset.pattern.permute.xlu0 %v4898_v17  ;;  %v2347_v59 = vmul.f32 %v2334_v53, %v14008_v58  ;;  %v11080_v1 = vmul.f32 %v13970_v47, %v3804_v54  ;;  %v11083_v43 = vadd.f32 1.0, %v14010_v13  ;;  %4735 = vset.pattern.permute.xlu1 %v4898_v17  ;;  %v14016_v47 = vld [vmem:[#allocation245_spill] sm:$0xff]  ;;  %v3444_v53 = vpop.permute.xlu1 %3443  ;;  %v14027_v17 = vld [vmem:[#allocation183_spill] sm:$0xff] }
 0x4ea   :  { %14003 = vst [vmem:[#allocation22_spill] sm:$0xff] %v11057_v45  ;;  %14004 = vst [vmem:[#allocation24_spill] sm:$0xff] %v11069_v63  ;;  %4430 = vperm.xlu0 %4734, %v4424_v39   ;;  %v11086_v9 = vadd.f32 %v2338_v42, %v14012_v62  ;;  %v11089_v6 = vadd.f32 %v3501_v15, %v14014_v7  ;;  %v3437_v20 = vmul.f32 %v13975_v49, %v13988_v23  ;;  %v14021_v19 = vld [vmem:[#allocation185_spill] sm:$0xff] }
 0x4eb   :  { %14005 = vst [vmem:[#allocation292_spill] sm:$0xff] %v11072_v21  ;;  %14006 = vst [vmem:[#allocation112_spill] sm:$0xff] %v11075_v32  ;;  %v3438_v57 = vmul.f32 %v13976_v34, %v13988_v23  ;;  %4435 = vperm.xlu1 %4735, %v4425_v60   ;;  %v11096_v22 = vadd.f32 %v2339_v38, %v14016_v47  ;;  %v11100_v2 = vmul.f32 %v14019_v16, %v14018_v50  ;;  %v4656_v23 = vld [vmem:[%s11958_s4 + $0x61] ss:$8 sm:$0xf] }
 0x4ec   :  { %14009 = vst [vmem:[#allocation206_spill] sm:$0xff] %v11080_v1  ;;  %14011 = vst [vmem:[#allocation201_spill] sm:$0xff] %v11083_v43  ;;  %v3475_v42 = vsel %vm3471_vm2, %v3462_v5, %v3470_v33  ;;  %v3487_v27 = vsel %vm3471_vm2, %v3470_v33, %v10997_v56  ;;  %v11112_v38 = vmul.f32 %v14020_v61, %v14018_v50  ;;  %v14022_v5 = vld [vmem:[#allocation139_spill] sm:$0xff]  ;;  %v14024_v39 = vld [vmem:[#allocation241_spill] sm:$0xff] }
 0x4ed   :  { %14013 = vst [vmem:[#allocation204_spill] sm:$0xff] %v11086_v9  ;;  %14015 = vst [vmem:[#allocation125_spill] sm:$0xff] %v11089_v6  ;;  %v11116_v44 = vmul.f32 %v14021_v19, %v14018_v50  ;;  %v3502_v12 = vmul.f32 %v3475_v42, %v3437_v20  ;;  %v3503_v37 = vmul.f32 %v3487_v27, %v3438_v57  ;;  %v14026_v60 = vld [vmem:[#allocation68_spill] sm:$0xff]  ;;  %v14028_v13 = vld [vmem:[#allocation269_spill] sm:$0xff] }
 0x4ee   :  { %14017 = vst [vmem:[#allocation327_spill] sm:$0xff] %v11096_v22  ;;  %v11119_v54 = vadd.f32 %v2346_v41, %v14022_v5  ;;  %v11122_v56 = vadd.f32 %v2347_v59, %v14024_v39  ;;  %v11126_v15 = vmul.f32 %v14019_v16, %v14026_v60  ;;  %v11130_v18 = vmul.f32 %v14027_v17, %v14018_v50  ;;  %v14030_v41 = vld [vmem:[#allocation272_spill] sm:$0xff]  ;;  %v3714_v59 = vpop.permute.xlu0 %3713  ;;  %v14032_v20 = vld [vmem:[#allocation270_spill] sm:$0xff]  ;;  %v14034_v42 = vld [vmem:[#allocation7_spill] sm:$0xff] }
 0x4ef   :  { %v11134_v58 = vmul.f32 %v14020_v61, %v14026_v60  ;;  %v11137_v62 = vadd.f32 %v3502_v12, %v14028_v13  ;;  %v11140_v7 = vadd.f32 %v3503_v37, %v14030_v41  ;;  %v11143_v57 = vrot.slane %v4656_v23, %v14032_v20  ;;  %v14033_v33 = vld [vmem:[#allocation48_spill] sm:$0xff]  ;;  %v14035_v27 = vld [vmem:[#allocation86_spill] sm:$0xff]  ;;  %v14036_v12 = vld [vmem:[#allocation257_spill] sm:$0xff]  ;;  %v3452_v37 = vpop.permute.xlu1 %3451 }
 0x4f0   :  { %14023 = vst [vmem:[#allocation132_spill] sm:$0xff] %v11119_v54  ;;  %14025 = vst [vmem:[#allocation331_spill] sm:$0xff] %v11122_v56  ;;  %v11147_v47 = vmul.f32 %v14019_v16, %v14033_v33  ;;  %v11151_v50 = vmul.f32 %v14020_v61, %v14033_v33  ;;  %v3360_v5 = vmul.f32 %v14035_v27, %v14034_v42  ;;  %v14037_v43 = vld [vmem:[#allocation286_spill] sm:$0xff]  ;;  %v14040_v1 = vld [vmem:[#allocation277_spill] sm:$0xff] }
 0x4f1   :  { %14029 = vst [vmem:[#allocation314_spill] sm:$0xff] %v11137_v62  ;;  %14031 = vst [vmem:[#allocation205_spill] sm:$0xff] %v11140_v7  ;;  %v3431_v39 = vmul.f32 %v13989_v30, %v14036_v12  ;;  %v11159_v13 = vmul.f32 %v14021_v19, %v14026_v60  ;;  %v11163_v41 = vmul.f32 %v14027_v17, %v14026_v60  ;;  %v14041_v21 = vld [vmem:[#allocation85_spill] sm:$0xff]  ;;  %v14042_v54 = vld [vmem:[#allocation267_spill] sm:$0xff] }
 0x4f2   :  { %v3482_v20 = vsel %vm3471_vm2, %v3444_v53, %v3452_v37  ;;  %v11170_v42 = vmul.f32 %v14021_v19, %v14033_v33  ;;  %v11174_v30 = vmul.f32 %v14027_v17, %v14033_v33  ;;  %v3376_v48 = vadd.f32 %v3360_v5, %v14037_v43  ;;  %v3722_v56 = vpop.permute.xlu0 %3721  ;;  %v14043_v33 = vld [vmem:[#allocation21_spill] sm:$0xff]  ;;  %v14046_v62 = vld [vmem:[#allocation50_spill] sm:$0xff]  ;;  %v14047_v6 = vld [vmem:[#allocation283_spill] sm:$0xff] }
 0x4f3   :  { %v3496_v36 = vmul.f32 %v3482_v20, %v3431_v39  ;;  %v2465_v60 = vsel %vm2455_vm4, %v14039_v28, %v14038_v40  ;;  %v2415_v32 = vmul.f32 %v14019_v16, %v14040_v1  ;;  %v3699_v63 = vmul.f32 %v11143_v57, %v14041_v21  ;;  %v3460_v20 = vpop.permute.xlu1 %3459  ;;  %v14045_v16 = vld [vmem:[#allocation49_spill] sm:$0xff]  ;;  %v14051_v22 = vld [vmem:[#allocation271_spill] sm:$0xff] }
 0x4f4   :  { %v11186_v45 = vrot.slane %v4656_v23, %v14042_v54  ;;  %v3361_v7 = vmul.f32 %v14035_v27, %v14043_v33  ;;  %v3753_v5 = vsel %vm3743_vm5, %v3714_v59, %v3722_v56  ;;  %v3432_v39 = vmul.f32 %v13999_v10, %v14036_v12  ;;  %v14048_v54 = vld [vmem:[#allocation282_spill] sm:$0xff] }
 0x4f5   :  { %v11190_v43 = vadd.f32 %v3496_v36, %v3376_v48  ;;  %v2467_v3 = vsel %vm2455_vm4, %v14046_v62, %v14045_v16  ;;  %v2464_v55 = vsel %vm2455_vm4, %v14048_v54, %v14047_v6  ;;  %v3764_v33 = vmul.f32 %v3753_v5, %v3699_v63  ;;  %v14049_v48 = vld [vmem:[#allocation97_spill] sm:$0xff] }
 0x4f6   :  { %v3478_v36 = vsel %vm3471_vm2, %v3452_v37, %v3460_v20  ;;  %v11208_v10 = vrot.slane %v4656_v23, %v14050_v0  ;;  %v11211_v8 = vrot.slane %v4656_v23, %v14051_v22  ;;  %v3362_v9 = vmul.f32 %v14035_v27, %v14052_v46 }
 0x4f7   :  { %14044 = vst [vmem:[#allocation140_spill] sm:$0xff] %v11190_v43  ;;  %v3377_v43 = vadd.f32 %v3361_v7, %v14049_v48  ;;  %v3497_v51 = vmul.f32 %v3478_v36, %v3432_v39  ;;  %v3363_v24 = vmul.f32 %v14035_v27, %v14053_v26  ;;  %v11218_v63 = vadd.f32 %v3764_v33, %v10926_v35  ;;  %v3730_v7 = vpop.permute.xlu0 %3729  ;;  %v3468_v23 = vpop.permute.xlu1 %3467  ;;  %v14055_v26 = vld [vmem:[#allocation284_spill] sm:$0xff]  ;;  %v14057_v33 = vld [vmem:[#allocation289_spill] sm:$0xff] }
 0x4f8   :  { %v3700_v37 = vmul.f32 %v11186_v45, %v14041_v21  ;;  %v3749_v0 = vsel %vm3743_vm5, %v3722_v56, %v3730_v7  ;;  %v3433_v22 = vmul.f32 %v13975_v49, %v14036_v12  ;;  %v3434_v46 = vmul.f32 %v13976_v34, %v14036_v12  ;;  %v14056_v56 = vld [vmem:[#allocation52_spill] sm:$0xff]  ;;  %v14058_v34 = vld [vmem:[#allocation71_spill] sm:$0xff]  ;;  %v14059_v12 = vld [vmem:[#allocation69_spill] sm:$0xff] }
 0x4f9   :  { %14054 = vst [vmem:[#allocation148_spill] sm:$0xff] %v11218_v63  ;;  %v11222_v5 = vadd.f32 %v3497_v51, %v3377_v43  ;;  %v2461_v35 = vsel %vm2455_vm4, %v14038_v40, %v14055_v26  ;;  %v3474_v51 = vsel %vm3471_vm2, %v3460_v20, %v3468_v23  ;;  %v3486_v43 = vsel %vm3471_vm2, %v3468_v23, %v3444_v53 }
 0x4fa   :  { %v3765_v27 = vmul.f32 %v3749_v0, %v3700_v37  ;;  %v3378_v39 = vadd.f32 %v3362_v9, %v14056_v56  ;;  %v3379_v49 = vadd.f32 %v3363_v24, %v14057_v33  ;;  %v3498_v36 = vmul.f32 %v3474_v51, %v3433_v22  ;;  %v14060_v56 = vld [vmem:[#allocation74_spill] sm:$0xff] }
 0x4fb   :  { %v3499_v48 = vmul.f32 %v3486_v43, %v3434_v46  ;;  %v2466_v63 = vsel %vm2455_vm4, %v14059_v12, %v14058_v34  ;;  %v3701_v20 = vmul.f32 %v11208_v10, %v14041_v21  ;;  %v3702_v53 = vmul.f32 %v11211_v8, %v14041_v21  ;;  %v3738_v37 = vpop.permute.xlu0 %3737  ;;  %v3712_v46 = vpop.permute.xlu1 %3711 }
 0x4fc   :  { %v11245_v40 = vadd.f32 %v3765_v27, %v10949_v4  ;;  %v11251_v9 = vadd.f32 %v3498_v36, %v3378_v39  ;;  %v3745_v0 = vsel %vm3743_vm5, %v3730_v7, %v3738_v37  ;;  %v3757_v22 = vsel %vm3743_vm5, %v3738_v37, %v3714_v59  ;;  %v14061_v7 = vld [vmem:[#allocation23_spill] sm:$0xff] }
 0x4fd   :  { %v11253_v24 = vadd.f32 %v3499_v48, %v3379_v49  ;;  %v2476_v4 = vmul.f32 %v2465_v60, %v11100_v2  ;;  %v2484_v23 = vmul.f32 %v2467_v3, %v11126_v15  ;;  %v3766_v27 = vmul.f32 %v3745_v0, %v3701_v20  ;;  %v14062_v2 = vld [vmem:[#allocation72_spill] sm:$0xff]  ;;  %v14065_v60 = vld [vmem:[#allocation258_spill] sm:$0xff] }
 0x4fe   :  { %v3767_v51 = vmul.f32 %v3757_v22, %v3702_v53  ;;  %v2472_v21 = vmul.f32 %v2464_v55, %v11147_v47  ;;  %v2477_v43 = vmul.f32 %v2461_v35, %v11112_v38  ;;  %v2463_v39 = vsel %vm2455_vm4, %v14045_v16, %v14060_v56  ;;  %v14069_v48 = vld [vmem:[#allocation254_spill] sm:$0xff] }
 0x4ff   :  { %v2460_v59 = vsel %vm2455_vm4, %v14047_v6, %v14061_v7  ;;  %v2480_v33 = vmul.f32 %v2466_v63, %v2415_v32  ;;  %v2457_v3 = vsel %vm2455_vm4, %v14055_v26, %v14062_v2  ;;  %v11276_v55 = vadd.f32 %v3766_v27, %v10968_v25  ;;  %v11281_v15 = vpop.permute.xlu0 %3933  ;;  %v3720_v16 = vpop.permute.xlu1 %3719  ;;  %v14066_v63 = vld [vmem:[#allocation248_spill] sm:$0xff]  ;;  %v14073_v0 = vld [vmem:[#allocation54_spill] sm:$0xff] }
 0x500   :  { %v11279_v38 = vadd.f32 %v3767_v51, %v10970_v14  ;;  %v2416_v47 = vmul.f32 %v14020_v61, %v14040_v1  ;;  %v11287_v6 = vmul.f32 %v14021_v19, %v14040_v1  ;;  %v11291_v32 = vmul.f32 %v14027_v17, %v14040_v1  ;;  %v14067_v19 = vld [vmem:[#allocation253_spill] sm:$0xff] }
 0x501   :  { %14063 = vst [vmem:[#allocation203_spill] sm:$0xff] %v11276_v55  ;;  %v3695_v25 = vmul.f32 %v11143_v57, %v14065_v60  ;;  %v11296_v14 = vadd.f32 %v2476_v4, %v14066_v63  ;;  %v2485_v26 = vmul.f32 %v2463_v39, %v11134_v58  ;;  %v2473_v35 = vmul.f32 %v2460_v59, %v11151_v50  ;;  %v14070_v58 = vld [vmem:[#allocation102_spill] sm:$0xff]  ;;  %v14071_v50 = vld [vmem:[#allocation293_spill] sm:$0xff]  ;;  %v14078_v59 = vld [vmem:[#allocation332_spill] sm:$0xff] }
 0x502   :  { %14064 = vst [vmem:[#allocation211_spill] sm:$0xff] %v11279_v38  ;;  %v3752_v61 = vsel %vm3743_vm5, %v3712_v46, %v3720_v16  ;;  %v11303_v49 = vadd.f32 %v2484_v23, %v14067_v19  ;;  %v2469_v1 = vsel %vm2455_vm4, %v14062_v2, %v14039_v28  ;;  %v2478_v17 = vmul.f32 %v2457_v3, %v11116_v44  ;;  %v14074_v44 = vld [vmem:[#allocation73_spill] sm:$0xff]  ;;  %v14079_v3 = vld [vmem:[#allocation120_spill] sm:$0xff] }
 0x503   :  { %v3760_v36 = vmul.f32 %v3752_v61, %v3695_v25  ;;  %v11311_v20 = vadd.f32 %v2472_v21, %v14069_v48  ;;  %v11314_v53 = vadd.f32 %v2477_v43, %v14070_v58  ;;  %v11317_v37 = vadd.f32 %v2480_v33, %v14071_v50  ;;  %v11324_v28 = vpop.permute.xlu0 %3587  ;;  %v14075_v23 = vld [vmem:[#allocation53_spill] sm:$0xff]  ;;  %v3728_v21 = vpop.permute.xlu1 %3727  ;;  %v14076_v43 = vld [vmem:[#allocation255_spill] sm:$0xff] }
 0x504   :  { %14068 = vst [vmem:[#allocation207_spill] sm:$0xff] %v11303_v49  ;;  %v2462_v22 = vsel %vm2455_vm4, %v14058_v34, %v14073_v0  ;;  %v2459_v4 = vsel %vm2455_vm4, %v14060_v56, %v14074_v44  ;;  %v2456_v27 = vsel %vm2455_vm4, %v14061_v7, %v14075_v23  ;;  %v3696_v34 = vmul.f32 %v11186_v45, %v14065_v60  ;;  %v14080_v61 = vld [vmem:[#allocation325_spill] sm:$0xff]  ;;  %v14081_v48 = vld [vmem:[#allocation119_spill] sm:$0xff] }
 0x505   :  { %14072 = vst [vmem:[#allocation217_spill] sm:$0xff] %v11317_v37  ;;  %v11335_v51 = vadd.f32 %v3760_v36, %v10995_v31  ;;  %v11340_v39 = vadd.f32 %v2485_v26, %v14076_v43  ;;  %v11343_v33 = vadd.f32 %v2473_v35, %v14078_v59  ;;  %v2479_v56 = vmul.f32 %v2469_v1, %v11130_v18  ;;  %v14082_v50 = vld [vmem:[#allocation137_spill] sm:$0xff]  ;;  %v14087_v43 = vld [vmem:[#allocation204_spill] sm:$0xff] }
 0x506   :  { %v3748_v2 = vsel %vm3743_vm5, %v3720_v16, %v3728_v21  ;;  %v11349_v7 = vadd.f32 %v2478_v17, %v14079_v3  ;;  %v2481_v31 = vmul.f32 %v2462_v22, %v2416_v47  ;;  %v2468_v25 = vsel %vm2455_vm4, %v14075_v23, %v14048_v54  ;;  %v14084_v23 = vld [vmem:[#allocation190_spill] sm:$0xff]  ;;  %v14089_v3 = vld [vmem:[#allocation312_spill] sm:$0xff] }
 0x507   :  { %14077 = vst [vmem:[#allocation128_spill] sm:$0xff] %v11340_v39  ;;  %v3761_v63 = vmul.f32 %v3748_v2, %v3696_v34  ;;  %v2471_v26 = vsel %vm2455_vm4, %v14074_v44, %v14046_v62  ;;  %v2486_v18 = vmul.f32 %v2459_v4, %v11159_v13  ;;  %v2474_v35 = vmul.f32 %v2456_v27, %v11170_v42  ;;  %v3596_v16 = vpop.permute.xlu0 %3595  ;;  %v3736_v13 = vpop.permute.xlu1 %3735 }
 0x508   :  { %v3568_v19 = vmul.f32 %v13978_v29, %v14080_v61  ;;  %v3614_v54 = vsel %vm3607_vm3, %v11324_v28, %v3596_v16  ;;  %v3697_v1 = vmul.f32 %v11208_v10, %v14065_v60  ;;  %v3698_v62 = vmul.f32 %v11211_v8, %v14065_v60 }
 0x509   :  { %v11364_v47 = vadd.f32 %v3761_v63, %v11021_v52  ;;  %v2475_v42 = vmul.f32 %v2468_v25, %v11174_v30  ;;  %v3744_v36 = vsel %vm3743_vm5, %v3728_v21, %v3736_v13  ;;  %v3756_v52 = vsel %vm3743_vm5, %v3736_v13, %v3712_v46  ;;  %v14086_v46 = vld [vmem:[#allocation186_spill] sm:$0xff] }
 0x50a   :  { %v3633_v17 = vmul.f32 %v3614_v54, %v3568_v19  ;;  %v11379_v58 = vadd.f32 %v2479_v56, %v14081_v48  ;;  %v11382_v22 = vadd.f32 %v2481_v31, %v14082_v50  ;;  %v3762_v44 = vmul.f32 %v3744_v36, %v3697_v1  ;;  %v14088_v56 = vld [vmem:[#allocation111_spill] sm:$0xff] }
 0x50b   :  { %v3763_v4 = vmul.f32 %v3756_v52, %v3698_v62  ;;  %v11385_v60 = vmul.f32 %v2471_v26, %v11163_v41  ;;  %v11388_v30 = vadd.f32 %v2486_v18, %v14084_v23  ;;  %v3604_v34 = vpop.permute.xlu0 %3603  ;;  %v3569_v21 = vmul.f32 %v14086_v46, %v14080_v61  ;;  %v11406_v25 = vpop.permute.xlu1 %3929  ;;  %v14091_v26 = vld [vmem:[#allocation75_spill] sm:$0xff]  ;;  %v14092_v18 = vld [vmem:[#allocation218_spill] sm:$0xff]  ;;  %v14094_v62 = vld [vmem:[#allocation285_spill] sm:$0xff] }
 0x50c   :  { %14083 = vst [vmem:[#allocation32_spill] sm:$0xff] %v11382_v22  ;;  %v11391_v27 = vadd.f32 %v3633_v17, %v11222_v5  ;;  %v11396_v59 = vadd.f32 %v2474_v35, %v14087_v43  ;;  %v11399_v2 = vadd.f32 %v3762_v44, %v14088_v56  ;;  %v3610_v41 = vsel %vm3607_vm3, %v3596_v16, %v3604_v34  ;;  %v14090_v5 = vld [vmem:[#allocation327_spill] sm:$0xff]  ;;  %v14093_v35 = vld [vmem:[#allocation229_spill] sm:$0xff]  ;;  %v14097_v17 = vld [vmem:[#allocation310_spill] sm:$0xff] }
 0x50d   :  { %14085 = vst [vmem:[#allocation136_spill] sm:$0xff] %v11388_v30  ;;  %v11402_v31 = vadd.f32 %v3763_v4, %v14089_v3  ;;  %v11409_v63 = vadd.f32 %v2475_v42, %v14090_v5  ;;  %v2547_v19 = vmul.f32 %v14092_v18, %v14091_v26  ;;  %v2548_v54 = vmul.f32 %v14093_v35, %v14091_v26  ;;  %v14096_v42 = vld [vmem:[#allocation58_spill] sm:$0xff]  ;;  %v14098_v52 = vld [vmem:[#allocation224_spill] sm:$0xff]  ;;  %v14099_v50 = vld [vmem:[#allocation303_spill] sm:$0xff] }
 0x50e   :  { %v3634_v1 = vmul.f32 %v3610_v41, %v3569_v21  ;;  %v2458_v13 = vsel %vm2455_vm4, %v14073_v0, %v14094_v62  ;;  %v11423_v16 = vsel %vm2455_vm4, %v14094_v62, %v14059_v12  ;;  %v2601_v36 = vsel %vm2591_vm6, %v14097_v17, %v14096_v42  ;;  %v14100_v4 = vld [vmem:[#allocation78_spill] sm:$0xff]  ;;  %v14101_v23 = vld [vmem:[#allocation28_spill] sm:$0xff]  ;;  %v14103_v41 = vld [vmem:[#allocation35_spill] sm:$0xff] }
 0x50f   :  { %14095 = vst [vmem:[#allocation130_spill] sm:$0xff] %v11423_v16  ;;  %v2549_v48 = vmul.f32 %v14098_v52, %v14091_v26  ;;  %v2543_v44 = vmul.f32 %v14092_v18, %v14099_v50  ;;  %v2600_v0 = vsel %vm2591_vm6, %v14101_v23, %v14100_v4  ;;  %v14102_v21 = vld [vmem:[#allocation34_spill] sm:$0xff]  ;;  %v3848_v56 = vpop.permute.xlu0 %3847  ;;  %v2544_v3 = vmul.f32 %v14093_v35, %v14099_v50  ;;  %v14104_v62 = vld [vmem:[#allocation164_spill] sm:$0xff]  ;;  %v14105_v22 = vld [vmem:[#allocation265_spill] sm:$0xff]  ;;  %v3580_v39 = vpop.permute.xlu1 %3579 }
 0x510   :  { %v2597_v12 = vsel %vm2591_vm6, %v14096_v42, %v14102_v21  ;;  %v11442_v43 = vadd.f32 %v3634_v1, %v11251_v9  ;;  %v2596_v5 = vsel %vm2591_vm6, %v14100_v4, %v14103_v41  ;;  %v3567_v30 = vmul.f32 %v14104_v62, %v14080_v61 }
 0x511   :  { %v3570_v42 = vmul.f32 %v14105_v22, %v14080_v61  ;;  %v2612_v9 = vmul.f32 %v2601_v36, %v2547_v19  ;;  %v3618_v1 = vsel %vm3607_vm3, %v3580_v39, %v11324_v28  ;;  %v3622_v37 = vsel %vm3607_vm3, %v3604_v34, %v3580_v39  ;;  %v14107_v61 = vld [vmem:[#allocation319_spill] sm:$0xff]  ;;  %v14108_v36 = vld [vmem:[#allocation316_spill] sm:$0xff] }
 0x512   :  { %v2608_v4 = vmul.f32 %v2600_v0, %v2543_v44  ;;  %v2613_v49 = vmul.f32 %v2597_v12, %v2548_v54  ;;  %v3632_v35 = vmul.f32 %v3618_v1, %v3567_v30  ;;  %v11462_v38 = vmul.f32 %v2458_v13, %v11287_v6  ;;  %v14109_v30 = vld [vmem:[#allocation140_spill] sm:$0xff]  ;;  %v14110_v13 = vld [vmem:[#allocation82_spill] sm:$0xff] }
 0x513   :  { %v3635_v18 = vmul.f32 %v3622_v37, %v3570_v42  ;;  %v2609_v55 = vmul.f32 %v2596_v5, %v2544_v3  ;;  %v2550_v19 = vmul.f32 %v14107_v61, %v14091_v26  ;;  %v2593_v28 = vsel %vm2591_vm6, %v14102_v21, %v14108_v36  ;;  %v3856_v16 = vpop.permute.xlu0 %3855  ;;  %v3582_v26 = vpop.permute.xlu1 %3581  ;;  %v14115_v1 = vld [vmem:[#allocation290_spill] sm:$0xff] }
 0x514   :  { %14106 = vst [vmem:[#allocation336_spill] sm:$0xff] %v11462_v38  ;;  %v2605_v39 = vsel %vm2591_vm6, %v14108_v36, %v14097_v17  ;;  %v11475_v37 = vadd.f32 %v3632_v35, %v14109_v30  ;;  %v3888_v34 = vsel %vm3879_vm8, %v3848_v56, %v3856_v16  ;;  %v2545_v54 = vmul.f32 %v14098_v52, %v14099_v50  ;;  %v14111_v17 = vld [vmem:[#allocation106_spill] sm:$0xff] }
 0x515   :  { %v11478_v6 = vadd.f32 %v3635_v18, %v11253_v24  ;;  %v2592_v44 = vsel %vm2591_vm6, %v14103_v41, %v14110_v13  ;;  %v2604_v35 = vsel %vm2591_vm6, %v14110_v13, %v14101_v23  ;;  %v3896_v24 = vmul.f32 %v3888_v34, %v14111_v17  ;;  %v14120_v13 = vld [vmem:[#allocation110_spill] sm:$0xff] }
 0x516   :  { %v11494_v18 = vadd.f32 %v2612_v9, %v11296_v14  ;;  %v11497_v0 = vadd.f32 %v2608_v4, %v11311_v20  ;;  %v11500_v21 = vadd.f32 %v2613_v49, %v11314_v53  ;;  %v2546_v12 = vmul.f32 %v14107_v61, %v14099_v50  ;;  %v14112_v53 = vld [vmem:[#allocation174_spill] sm:$0xff] }
 0x517   :  { %v11505_v3 = vadd.f32 %v2609_v55, %v11343_v33  ;;  %v11507_v41 = vmul.f32 %v2593_v28, %v2549_v48  ;;  %v11509_v23 = vmul.f32 %v2605_v39, %v2550_v19  ;;  %v11512_v5 = vadd.f32 %v3896_v24, %v11335_v51  ;;  %v3864_v14 = vpop.permute.xlu0 %3863  ;;  %v3590_v55 = vpop.permute.xlu1 %3589  ;;  %v14113_v33 = vld [vmem:[#allocation83_spill] sm:$0xff]  ;;  %v14114_v48 = vld [vmem:[#allocation114_spill] sm:$0xff]  ;;  %v14116_v51 = vld [vmem:[#allocation124_spill] sm:$0xff] }
 0x518   :  { %v11514_v42 = vmul.f32 %v2592_v44, %v2545_v54  ;;  %v11516_v20 = vmul.f32 %v2604_v35, %v2546_v12  ;;  %v3884_v49 = vsel %vm3879_vm8, %v3856_v16, %v3864_v14  ;;  %v3571_v50 = vmul.f32 %v14104_v62, %v14112_v53  ;;  %v14117_v28 = vld [vmem:[#allocation105_spill] sm:$0xff]  ;;  %v14118_v16 = vld [vmem:[#allocation250_spill] sm:$0xff]  ;;  %v14121_v44 = vld [vmem:[#allocation87_spill] sm:$0xff] }
 0x519   :  { %v2683_v9 = vmul.f32 %v14114_v48, %v14113_v33  ;;  %v2684_v4 = vmul.f32 %v14115_v1, %v14113_v33  ;;  %v3897_v19 = vmul.f32 %v3884_v49, %v14116_v51  ;;  %v3619_v36 = vsel %vm3607_vm3, %v3582_v26, %v3590_v55  ;;  %v14119_v62 = vld [vmem:[#allocation334_spill] sm:$0xff] }
 0x51a   :  { %v2679_v39 = vmul.f32 %v14114_v48, %v14117_v28  ;;  %v2685_v30 = vmul.f32 %v14118_v16, %v14113_v33  ;;  %v2686_v34 = vmul.f32 %v14119_v62, %v14113_v33  ;;  %v3636_v54 = vmul.f32 %v3619_v36, %v3571_v50  ;;  %v14122_v51 = vld [vmem:[#allocation14_spill] sm:$0xff] }
 0x51b   :  { %v2737_v35 = vsel %vm2727_vm7, %v14121_v44, %v14120_v13  ;;  %v2680_v17 = vmul.f32 %v14115_v1, %v14117_v28  ;;  %v2681_v24 = vmul.f32 %v14118_v16, %v14117_v28  ;;  %v11544_v12 = vadd.f32 %v3897_v19, %v11364_v47  ;;  %v3872_v49 = vpop.permute.xlu0 %3871  ;;  %v3598_v1 = vpop.permute.xlu1 %3597  ;;  %v14124_v61 = vld [vmem:[#allocation266_spill] sm:$0xff]  ;;  %v14125_v19 = vld [vmem:[#allocation275_spill] sm:$0xff] }
 0x51c   :  { %v11547_v48 = vadd.f32 %v3636_v54, %v14122_v51  ;;  %v3880_v50 = vsel %vm3879_vm8, %v3864_v14, %v3872_v49  ;;  %v3892_v33 = vsel %vm3879_vm8, %v3872_v49, %v3848_v56  ;;  %v3572_v36 = vmul.f32 %v13978_v29, %v14112_v53  ;;  %v14127_v14 = vld [vmem:[#allocation109_spill] sm:$0xff] }
 0x51d   :  { %v2682_v16 = vmul.f32 %v14119_v62, %v14117_v28  ;;  %v3898_v47 = vmul.f32 %v3880_v50, %v14124_v61  ;;  %v3899_v52 = vmul.f32 %v3892_v33, %v14125_v19  ;;  %v3615_v54 = vsel %vm3607_vm3, %v3590_v55, %v3598_v1  ;;  %v14128_v49 = vld [vmem:[#allocation89_spill] sm:$0xff]  ;;  %v14130_v50 = vld [vmem:[#allocation92_spill] sm:$0xff]  ;;  %v14135_v62 = vld [vmem:[#allocation191_spill] sm:$0xff] }
 0x51e   :  { %14123 = vst [vmem:[#allocation95_spill] sm:$0xff] %v11547_v48  ;;  %v2748_v51 = vmul.f32 %v2737_v35, %v2683_v9  ;;  %v14126_v48 = vld [vmem:[#allocation90_spill] sm:$0xff]  ;;  %v2733_v29 = vsel %vm2727_vm7, %v14120_v13, %v14128_v49  ;;  %v3637_v38 = vmul.f32 %v3615_v54, %v3572_v36  ;;  %v14129_v28 = vld [vmem:[#allocation113_spill] sm:$0xff]  ;;  %v2729_v55 = vsel %vm2727_vm7, %v14128_v49, %v14130_v50  ;;  %v14134_v49 = vld [vmem:[#allocation300_spill] sm:$0xff] }
 0x51f   :  { %v2736_v56 = vsel %vm2727_vm7, %v14127_v14, %v14126_v48  ;;  %v2732_v61 = vsel %vm2727_vm7, %v14126_v48, %v14129_v28  ;;  %v11578_v9 = vadd.f32 %v3898_v47, %v11399_v2  ;;  %v11581_v35 = vadd.f32 %v3899_v52, %v11402_v31  ;;  %v3716_v33 = vpop.permute.xlu0 %3715  ;;  %v14132_v36 = vld [vmem:[#allocation125_spill] sm:$0xff]  ;;  %v3606_v2 = vpop.permute.xlu1 %3605 }
 0x520   :  { %v2741_v13 = vsel %vm2727_vm7, %v14130_v50, %v14121_v44  ;;  %v11588_v19 = vadd.f32 %v3637_v38, %v14132_v36  ;;  %v3573_v48 = vmul.f32 %v14086_v46, %v14112_v53  ;;  %v3574_v54 = vmul.f32 %v14105_v22, %v14112_v53 }
 0x521   :  { %14131 = vst [vmem:[#allocation144_spill] sm:$0xff] %v11581_v35  ;;  %v2744_v47 = vmul.f32 %v2736_v56, %v2679_v39  ;;  %v2728_v31 = vsel %vm2727_vm7, %v14129_v28, %v14134_v49  ;;  %v3611_v52 = vsel %vm3607_vm3, %v3598_v1, %v3606_v2  ;;  %v3623_v38 = vsel %vm3607_vm3, %v3606_v2, %v3582_v26  ;;  %v14136_v1 = vld [vmem:[#allocation314_spill] sm:$0xff]  ;;  %v14137_v26 = vld [vmem:[#allocation205_spill] sm:$0xff] }
 0x522   :  { %14133 = vst [vmem:[#allocation152_spill] sm:$0xff] %v11588_v19  ;;  %v2749_v44 = vmul.f32 %v2733_v29, %v2684_v4  ;;  %v2740_v46 = vsel %vm2727_vm7, %v14134_v49, %v14127_v14  ;;  %v3638_v22 = vmul.f32 %v3611_v52, %v3573_v48  ;;  %v3639_v53 = vmul.f32 %v3623_v38, %v3574_v54 }
 0x523   :  { %v2745_v39 = vmul.f32 %v2732_v61, %v2680_v17  ;;  %v2750_v56 = vmul.f32 %v2729_v55, %v2685_v30  ;;  %v2751_v50 = vmul.f32 %v2741_v13, %v2686_v34  ;;  %v3724_v36 = vpop.permute.xlu0 %3723  ;;  %v3703_v28 = vmul.f32 %v11143_v57, %v14135_v62  ;;  %v3850_v14 = vpop.permute.xlu1 %3849 }
 0x524   :  { %v2746_v19 = vmul.f32 %v2728_v31, %v2681_v24  ;;  %v11609_v35 = vadd.f32 %v3638_v22, %v14136_v1  ;;  %v11612_v4 = vadd.f32 %v3639_v53, %v14137_v26  ;;  %v3754_v29 = vsel %vm3743_vm5, %v3716_v33, %v3724_v36  ;;  %v14140_v31 = vld [vmem:[#allocation263_spill] sm:$0xff] }
 0x525   :  { %v2630_v17 = vadd.f32 %v11507_v41, %v11349_v7  ;;  %v2631_v30 = vadd.f32 %v11509_v23, %v11379_v58  ;;  %v2747_v34 = vmul.f32 %v2740_v46, %v2682_v16  ;;  %v3768_v61 = vmul.f32 %v3754_v29, %v3703_v28 }
 0x526   :  { %v2626_v24 = vadd.f32 %v11514_v42, %v11396_v59  ;;  %v2627_v55 = vadd.f32 %v11516_v20, %v11409_v63  ;;  %v2764_v13 = vadd.f32 %v2748_v51, %v11494_v18  ;;  %v2760_v48 = vadd.f32 %v2744_v47, %v11497_v0  ;;  %v14138_v0 = vld [vmem:[#allocation322_spill] sm:$0xff]  ;;  %v14139_v47 = vld [vmem:[#allocation323_spill] sm:$0xff] }
 0x527   :  { %v2765_v54 = vadd.f32 %v2749_v44, %v11500_v21  ;;  %v2761_v2 = vadd.f32 %v2745_v39, %v11505_v3  ;;  %v11629_v7 = vadd.f32 %v3768_v61, %v11475_v37  ;;  %v3732_v58 = vpop.permute.xlu0 %3731  ;;  %v3704_v41 = vmul.f32 %v11186_v45, %v14135_v62  ;;  %v3858_v18 = vpop.permute.xlu1 %3857  ;;  %v14141_v39 = vld [vmem:[#allocation148_spill] sm:$0xff] }
 0x528   :  { %v2766_v23 = vadd.f32 %v2750_v56, %v2630_v17  ;;  %v2767_v59 = vadd.f32 %v2751_v50, %v2631_v30  ;;  %v2762_v42 = vadd.f32 %v2746_v19, %v2626_v24  ;;  %v3750_v63 = vsel %vm3743_vm5, %v3724_v36, %v3732_v58  ;;  %v14143_v30 = vld [vmem:[#allocation196_spill] sm:$0xff] }
 0x529   :  { %v2763_v20 = vadd.f32 %v2747_v34, %v2627_v55  ;;  %v2796_v16 = vadd.f32 %v14138_v0, %v2764_v13  ;;  %v3769_v21 = vmul.f32 %v3750_v63, %v3704_v41  ;;  %v3889_v3 = vsel %vm3879_vm8, %v3850_v14, %v3858_v18  ;;  %v14144_v61 = vld [vmem:[#allocation264_spill] sm:$0xff] }
 0x52a   :  { %v2797_v37 = vadd.f32 %v14138_v0, %v2765_v54  ;;  %v2798_v51 = vadd.f32 %v14138_v0, %v2766_v23  ;;  %v2792_v49 = vadd.f32 %v14139_v47, %v2760_v48  ;;  %v3900_v52 = vmul.f32 %v3889_v3, %v14140_v31  ;;  %v14145_v54 = vld [vmem:[#allocation227_spill] sm:$0xff]  ;;  %v14149_v31 = vld [vmem:[#allocation22_spill] sm:$0xff] }
 0x52b   :  { %v2799_v19 = vadd.f32 %v14138_v0, %v2767_v59  ;;  %v11644_v38 = vadd.f32 %v3769_v21, %v11391_v27  ;;  %v3740_v44 = vpop.permute.xlu0 %3739  ;;  %v3705_v46 = vmul.f32 %v11208_v10, %v14135_v62  ;;  %v3706_v22 = vmul.f32 %v11211_v8, %v14135_v62  ;;  %v3866_v27 = vpop.permute.xlu1 %3865  ;;  %v14142_v62 = vld [vmem:[#allocation184_spill] sm:$0xff]  ;;  %v14147_v21 = vld [vmem:[#allocation93_spill] sm:$0xff] }
 0x52c   :  { %v3944_v53 = vadd.f32 %v11406_v25, %v11512_v5  ;;  %v3916_v56 = vadd.f32 %v3900_v52, %v14141_v39  ;;  %v3746_v50 = vsel %vm3743_vm5, %v3732_v58, %v3740_v44  ;;  %v3758_v36 = vsel %vm3743_vm5, %v3740_v44, %v3716_v33 }
 0x52d   :  { %v2793_v28 = vadd.f32 %v14139_v47, %v2761_v2  ;;  %v3770_v1 = vmul.f32 %v3746_v50, %v3705_v46  ;;  %v3771_v26 = vmul.f32 %v3758_v36, %v3706_v22  ;;  %v3885_v29 = vsel %vm3879_vm8, %v3858_v18, %v3866_v27  ;;  %v14151_v46 = vld [vmem:[#allocation144_spill] sm:$0xff] }
 0x52e   :  { %v4396_v17 = vmul.f32 %v14142_v62, %v2796_v16  ;;  %v4392_v5 = vmul.f32 %v14143_v30, %v2792_v49  ;;  %v3948_v34 = vadd.f32 %v11281_v15, %v3916_v56  ;;  %v3901_v24 = vmul.f32 %v3885_v29, %v14144_v61  ;;  %v14153_v56 = vld [vmem:[#allocation211_spill] sm:$0xff]  ;;  %v14158_v62 = vld [vmem:[#allocation234_spill] sm:$0xff] }
 0x52f   :  { %v3945_v55 = vadd.f32 %v11406_v25, %v11544_v12  ;;  %v11667_v33 = vadd.f32 %v3770_v1, %v11442_v43  ;;  %v11670_v13 = vadd.f32 %v3771_v26, %v11478_v6  ;;  %v11672_v48 = vpop.permute.xlu0 %3937  ;;  %v4397_v2 = vmul.f32 %v14145_v54, %v2797_v37  ;;  %v3874_v63 = vpop.permute.xlu1 %3873  ;;  %v14146_v12 = vld [vmem:[#allocation231_spill] sm:$0xff] }
 0x530   :  { %v2794_v58 = vadd.f32 %v14139_v47, %v2762_v42  ;;  %v4408_v41 = vmul.f32 %v4392_v5, %v3944_v53  ;;  %v4412_v23 = vmul.f32 %v4396_v17, %v3948_v34  ;;  %v3917_v59 = vadd.f32 %v3901_v24, %v11245_v40  ;;  %v14148_v42 = vld [vmem:[#allocation273_spill] sm:$0xff]  ;;  %v14152_v53 = vld [vmem:[#allocation203_spill] sm:$0xff] }
 0x531   :  { %v2795_v18 = vadd.f32 %v14139_v47, %v2763_v20  ;;  %v3881_v43 = vsel %vm3879_vm8, %v3866_v27, %v3874_v63  ;;  %v3893_v6 = vsel %vm3879_vm8, %v3874_v63, %v3850_v14  ;;  %v4393_v0 = vmul.f32 %v14146_v12, %v2793_v28  ;;  %v14150_v20 = vld [vmem:[#allocation130_spill] sm:$0xff]  ;;  %v14154_v27 = vld [vmem:[#allocation132_spill] sm:$0xff]  ;;  %v14159_v34 = vld [vmem:[#allocation233_spill] sm:$0xff] }
 0x532   :  { %v3949_v16 = vadd.f32 %v11281_v15, %v3917_v59  ;;  %v3902_v3 = vmul.f32 %v3881_v43, %v14147_v21  ;;  %v3903_v37 = vmul.f32 %v3893_v6, %v14148_v42  ;;  %v4672_v49 = vpack.c.bf16 %v4412_v23, %v4408_v41  ;;  %v14155_v28 = vld [vmem:[#allocation336_spill] sm:$0xff]  ;;  %v14160_v24 = vld [vmem:[#allocation331_spill] sm:$0xff]  ;;  %v14164_v6 = vld [vmem:[#allocation229_spill] sm:$0xff] }
 0x533   :  { %v11688_v40 = vadd.f32 %v11385_v60, %v14149_v31  ;;  %v2483_v47 = vmul.f32 %v14150_v20, %v11291_v32  ;;  %v3946_v52 = vadd.f32 %v11406_v25, %v11578_v9  ;;  %v11694_v14 = vpop.permute.xlu0 %3851  ;;  %v4409_v44 = vmul.f32 %v4393_v0, %v3945_v55  ;;  %v11700_v36 = vpop.permute.xlu1 %3717  ;;  %v14156_v32 = vld [vmem:[#allocation188_spill] sm:$0xff]  ;;  %v14161_v54 = vld [vmem:[#allocation55_spill] sm:$0xff] }
 0x534   :  { %v3947_v22 = vadd.f32 %v11406_v25, %v14151_v46  ;;  %v3918_v39 = vadd.f32 %v3902_v3, %v14152_v53  ;;  %v3919_v50 = vadd.f32 %v3903_v37, %v14153_v56  ;;  %v4413_v60 = vmul.f32 %v4397_v2, %v3949_v16  ;;  %v14157_v9 = vld [vmem:[#allocation180_spill] sm:$0xff]  ;;  %v14162_v2 = vld [vmem:[#allocation218_spill] sm:$0xff]  ;;  %v14167_v42 = vld [vmem:[#allocation319_spill] sm:$0xff] }
 0x535   :  { %v11704_v1 = vadd.f32 %v14155_v28, %v14154_v27  ;;  %v4398_v26 = vmul.f32 %v14156_v32, %v2798_v51  ;;  %v4394_v29 = vmul.f32 %v14157_v9, %v2794_v58  ;;  %v4399_v17 = vmul.f32 %v14158_v62, %v2799_v19  ;;  %v14163_v51 = vld [vmem:[#allocation274_spill] sm:$0xff]  ;;  %v14165_v0 = vld [vmem:[#allocation224_spill] sm:$0xff]  ;;  %v14172_v56 = vld [vmem:[#allocation59_spill] sm:$0xff] }
 0x536   :  { %v3950_v30 = vadd.f32 %v11281_v15, %v3918_v39  ;;  %v3951_v25 = vadd.f32 %v11281_v15, %v3919_v50  ;;  %v4670_v5 = vpack.c.bf16 %v4413_v60, %v4409_v44  ;;  %v4395_v61 = vmul.f32 %v14159_v34, %v2795_v18  ;;  %v14166_v21 = vld [vmem:[#allocation24_spill] sm:$0xff]  ;;  %v14169_v44 = vld [vmem:[#allocation299_spill] sm:$0xff] }
 0x537   :  { %v11713_v55 = vadd.f32 %v2483_v47, %v14160_v24  ;;  %v2555_v41 = vmul.f32 %v14162_v2, %v14161_v54  ;;  %v4410_v23 = vmul.f32 %v4394_v29, %v3946_v52  ;;  %v3860_v59 = vpop.permute.xlu0 %3859  ;;  %v3707_v58 = vmul.f32 %v11143_v57, %v14163_v51  ;;  %v3726_v15 = vpop.permute.xlu1 %3725  ;;  %v14168_v52 = vld [vmem:[#allocation57_spill] sm:$0xff]  ;;  %v14171_v39 = vld [vmem:[#allocation315_spill] sm:$0xff] }
 0x538   :  { %v4414_v63 = vmul.f32 %v4398_v26, %v3950_v30  ;;  %v3890_v19 = vsel %vm3879_vm8, %v11694_v14, %v3860_v59  ;;  %4671 = vmatprep.subr.bf16.mxu0 %v4670_v5  ;;  %v4411_v43 = vmul.f32 %v4395_v61, %v3947_v22  ;;  %v4415_v18 = vmul.f32 %v4399_v17, %v3951_v25  ;;  %v14170_v22 = vld [vmem:[#allocation298_spill] sm:$0xff]  ;;  %v14173_v27 = vld [vmem:[#allocation79_spill] sm:$0xff]  ;;  %v14175_v30 = vld [vmem:[#allocation292_spill] sm:$0xff] }
 0x539   :  { %v2556_v12 = vmul.f32 %v14164_v6, %v14161_v54  ;;  %v2557_v16 = vmul.f32 %v14165_v0, %v14161_v54  ;;  %v3904_v3 = vmul.f32 %v3890_v19, %v14166_v21  ;;  %v3755_v57 = vsel %vm3743_vm5, %v11700_v36, %v3726_v15  ;;  %4673 = vmatpush1.bf16.msra.mxu0 %v4672_v49  ;;  %v14174_v32 = vld [vmem:[#allocation95_spill] sm:$0xff]  ;;  %v14178_v19 = vld [vmem:[#allocation152_spill] sm:$0xff] }
 0x53a   :  { %v2558_v37 = vmul.f32 %v14167_v42, %v14161_v54  ;;  %v3772_v31 = vmul.f32 %v3755_v57, %v3707_v58  ;;  %v4678_v20 = vpack.c.bf16 %v4415_v18, %v4411_v43  ;;  %v4680_v47 = vpack.c.bf16 %v4414_v63, %v4410_v23 }
 0x53b   :  { %v2603_v46 = vsel %vm2591_vm6, %v14169_v44, %v14168_v52  ;;  %v2551_v53 = vmul.f32 %v14162_v2, %v14170_v22  ;;  %v2602_v50 = vsel %vm2591_vm6, %v14172_v56, %v14171_v39  ;;  %v11743_v49 = vadd.f32 %v3904_v3, %v11629_v7  ;;  %v3868_v60 = vpop.permute.xlu0 %3867  ;;  %v3734_v62 = vpop.permute.xlu1 %3733  ;;  %v14176_v2 = vld [vmem:[#allocation317_spill] sm:$0xff]  ;;  %v14180_v3 = vld [vmem:[#allocation206_spill] sm:$0xff] }
 0x53c   :  { %v2599_v28 = vsel %vm2591_vm6, %v14168_v52, %v14173_v27  ;;  %v11750_v26 = vadd.f32 %v3772_v31, %v14174_v32  ;;  %v3886_v9 = vsel %vm3879_vm8, %v3860_v59, %v3868_v60  ;;  %4679 = vmatprep.subr.bf16.mxu1 %v4678_v20  ;;  %v3708_v29 = vmul.f32 %v11186_v45, %v14163_v51  ;;  %v14177_v59 = vld [vmem:[#allocation318_spill] sm:$0xff]  ;;  %v14181_v31 = vld [vmem:[#allocation207_spill] sm:$0xff] }
 0x53d   :  { %v2552_v7 = vmul.f32 %v14164_v6, %v14170_v22  ;;  %v2553_v17 = vmul.f32 %v14165_v0, %v14170_v22  ;;  %v3905_v25 = vmul.f32 %v3886_v9, %v14175_v30  ;;  %v3751_v5 = vsel %vm3743_vm5, %v3726_v15, %v3734_v62  ;;  %4681 = vmatpush1.bf16.msra.mxu1 %v4680_v47  ;;  %v14179_v0 = vld [vmem:[#allocation112_spill] sm:$0xff]  ;;  %v14187_v9 = vld [vmem:[#allocation91_spill] sm:$0xff] }
 0x53e   :  { %v2620_v34 = vmul.f32 %v2603_v46, %v2555_v41  ;;  %v2616_v61 = vmul.f32 %v2602_v50, %v2551_v53  ;;  %v2554_v24 = vmul.f32 %v14167_v42, %v14170_v22  ;;  %v3773_v54 = vmul.f32 %v3751_v5, %v3708_v29  ;;  %v14188_v29 = vld [vmem:[#allocation88_spill] sm:$0xff] }
 0x53f   :  { %v2621_v45 = vmul.f32 %v2599_v28, %v2556_v12  ;;  %v2598_v23 = vsel %vm2591_vm6, %v14171_v39, %v14176_v2  ;;  %v2595_v58 = vsel %vm2591_vm6, %v14173_v27, %v14177_v59  ;;  %v11774_v63 = vadd.f32 %v3905_v25, %v11644_v38  ;;  %v3876_v41 = vpop.permute.xlu0 %3875  ;;  %v3742_v12 = vpop.permute.xlu1 %3741  ;;  %v14183_v39 = vld [vmem:[#allocation128_spill] sm:$0xff]  ;;  %v14185_v27 = vld [vmem:[#allocation295_spill] sm:$0xff]  ;;  %v14191_v25 = vld [vmem:[#allocation114_spill] sm:$0xff] }
 0x540   :  { %v11777_v15 = vadd.f32 %v3773_v54, %v14178_v19  ;;  %v3882_v43 = vsel %vm3879_vm8, %v3868_v60, %v3876_v41  ;;  %v3894_v18 = vsel %vm3879_vm8, %v3876_v41, %v11694_v14  ;;  %v3709_v6 = vmul.f32 %v11208_v10, %v14163_v51  ;;  %v14186_v28 = vld [vmem:[#allocation104_spill] sm:$0xff]  ;;  %v14193_v54 = vld [vmem:[#allocation94_spill] sm:$0xff] }
 0x541   :  { %v3906_v21 = vmul.f32 %v3882_v43, %v14179_v0  ;;  %v3907_v38 = vmul.f32 %v3894_v18, %v14180_v3  ;;  %v3710_v57 = vmul.f32 %v11211_v8, %v14163_v51  ;;  %v3747_v42 = vsel %vm3743_vm5, %v3734_v62, %v3742_v12  ;;  %v14182_v8 = vld [vmem:[#allocation217_spill] sm:$0xff]  ;;  %v14189_v62 = vld [vmem:[#allocation32_spill] sm:$0xff] }
 0x542   :  { %v2636_v20 = vadd.f32 %v2620_v34, %v14181_v31  ;;  %v2617_v47 = vmul.f32 %v2598_v23, %v2552_v7  ;;  %v3759_v14 = vsel %vm3743_vm5, %v3742_v12, %v11700_v36  ;;  %v3774_v52 = vmul.f32 %v3747_v42, %v3709_v6  ;;  %v14190_v30 = vld [vmem:[#allocation288_spill] sm:$0xff]  ;;  %v14192_v34 = vld [vmem:[#allocation107_spill] sm:$0xff]  ;;  %v14196_v6 = vld [vmem:[#allocation26_spill] sm:$0xff] }
 0x543   :  { %v2622_v10 = vmul.f32 %v2595_v58, %v2557_v16  ;;  %v11797_v46 = vadd.f32 %v3906_v21, %v11667_v33  ;;  %v11800_v22 = vadd.f32 %v3907_v38, %v11670_v13  ;;  %v3775_v53 = vmul.f32 %v3759_v14, %v3710_v57  ;;  %v11811_v16 = vpop.permute.xlu1 %3941  ;;  %v14184_v33 = vld [vmem:[#allocation81_spill] sm:$0xff]  ;;  %v14194_v23 = vld [vmem:[#allocation136_spill] sm:$0xff]  ;;  %v14195_v58 = vld [vmem:[#allocation290_spill] sm:$0xff] }
 0x544   :  { %v2632_v51 = vadd.f32 %v2616_v61, %v14182_v8  ;;  %v2637_v50 = vadd.f32 %v2621_v45, %v14183_v39  ;;  %v2607_v60 = vsel %vm2591_vm6, %v14177_v59, %v14169_v44  ;;  %v11809_v36 = vadd.f32 %v3774_v52, %v11609_v35  ;;  %v14197_v3 = vld [vmem:[#allocation116_spill] sm:$0xff]  ;;  %v14198_v38 = vld [vmem:[#allocation250_spill] sm:$0xff] }
 0x545   :  { %v2594_v13 = vsel %vm2591_vm6, %v14176_v2, %v14184_v33  ;;  %v2739_v32 = vsel %vm2727_vm7, %v14186_v28, %v14185_v27  ;;  %v2738_v44 = vsel %vm2727_vm7, %v14188_v29, %v14187_v9  ;;  %v11826_v35 = vadd.f32 %v3775_v53, %v11612_v4  ;;  %v14199_v42 = vld [vmem:[#allocation334_spill] sm:$0xff] }
 0x546   :  { %v2633_v7 = vadd.f32 %v2617_v47, %v14189_v62  ;;  %v2691_v5 = vmul.f32 %v14191_v25, %v14190_v30  ;;  %v2687_v61 = vmul.f32 %v14191_v25, %v14192_v34  ;;  %v2734_v45 = vsel %vm2727_vm7, %v14187_v9, %v14193_v54  ;;  %v14200_v47 = vld [vmem:[#allocation29_spill] sm:$0xff] }
 0x547   :  { %v2623_v2 = vmul.f32 %v2607_v60, %v2558_v37  ;;  %v2638_v59 = vadd.f32 %v2622_v10, %v14194_v23  ;;  %v2606_v4 = vsel %vm2591_vm6, %v14184_v33, %v14172_v56  ;;  %v2688_v41 = vmul.f32 %v14195_v58, %v14192_v34  ;;  %v3854_v0 = vpop.permute.xlu1 %3853  ;;  %v14202_v25 = vld [vmem:[#allocation121_spill] sm:$0xff] }
 0x548   :  { %v2618_v19 = vmul.f32 %v2594_v13, %v2553_v17  ;;  %v2756_v43 = vmul.f32 %v2739_v32, %v2691_v5  ;;  %v2752_v18 = vmul.f32 %v2738_v44, %v2687_v61  ;;  %v2735_v12 = vsel %vm2727_vm7, %v14185_v27, %v14196_v6  ;;  %v14203_v61 = vld [vmem:[#allocation27_spill] sm:$0xff] }
 0x549   :  { %v2692_v37 = vmul.f32 %v14195_v58, %v14190_v30  ;;  %v2753_v21 = vmul.f32 %v2734_v45, %v2688_v41  ;;  %v2731_v56 = vsel %vm2727_vm7, %v14196_v6, %v14197_v3  ;;  %v2743_v17 = vsel %vm2727_vm7, %v14197_v3, %v14186_v28  ;;  %v14206_v6 = vld [vmem:[#allocation25_spill] sm:$0xff] }
 0x54a   :  { %v2693_v57 = vmul.f32 %v14198_v38, %v14190_v30  ;;  %v2694_v31 = vmul.f32 %v14199_v42, %v14190_v30  ;;  %v2730_v14 = vsel %vm2727_vm7, %v14193_v54, %v14200_v47  ;;  %v2742_v52 = vsel %vm2727_vm7, %v14200_v47, %v14188_v29  ;;  %v14201_v29 = vld [vmem:[#allocation118_spill] sm:$0xff] }
 0x54b   :  { %v2619_v10 = vmul.f32 %v2606_v4, %v2554_v24  ;;  %v2757_v53 = vmul.f32 %v2735_v12, %v2692_v37  ;;  %v2689_v8 = vmul.f32 %v14198_v38, %v14192_v34  ;;  %v2690_v39 = vmul.f32 %v14199_v42, %v14192_v34  ;;  %v3862_v28 = vpop.permute.xlu1 %3861 }
 0x54c   :  { %v2772_v60 = vadd.f32 %v2756_v43, %v2636_v20  ;;  %v2768_v33 = vadd.f32 %v2752_v18, %v2632_v51  ;;  %v2758_v13 = vmul.f32 %v2731_v56, %v2693_v57  ;;  %v2759_v27 = vmul.f32 %v2743_v17, %v2694_v31 }
 0x54d   :  { %v2769_v32 = vadd.f32 %v2753_v21, %v2633_v7  ;;  %v2754_v9 = vmul.f32 %v2730_v14, %v2689_v8  ;;  %v2755_v44 = vmul.f32 %v2742_v52, %v2690_v39  ;;  %v3891_v62 = vsel %vm3879_vm8, %v3854_v0, %v3862_v28  ;;  %v14207_v21 = vld [vmem:[#allocation237_spill] sm:$0xff]  ;;  %v14210_v39 = vld [vmem:[#allocation51_spill] sm:$0xff] }
 0x54e   :  { %v2639_v24 = vadd.f32 %v2623_v2, %v11688_v40  ;;  %v2800_v30 = vadd.f32 %v14201_v29, %v2768_v33  ;;  %v2804_v5 = vadd.f32 %v14202_v25, %v2772_v60  ;;  %v3908_v54 = vmul.f32 %v3891_v62, %v14203_v61  ;;  %v14208_v52 = vld [vmem:[#allocation145_spill] sm:$0xff] }
 0x54f   :  { %v2634_v20 = vadd.f32 %v2618_v19, %v11704_v1  ;;  %v2635_v51 = vadd.f32 %v2619_v10, %v11713_v55  ;;  %v2773_v34 = vadd.f32 %v2757_v53, %v2637_v50  ;;  %v2801_v7 = vadd.f32 %v14201_v29, %v2769_v32  ;;  %v3870_v2 = vpop.permute.xlu1 %3869  ;;  %v14204_v19 = vld [vmem:[#allocation192_spill] sm:$0xff]  ;;  %v14205_v50 = vld [vmem:[#allocation77_spill] sm:$0xff] }
 0x550   :  { %v2774_v45 = vadd.f32 %v2758_v13, %v2638_v59  ;;  %v2775_v23 = vadd.f32 %v2759_v27, %v2639_v24  ;;  %v3952_v4 = vadd.f32 %v11672_v48, %v11743_v49  ;;  %v3924_v40 = vadd.f32 %v3908_v54, %v11750_v26  ;;  %v14209_v53 = vld [vmem:[#allocation108_spill] sm:$0xff] }
 0x551   :  { %v2770_v58 = vadd.f32 %v2754_v9, %v2634_v20  ;;  %v2771_v41 = vadd.f32 %v2755_v44, %v2635_v51  ;;  %v2805_v43 = vadd.f32 %v14202_v25, %v2773_v34  ;;  %v3887_v1 = vsel %vm3879_vm8, %v3862_v28, %v3870_v2  ;;  %v14211_v27 = vld [vmem:[#allocation308_spill] sm:$0xff]  ;;  %v14213_v9 = vld [vmem:[#allocation37_spill] sm:$0xff] }
 0x552   :  { %v4400_v55 = vmul.f32 %v14204_v19, %v2800_v30  ;;  %v4404_v18 = vmul.f32 %v14205_v50, %v2804_v5  ;;  %v3956_v59 = vadd.f32 %v11811_v16, %v3924_v40  ;;  %v3909_v12 = vmul.f32 %v3887_v1, %v14206_v6  ;;  %v14212_v28 = vld [vmem:[#allocation324_spill] sm:$0xff]  ;;  %v14214_v44 = vld [vmem:[#allocation201_spill] sm:$0xff]  ;;  %v14215_v30 = vld [vmem:[#allocation195_spill] sm:$0xff] }
 0x553   :  { %v2802_v49 = vadd.f32 %v14201_v29, %v2770_v58  ;;  %v2803_v26 = vadd.f32 %v14201_v29, %v2771_v41  ;;  %v3953_v37 = vadd.f32 %v11672_v48, %v11774_v63  ;;  %v4401_v3 = vmul.f32 %v14207_v21, %v2801_v7  ;;  %v3878_v42 = vpop.permute.xlu1 %3877  ;;  %v14216_v5 = vld [vmem:[#allocation197_spill] sm:$0xff] }
 0x554   :  { %v2806_v56 = vadd.f32 %v14202_v25, %v2774_v45  ;;  %v4416_v17 = vmul.f32 %v4400_v55, %v3952_v4  ;;  %v4420_v38 = vmul.f32 %v4404_v18, %v3956_v59  ;;  %v3925_v57 = vadd.f32 %v3909_v12, %v11777_v15 }
 0x555   :  { %v2807_v31 = vadd.f32 %v14202_v25, %v2775_v23  ;;  %v3883_v47 = vsel %vm3879_vm8, %v3870_v2, %v3878_v42  ;;  %v3895_v14 = vsel %vm3879_vm8, %v3878_v42, %v3854_v0  ;;  %v4405_v10 = vmul.f32 %v14208_v52, %v2805_v43 }
 0x556   :  { %v3957_v63 = vadd.f32 %v11811_v16, %v3925_v57  ;;  %v3910_v8 = vmul.f32 %v3883_v47, %v14209_v53  ;;  %v3911_v60 = vmul.f32 %v3895_v14, %v14210_v39  ;;  %v4676_v33 = vpack.c.bf16 %v4420_v38, %v4416_v17 }
 0x557   :  { %v3954_v15 = vadd.f32 %v11672_v48, %v11797_v46  ;;  %v4417_v13 = vmul.f32 %v4401_v3, %v3953_v37  ;;  %v4387_v32 = vmul.f32 %v14212_v28, %v14211_v27  ;;  %v4391_v11 = vmul.f32 %v14214_v44, %v14213_v9 }
 0x558   :  { %v3955_v0 = vadd.f32 %v11672_v48, %v11800_v22  ;;  %v3926_v62 = vadd.f32 %v3910_v8, %v11809_v36  ;;  %v3927_v24 = vadd.f32 %v3911_v60, %v11826_v35  ;;  %v4421_v29 = vmul.f32 %v4405_v10, %v3957_v63  ;;  %v4426_v36 = vld [vmem:[%s11959_s2] sm:$0xff] }
 0x559   :  { %v4402_v25 = vmul.f32 %v14215_v30, %v2802_v49  ;;  %v4406_v61 = vmul.f32 %v14216_v5, %v2806_v56  ;;  %v4403_v46 = vmul.f32 %v4387_v32, %v2803_v26  ;;  %v4407_v34 = vmul.f32 %v4391_v11, %v2807_v31 }
 0x55a   :  { %v3958_v54 = vadd.f32 %v11811_v16, %v3926_v62  ;;  %v3959_v20 = vadd.f32 %v11811_v16, %v3927_v24  ;;  %v4674_v51 = vpack.c.bf16 %v4421_v29, %v4417_v13  ;;  %v14217_v4 = vmov 0.0   ;;  %v4427_v16 = vld [vmem:[%s11959_s2 + $0x8] sm:$0xff] }
 0x55b   :  { %v4418_v7 = vmul.f32 %v4402_v25, %v3954_v15  ;;  %v4419_v48 = vmul.f32 %v4403_v46, %v3955_v0 }
 0x55c   :  { %v4422_v45 = vmul.f32 %v4406_v61, %v3958_v54  ;;  %4675 = vmatprep.subr.bf16.mxu0 %v4674_v51  ;;  %v4423_v22 = vmul.f32 %v4407_v34, %v3959_v20 }
 0x55d   :  { %4677 = vmatpush1.bf16.msra.mxu0 %v4676_v33 }
 0x55e   :  { %v4682_v35 = vpack.c.bf16 %v4423_v22, %v4419_v48  ;;  %v4684_v23 = vpack.c.bf16 %v4422_v45, %v4418_v7 }
 0x560   :  { %4683 = vmatprep.subr.bf16.mxu1 %v4682_v35  ;;  %4658 = vmatmul.mubr.msk.f32.vlgmr.msra.gmra.mrb[24].mxu0 %vm4438_vm9, %v4426_v36 }
 0x561   :  { %4685 = vmatpush1.bf16.msra.mxu1 %v4684_v23  ;;  %4515 = vmatprep.mubr.f32.mxu0 %v14217_v4 }
 0x564   :  { %4660 = vmatmul.mubr.msk.f32.vlgmr.msra.gmra.mrb[24].mxu1 %vm4438_vm9, %v4426_v36  ;;  %4659 = vmatmul.mubr.msk.f32.gmra.mrb[26].mxu0 %vm4438_vm9, %v4427_v16 }
 0x565   :  { %4592 = vmatprep.mubr.f32.mxu1 %v14217_v4 }
 0x568   :  { %4661 = vmatmul.mubr.msk.f32.gmra.mrb[26].mxu1 %vm4438_vm9, %v4427_v16 }
 0x569   :  { %v4431_v40 = vpop.permute.xlu0 %4430 }
 0x56a   :  { %v4436_v1 = vpop.permute.xlu1 %4435 }
 0x633   :  { %v4511_v2 = vpop.f32.mrb[24].mxu0 }
 0x634   :  { %v4512_v58 = vadd.f32 %v4511_v2, %v4431_v40  ;;  %v4513_v41 = vpop.f32.mrb[25].mxu0 }
 0x635   :  { %v4514_v43 = vadd.f32 %v4513_v41, %v4431_v40 }
 0x636   :  { %4599 = vst [vmem:[%s11960_s5] sm:$0xff] %v4512_v58 }
 0x637   :  { %v4588_v19 = vpop.f32.mrb[24].mxu1  ;;  %4600 = vst [vmem:[%s11960_s5 + $0x8] sm:$0xff] %v4514_v43  ;;  %v4517_v55 = vpop.f32.mrb[26].mxu0 }
 0x638   :  { %v4589_v50 = vadd.f32 %v4588_v19, %v4431_v40  ;;  %v4590_v18 = vpop.f32.mrb[25].mxu1  ;;  %v4518_v59 = vadd.f32 %v4517_v55, %v4436_v1  ;;  %v4519_v6 = vpop.f32.mrb[27].mxu0 }
 0x639   :  { %v4591_v12 = vadd.f32 %v4590_v18, %v4431_v40  ;;  %v4520_v49 = vadd.f32 %v4519_v6, %v4436_v1 }
 0x63a   :  { %4601 = vst [vmem:[%s11960_s5 + $0x10] sm:$0xff] %v4589_v50  ;;  %4603 = vst [vmem:[%s11960_s5 + $0x20] sm:$0xff] %v4518_v59 }
 0x63b   :  { %4602 = vst [vmem:[%s11960_s5 + $0x18] sm:$0xff] %v4591_v12  ;;  %v4594_v26 = vpop.f32.mrb[26].mxu1  ;;  %4604 = vst [vmem:[%s11960_s5 + $0x28] sm:$0xff] %v4520_v49 }
 0x63c   :  { %v4596_v37 = vpop.f32.mrb[27].mxu1  ;;  %v4595_v21 = vadd.f32 %v4594_v26, %v4436_v1 }
 0x63d   :  { %v4597_v3 = vadd.f32 %v4596_v37, %v4436_v1 }
 0x63e   :  { %4605 = vst [vmem:[%s11960_s5 + $0x30] sm:$0xff] %v4595_v21 }
 0x63f   :  { %4606 = vst [vmem:[%s11960_s5 + $0x38] sm:$0xff] %v4597_v3 }

</bundles_post_ra>
